<compile_context>
chip_gen: v7x
topology: tpu7x:2x2x1
jax: 0.10.0
libtpu: 0.0.40
codegen_flags: <defaults>
</compile_context>

<pallas_src>
import functools

import jax
import jax.numpy as jnp
from jax.experimental import pallas as pl
from jax.experimental.pallas import tpu as pltpu

LN_EPS = 1e-5
LANE = 128
# MXU operand dtype (accumulation is always float32 via preferred_element_type;
# LayerNorm / softmax / ReLU stay float32).
MXU_DTYPE = jnp.bfloat16


def _round_up(x, m):
    return ((x + m - 1) // m) * m


def _cparams(sems=None):
    # 48 MiB: generous on 128 MiB parts (v5e/v6e), safely under v7x's 64 MiB.
    kw = dict(vmem_limit_bytes=48 * 1024 * 1024)
    if sems is not None:
        kw["dimension_semantics"] = sems
    return pltpu.CompilerParams(**kw)


def _ln(x, g, b):
    mu = jnp.mean(x, axis=-1, keepdims=True)
    c = x - mu
    var = jnp.mean(c * c, axis=-1, keepdims=True)
    return c * jax.lax.rsqrt(var + LN_EPS) * g + b


# ----------------------------------------------------------------------------
# Fused conv3x3 + bias + ReLU + 2x2/2 max-pool (one batch element per step)
# ----------------------------------------------------------------------------
def _conv_pool_kernel(x_ref, w_ref, b_ref, o_ref, col_ref, pool_ref,
                      *, H, Wc, Cin):
    """x_ref : (1, H+2, Wc+2, Cin) zero-padded NHWC slab for this batch element.
    w_ref : (9*Cin, Cout) weights (row = (kh*3+kw)*Cin + ci), MXU dtype.
    b_ref : (1, Cout) f32 bias.
    col_ref : VMEM (H*Wc, 9*Cin) f32 — in-VMEM im2col (never touches HBM).
    pool_ref: VMEM ((H//2)*Wc, Cout) f32 — h-pooled rows, re-read with stride 2.
    o_ref : (1, (H//2)*(Wc//2), Cout) compact pooled output.
    """
    Cout = w_ref.shape[1]
    R = H * Wc

    # im2col built directly in VMEM: the 9 tap windows packed along lanes,
    # so the MXU sees one dense K = 9*Cin contraction (K=36 even for Cin=4).
    for kh in range(3):
        for kw in range(3):
            t = kh * 3 + kw
            win = x_ref[:, kh:kh + H, kw:kw + Wc, :]           # (1, H, Wc, Cin)
            col_ref[:, t * Cin:(t + 1) * Cin] = win.reshape(R, Cin)

    acc = jnp.dot(col_ref[...].astype(MXU_DTYPE), w_ref[...],
                  preferred_element_type=jnp.float32)          # (R, Cout) f32
    y = jnp.maximum(acc + b_ref[...], 0.0)                     # bias + ReLU

    # Fused 2x2/2 max-pool with compact output:
    #  - H pool: regroup rows (H, Wc) -> (H//2, 2*Wc) (leading-dim regroup,
    #    Wc % 8 == 0 so it is a layout no-op) and max the two halves.
    z = y.reshape(H // 2, 2 * Wc, Cout)
    yh = jnp.maximum(z[:, :Wc, :], z[:, Wc:, :])               # (H//2, Wc, Cout)
    pool_ref[...] = yh.reshape((H // 2) * Wc, Cout)
    #  - W pool + compaction: adjacent (even, odd) rows via sublane-strided
    #    reads, writing a compact (H//2)*(Wc//2)-row slab (no post-hoc slice).
    P = (H // 2) * (Wc // 2)
    even = pool_ref[pl.ds(0, P, 2), :]
    odd = pool_ref[pl.ds(1, P, 2), :]
    o_ref[...] = jnp.maximum(even, odd).reshape(1, P, Cout).astype(o_ref.dtype)


def conv3x3_relu_pool(x, w, b):
    """x: (B, H, W, Cin) NHWC float32. w: (Cout, Cin, 3, 3) PyTorch layout.
    Returns the pooled (B, H//2, W//2, Cout) float32 activations."""
    B, H, W, Cin = x.shape
    Cout = w.shape[0]
    assert H % 2 == 0 and W % 2 == 0 and w.shape[1] == Cin
    Wc = _round_up(W, 8)                       # computed width; junk cols sliced

    xp = jnp.pad(x, ((0, 0), (1, 1), (1, Wc + 1 - W), (0, 0)))
    wt = jnp.transpose(w, (2, 3, 1, 0)).reshape(9 * Cin, Cout).astype(MXU_DTYPE)
    bp = b.reshape(1, Cout).astype(jnp.float32)

    P = (H // 2) * (Wc // 2)
    out = pl.pallas_call(
        functools.partial(_conv_pool_kernel, H=H, Wc=Wc, Cin=Cin),
        out_shape=jax.ShapeDtypeStruct((B, P, Cout), x.dtype),
        grid=(B,),
        in_specs=[pl.BlockSpec((1, H + 2, Wc + 2, Cin), lambda bi: (bi, 0, 0, 0)),
                  pl.BlockSpec((9 * Cin, Cout), lambda bi: (0, 0)),
                  pl.BlockSpec((1, Cout), lambda bi: (0, 0))],
        out_specs=pl.BlockSpec((1, P, Cout), lambda bi: (bi, 0, 0)),
        scratch_shapes=[pltpu.VMEM((H * Wc, 9 * Cin), jnp.float32),
                        pltpu.VMEM(((H // 2) * Wc, Cout), jnp.float32)],
        compiler_params=_cparams(("parallel",)),
    )(xp, wt, bp)

    out = out.reshape(B, H // 2, Wc // 2, Cout)
    # Drop junk columns (present only when W is not a multiple of 8; pairs
    # never straddle the valid/junk boundary because W is even).
    return out[:, :, :W // 2, :]


# ----------------------------------------------------------------------------
# Fully fused transformer encoder layer (one batch element per grid step)
# ----------------------------------------------------------------------------
def _encoder_layer_kernel(x_ref, in_w, in_b, out_w, out_b, g1, be1,
                          w1, b1, w2, b2, g2, be2, o_ref, attn_ref,
                          *, num_heads, scale):
    S = x_ref.shape[1]
    E = x_ref.shape[2]
    Dh = E // num_heads

    x = x_ref[...].reshape(S, E).astype(jnp.float32)
    qkv = jnp.dot(x.astype(MXU_DTYPE), in_w[...],
                  preferred_element_type=jnp.float32) + in_b[...]   # (S, 3E)

    # Per-head attention; head outputs land lane-concatenated in attn_ref
    # (last dim = E = 128 -> lane-dense, no transpose glue in HBM).
    for h in range(num_heads):
        q = qkv[:, h * Dh:(h + 1) * Dh] * scale
        k = qkv[:, E + h * Dh:E + (h + 1) * Dh]
        v = qkv[:, 2 * E + h * Dh:2 * E + (h + 1) * Dh]
        s = jax.lax.dot_general(q.astype(MXU_DTYPE), k.astype(MXU_DTYPE),
                                dimension_numbers=(((1,), (1,)), ((), ())),
                                preferred_element_type=jnp.float32)  # (S, S)
        s = s - jnp.max(s, axis=-1, keepdims=True)
        p = jnp.exp(s)
        p = p / jnp.sum(p, axis=-1, keepdims=True)                   # exact divide
        attn_ref[:, h * Dh:(h + 1) * Dh] = jnp.dot(
            p.astype(MXU_DTYPE), v.astype(MXU_DTYPE),
            preferred_element_type=jnp.float32)

    a = jnp.dot(attn_ref[...].astype(MXU_DTYPE), out_w[...],
                preferred_element_type=jnp.float32) + out_b[...]
    x1 = _ln(x + a, g1[...], be1[...])                               # norm1
    hdn = jnp.maximum(jnp.dot(x1.astype(MXU_DTYPE), w1[...],
                              preferred_element_type=jnp.float32) + b1[...], 0.0)
    y = jnp.dot(hdn.astype(MXU_DTYPE), w2[...],
                preferred_element_type=jnp.float32) + b2[...]
    y = _ln(x1 + y, g2[...], be2[...])                               # norm2
    o_ref[...] = y.reshape(1, S, E).astype(o_ref.dtype)


def encoder_layer(tok, p, num_heads):
    """tok: (B, S, E) float32 tokens (batch-major; result is identical to the
    PyTorch (S, B, E) ordering because the layer is per-token / per-batch)."""
    B, S, E = tok.shape
    F = p["ff1_w"].shape[1]
    scale = 1.0 / float(E // num_heads) ** 0.5
    rep = lambda shape: pl.BlockSpec(shape, lambda b: (0, 0))
    return pl.pallas_call(
        functools.partial(_encoder_layer_kernel, num_heads=num_heads, scale=scale),
        out_shape=jax.ShapeDtypeStruct((B, S, E), tok.dtype),
        grid=(B,),
        in_specs=[pl.BlockSpec((1, S, E), lambda b: (b, 0, 0)),
                  rep((E, 3 * E)), rep((1, 3 * E)),
                  rep((E, E)), rep((1, E)),
                  rep((1, E)), rep((1, E)),
                  rep((E, F)), rep((1, F)),
                  rep((F, E)), rep((1, E)),
                  rep((1, E)), rep((1, E))],
        out_specs=pl.BlockSpec((1, S, E), lambda b: (b, 0, 0)),
        scratch_shapes=[pltpu.VMEM((S, E), jnp.float32)],
        compiler_params=_cparams(("parallel",)),
    )(tok,
      p["in_w"].astype(MXU_DTYPE), p["in_b"].reshape(1, 3 * E),
      p["out_w"].astype(MXU_DTYPE), p["out_b"].reshape(1, E),
      p["ln1_g"].reshape(1, E), p["ln1_b"].reshape(1, E),
      p["ff1_w"].astype(MXU_DTYPE), p["ff1_b"].reshape(1, F),
      p["ff2_w"].astype(MXU_DTYPE), p["ff2_b"].reshape(1, E),
      p["ln2_g"].reshape(1, E), p["ln2_b"].reshape(1, E))


# ----------------------------------------------------------------------------
# Fused mean-over-sequence + final FC (classes padded to a 128-lane slab)
# ----------------------------------------------------------------------------
def _mean_fc_kernel(x_ref, w_ref, b_ref, o_ref):
    m = jnp.mean(x_ref[...].astype(jnp.float32), axis=1)            # (B, E)
    o_ref[...] = (jnp.dot(m.astype(MXU_DTYPE), w_ref[...],
                          preferred_element_type=jnp.float32)
                  + b_ref[...]).astype(o_ref.dtype)


def mean_pool_fc(tokens, w, b):
    B, S, E = tokens.shape
    N = w.shape[1]
    Np = _round_up(N, LANE)
    wp = jnp.pad(w, ((0, 0), (0, Np - N))).astype(MXU_DTYPE)
    bp = jnp.pad(b, (0, Np - N)).reshape(1, Np).astype(jnp.float32)
    out = pl.pallas_call(
        _mean_fc_kernel,
        out_shape=jax.ShapeDtypeStruct((B, Np), tokens.dtype),
        compiler_params=_cparams(),
    )(tokens, wp, bp)
    return out[:, :N]


# ----------------------------------------------------------------------------
# Full ConvFormer forward
# ----------------------------------------------------------------------------
def convformer_forward(x_nchw, params, embed_dim=128, num_heads=8):
    x = jnp.transpose(x_nchw, (0, 2, 3, 1))                          # NCHW -> NHWC
    x = conv3x3_relu_pool(x, params["c1_w"], params["c1_b"])
    x = conv3x3_relu_pool(x, params["c2_w"], params["c2_b"])
    x = conv3x3_relu_pool(x, params["c3_w"], params["c3_b"])         # (B, h, w, E)
    B, h, w, C = x.shape
    assert C == embed_dim
    tok = x.reshape(B, h * w, embed_dim)                             # batch-major tokens
    for lp in params["layers"]:
        tok = encoder_layer(tok, lp, num_heads)
    return mean_pool_fc(tok, params["fc_w"], params["fc_b"])


# ----------------------------------------------------------------------------
# Deterministic parameter construction (matches the module's __init__ shapes)
# ----------------------------------------------------------------------------
def init_params(key, num_channels, num_classes, embed_dim=128, num_layers=2,
                ffn_dim=2048):
    ks = iter(jax.random.split(key, 64))

    def nrm(shape, scale=0.05):
        return scale * jax.random.normal(next(ks), shape, dtype=jnp.float32)

    E, F = embed_dim, ffn_dim
    params = {
        "c1_w": nrm((32, num_channels, 3, 3)), "c1_b": nrm((32,)),
        "c2_w": nrm((64, 32, 3, 3)), "c2_b": nrm((64,)),
        "c3_w": nrm((E, 64, 3, 3)), "c3_b": nrm((E,)),
        "fc_w": nrm((E, num_classes)),
        "fc_b": jnp.zeros((num_classes,), jnp.float32),
        "layers": [],
    }
    for _ in range(num_layers):
        params["layers"].append({
            # stored pre-transposed: y = x @ W
            "in_w": nrm((E, 3 * E)), "in_b": nrm((3 * E,)),
            "out_w": nrm((E, E)), "out_b": nrm((E,)),
            "ff1_w": nrm((E, F)), "ff1_b": nrm((F,)),
            "ff2_w": nrm((F, E)), "ff2_b": nrm((E,)),
            "ln1_g": jnp.ones((E,), jnp.float32), "ln1_b": jnp.zeros((E,), jnp.float32),
            "ln2_g": jnp.ones((E,), jnp.float32), "ln2_b": jnp.zeros((E,), jnp.float32),
        })
    return params


if __name__ == "__main__":
    # Shapes consistent with the module: batch=2, channels=4, freqs=times=16
    # -> after 3x (conv+pool): 2x2 spatial -> seq_len=4.
    B, C, NF, NT = 2, 4, 16, 16
    NUM_CLASSES = 5
    EMBED_DIM, NUM_HEADS, NUM_LAYERS = 128, 8, 2

    key = jax.random.PRNGKey(0)
    kx, kp = jax.random.split(key)
    x = jax.random.normal(kx, (B, C, NF, NT), dtype=jnp.float32)     # NCHW input
    params = init_params(kp, C, NUM_CLASSES, EMBED_DIM, NUM_LAYERS)

    fwd = jax.jit(functools.partial(convformer_forward,
                                    embed_dim=EMBED_DIM, num_heads=NUM_HEADS))
    out = jax.block_until_ready(fwd(x, params))
    assert out.shape == (B, NUM_CLASSES), out.shape
    assert bool(jnp.all(jnp.isfinite(out)))
    print("KERNEL_OK")
</pallas_src>

<mosaic_0001>
module attributes {stable_mosaic.version = 11 : i64} {
  func.func @_conv_pool_kernel(%arg0: i32, %arg1: memref<1x18x18x4xf32, #tpu.memory_space<vmem>>, %arg2: memref<36x32xbf16, #tpu.memory_space<vmem>>, %arg3: memref<1x32xf32, #tpu.memory_space<vmem>>, %arg4: memref<1x64x32xf32, #tpu.memory_space<vmem>>, %arg5: memref<256x36xf32, #tpu.memory_space<vmem>>, %arg6: memref<128x32xf32, #tpu.memory_space<vmem>>) attributes {dimension_semantics = [#tpu.dimension_semantics<parallel>], iteration_bounds = array<i64: 2>, scalar_prefetch = 0 : i64, scratch_operands = 2 : i64, tpu.core_type = #tpu.core_type<tc>, window_params = [{transform_indices = @transform_0, window_bounds = array<i64: 1, 18, 18, 4>}, {pipeline_mode = #tpu.pipeline_mode<synchronous>, transform_indices = @transform_1, window_bounds = array<i64: 36, 32>}, {pipeline_mode = #tpu.pipeline_mode<synchronous>, transform_indices = @transform_2, window_bounds = array<i64: 1, 32>}, {transform_indices = @transform_3, window_bounds = array<i64: 1, 64, 32>}]} {
    %c0 = arith.constant 0 : index
    %c0_0 = arith.constant 0 : index
    %c0_1 = arith.constant 0 : index
    %c0_2 = arith.constant 0 : index
    %0 = vector.load %arg1[%c0, %c0_0, %c0_1, %c0_2] : memref<1x18x18x4xf32, #tpu.memory_space<vmem>>, vector<1x16x16x4xf32>
    %1 = vector.shape_cast %0 : vector<1x16x16x4xf32> to vector<256x4xf32>
    %c0_3 = arith.constant 0 : index
    %c0_4 = arith.constant 0 : index
    %2 = vector.load %arg5[%c0_3, %c0_4] : memref<256x36xf32, #tpu.memory_space<vmem>>, vector<256x4xf32>
    tpu.vector_store %arg5[%c0_3, %c0_4], %1 {strides = array<i32>} : memref<256x36xf32, #tpu.memory_space<vmem>>, vector<256x4xf32>,
    %c0_5 = arith.constant 0 : index
    %c0_6 = arith.constant 0 : index
    %c1 = arith.constant 1 : index
    %c0_7 = arith.constant 0 : index
    %3 = vector.load %arg1[%c0_5, %c0_6, %c1, %c0_7] : memref<1x18x18x4xf32, #tpu.memory_space<vmem>>, vector<1x16x16x4xf32>
    %4 = vector.shape_cast %3 : vector<1x16x16x4xf32> to vector<256x4xf32>
    %c0_8 = arith.constant 0 : index
    %c4 = arith.constant 4 : index
    %5 = vector.load %arg5[%c0_8, %c4] : memref<256x36xf32, #tpu.memory_space<vmem>>, vector<256x4xf32>
    tpu.vector_store %arg5[%c0_8, %c4], %4 {strides = array<i32>} : memref<256x36xf32, #tpu.memory_space<vmem>>, vector<256x4xf32>,
    %c0_9 = arith.constant 0 : index
    %c0_10 = arith.constant 0 : index
    %c2 = arith.constant 2 : index
    %c0_11 = arith.constant 0 : index
    %6 = vector.load %arg1[%c0_9, %c0_10, %c2, %c0_11] : memref<1x18x18x4xf32, #tpu.memory_space<vmem>>, vector<1x16x16x4xf32>
    %7 = vector.shape_cast %6 : vector<1x16x16x4xf32> to vector<256x4xf32>
    %c0_12 = arith.constant 0 : index
    %c8 = arith.constant 8 : index
    %8 = vector.load %arg5[%c0_12, %c8] : memref<256x36xf32, #tpu.memory_space<vmem>>, vector<256x4xf32>
    tpu.vector_store %arg5[%c0_12, %c8], %7 {strides = array<i32>} : memref<256x36xf32, #tpu.memory_space<vmem>>, vector<256x4xf32>,
    %c0_13 = arith.constant 0 : index
    %c1_14 = arith.constant 1 : index
    %c0_15 = arith.constant 0 : index
    %c0_16 = arith.constant 0 : index
    %9 = vector.load %arg1[%c0_13, %c1_14, %c0_15, %c0_16] : memref<1x18x18x4xf32, #tpu.memory_space<vmem>>, vector<1x16x16x4xf32>
    %10 = vector.shape_cast %9 : vector<1x16x16x4xf32> to vector<256x4xf32>
    %c0_17 = arith.constant 0 : index
    %c12 = arith.constant 12 : index
    %11 = vector.load %arg5[%c0_17, %c12] : memref<256x36xf32, #tpu.memory_space<vmem>>, vector<256x4xf32>
    tpu.vector_store %arg5[%c0_17, %c12], %10 {strides = array<i32>} : memref<256x36xf32, #tpu.memory_space<vmem>>, vector<256x4xf32>,
    %c0_18 = arith.constant 0 : index
    %c1_19 = arith.constant 1 : index
    %c1_20 = arith.constant 1 : index
    %c0_21 = arith.constant 0 : index
    %12 = vector.load %arg1[%c0_18, %c1_19, %c1_20, %c0_21] : memref<1x18x18x4xf32, #tpu.memory_space<vmem>>, vector<1x16x16x4xf32>
    %13 = vector.shape_cast %12 : vector<1x16x16x4xf32> to vector<256x4xf32>
    %c0_22 = arith.constant 0 : index
    %c16 = arith.constant 16 : index
    %14 = vector.load %arg5[%c0_22, %c16] : memref<256x36xf32, #tpu.memory_space<vmem>>, vector<256x4xf32>
    tpu.vector_store %arg5[%c0_22, %c16], %13 {strides = array<i32>} : memref<256x36xf32, #tpu.memory_space<vmem>>, vector<256x4xf32>,
    %c0_23 = arith.constant 0 : index
    %c1_24 = arith.constant 1 : index
    %c2_25 = arith.constant 2 : index
    %c0_26 = arith.constant 0 : index
    %15 = vector.load %arg1[%c0_23, %c1_24, %c2_25, %c0_26] : memref<1x18x18x4xf32, #tpu.memory_space<vmem>>, vector<1x16x16x4xf32>
    %16 = vector.shape_cast %15 : vector<1x16x16x4xf32> to vector<256x4xf32>
    %c0_27 = arith.constant 0 : index
    %c20 = arith.constant 20 : index
    %17 = vector.load %arg5[%c0_27, %c20] : memref<256x36xf32, #tpu.memory_space<vmem>>, vector<256x4xf32>
    tpu.vector_store %arg5[%c0_27, %c20], %16 {strides = array<i32>} : memref<256x36xf32, #tpu.memory_space<vmem>>, vector<256x4xf32>,
    %c0_28 = arith.constant 0 : index
    %c2_29 = arith.constant 2 : index
    %c0_30 = arith.constant 0 : index
    %c0_31 = arith.constant 0 : index
    %18 = vector.load %arg1[%c0_28, %c2_29, %c0_30, %c0_31] : memref<1x18x18x4xf32, #tpu.memory_space<vmem>>, vector<1x16x16x4xf32>
    %19 = vector.shape_cast %18 : vector<1x16x16x4xf32> to vector<256x4xf32>
    %c0_32 = arith.constant 0 : index
    %c24 = arith.constant 24 : index
    %20 = vector.load %arg5[%c0_32, %c24] : memref<256x36xf32, #tpu.memory_space<vmem>>, vector<256x4xf32>
    tpu.vector_store %arg5[%c0_32, %c24], %19 {strides = array<i32>} : memref<256x36xf32, #tpu.memory_space<vmem>>, vector<256x4xf32>,
    %c0_33 = arith.constant 0 : index
    %c2_34 = arith.constant 2 : index
    %c1_35 = arith.constant 1 : index
    %c0_36 = arith.constant 0 : index
    %21 = vector.load %arg1[%c0_33, %c2_34, %c1_35, %c0_36] : memref<1x18x18x4xf32, #tpu.memory_space<vmem>>, vector<1x16x16x4xf32>
    %22 = vector.shape_cast %21 : vector<1x16x16x4xf32> to vector<256x4xf32>
    %c0_37 = arith.constant 0 : index
    %c28 = arith.constant 28 : index
    %23 = vector.load %arg5[%c0_37, %c28] : memref<256x36xf32, #tpu.memory_space<vmem>>, vector<256x4xf32>
    tpu.vector_store %arg5[%c0_37, %c28], %22 {strides = array<i32>} : memref<256x36xf32, #tpu.memory_space<vmem>>, vector<256x4xf32>,
    %c0_38 = arith.constant 0 : index
    %c2_39 = arith.constant 2 : index
    %c2_40 = arith.constant 2 : index
    %c0_41 = arith.constant 0 : index
    %24 = vector.load %arg1[%c0_38, %c2_39, %c2_40, %c0_41] : memref<1x18x18x4xf32, #tpu.memory_space<vmem>>, vector<1x16x16x4xf32>
    %25 = vector.shape_cast %24 : vector<1x16x16x4xf32> to vector<256x4xf32>
    %c0_42 = arith.constant 0 : index
    %c32 = arith.constant 32 : index
    %26 = vector.load %arg5[%c0_42, %c32] : memref<256x36xf32, #tpu.memory_space<vmem>>, vector<256x4xf32>
    tpu.vector_store %arg5[%c0_42, %c32], %25 {strides = array<i32>} : memref<256x36xf32, #tpu.memory_space<vmem>>, vector<256x4xf32>,
    %c0_43 = arith.constant 0 : index
    %c0_44 = arith.constant 0 : index
    %27 = vector.load %arg5[%c0_43, %c0_44] : memref<256x36xf32, #tpu.memory_space<vmem>>, vector<256x36xf32>
    %28 = arith.truncf %27 : vector<256x36xf32> to vector<256x36xbf16>
    %c0_45 = arith.constant 0 : index
    %c0_46 = arith.constant 0 : index
    %29 = vector.load %arg2[%c0_45, %c0_46] : memref<36x32xbf16, #tpu.memory_space<vmem>>, vector<36x32xbf16>
    %cst = arith.constant dense<0.000000e+00> : vector<256x32xf32>
    %30 = tpu.matmul %28, %29, %cst {dimension_numbers = #tpu.dot_dimension_numbers<[1], [0], [0], [1], [0, 0, 1, 1], [], []>} : vector<256x36xbf16>, vector<36x32xbf16>, vector<256x32xf32> -> vector<256x32xf32>
    %c0_47 = arith.constant 0 : index
    %c0_48 = arith.constant 0 : index
    %31 = vector.load %arg3[%c0_47, %c0_48] : memref<1x32xf32, #tpu.memory_space<vmem>>, vector<1x32xf32>
    %32 = vector.broadcast %31 : vector<1x32xf32> to vector<256x32xf32>
    %33 = arith.addf %30, %32 : vector<256x32xf32>
    %cst_49 = arith.constant 0.000000e+00 : f32
    %34 = vector.broadcast %cst_49 : f32 to vector<256x32xf32>
    %35 = arith.maximumf %33, %34 : vector<256x32xf32>
    %36 = vector.shape_cast %35 : vector<256x32xf32> to vector<8x32x32xf32>
    %37 = vector.extract_strided_slice %36 {offsets = [0, 0, 0], sizes = [8, 16, 32], strides = [1, 1, 1]} : vector<8x32x32xf32> to vector<8x16x32xf32>
    %38 = vector.extract_strided_slice %36 {offsets = [0, 16, 0], sizes = [8, 16, 32], strides = [1, 1, 1]} : vector<8x32x32xf32> to vector<8x16x32xf32>
    %39 = arith.maximumf %37, %38 : vector<8x16x32xf32>
    %40 = vector.shape_cast %39 : vector<8x16x32xf32> to vector<128x32xf32>
    %c0_50 = arith.constant 0 : index
    %c0_51 = arith.constant 0 : index
    %41 = vector.load %arg6[%c0_50, %c0_51] : memref<128x32xf32, #tpu.memory_space<vmem>>, vector<128x32xf32>
    tpu.vector_store %arg6[%c0_50, %c0_51], %40 {strides = array<i32>} : memref<128x32xf32, #tpu.memory_space<vmem>>, vector<128x32xf32>,
    %c0_52 = arith.constant 0 : index
    %c0_53 = arith.constant 0 : index
    %42 = tpu.strided_load %arg6[%c0_52, %c0_53] {strides = array<i32: 2, 1>} : memref<128x32xf32, #tpu.memory_space<vmem>>, vector<64x32xf32>
    %c1_54 = arith.constant 1 : index
    %c0_55 = arith.constant 0 : index
    %43 = tpu.strided_load %arg6[%c1_54, %c0_55] {strides = array<i32: 2, 1>} : memref<128x32xf32, #tpu.memory_space<vmem>>, vector<64x32xf32>
    %44 = arith.maximumf %42, %43 : vector<64x32xf32>
    %45 = vector.shape_cast %44 : vector<64x32xf32> to vector<1x64x32xf32>
    %c0_56 = arith.constant 0 : index
    %c0_57 = arith.constant 0 : index
    %c0_58 = arith.constant 0 : index
    %46 = vector.load %arg4[%c0_56, %c0_57, %c0_58] : memref<1x64x32xf32, #tpu.memory_space<vmem>>, vector<1x64x32xf32>
    tpu.vector_store %arg4[%c0_56, %c0_57, %c0_58], %45 {strides = array<i32>} : memref<1x64x32xf32, #tpu.memory_space<vmem>>, vector<1x64x32xf32>,
    return
  }
  func.func @transform_0(%arg0: i32) -> (i32, i32, i32, i32) {
    %c0_i32 = arith.constant 0 : i32
    %c0_i32_0 = arith.constant 0 : i32
    %c0_i32_1 = arith.constant 0 : i32
    %c0_i32_2 = arith.constant 0 : i32
    return %arg0, %c0_i32, %c0_i32_0, %c0_i32_1 : i32, i32, i32, i32
  }
  func.func @transform_1(%arg0: i32) -> (i32, i32) {
    %c0_i32 = arith.constant 0 : i32
    %c0_i32_0 = arith.constant 0 : i32
    %c0_i32_1 = arith.constant 0 : i32
    return %c0_i32, %c0_i32_0 : i32, i32
  }
  func.func @transform_2(%arg0: i32) -> (i32, i32) {
    %c0_i32 = arith.constant 0 : i32
    %c0_i32_0 = arith.constant 0 : i32
    %c0_i32_1 = arith.constant 0 : i32
    return %c0_i32, %c0_i32_0 : i32, i32
  }
  func.func @transform_3(%arg0: i32) -> (i32, i32, i32) {
    %c0_i32 = arith.constant 0 : i32
    %c0_i32_0 = arith.constant 0 : i32
    %c0_i32_1 = arith.constant 0 : i32
    return %arg0, %c0_i32, %c0_i32_0 : i32, i32, i32
  }
}

module attributes {stable_mosaic.version = 11 : i64} {
  func.func @_conv_pool_kernel(%arg0: i32, %arg1: memref<1x10x10x32xf32, #tpu.memory_space<vmem>>, %arg2: memref<288x64xbf16, #tpu.memory_space<vmem>>, %arg3: memref<1x64xf32, #tpu.memory_space<vmem>>, %arg4: memref<1x16x64xf32, #tpu.memory_space<vmem>>, %arg5: memref<64x288xf32, #tpu.memory_space<vmem>>, %arg6: memref<32x64xf32, #tpu.memory_space<vmem>>) attributes {dimension_semantics = [#tpu.dimension_semantics<parallel>], iteration_bounds = array<i64: 2>, scalar_prefetch = 0 : i64, scratch_operands = 2 : i64, tpu.core_type = #tpu.core_type<tc>, window_params = [{transform_indices = @transform_0, window_bounds = array<i64: 1, 10, 10, 32>}, {pipeline_mode = #tpu.pipeline_mode<synchronous>, transform_indices = @transform_1, window_bounds = array<i64: 288, 64>}, {pipeline_mode = #tpu.pipeline_mode<synchronous>, transform_indices = @transform_2, window_bounds = array<i64: 1, 64>}, {transform_indices = @transform_3, window_bounds = array<i64: 1, 16, 64>}]} {
    %c0 = arith.constant 0 : index
    %c0_0 = arith.constant 0 : index
    %c0_1 = arith.constant 0 : index
    %c0_2 = arith.constant 0 : index
    %0 = vector.load %arg1[%c0, %c0_0, %c0_1, %c0_2] : memref<1x10x10x32xf32, #tpu.memory_space<vmem>>, vector<1x8x8x32xf32>
    %1 = vector.shape_cast %0 : vector<1x8x8x32xf32> to vector<64x32xf32>
    %c0_3 = arith.constant 0 : index
    %c0_4 = arith.constant 0 : index
    %2 = vector.load %arg5[%c0_3, %c0_4] : memref<64x288xf32, #tpu.memory_space<vmem>>, vector<64x32xf32>
    tpu.vector_store %arg5[%c0_3, %c0_4], %1 {strides = array<i32>} : memref<64x288xf32, #tpu.memory_space<vmem>>, vector<64x32xf32>,
    %c0_5 = arith.constant 0 : index
    %c0_6 = arith.constant 0 : index
    %c1 = arith.constant 1 : index
    %c0_7 = arith.constant 0 : index
    %3 = vector.load %arg1[%c0_5, %c0_6, %c1, %c0_7] : memref<1x10x10x32xf32, #tpu.memory_space<vmem>>, vector<1x8x8x32xf32>
    %4 = vector.shape_cast %3 : vector<1x8x8x32xf32> to vector<64x32xf32>
    %c0_8 = arith.constant 0 : index
    %c32 = arith.constant 32 : index
    %5 = vector.load %arg5[%c0_8, %c32] : memref<64x288xf32, #tpu.memory_space<vmem>>, vector<64x32xf32>
    tpu.vector_store %arg5[%c0_8, %c32], %4 {strides = array<i32>} : memref<64x288xf32, #tpu.memory_space<vmem>>, vector<64x32xf32>,
    %c0_9 = arith.constant 0 : index
    %c0_10 = arith.constant 0 : index
    %c2 = arith.constant 2 : index
    %c0_11 = arith.constant 0 : index
    %6 = vector.load %arg1[%c0_9, %c0_10, %c2, %c0_11] : memref<1x10x10x32xf32, #tpu.memory_space<vmem>>, vector<1x8x8x32xf32>
    %7 = vector.shape_cast %6 : vector<1x8x8x32xf32> to vector<64x32xf32>
    %c0_12 = arith.constant 0 : index
    %c64 = arith.constant 64 : index
    %8 = vector.load %arg5[%c0_12, %c64] : memref<64x288xf32, #tpu.memory_space<vmem>>, vector<64x32xf32>
    tpu.vector_store %arg5[%c0_12, %c64], %7 {strides = array<i32>} : memref<64x288xf32, #tpu.memory_space<vmem>>, vector<64x32xf32>,
    %c0_13 = arith.constant 0 : index
    %c1_14 = arith.constant 1 : index
    %c0_15 = arith.constant 0 : index
    %c0_16 = arith.constant 0 : index
    %9 = vector.load %arg1[%c0_13, %c1_14, %c0_15, %c0_16] : memref<1x10x10x32xf32, #tpu.memory_space<vmem>>, vector<1x8x8x32xf32>
    %10 = vector.shape_cast %9 : vector<1x8x8x32xf32> to vector<64x32xf32>
    %c0_17 = arith.constant 0 : index
    %c96 = arith.constant 96 : index
    %11 = vector.load %arg5[%c0_17, %c96] : memref<64x288xf32, #tpu.memory_space<vmem>>, vector<64x32xf32>
    tpu.vector_store %arg5[%c0_17, %c96], %10 {strides = array<i32>} : memref<64x288xf32, #tpu.memory_space<vmem>>, vector<64x32xf32>,
    %c0_18 = arith.constant 0 : index
    %c1_19 = arith.constant 1 : index
    %c1_20 = arith.constant 1 : index
    %c0_21 = arith.constant 0 : index
    %12 = vector.load %arg1[%c0_18, %c1_19, %c1_20, %c0_21] : memref<1x10x10x32xf32, #tpu.memory_space<vmem>>, vector<1x8x8x32xf32>
    %13 = vector.shape_cast %12 : vector<1x8x8x32xf32> to vector<64x32xf32>
    %c0_22 = arith.constant 0 : index
    %c128 = arith.constant 128 : index
    %14 = vector.load %arg5[%c0_22, %c128] : memref<64x288xf32, #tpu.memory_space<vmem>>, vector<64x32xf32>
    tpu.vector_store %arg5[%c0_22, %c128], %13 {strides = array<i32>} : memref<64x288xf32, #tpu.memory_space<vmem>>, vector<64x32xf32>,
    %c0_23 = arith.constant 0 : index
    %c1_24 = arith.constant 1 : index
    %c2_25 = arith.constant 2 : index
    %c0_26 = arith.constant 0 : index
    %15 = vector.load %arg1[%c0_23, %c1_24, %c2_25, %c0_26] : memref<1x10x10x32xf32, #tpu.memory_space<vmem>>, vector<1x8x8x32xf32>
    %16 = vector.shape_cast %15 : vector<1x8x8x32xf32> to vector<64x32xf32>
    %c0_27 = arith.constant 0 : index
    %c160 = arith.constant 160 : index
    %17 = vector.load %arg5[%c0_27, %c160] : memref<64x288xf32, #tpu.memory_space<vmem>>, vector<64x32xf32>
    tpu.vector_store %arg5[%c0_27, %c160], %16 {strides = array<i32>} : memref<64x288xf32, #tpu.memory_space<vmem>>, vector<64x32xf32>,
    %c0_28 = arith.constant 0 : index
    %c2_29 = arith.constant 2 : index
    %c0_30 = arith.constant 0 : index
    %c0_31 = arith.constant 0 : index
    %18 = vector.load %arg1[%c0_28, %c2_29, %c0_30, %c0_31] : memref<1x10x10x32xf32, #tpu.memory_space<vmem>>, vector<1x8x8x32xf32>
    %19 = vector.shape_cast %18 : vector<1x8x8x32xf32> to vector<64x32xf32>
    %c0_32 = arith.constant 0 : index
    %c192 = arith.constant 192 : index
    %20 = vector.load %arg5[%c0_32, %c192] : memref<64x288xf32, #tpu.memory_space<vmem>>, vector<64x32xf32>
    tpu.vector_store %arg5[%c0_32, %c192], %19 {strides = array<i32>} : memref<64x288xf32, #tpu.memory_space<vmem>>, vector<64x32xf32>,
    %c0_33 = arith.constant 0 : index
    %c2_34 = arith.constant 2 : index
    %c1_35 = arith.constant 1 : index
    %c0_36 = arith.constant 0 : index
    %21 = vector.load %arg1[%c0_33, %c2_34, %c1_35, %c0_36] : memref<1x10x10x32xf32, #tpu.memory_space<vmem>>, vector<1x8x8x32xf32>
    %22 = vector.shape_cast %21 : vector<1x8x8x32xf32> to vector<64x32xf32>
    %c0_37 = arith.constant 0 : index
    %c224 = arith.constant 224 : index
    %23 = vector.load %arg5[%c0_37, %c224] : memref<64x288xf32, #tpu.memory_space<vmem>>, vector<64x32xf32>
    tpu.vector_store %arg5[%c0_37, %c224], %22 {strides = array<i32>} : memref<64x288xf32, #tpu.memory_space<vmem>>, vector<64x32xf32>,
    %c0_38 = arith.constant 0 : index
    %c2_39 = arith.constant 2 : index
    %c2_40 = arith.constant 2 : index
    %c0_41 = arith.constant 0 : index
    %24 = vector.load %arg1[%c0_38, %c2_39, %c2_40, %c0_41] : memref<1x10x10x32xf32, #tpu.memory_space<vmem>>, vector<1x8x8x32xf32>
    %25 = vector.shape_cast %24 : vector<1x8x8x32xf32> to vector<64x32xf32>
    %c0_42 = arith.constant 0 : index
    %c256 = arith.constant 256 : index
    %26 = vector.load %arg5[%c0_42, %c256] : memref<64x288xf32, #tpu.memory_space<vmem>>, vector<64x32xf32>
    tpu.vector_store %arg5[%c0_42, %c256], %25 {strides = array<i32>} : memref<64x288xf32, #tpu.memory_space<vmem>>, vector<64x32xf32>,
    %c0_43 = arith.constant 0 : index
    %c0_44 = arith.constant 0 : index
    %27 = vector.load %arg5[%c0_43, %c0_44] : memref<64x288xf32, #tpu.memory_space<vmem>>, vector<64x288xf32>
    %28 = arith.truncf %27 : vector<64x288xf32> to vector<64x288xbf16>
    %c0_45 = arith.constant 0 : index
    %c0_46 = arith.constant 0 : index
    %29 = vector.load %arg2[%c0_45, %c0_46] : memref<288x64xbf16, #tpu.memory_space<vmem>>, vector<288x64xbf16>
    %cst = arith.constant dense<0.000000e+00> : vector<64x64xf32>
    %30 = tpu.matmul %28, %29, %cst {dimension_numbers = #tpu.dot_dimension_numbers<[1], [0], [0], [1], [0, 0, 1, 1], [], []>} : vector<64x288xbf16>, vector<288x64xbf16>, vector<64x64xf32> -> vector<64x64xf32>
    %c0_47 = arith.constant 0 : index
    %c0_48 = arith.constant 0 : index
    %31 = vector.load %arg3[%c0_47, %c0_48] : memref<1x64xf32, #tpu.memory_space<vmem>>, vector<1x64xf32>
    %32 = vector.broadcast %31 : vector<1x64xf32> to vector<64x64xf32>
    %33 = arith.addf %30, %32 : vector<64x64xf32>
    %cst_49 = arith.constant 0.000000e+00 : f32
    %34 = vector.broadcast %cst_49 : f32 to vector<64x64xf32>
    %35 = arith.maximumf %33, %34 : vector<64x64xf32>
    %36 = vector.shape_cast %35 : vector<64x64xf32> to vector<4x16x64xf32>
    %37 = vector.extract_strided_slice %36 {offsets = [0, 0, 0], sizes = [4, 8, 64], strides = [1, 1, 1]} : vector<4x16x64xf32> to vector<4x8x64xf32>
    %38 = vector.extract_strided_slice %36 {offsets = [0, 8, 0], sizes = [4, 8, 64], strides = [1, 1, 1]} : vector<4x16x64xf32> to vector<4x8x64xf32>
    %39 = arith.maximumf %37, %38 : vector<4x8x64xf32>
    %40 = vector.shape_cast %39 : vector<4x8x64xf32> to vector<32x64xf32>
    %c0_50 = arith.constant 0 : index
    %c0_51 = arith.constant 0 : index
    %41 = vector.load %arg6[%c0_50, %c0_51] : memref<32x64xf32, #tpu.memory_space<vmem>>, vector<32x64xf32>
    tpu.vector_store %arg6[%c0_50, %c0_51], %40 {strides = array<i32>} : memref<32x64xf32, #tpu.memory_space<vmem>>, vector<32x64xf32>,
    %c0_52 = arith.constant 0 : index
    %c0_53 = arith.constant 0 : index
    %42 = tpu.strided_load %arg6[%c0_52, %c0_53] {strides = array<i32: 2, 1>} : memref<32x64xf32, #tpu.memory_space<vmem>>, vector<16x64xf32>
    %c1_54 = arith.constant 1 : index
    %c0_55 = arith.constant 0 : index
    %43 = tpu.strided_load %arg6[%c1_54, %c0_55] {strides = array<i32: 2, 1>} : memref<32x64xf32, #tpu.memory_space<vmem>>, vector<16x64xf32>
    %44 = arith.maximumf %42, %43 : vector<16x64xf32>
    %45 = vector.shape_cast %44 : vector<16x64xf32> to vector<1x16x64xf32>
    %c0_56 = arith.constant 0 : index
    %c0_57 = arith.constant 0 : index
    %c0_58 = arith.constant 0 : index
    %46 = vector.load %arg4[%c0_56, %c0_57, %c0_58] : memref<1x16x64xf32, #tpu.memory_space<vmem>>, vector<1x16x64xf32>
    tpu.vector_store %arg4[%c0_56, %c0_57, %c0_58], %45 {strides = array<i32>} : memref<1x16x64xf32, #tpu.memory_space<vmem>>, vector<1x16x64xf32>,
    return
  }
  func.func @transform_0(%arg0: i32) -> (i32, i32, i32, i32) {
    %c0_i32 = arith.constant 0 : i32
    %c0_i32_0 = arith.constant 0 : i32
    %c0_i32_1 = arith.constant 0 : i32
    %c0_i32_2 = arith.constant 0 : i32
    return %arg0, %c0_i32, %c0_i32_0, %c0_i32_1 : i32, i32, i32, i32
  }
  func.func @transform_1(%arg0: i32) -> (i32, i32) {
    %c0_i32 = arith.constant 0 : i32
    %c0_i32_0 = arith.constant 0 : i32
    %c0_i32_1 = arith.constant 0 : i32
    return %c0_i32, %c0_i32_0 : i32, i32
  }
  func.func @transform_2(%arg0: i32) -> (i32, i32) {
    %c0_i32 = arith.constant 0 : i32
    %c0_i32_0 = arith.constant 0 : i32
    %c0_i32_1 = arith.constant 0 : i32
    return %c0_i32, %c0_i32_0 : i32, i32
  }
  func.func @transform_3(%arg0: i32) -> (i32, i32, i32) {
    %c0_i32 = arith.constant 0 : i32
    %c0_i32_0 = arith.constant 0 : i32
    %c0_i32_1 = arith.constant 0 : i32
    return %arg0, %c0_i32, %c0_i32_0 : i32, i32, i32
  }
}

module attributes {stable_mosaic.version = 11 : i64} {
  func.func @_conv_pool_kernel(%arg0: i32, %arg1: memref<1x6x10x64xf32, #tpu.memory_space<vmem>>, %arg2: memref<576x128xbf16, #tpu.memory_space<vmem>>, %arg3: memref<1x128xf32, #tpu.memory_space<vmem>>, %arg4: memref<1x8x128xf32, #tpu.memory_space<vmem>>, %arg5: memref<32x576xf32, #tpu.memory_space<vmem>>, %arg6: memref<16x128xf32, #tpu.memory_space<vmem>>) attributes {dimension_semantics = [#tpu.dimension_semantics<parallel>], iteration_bounds = array<i64: 2>, scalar_prefetch = 0 : i64, scratch_operands = 2 : i64, tpu.core_type = #tpu.core_type<tc>, window_params = [{transform_indices = @transform_0, window_bounds = array<i64: 1, 6, 10, 64>}, {pipeline_mode = #tpu.pipeline_mode<synchronous>, transform_indices = @transform_1, window_bounds = array<i64: 576, 128>}, {pipeline_mode = #tpu.pipeline_mode<synchronous>, transform_indices = @transform_2, window_bounds = array<i64: 1, 128>}, {transform_indices = @transform_3, window_bounds = array<i64: 1, 8, 128>}]} {
    %c0 = arith.constant 0 : index
    %c0_0 = arith.constant 0 : index
    %c0_1 = arith.constant 0 : index
    %c0_2 = arith.constant 0 : index
    %0 = vector.load %arg1[%c0, %c0_0, %c0_1, %c0_2] : memref<1x6x10x64xf32, #tpu.memory_space<vmem>>, vector<1x4x8x64xf32>
    %1 = vector.shape_cast %0 : vector<1x4x8x64xf32> to vector<32x64xf32>
    %c0_3 = arith.constant 0 : index
    %c0_4 = arith.constant 0 : index
    %2 = vector.load %arg5[%c0_3, %c0_4] : memref<32x576xf32, #tpu.memory_space<vmem>>, vector<32x64xf32>
    tpu.vector_store %arg5[%c0_3, %c0_4], %1 {strides = array<i32>} : memref<32x576xf32, #tpu.memory_space<vmem>>, vector<32x64xf32>,
    %c0_5 = arith.constant 0 : index
    %c0_6 = arith.constant 0 : index
    %c1 = arith.constant 1 : index
    %c0_7 = arith.constant 0 : index
    %3 = vector.load %arg1[%c0_5, %c0_6, %c1, %c0_7] : memref<1x6x10x64xf32, #tpu.memory_space<vmem>>, vector<1x4x8x64xf32>
    %4 = vector.shape_cast %3 : vector<1x4x8x64xf32> to vector<32x64xf32>
    %c0_8 = arith.constant 0 : index
    %c64 = arith.constant 64 : index
    %5 = vector.load %arg5[%c0_8, %c64] : memref<32x576xf32, #tpu.memory_space<vmem>>, vector<32x64xf32>
    tpu.vector_store %arg5[%c0_8, %c64], %4 {strides = array<i32>} : memref<32x576xf32, #tpu.memory_space<vmem>>, vector<32x64xf32>,
    %c0_9 = arith.constant 0 : index
    %c0_10 = arith.constant 0 : index
    %c2 = arith.constant 2 : index
    %c0_11 = arith.constant 0 : index
    %6 = vector.load %arg1[%c0_9, %c0_10, %c2, %c0_11] : memref<1x6x10x64xf32, #tpu.memory_space<vmem>>, vector<1x4x8x64xf32>
    %7 = vector.shape_cast %6 : vector<1x4x8x64xf32> to vector<32x64xf32>
    %c0_12 = arith.constant 0 : index
    %c128 = arith.constant 128 : index
    %8 = vector.load %arg5[%c0_12, %c128] : memref<32x576xf32, #tpu.memory_space<vmem>>, vector<32x64xf32>
    tpu.vector_store %arg5[%c0_12, %c128], %7 {strides = array<i32>} : memref<32x576xf32, #tpu.memory_space<vmem>>, vector<32x64xf32>,
    %c0_13 = arith.constant 0 : index
    %c1_14 = arith.constant 1 : index
    %c0_15 = arith.constant 0 : index
    %c0_16 = arith.constant 0 : index
    %9 = vector.load %arg1[%c0_13, %c1_14, %c0_15, %c0_16] : memref<1x6x10x64xf32, #tpu.memory_space<vmem>>, vector<1x4x8x64xf32>
    %10 = vector.shape_cast %9 : vector<1x4x8x64xf32> to vector<32x64xf32>
    %c0_17 = arith.constant 0 : index
    %c192 = arith.constant 192 : index
    %11 = vector.load %arg5[%c0_17, %c192] : memref<32x576xf32, #tpu.memory_space<vmem>>, vector<32x64xf32>
    tpu.vector_store %arg5[%c0_17, %c192], %10 {strides = array<i32>} : memref<32x576xf32, #tpu.memory_space<vmem>>, vector<32x64xf32>,
    %c0_18 = arith.constant 0 : index
    %c1_19 = arith.constant 1 : index
    %c1_20 = arith.constant 1 : index
    %c0_21 = arith.constant 0 : index
    %12 = vector.load %arg1[%c0_18, %c1_19, %c1_20, %c0_21] : memref<1x6x10x64xf32, #tpu.memory_space<vmem>>, vector<1x4x8x64xf32>
    %13 = vector.shape_cast %12 : vector<1x4x8x64xf32> to vector<32x64xf32>
    %c0_22 = arith.constant 0 : index
    %c256 = arith.constant 256 : index
    %14 = vector.load %arg5[%c0_22, %c256] : memref<32x576xf32, #tpu.memory_space<vmem>>, vector<32x64xf32>
    tpu.vector_store %arg5[%c0_22, %c256], %13 {strides = array<i32>} : memref<32x576xf32, #tpu.memory_space<vmem>>, vector<32x64xf32>,
    %c0_23 = arith.constant 0 : index
    %c1_24 = arith.constant 1 : index
    %c2_25 = arith.constant 2 : index
    %c0_26 = arith.constant 0 : index
    %15 = vector.load %arg1[%c0_23, %c1_24, %c2_25, %c0_26] : memref<1x6x10x64xf32, #tpu.memory_space<vmem>>, vector<1x4x8x64xf32>
    %16 = vector.shape_cast %15 : vector<1x4x8x64xf32> to vector<32x64xf32>
    %c0_27 = arith.constant 0 : index
    %c320 = arith.constant 320 : index
    %17 = vector.load %arg5[%c0_27, %c320] : memref<32x576xf32, #tpu.memory_space<vmem>>, vector<32x64xf32>
    tpu.vector_store %arg5[%c0_27, %c320], %16 {strides = array<i32>} : memref<32x576xf32, #tpu.memory_space<vmem>>, vector<32x64xf32>,
    %c0_28 = arith.constant 0 : index
    %c2_29 = arith.constant 2 : index
    %c0_30 = arith.constant 0 : index
    %c0_31 = arith.constant 0 : index
    %18 = vector.load %arg1[%c0_28, %c2_29, %c0_30, %c0_31] : memref<1x6x10x64xf32, #tpu.memory_space<vmem>>, vector<1x4x8x64xf32>
    %19 = vector.shape_cast %18 : vector<1x4x8x64xf32> to vector<32x64xf32>
    %c0_32 = arith.constant 0 : index
    %c384 = arith.constant 384 : index
    %20 = vector.load %arg5[%c0_32, %c384] : memref<32x576xf32, #tpu.memory_space<vmem>>, vector<32x64xf32>
    tpu.vector_store %arg5[%c0_32, %c384], %19 {strides = array<i32>} : memref<32x576xf32, #tpu.memory_space<vmem>>, vector<32x64xf32>,
    %c0_33 = arith.constant 0 : index
    %c2_34 = arith.constant 2 : index
    %c1_35 = arith.constant 1 : index
    %c0_36 = arith.constant 0 : index
    %21 = vector.load %arg1[%c0_33, %c2_34, %c1_35, %c0_36] : memref<1x6x10x64xf32, #tpu.memory_space<vmem>>, vector<1x4x8x64xf32>
    %22 = vector.shape_cast %21 : vector<1x4x8x64xf32> to vector<32x64xf32>
    %c0_37 = arith.constant 0 : index
    %c448 = arith.constant 448 : index
    %23 = vector.load %arg5[%c0_37, %c448] : memref<32x576xf32, #tpu.memory_space<vmem>>, vector<32x64xf32>
    tpu.vector_store %arg5[%c0_37, %c448], %22 {strides = array<i32>} : memref<32x576xf32, #tpu.memory_space<vmem>>, vector<32x64xf32>,
    %c0_38 = arith.constant 0 : index
    %c2_39 = arith.constant 2 : index
    %c2_40 = arith.constant 2 : index
    %c0_41 = arith.constant 0 : index
    %24 = vector.load %arg1[%c0_38, %c2_39, %c2_40, %c0_41] : memref<1x6x10x64xf32, #tpu.memory_space<vmem>>, vector<1x4x8x64xf32>
    %25 = vector.shape_cast %24 : vector<1x4x8x64xf32> to vector<32x64xf32>
    %c0_42 = arith.constant 0 : index
    %c512 = arith.constant 512 : index
    %26 = vector.load %arg5[%c0_42, %c512] : memref<32x576xf32, #tpu.memory_space<vmem>>, vector<32x64xf32>
    tpu.vector_store %arg5[%c0_42, %c512], %25 {strides = array<i32>} : memref<32x576xf32, #tpu.memory_space<vmem>>, vector<32x64xf32>,
    %c0_43 = arith.constant 0 : index
    %c0_44 = arith.constant 0 : index
    %27 = vector.load %arg5[%c0_43, %c0_44] : memref<32x576xf32, #tpu.memory_space<vmem>>, vector<32x576xf32>
    %28 = arith.truncf %27 : vector<32x576xf32> to vector<32x576xbf16>
    %c0_45 = arith.constant 0 : index
    %c0_46 = arith.constant 0 : index
    %29 = vector.load %arg2[%c0_45, %c0_46] : memref<576x128xbf16, #tpu.memory_space<vmem>>, vector<576x128xbf16>
    %cst = arith.constant dense<0.000000e+00> : vector<32x128xf32>
    %30 = tpu.matmul %28, %29, %cst {dimension_numbers = #tpu.dot_dimension_numbers<[1], [0], [0], [1], [0, 0, 1, 1], [], []>} : vector<32x576xbf16>, vector<576x128xbf16>, vector<32x128xf32> -> vector<32x128xf32>
    %c0_47 = arith.constant 0 : index
    %c0_48 = arith.constant 0 : index
    %31 = vector.load %arg3[%c0_47, %c0_48] : memref<1x128xf32, #tpu.memory_space<vmem>>, vector<1x128xf32>
    %32 = vector.broadcast %31 : vector<1x128xf32> to vector<32x128xf32>
    %33 = arith.addf %30, %32 : vector<32x128xf32>
    %cst_49 = arith.constant 0.000000e+00 : f32
    %34 = vector.broadcast %cst_49 : f32 to vector<32x128xf32>
    %35 = arith.maximumf %33, %34 : vector<32x128xf32>
    %36 = vector.shape_cast %35 : vector<32x128xf32> to vector<2x16x128xf32>
    %37 = vector.extract_strided_slice %36 {offsets = [0, 0, 0], sizes = [2, 8, 128], strides = [1, 1, 1]} : vector<2x16x128xf32> to vector<2x8x128xf32>
    %38 = vector.extract_strided_slice %36 {offsets = [0, 8, 0], sizes = [2, 8, 128], strides = [1, 1, 1]} : vector<2x16x128xf32> to vector<2x8x128xf32>
    %39 = arith.maximumf %37, %38 : vector<2x8x128xf32>
    %40 = vector.shape_cast %39 : vector<2x8x128xf32> to vector<16x128xf32>
    %c0_50 = arith.constant 0 : index
    %c0_51 = arith.constant 0 : index
    %41 = vector.load %arg6[%c0_50, %c0_51] : memref<16x128xf32, #tpu.memory_space<vmem>>, vector<16x128xf32>
    tpu.vector_store %arg6[%c0_50, %c0_51], %40 {strides = array<i32>} : memref<16x128xf32, #tpu.memory_space<vmem>>, vector<16x128xf32>,
    %c0_52 = arith.constant 0 : index
    %c0_53 = arith.constant 0 : index
    %42 = tpu.strided_load %arg6[%c0_52, %c0_53] {strides = array<i32: 2, 1>} : memref<16x128xf32, #tpu.memory_space<vmem>>, vector<8x128xf32>
    %c1_54 = arith.constant 1 : index
    %c0_55 = arith.constant 0 : index
    %43 = tpu.strided_load %arg6[%c1_54, %c0_55] {strides = array<i32: 2, 1>} : memref<16x128xf32, #tpu.memory_space<vmem>>, vector<8x128xf32>
    %44 = arith.maximumf %42, %43 : vector<8x128xf32>
    %45 = vector.shape_cast %44 : vector<8x128xf32> to vector<1x8x128xf32>
    %c0_56 = arith.constant 0 : index
    %c0_57 = arith.constant 0 : index
    %c0_58 = arith.constant 0 : index
    %46 = vector.load %arg4[%c0_56, %c0_57, %c0_58] : memref<1x8x128xf32, #tpu.memory_space<vmem>>, vector<1x8x128xf32>
    tpu.vector_store %arg4[%c0_56, %c0_57, %c0_58], %45 {strides = array<i32>} : memref<1x8x128xf32, #tpu.memory_space<vmem>>, vector<1x8x128xf32>,
    return
  }
  func.func @transform_0(%arg0: i32) -> (i32, i32, i32, i32) {
    %c0_i32 = arith.constant 0 : i32
    %c0_i32_0 = arith.constant 0 : i32
    %c0_i32_1 = arith.constant 0 : i32
    %c0_i32_2 = arith.constant 0 : i32
    return %arg0, %c0_i32, %c0_i32_0, %c0_i32_1 : i32, i32, i32, i32
  }
  func.func @transform_1(%arg0: i32) -> (i32, i32) {
    %c0_i32 = arith.constant 0 : i32
    %c0_i32_0 = arith.constant 0 : i32
    %c0_i32_1 = arith.constant 0 : i32
    return %c0_i32, %c0_i32_0 : i32, i32
  }
  func.func @transform_2(%arg0: i32) -> (i32, i32) {
    %c0_i32 = arith.constant 0 : i32
    %c0_i32_0 = arith.constant 0 : i32
    %c0_i32_1 = arith.constant 0 : i32
    return %c0_i32, %c0_i32_0 : i32, i32
  }
  func.func @transform_3(%arg0: i32) -> (i32, i32, i32) {
    %c0_i32 = arith.constant 0 : i32
    %c0_i32_0 = arith.constant 0 : i32
    %c0_i32_1 = arith.constant 0 : i32
    return %arg0, %c0_i32, %c0_i32_0 : i32, i32, i32
  }
}

module attributes {stable_mosaic.version = 11 : i64} {
  func.func @_encoder_layer_kernel(%arg0: i32, %arg1: memref<1x4x128xf32, #tpu.memory_space<vmem>>, %arg2: memref<128x384xbf16, #tpu.memory_space<vmem>>, %arg3: memref<1x384xf32, #tpu.memory_space<vmem>>, %arg4: memref<128x128xbf16, #tpu.memory_space<vmem>>, %arg5: memref<1x128xf32, #tpu.memory_space<vmem>>, %arg6: memref<1x128xf32, #tpu.memory_space<vmem>>, %arg7: memref<1x128xf32, #tpu.memory_space<vmem>>, %arg8: memref<128x2048xbf16, #tpu.memory_space<vmem>>, %arg9: memref<1x2048xf32, #tpu.memory_space<vmem>>, %arg10: memref<2048x128xbf16, #tpu.memory_space<vmem>>, %arg11: memref<1x128xf32, #tpu.memory_space<vmem>>, %arg12: memref<1x128xf32, #tpu.memory_space<vmem>>, %arg13: memref<1x128xf32, #tpu.memory_space<vmem>>, %arg14: memref<1x4x128xf32, #tpu.memory_space<vmem>>, %arg15: memref<4x128xf32, #tpu.memory_space<vmem>>) attributes {dimension_semantics = [#tpu.dimension_semantics<parallel>], iteration_bounds = array<i64: 2>, scalar_prefetch = 0 : i64, scratch_operands = 1 : i64, tpu.core_type = #tpu.core_type<tc>, window_params = [{transform_indices = @transform_0, window_bounds = array<i64: 1, 4, 128>}, {pipeline_mode = #tpu.pipeline_mode<synchronous>, transform_indices = @transform_1, window_bounds = array<i64: 128, 384>}, {pipeline_mode = #tpu.pipeline_mode<synchronous>, transform_indices = @transform_2, window_bounds = array<i64: 1, 384>}, {pipeline_mode = #tpu.pipeline_mode<synchronous>, transform_indices = @transform_3, window_bounds = array<i64: 128, 128>}, {pipeline_mode = #tpu.pipeline_mode<synchronous>, transform_indices = @transform_4, window_bounds = array<i64: 1, 128>}, {pipeline_mode = #tpu.pipeline_mode<synchronous>, transform_indices = @transform_5, window_bounds = array<i64: 1, 128>}, {pipeline_mode = #tpu.pipeline_mode<synchronous>, transform_indices = @transform_6, window_bounds = array<i64: 1, 128>}, {pipeline_mode = #tpu.pipeline_mode<synchronous>, transform_indices = @transform_7, window_bounds = array<i64: 128, 2048>}, {pipeline_mode = #tpu.pipeline_mode<synchronous>, transform_indices = @transform_8, window_bounds = array<i64: 1, 2048>}, {pipeline_mode = #tpu.pipeline_mode<synchronous>, transform_indices = @transform_9, window_bounds = array<i64: 2048, 128>}, {pipeline_mode = #tpu.pipeline_mode<synchronous>, transform_indices = @transform_10, window_bounds = array<i64: 1, 128>}, {pipeline_mode = #tpu.pipeline_mode<synchronous>, transform_indices = @transform_11, window_bounds = array<i64: 1, 128>}, {pipeline_mode = #tpu.pipeline_mode<synchronous>, transform_indices = @transform_12, window_bounds = array<i64: 1, 128>}, {transform_indices = @transform_13, window_bounds = array<i64: 1, 4, 128>}]} {
    %c0 = arith.constant 0 : index
    %c0_0 = arith.constant 0 : index
    %c0_1 = arith.constant 0 : index
    %0 = vector.load %arg1[%c0, %c0_0, %c0_1] : memref<1x4x128xf32, #tpu.memory_space<vmem>>, vector<1x4x128xf32>
    %1 = vector.shape_cast %0 : vector<1x4x128xf32> to vector<4x128xf32>
    %2 = arith.truncf %1 : vector<4x128xf32> to vector<4x128xbf16>
    %c0_2 = arith.constant 0 : index
    %c0_3 = arith.constant 0 : index
    %3 = vector.load %arg2[%c0_2, %c0_3] : memref<128x384xbf16, #tpu.memory_space<vmem>>, vector<128x384xbf16>
    %cst = arith.constant dense<0.000000e+00> : vector<4x384xf32>
    %4 = tpu.matmul %2, %3, %cst {dimension_numbers = #tpu.dot_dimension_numbers<[1], [0], [0], [1], [0, 0, 1, 1], [], []>} : vector<4x128xbf16>, vector<128x384xbf16>, vector<4x384xf32> -> vector<4x384xf32>
    %c0_4 = arith.constant 0 : index
    %c0_5 = arith.constant 0 : index
    %5 = vector.load %arg3[%c0_4, %c0_5] : memref<1x384xf32, #tpu.memory_space<vmem>>, vector<1x384xf32>
    %6 = vector.broadcast %5 : vector<1x384xf32> to vector<4x384xf32>
    %7 = arith.addf %4, %6 : vector<4x384xf32>
    %8 = vector.extract_strided_slice %7 {offsets = [0, 0], sizes = [4, 16], strides = [1, 1]} : vector<4x384xf32> to vector<4x16xf32>
    %cst_6 = arith.constant 2.500000e-01 : f32
    %9 = vector.broadcast %cst_6 : f32 to vector<4x16xf32>
    %10 = arith.mulf %8, %9 : vector<4x16xf32>
    %11 = vector.extract_strided_slice %7 {offsets = [0, 128], sizes = [4, 16], strides = [1, 1]} : vector<4x384xf32> to vector<4x16xf32>
    %12 = vector.extract_strided_slice %7 {offsets = [0, 256], sizes = [4, 16], strides = [1, 1]} : vector<4x384xf32> to vector<4x16xf32>
    %13 = arith.truncf %10 : vector<4x16xf32> to vector<4x16xbf16>
    %14 = arith.truncf %11 : vector<4x16xf32> to vector<4x16xbf16>
    %cst_7 = arith.constant dense<0.000000e+00> : vector<4x4xf32>
    %15 = tpu.matmul %13, %14, %cst_7 {dimension_numbers = #tpu.dot_dimension_numbers<[1], [1], [0], [0], [0, 0, 1, 0], [], []>} : vector<4x16xbf16>, vector<4x16xbf16>, vector<4x4xf32> -> vector<4x4xf32>
    %cst_8 = arith.constant dense<0xFF800000> : vector<4xf32>
    %16 = vector.multi_reduction <maximumf>, %15, %cst_8 [1] : vector<4x4xf32> to vector<4xf32>
    %17 = vector.shape_cast %16 : vector<4xf32> to vector<4x1xf32>
    %18 = vector.broadcast %17 : vector<4x1xf32> to vector<4x4xf32>
    %19 = arith.subf %15, %18 : vector<4x4xf32>
    %20 = math.exp %19 : vector<4x4xf32>
    %cst_9 = arith.constant dense<0.000000e+00> : vector<4xf32>
    %21 = vector.multi_reduction <add>, %20, %cst_9 [1] : vector<4x4xf32> to vector<4xf32>
    %22 = vector.shape_cast %21 : vector<4xf32> to vector<4x1xf32>
    %23 = vector.broadcast %22 : vector<4x1xf32> to vector<4x4xf32>
    %24 = arith.divf %20, %23 : vector<4x4xf32>
    %25 = arith.truncf %24 : vector<4x4xf32> to vector<4x4xbf16>
    %26 = arith.truncf %12 : vector<4x16xf32> to vector<4x16xbf16>
    %cst_10 = arith.constant dense<0.000000e+00> : vector<4x16xf32>
    %27 = tpu.matmul %25, %26, %cst_10 {dimension_numbers = #tpu.dot_dimension_numbers<[1], [0], [0], [1], [0, 0, 1, 1], [], []>} : vector<4x4xbf16>, vector<4x16xbf16>, vector<4x16xf32> -> vector<4x16xf32>
    %c0_11 = arith.constant 0 : index
    %c0_12 = arith.constant 0 : index
    %28 = vector.load %arg15[%c0_11, %c0_12] : memref<4x128xf32, #tpu.memory_space<vmem>>, vector<4x16xf32>
    tpu.vector_store %arg15[%c0_11, %c0_12], %27 {strides = array<i32>} : memref<4x128xf32, #tpu.memory_space<vmem>>, vector<4x16xf32>,
    %29 = vector.extract_strided_slice %7 {offsets = [0, 16], sizes = [4, 16], strides = [1, 1]} : vector<4x384xf32> to vector<4x16xf32>
    %cst_13 = arith.constant 2.500000e-01 : f32
    %30 = vector.broadcast %cst_13 : f32 to vector<4x16xf32>
    %31 = arith.mulf %29, %30 : vector<4x16xf32>
    %32 = vector.extract_strided_slice %7 {offsets = [0, 144], sizes = [4, 16], strides = [1, 1]} : vector<4x384xf32> to vector<4x16xf32>
    %33 = vector.extract_strided_slice %7 {offsets = [0, 272], sizes = [4, 16], strides = [1, 1]} : vector<4x384xf32> to vector<4x16xf32>
    %34 = arith.truncf %31 : vector<4x16xf32> to vector<4x16xbf16>
    %35 = arith.truncf %32 : vector<4x16xf32> to vector<4x16xbf16>
    %cst_14 = arith.constant dense<0.000000e+00> : vector<4x4xf32>
    %36 = tpu.matmul %34, %35, %cst_14 {dimension_numbers = #tpu.dot_dimension_numbers<[1], [1], [0], [0], [0, 0, 1, 0], [], []>} : vector<4x16xbf16>, vector<4x16xbf16>, vector<4x4xf32> -> vector<4x4xf32>
    %cst_15 = arith.constant dense<0xFF800000> : vector<4xf32>
    %37 = vector.multi_reduction <maximumf>, %36, %cst_15 [1] : vector<4x4xf32> to vector<4xf32>
    %38 = vector.shape_cast %37 : vector<4xf32> to vector<4x1xf32>
    %39 = vector.broadcast %38 : vector<4x1xf32> to vector<4x4xf32>
    %40 = arith.subf %36, %39 : vector<4x4xf32>
    %41 = math.exp %40 : vector<4x4xf32>
    %cst_16 = arith.constant dense<0.000000e+00> : vector<4xf32>
    %42 = vector.multi_reduction <add>, %41, %cst_16 [1] : vector<4x4xf32> to vector<4xf32>
    %43 = vector.shape_cast %42 : vector<4xf32> to vector<4x1xf32>
    %44 = vector.broadcast %43 : vector<4x1xf32> to vector<4x4xf32>
    %45 = arith.divf %41, %44 : vector<4x4xf32>
    %46 = arith.truncf %45 : vector<4x4xf32> to vector<4x4xbf16>
    %47 = arith.truncf %33 : vector<4x16xf32> to vector<4x16xbf16>
    %cst_17 = arith.constant dense<0.000000e+00> : vector<4x16xf32>
    %48 = tpu.matmul %46, %47, %cst_17 {dimension_numbers = #tpu.dot_dimension_numbers<[1], [0], [0], [1], [0, 0, 1, 1], [], []>} : vector<4x4xbf16>, vector<4x16xbf16>, vector<4x16xf32> -> vector<4x16xf32>
    %c0_18 = arith.constant 0 : index
    %c16 = arith.constant 16 : index
    %49 = vector.load %arg15[%c0_18, %c16] : memref<4x128xf32, #tpu.memory_space<vmem>>, vector<4x16xf32>
    tpu.vector_store %arg15[%c0_18, %c16], %48 {strides = array<i32>} : memref<4x128xf32, #tpu.memory_space<vmem>>, vector<4x16xf32>,
    %50 = vector.extract_strided_slice %7 {offsets = [0, 32], sizes = [4, 16], strides = [1, 1]} : vector<4x384xf32> to vector<4x16xf32>
    %cst_19 = arith.constant 2.500000e-01 : f32
    %51 = vector.broadcast %cst_19 : f32 to vector<4x16xf32>
    %52 = arith.mulf %50, %51 : vector<4x16xf32>
    %53 = vector.extract_strided_slice %7 {offsets = [0, 160], sizes = [4, 16], strides = [1, 1]} : vector<4x384xf32> to vector<4x16xf32>
    %54 = vector.extract_strided_slice %7 {offsets = [0, 288], sizes = [4, 16], strides = [1, 1]} : vector<4x384xf32> to vector<4x16xf32>
    %55 = arith.truncf %52 : vector<4x16xf32> to vector<4x16xbf16>
    %56 = arith.truncf %53 : vector<4x16xf32> to vector<4x16xbf16>
    %cst_20 = arith.constant dense<0.000000e+00> : vector<4x4xf32>
    %57 = tpu.matmul %55, %56, %cst_20 {dimension_numbers = #tpu.dot_dimension_numbers<[1], [1], [0], [0], [0, 0, 1, 0], [], []>} : vector<4x16xbf16>, vector<4x16xbf16>, vector<4x4xf32> -> vector<4x4xf32>
    %cst_21 = arith.constant dense<0xFF800000> : vector<4xf32>
    %58 = vector.multi_reduction <maximumf>, %57, %cst_21 [1] : vector<4x4xf32> to vector<4xf32>
    %59 = vector.shape_cast %58 : vector<4xf32> to vector<4x1xf32>
    %60 = vector.broadcast %59 : vector<4x1xf32> to vector<4x4xf32>
    %61 = arith.subf %57, %60 : vector<4x4xf32>
    %62 = math.exp %61 : vector<4x4xf32>
    %cst_22 = arith.constant dense<0.000000e+00> : vector<4xf32>
    %63 = vector.multi_reduction <add>, %62, %cst_22 [1] : vector<4x4xf32> to vector<4xf32>
    %64 = vector.shape_cast %63 : vector<4xf32> to vector<4x1xf32>
    %65 = vector.broadcast %64 : vector<4x1xf32> to vector<4x4xf32>
    %66 = arith.divf %62, %65 : vector<4x4xf32>
    %67 = arith.truncf %66 : vector<4x4xf32> to vector<4x4xbf16>
    %68 = arith.truncf %54 : vector<4x16xf32> to vector<4x16xbf16>
    %cst_23 = arith.constant dense<0.000000e+00> : vector<4x16xf32>
    %69 = tpu.matmul %67, %68, %cst_23 {dimension_numbers = #tpu.dot_dimension_numbers<[1], [0], [0], [1], [0, 0, 1, 1], [], []>} : vector<4x4xbf16>, vector<4x16xbf16>, vector<4x16xf32> -> vector<4x16xf32>
    %c0_24 = arith.constant 0 : index
    %c32 = arith.constant 32 : index
    %70 = vector.load %arg15[%c0_24, %c32] : memref<4x128xf32, #tpu.memory_space<vmem>>, vector<4x16xf32>
    tpu.vector_store %arg15[%c0_24, %c32], %69 {strides = array<i32>} : memref<4x128xf32, #tpu.memory_space<vmem>>, vector<4x16xf32>,
    %71 = vector.extract_strided_slice %7 {offsets = [0, 48], sizes = [4, 16], strides = [1, 1]} : vector<4x384xf32> to vector<4x16xf32>
    %cst_25 = arith.constant 2.500000e-01 : f32
    %72 = vector.broadcast %cst_25 : f32 to vector<4x16xf32>
    %73 = arith.mulf %71, %72 : vector<4x16xf32>
    %74 = vector.extract_strided_slice %7 {offsets = [0, 176], sizes = [4, 16], strides = [1, 1]} : vector<4x384xf32> to vector<4x16xf32>
    %75 = vector.extract_strided_slice %7 {offsets = [0, 304], sizes = [4, 16], strides = [1, 1]} : vector<4x384xf32> to vector<4x16xf32>
    %76 = arith.truncf %73 : vector<4x16xf32> to vector<4x16xbf16>
    %77 = arith.truncf %74 : vector<4x16xf32> to vector<4x16xbf16>
    %cst_26 = arith.constant dense<0.000000e+00> : vector<4x4xf32>
    %78 = tpu.matmul %76, %77, %cst_26 {dimension_numbers = #tpu.dot_dimension_numbers<[1], [1], [0], [0], [0, 0, 1, 0], [], []>} : vector<4x16xbf16>, vector<4x16xbf16>, vector<4x4xf32> -> vector<4x4xf32>
    %cst_27 = arith.constant dense<0xFF800000> : vector<4xf32>
    %79 = vector.multi_reduction <maximumf>, %78, %cst_27 [1] : vector<4x4xf32> to vector<4xf32>
    %80 = vector.shape_cast %79 : vector<4xf32> to vector<4x1xf32>
    %81 = vector.broadcast %80 : vector<4x1xf32> to vector<4x4xf32>
    %82 = arith.subf %78, %81 : vector<4x4xf32>
    %83 = math.exp %82 : vector<4x4xf32>
    %cst_28 = arith.constant dense<0.000000e+00> : vector<4xf32>
    %84 = vector.multi_reduction <add>, %83, %cst_28 [1] : vector<4x4xf32> to vector<4xf32>
    %85 = vector.shape_cast %84 : vector<4xf32> to vector<4x1xf32>
    %86 = vector.broadcast %85 : vector<4x1xf32> to vector<4x4xf32>
    %87 = arith.divf %83, %86 : vector<4x4xf32>
    %88 = arith.truncf %87 : vector<4x4xf32> to vector<4x4xbf16>
    %89 = arith.truncf %75 : vector<4x16xf32> to vector<4x16xbf16>
    %cst_29 = arith.constant dense<0.000000e+00> : vector<4x16xf32>
    %90 = tpu.matmul %88, %89, %cst_29 {dimension_numbers = #tpu.dot_dimension_numbers<[1], [0], [0], [1], [0, 0, 1, 1], [], []>} : vector<4x4xbf16>, vector<4x16xbf16>, vector<4x16xf32> -> vector<4x16xf32>
    %c0_30 = arith.constant 0 : index
    %c48 = arith.constant 48 : index
    %91 = vector.load %arg15[%c0_30, %c48] : memref<4x128xf32, #tpu.memory_space<vmem>>, vector<4x16xf32>
    tpu.vector_store %arg15[%c0_30, %c48], %90 {strides = array<i32>} : memref<4x128xf32, #tpu.memory_space<vmem>>, vector<4x16xf32>,
    %92 = vector.extract_strided_slice %7 {offsets = [0, 64], sizes = [4, 16], strides = [1, 1]} : vector<4x384xf32> to vector<4x16xf32>
    %cst_31 = arith.constant 2.500000e-01 : f32
    %93 = vector.broadcast %cst_31 : f32 to vector<4x16xf32>
    %94 = arith.mulf %92, %93 : vector<4x16xf32>
    %95 = vector.extract_strided_slice %7 {offsets = [0, 192], sizes = [4, 16], strides = [1, 1]} : vector<4x384xf32> to vector<4x16xf32>
    %96 = vector.extract_strided_slice %7 {offsets = [0, 320], sizes = [4, 16], strides = [1, 1]} : vector<4x384xf32> to vector<4x16xf32>
    %97 = arith.truncf %94 : vector<4x16xf32> to vector<4x16xbf16>
    %98 = arith.truncf %95 : vector<4x16xf32> to vector<4x16xbf16>
    %cst_32 = arith.constant dense<0.000000e+00> : vector<4x4xf32>
    %99 = tpu.matmul %97, %98, %cst_32 {dimension_numbers = #tpu.dot_dimension_numbers<[1], [1], [0], [0], [0, 0, 1, 0], [], []>} : vector<4x16xbf16>, vector<4x16xbf16>, vector<4x4xf32> -> vector<4x4xf32>
    %cst_33 = arith.constant dense<0xFF800000> : vector<4xf32>
    %100 = vector.multi_reduction <maximumf>, %99, %cst_33 [1] : vector<4x4xf32> to vector<4xf32>
    %101 = vector.shape_cast %100 : vector<4xf32> to vector<4x1xf32>
    %102 = vector.broadcast %101 : vector<4x1xf32> to vector<4x4xf32>
    %103 = arith.subf %99, %102 : vector<4x4xf32>
    %104 = math.exp %103 : vector<4x4xf32>
    %cst_34 = arith.constant dense<0.000000e+00> : vector<4xf32>
    %105 = vector.multi_reduction <add>, %104, %cst_34 [1] : vector<4x4xf32> to vector<4xf32>
    %106 = vector.shape_cast %105 : vector<4xf32> to vector<4x1xf32>
    %107 = vector.broadcast %106 : vector<4x1xf32> to vector<4x4xf32>
    %108 = arith.divf %104, %107 : vector<4x4xf32>
    %109 = arith.truncf %108 : vector<4x4xf32> to vector<4x4xbf16>
    %110 = arith.truncf %96 : vector<4x16xf32> to vector<4x16xbf16>
    %cst_35 = arith.constant dense<0.000000e+00> : vector<4x16xf32>
    %111 = tpu.matmul %109, %110, %cst_35 {dimension_numbers = #tpu.dot_dimension_numbers<[1], [0], [0], [1], [0, 0, 1, 1], [], []>} : vector<4x4xbf16>, vector<4x16xbf16>, vector<4x16xf32> -> vector<4x16xf32>
    %c0_36 = arith.constant 0 : index
    %c64 = arith.constant 64 : index
    %112 = vector.load %arg15[%c0_36, %c64] : memref<4x128xf32, #tpu.memory_space<vmem>>, vector<4x16xf32>
    tpu.vector_store %arg15[%c0_36, %c64], %111 {strides = array<i32>} : memref<4x128xf32, #tpu.memory_space<vmem>>, vector<4x16xf32>,
    %113 = vector.extract_strided_slice %7 {offsets = [0, 80], sizes = [4, 16], strides = [1, 1]} : vector<4x384xf32> to vector<4x16xf32>
    %cst_37 = arith.constant 2.500000e-01 : f32
    %114 = vector.broadcast %cst_37 : f32 to vector<4x16xf32>
    %115 = arith.mulf %113, %114 : vector<4x16xf32>
    %116 = vector.extract_strided_slice %7 {offsets = [0, 208], sizes = [4, 16], strides = [1, 1]} : vector<4x384xf32> to vector<4x16xf32>
    %117 = vector.extract_strided_slice %7 {offsets = [0, 336], sizes = [4, 16], strides = [1, 1]} : vector<4x384xf32> to vector<4x16xf32>
    %118 = arith.truncf %115 : vector<4x16xf32> to vector<4x16xbf16>
    %119 = arith.truncf %116 : vector<4x16xf32> to vector<4x16xbf16>
    %cst_38 = arith.constant dense<0.000000e+00> : vector<4x4xf32>
    %120 = tpu.matmul %118, %119, %cst_38 {dimension_numbers = #tpu.dot_dimension_numbers<[1], [1], [0], [0], [0, 0, 1, 0], [], []>} : vector<4x16xbf16>, vector<4x16xbf16>, vector<4x4xf32> -> vector<4x4xf32>
    %cst_39 = arith.constant dense<0xFF800000> : vector<4xf32>
    %121 = vector.multi_reduction <maximumf>, %120, %cst_39 [1] : vector<4x4xf32> to vector<4xf32>
    %122 = vector.shape_cast %121 : vector<4xf32> to vector<4x1xf32>
    %123 = vector.broadcast %122 : vector<4x1xf32> to vector<4x4xf32>
    %124 = arith.subf %120, %123 : vector<4x4xf32>
    %125 = math.exp %124 : vector<4x4xf32>
    %cst_40 = arith.constant dense<0.000000e+00> : vector<4xf32>
    %126 = vector.multi_reduction <add>, %125, %cst_40 [1] : vector<4x4xf32> to vector<4xf32>
    %127 = vector.shape_cast %126 : vector<4xf32> to vector<4x1xf32>
    %128 = vector.broadcast %127 : vector<4x1xf32> to vector<4x4xf32>
    %129 = arith.divf %125, %128 : vector<4x4xf32>
    %130 = arith.truncf %129 : vector<4x4xf32> to vector<4x4xbf16>
    %131 = arith.truncf %117 : vector<4x16xf32> to vector<4x16xbf16>
    %cst_41 = arith.constant dense<0.000000e+00> : vector<4x16xf32>
    %132 = tpu.matmul %130, %131, %cst_41 {dimension_numbers = #tpu.dot_dimension_numbers<[1], [0], [0], [1], [0, 0, 1, 1], [], []>} : vector<4x4xbf16>, vector<4x16xbf16>, vector<4x16xf32> -> vector<4x16xf32>
    %c0_42 = arith.constant 0 : index
    %c80 = arith.constant 80 : index
    %133 = vector.load %arg15[%c0_42, %c80] : memref<4x128xf32, #tpu.memory_space<vmem>>, vector<4x16xf32>
    tpu.vector_store %arg15[%c0_42, %c80], %132 {strides = array<i32>} : memref<4x128xf32, #tpu.memory_space<vmem>>, vector<4x16xf32>,
    %134 = vector.extract_strided_slice %7 {offsets = [0, 96], sizes = [4, 16], strides = [1, 1]} : vector<4x384xf32> to vector<4x16xf32>
    %cst_43 = arith.constant 2.500000e-01 : f32
    %135 = vector.broadcast %cst_43 : f32 to vector<4x16xf32>
    %136 = arith.mulf %134, %135 : vector<4x16xf32>
    %137 = vector.extract_strided_slice %7 {offsets = [0, 224], sizes = [4, 16], strides = [1, 1]} : vector<4x384xf32> to vector<4x16xf32>
    %138 = vector.extract_strided_slice %7 {offsets = [0, 352], sizes = [4, 16], strides = [1, 1]} : vector<4x384xf32> to vector<4x16xf32>
    %139 = arith.truncf %136 : vector<4x16xf32> to vector<4x16xbf16>
    %140 = arith.truncf %137 : vector<4x16xf32> to vector<4x16xbf16>
    %cst_44 = arith.constant dense<0.000000e+00> : vector<4x4xf32>
    %141 = tpu.matmul %139, %140, %cst_44 {dimension_numbers = #tpu.dot_dimension_numbers<[1], [1], [0], [0], [0, 0, 1, 0], [], []>} : vector<4x16xbf16>, vector<4x16xbf16>, vector<4x4xf32> -> vector<4x4xf32>
    %cst_45 = arith.constant dense<0xFF800000> : vector<4xf32>
    %142 = vector.multi_reduction <maximumf>, %141, %cst_45 [1] : vector<4x4xf32> to vector<4xf32>
    %143 = vector.shape_cast %142 : vector<4xf32> to vector<4x1xf32>
    %144 = vector.broadcast %143 : vector<4x1xf32> to vector<4x4xf32>
    %145 = arith.subf %141, %144 : vector<4x4xf32>
    %146 = math.exp %145 : vector<4x4xf32>
    %cst_46 = arith.constant dense<0.000000e+00> : vector<4xf32>
    %147 = vector.multi_reduction <add>, %146, %cst_46 [1] : vector<4x4xf32> to vector<4xf32>
    %148 = vector.shape_cast %147 : vector<4xf32> to vector<4x1xf32>
    %149 = vector.broadcast %148 : vector<4x1xf32> to vector<4x4xf32>
    %150 = arith.divf %146, %149 : vector<4x4xf32>
    %151 = arith.truncf %150 : vector<4x4xf32> to vector<4x4xbf16>
    %152 = arith.truncf %138 : vector<4x16xf32> to vector<4x16xbf16>
    %cst_47 = arith.constant dense<0.000000e+00> : vector<4x16xf32>
    %153 = tpu.matmul %151, %152, %cst_47 {dimension_numbers = #tpu.dot_dimension_numbers<[1], [0], [0], [1], [0, 0, 1, 1], [], []>} : vector<4x4xbf16>, vector<4x16xbf16>, vector<4x16xf32> -> vector<4x16xf32>
    %c0_48 = arith.constant 0 : index
    %c96 = arith.constant 96 : index
    %154 = vector.load %arg15[%c0_48, %c96] : memref<4x128xf32, #tpu.memory_space<vmem>>, vector<4x16xf32>
    tpu.vector_store %arg15[%c0_48, %c96], %153 {strides = array<i32>} : memref<4x128xf32, #tpu.memory_space<vmem>>, vector<4x16xf32>,
    %155 = vector.extract_strided_slice %7 {offsets = [0, 112], sizes = [4, 16], strides = [1, 1]} : vector<4x384xf32> to vector<4x16xf32>
    %cst_49 = arith.constant 2.500000e-01 : f32
    %156 = vector.broadcast %cst_49 : f32 to vector<4x16xf32>
    %157 = arith.mulf %155, %156 : vector<4x16xf32>
    %158 = vector.extract_strided_slice %7 {offsets = [0, 240], sizes = [4, 16], strides = [1, 1]} : vector<4x384xf32> to vector<4x16xf32>
    %159 = vector.extract_strided_slice %7 {offsets = [0, 368], sizes = [4, 16], strides = [1, 1]} : vector<4x384xf32> to vector<4x16xf32>
    %160 = arith.truncf %157 : vector<4x16xf32> to vector<4x16xbf16>
    %161 = arith.truncf %158 : vector<4x16xf32> to vector<4x16xbf16>
    %cst_50 = arith.constant dense<0.000000e+00> : vector<4x4xf32>
    %162 = tpu.matmul %160, %161, %cst_50 {dimension_numbers = #tpu.dot_dimension_numbers<[1], [1], [0], [0], [0, 0, 1, 0], [], []>} : vector<4x16xbf16>, vector<4x16xbf16>, vector<4x4xf32> -> vector<4x4xf32>
    %cst_51 = arith.constant dense<0xFF800000> : vector<4xf32>
    %163 = vector.multi_reduction <maximumf>, %162, %cst_51 [1] : vector<4x4xf32> to vector<4xf32>
    %164 = vector.shape_cast %163 : vector<4xf32> to vector<4x1xf32>
    %165 = vector.broadcast %164 : vector<4x1xf32> to vector<4x4xf32>
    %166 = arith.subf %162, %165 : vector<4x4xf32>
    %167 = math.exp %166 : vector<4x4xf32>
    %cst_52 = arith.constant dense<0.000000e+00> : vector<4xf32>
    %168 = vector.multi_reduction <add>, %167, %cst_52 [1] : vector<4x4xf32> to vector<4xf32>
    %169 = vector.shape_cast %168 : vector<4xf32> to vector<4x1xf32>
    %170 = vector.broadcast %169 : vector<4x1xf32> to vector<4x4xf32>
    %171 = arith.divf %167, %170 : vector<4x4xf32>
    %172 = arith.truncf %171 : vector<4x4xf32> to vector<4x4xbf16>
    %173 = arith.truncf %159 : vector<4x16xf32> to vector<4x16xbf16>
    %cst_53 = arith.constant dense<0.000000e+00> : vector<4x16xf32>
    %174 = tpu.matmul %172, %173, %cst_53 {dimension_numbers = #tpu.dot_dimension_numbers<[1], [0], [0], [1], [0, 0, 1, 1], [], []>} : vector<4x4xbf16>, vector<4x16xbf16>, vector<4x16xf32> -> vector<4x16xf32>
    %c0_54 = arith.constant 0 : index
    %c112 = arith.constant 112 : index
    %175 = vector.load %arg15[%c0_54, %c112] : memref<4x128xf32, #tpu.memory_space<vmem>>, vector<4x16xf32>
    tpu.vector_store %arg15[%c0_54, %c112], %174 {strides = array<i32>} : memref<4x128xf32, #tpu.memory_space<vmem>>, vector<4x16xf32>,
    %c0_55 = arith.constant 0 : index
    %c0_56 = arith.constant 0 : index
    %176 = vector.load %arg15[%c0_55, %c0_56] : memref<4x128xf32, #tpu.memory_space<vmem>>, vector<4x128xf32>
    %177 = arith.truncf %176 : vector<4x128xf32> to vector<4x128xbf16>
    %c0_57 = arith.constant 0 : index
    %c0_58 = arith.constant 0 : index
    %178 = vector.load %arg4[%c0_57, %c0_58] : memref<128x128xbf16, #tpu.memory_space<vmem>>, vector<128x128xbf16>
    %cst_59 = arith.constant dense<0.000000e+00> : vector<4x128xf32>
    %179 = tpu.matmul %177, %178, %cst_59 {dimension_numbers = #tpu.dot_dimension_numbers<[1], [0], [0], [1], [0, 0, 1, 1], [], []>} : vector<4x128xbf16>, vector<128x128xbf16>, vector<4x128xf32> -> vector<4x128xf32>
    %c0_60 = arith.constant 0 : index
    %c0_61 = arith.constant 0 : index
    %180 = vector.load %arg5[%c0_60, %c0_61] : memref<1x128xf32, #tpu.memory_space<vmem>>, vector<1x128xf32>
    %181 = vector.broadcast %180 : vector<1x128xf32> to vector<4x128xf32>
    %182 = arith.addf %179, %181 : vector<4x128xf32>
    %183 = arith.addf %1, %182 : vector<4x128xf32>
    %c0_62 = arith.constant 0 : index
    %c0_63 = arith.constant 0 : index
    %184 = vector.load %arg6[%c0_62, %c0_63] : memref<1x128xf32, #tpu.memory_space<vmem>>, vector<1x128xf32>
    %c0_64 = arith.constant 0 : index
    %c0_65 = arith.constant 0 : index
    %185 = vector.load %arg7[%c0_64, %c0_65] : memref<1x128xf32, #tpu.memory_space<vmem>>, vector<1x128xf32>
    %cst_66 = arith.constant dense<0.000000e+00> : vector<4xf32>
    %186 = vector.multi_reduction <add>, %183, %cst_66 [1] : vector<4x128xf32> to vector<4xf32>
    %187 = vector.shape_cast %186 : vector<4xf32> to vector<4x1xf32>
    %cst_67 = arith.constant 1.280000e+02 : f32
    %188 = vector.broadcast %cst_67 : f32 to vector<4x1xf32>
    %189 = arith.divf %187, %188 : vector<4x1xf32>
    %190 = vector.broadcast %189 : vector<4x1xf32> to vector<4x128xf32>
    %191 = arith.subf %183, %190 : vector<4x128xf32>
    %192 = arith.mulf %191, %191 : vector<4x128xf32>
    %cst_68 = arith.constant dense<0.000000e+00> : vector<4xf32>
    %193 = vector.multi_reduction <add>, %192, %cst_68 [1] : vector<4x128xf32> to vector<4xf32>
    %194 = vector.shape_cast %193 : vector<4xf32> to vector<4x1xf32>
    %cst_69 = arith.constant 1.280000e+02 : f32
    %195 = vector.broadcast %cst_69 : f32 to vector<4x1xf32>
    %196 = arith.divf %194, %195 : vector<4x1xf32>
    %cst_70 = arith.constant 9.99999974E-6 : f32
    %197 = vector.broadcast %cst_70 : f32 to vector<4x1xf32>
    %198 = arith.addf %196, %197 : vector<4x1xf32>
    %199 = math.rsqrt %198 : vector<4x1xf32>
    %200 = vector.broadcast %199 : vector<4x1xf32> to vector<4x128xf32>
    %201 = arith.mulf %191, %200 : vector<4x128xf32>
    %202 = vector.broadcast %184 : vector<1x128xf32> to vector<4x128xf32>
    %203 = arith.mulf %201, %202 : vector<4x128xf32>
    %204 = vector.broadcast %185 : vector<1x128xf32> to vector<4x128xf32>
    %205 = arith.addf %203, %204 : vector<4x128xf32>
    %206 = arith.truncf %205 : vector<4x128xf32> to vector<4x128xbf16>
    %c0_71 = arith.constant 0 : index
    %c0_72 = arith.constant 0 : index
    %207 = vector.load %arg8[%c0_71, %c0_72] : memref<128x2048xbf16, #tpu.memory_space<vmem>>, vector<128x2048xbf16>
    %cst_73 = arith.constant dense<0.000000e+00> : vector<4x2048xf32>
    %208 = tpu.matmul %206, %207, %cst_73 {dimension_numbers = #tpu.dot_dimension_numbers<[1], [0], [0], [1], [0, 0, 1, 1], [], []>} : vector<4x128xbf16>, vector<128x2048xbf16>, vector<4x2048xf32> -> vector<4x2048xf32>
    %c0_74 = arith.constant 0 : index
    %c0_75 = arith.constant 0 : index
    %209 = vector.load %arg9[%c0_74, %c0_75] : memref<1x2048xf32, #tpu.memory_space<vmem>>, vector<1x2048xf32>
    %210 = vector.broadcast %209 : vector<1x2048xf32> to vector<4x2048xf32>
    %211 = arith.addf %208, %210 : vector<4x2048xf32>
    %cst_76 = arith.constant 0.000000e+00 : f32
    %212 = vector.broadcast %cst_76 : f32 to vector<4x2048xf32>
    %213 = arith.maximumf %211, %212 : vector<4x2048xf32>
    %214 = arith.truncf %213 : vector<4x2048xf32> to vector<4x2048xbf16>
    %c0_77 = arith.constant 0 : index
    %c0_78 = arith.constant 0 : index
    %215 = vector.load %arg10[%c0_77, %c0_78] : memref<2048x128xbf16, #tpu.memory_space<vmem>>, vector<2048x128xbf16>
    %cst_79 = arith.constant dense<0.000000e+00> : vector<4x128xf32>
    %216 = tpu.matmul %214, %215, %cst_79 {dimension_numbers = #tpu.dot_dimension_numbers<[1], [0], [0], [1], [0, 0, 1, 1], [], []>} : vector<4x2048xbf16>, vector<2048x128xbf16>, vector<4x128xf32> -> vector<4x128xf32>
    %c0_80 = arith.constant 0 : index
    %c0_81 = arith.constant 0 : index
    %217 = vector.load %arg11[%c0_80, %c0_81] : memref<1x128xf32, #tpu.memory_space<vmem>>, vector<1x128xf32>
    %218 = vector.broadcast %217 : vector<1x128xf32> to vector<4x128xf32>
    %219 = arith.addf %216, %218 : vector<4x128xf32>
    %220 = arith.addf %205, %219 : vector<4x128xf32>
    %c0_82 = arith.constant 0 : index
    %c0_83 = arith.constant 0 : index
    %221 = vector.load %arg12[%c0_82, %c0_83] : memref<1x128xf32, #tpu.memory_space<vmem>>, vector<1x128xf32>
    %c0_84 = arith.constant 0 : index
    %c0_85 = arith.constant 0 : index
    %222 = vector.load %arg13[%c0_84, %c0_85] : memref<1x128xf32, #tpu.memory_space<vmem>>, vector<1x128xf32>
    %cst_86 = arith.constant dense<0.000000e+00> : vector<4xf32>
    %223 = vector.multi_reduction <add>, %220, %cst_86 [1] : vector<4x128xf32> to vector<4xf32>
    %224 = vector.shape_cast %223 : vector<4xf32> to vector<4x1xf32>
    %cst_87 = arith.constant 1.280000e+02 : f32
    %225 = vector.broadcast %cst_87 : f32 to vector<4x1xf32>
    %226 = arith.divf %224, %225 : vector<4x1xf32>
    %227 = vector.broadcast %226 : vector<4x1xf32> to vector<4x128xf32>
    %228 = arith.subf %220, %227 : vector<4x128xf32>
    %229 = arith.mulf %228, %228 : vector<4x128xf32>
    %cst_88 = arith.constant dense<0.000000e+00> : vector<4xf32>
    %230 = vector.multi_reduction <add>, %229, %cst_88 [1] : vector<4x128xf32> to vector<4xf32>
    %231 = vector.shape_cast %230 : vector<4xf32> to vector<4x1xf32>
    %cst_89 = arith.constant 1.280000e+02 : f32
    %232 = vector.broadcast %cst_89 : f32 to vector<4x1xf32>
    %233 = arith.divf %231, %232 : vector<4x1xf32>
    %cst_90 = arith.constant 9.99999974E-6 : f32
    %234 = vector.broadcast %cst_90 : f32 to vector<4x1xf32>
    %235 = arith.addf %233, %234 : vector<4x1xf32>
    %236 = math.rsqrt %235 : vector<4x1xf32>
    %237 = vector.broadcast %236 : vector<4x1xf32> to vector<4x128xf32>
    %238 = arith.mulf %228, %237 : vector<4x128xf32>
    %239 = vector.broadcast %221 : vector<1x128xf32> to vector<4x128xf32>
    %240 = arith.mulf %238, %239 : vector<4x128xf32>
    %241 = vector.broadcast %222 : vector<1x128xf32> to vector<4x128xf32>
    %242 = arith.addf %240, %241 : vector<4x128xf32>
    %243 = vector.shape_cast %242 : vector<4x128xf32> to vector<1x4x128xf32>
    %c0_91 = arith.constant 0 : index
    %c0_92 = arith.constant 0 : index
    %c0_93 = arith.constant 0 : index
    %244 = vector.load %arg14[%c0_91, %c0_92, %c0_93] : memref<1x4x128xf32, #tpu.memory_space<vmem>>, vector<1x4x128xf32>
    tpu.vector_store %arg14[%c0_91, %c0_92, %c0_93], %243 {strides = array<i32>} : memref<1x4x128xf32, #tpu.memory_space<vmem>>, vector<1x4x128xf32>,
    return
  }
  func.func @transform_0(%arg0: i32) -> (i32, i32, i32) {
    %c0_i32 = arith.constant 0 : i32
    %c0_i32_0 = arith.constant 0 : i32
    %c0_i32_1 = arith.constant 0 : i32
    return %arg0, %c0_i32, %c0_i32_0 : i32, i32, i32
  }
  func.func @transform_1(%arg0: i32) -> (i32, i32) {
    %c0_i32 = arith.constant 0 : i32
    %c0_i32_0 = arith.constant 0 : i32
    %c0_i32_1 = arith.constant 0 : i32
    return %c0_i32, %c0_i32_0 : i32, i32
  }
  func.func @transform_2(%arg0: i32) -> (i32, i32) {
    %c0_i32 = arith.constant 0 : i32
    %c0_i32_0 = arith.constant 0 : i32
    %c0_i32_1 = arith.constant 0 : i32
    return %c0_i32, %c0_i32_0 : i32, i32
  }
  func.func @transform_3(%arg0: i32) -> (i32, i32) {
    %c0_i32 = arith.constant 0 : i32
    %c0_i32_0 = arith.constant 0 : i32
    %c0_i32_1 = arith.constant 0 : i32
    return %c0_i32, %c0_i32_0 : i32, i32
  }
  func.func @transform_4(%arg0: i32) -> (i32, i32) {
    %c0_i32 = arith.constant 0 : i32
    %c0_i32_0 = arith.constant 0 : i32
    %c0_i32_1 = arith.constant 0 : i32
    return %c0_i32, %c0_i32_0 : i32, i32
  }
  func.func @transform_5(%arg0: i32) -> (i32, i32) {
    %c0_i32 = arith.constant 0 : i32
    %c0_i32_0 = arith.constant 0 : i32
    %c0_i32_1 = arith.constant 0 : i32
    return %c0_i32, %c0_i32_0 : i32, i32
  }
  func.func @transform_6(%arg0: i32) -> (i32, i32) {
    %c0_i32 = arith.constant 0 : i32
    %c0_i32_0 = arith.constant 0 : i32
    %c0_i32_1 = arith.constant 0 : i32
    return %c0_i32, %c0_i32_0 : i32, i32
  }
  func.func @transform_7(%arg0: i32) -> (i32, i32) {
    %c0_i32 = arith.constant 0 : i32
    %c0_i32_0 = arith.constant 0 : i32
    %c0_i32_1 = arith.constant 0 : i32
    return %c0_i32, %c0_i32_0 : i32, i32
  }
  func.func @transform_8(%arg0: i32) -> (i32, i32) {
    %c0_i32 = arith.constant 0 : i32
    %c0_i32_0 = arith.constant 0 : i32
    %c0_i32_1 = arith.constant 0 : i32
    return %c0_i32, %c0_i32_0 : i32, i32
  }
  func.func @transform_9(%arg0: i32) -> (i32, i32) {
    %c0_i32 = arith.constant 0 : i32
    %c0_i32_0 = arith.constant 0 : i32
    %c0_i32_1 = arith.constant 0 : i32
    return %c0_i32, %c0_i32_0 : i32, i32
  }
  func.func @transform_10(%arg0: i32) -> (i32, i32) {
    %c0_i32 = arith.constant 0 : i32
    %c0_i32_0 = arith.constant 0 : i32
    %c0_i32_1 = arith.constant 0 : i32
    return %c0_i32, %c0_i32_0 : i32, i32
  }
  func.func @transform_11(%arg0: i32) -> (i32, i32) {
    %c0_i32 = arith.constant 0 : i32
    %c0_i32_0 = arith.constant 0 : i32
    %c0_i32_1 = arith.constant 0 : i32
    return %c0_i32, %c0_i32_0 : i32, i32
  }
  func.func @transform_12(%arg0: i32) -> (i32, i32) {
    %c0_i32 = arith.constant 0 : i32
    %c0_i32_0 = arith.constant 0 : i32
    %c0_i32_1 = arith.constant 0 : i32
    return %c0_i32, %c0_i32_0 : i32, i32
  }
  func.func @transform_13(%arg0: i32) -> (i32, i32, i32) {
    %c0_i32 = arith.constant 0 : i32
    %c0_i32_0 = arith.constant 0 : i32
    %c0_i32_1 = arith.constant 0 : i32
    return %arg0, %c0_i32, %c0_i32_0 : i32, i32, i32
  }
}

module attributes {stable_mosaic.version = 11 : i64} {
  func.func @_mean_fc_kernel(%arg0: memref<2x4x128xf32, #tpu.memory_space<vmem>>, %arg1: memref<128x128xbf16, #tpu.memory_space<vmem>>, %arg2: memref<1x128xf32, #tpu.memory_space<vmem>>, %arg3: memref<2x128xf32, #tpu.memory_space<vmem>>) attributes {dimension_semantics = [], scalar_prefetch = 0 : i64, scratch_operands = 0 : i64, tpu.core_type = #tpu.core_type<tc>} {
    %c0 = arith.constant 0 : index
    %c0_0 = arith.constant 0 : index
    %c0_1 = arith.constant 0 : index
    %0 = vector.load %arg0[%c0, %c0_0, %c0_1] : memref<2x4x128xf32, #tpu.memory_space<vmem>>, vector<2x4x128xf32>
    %cst = arith.constant dense<0.000000e+00> : vector<2x128xf32>
    %1 = vector.multi_reduction <add>, %0, %cst [1] : vector<2x4x128xf32> to vector<2x128xf32>
    %cst_2 = arith.constant 4.000000e+00 : f32
    %2 = vector.broadcast %cst_2 : f32 to vector<2x128xf32>
    %3 = arith.divf %1, %2 : vector<2x128xf32>
    %4 = arith.truncf %3 : vector<2x128xf32> to vector<2x128xbf16>
    %c0_3 = arith.constant 0 : index
    %c0_4 = arith.constant 0 : index
    %5 = vector.load %arg1[%c0_3, %c0_4] : memref<128x128xbf16, #tpu.memory_space<vmem>>, vector<128x128xbf16>
    %cst_5 = arith.constant dense<0.000000e+00> : vector<2x128xf32>
    %6 = tpu.matmul %4, %5, %cst_5 {dimension_numbers = #tpu.dot_dimension_numbers<[1], [0], [0], [1], [0, 0, 1, 1], [], []>} : vector<2x128xbf16>, vector<128x128xbf16>, vector<2x128xf32> -> vector<2x128xf32>
    %c0_6 = arith.constant 0 : index
    %c0_7 = arith.constant 0 : index
    %7 = vector.load %arg2[%c0_6, %c0_7] : memref<1x128xf32, #tpu.memory_space<vmem>>, vector<1x128xf32>
    %8 = vector.broadcast %7 : vector<1x128xf32> to vector<2x128xf32>
    %9 = arith.addf %6, %8 : vector<2x128xf32>
    %c0_8 = arith.constant 0 : index
    %c0_9 = arith.constant 0 : index
    %10 = vector.load %arg3[%c0_8, %c0_9] : memref<2x128xf32, #tpu.memory_space<vmem>>, vector<2x128xf32>
    tpu.vector_store %arg3[%c0_8, %c0_9], %9 {strides = array<i32>} : memref<2x128xf32, #tpu.memory_space<vmem>>, vector<2x128xf32>,
    return
  }
}

</mosaic_0001>

<bundles_post_ra>
// kernel: convformer_forward.8
= control target key start
LH: loop header
LB: loop body
LE: loop exit
PB: predicated region body
PF: predicated region fallthrough
CT: control target
= control target key end

     0   :  { %s1075_s12 = smov 0   ;;  %s1299_s0 = inlined_call_operand.vmem [shape: f32[2,6,10,64], index: 0, kind: input, shape index: {}]   ;;  %s1300_s1 = inlined_call_operand.vmem [shape: bf16[576,128], index: 1, kind: input, shape index: {}]   ;;  %s1301_s2 = inlined_call_operand.vmem [shape: f32[1,128], index: 2, kind: input, shape index: {}]   ;;  %s1302_s3 = inlined_call_operand.vmem [shape: f32[2,8,128], index: 3, kind: output, shape index: {}]  }
   0x1 LB: > { %s854_s13 = sadd.s32 4294967295, %s1052_s12   ;;  %p858_p0 = scmp.ge.s32.totalorder %s1052_s12, 1  ;;  %s1052_s12 = sphi %s1075_s12, %s13_s12  }
   0x2   : > { %p137_p1 = scmp.lt.s32.totalorder %s1052_s12, 3 }
   0x4   : > { %p138_p2 = pnand %p858_p0, %p137_p1 }
   0x5   : > { %p160_p3 = scmp.lt.s32.totalorder (!%p138_p2), %s854_s13, 1  ;;  %v1010_v0 = vld [vmem:[%s1300_s1 + $0x40] sm:$0xff] (!%p138_p2)   ;;  %v1012_v2 = vld [vmem:[%s1300_s1 + $0x48] sm:$0xff] (!%p138_p2)   ;;  %v1015_v5 = vld [vmem:[%s1300_s1 + $0x50] sm:$0xff] (!%p138_p2)   ;;  %vm174_vm0 = vcmask (!%p138_p2), 523264   ;;  %s1054_s30 = smov (!%p138_p2), 64  }
   0x6   : > { %141 = sbr.rel (%p138_p2) target bundleno = 407 (0x197), region = 32  ;;  %v1011_v1 = vld [vmem:[%s1300_s1] sm:$0xff] (!%p138_p2)   ;;  %926 = vmatprep.subr.bf16.mxu0 (!%p138_p2), %v1010_v0  ;;  %v1013_v3 = vld [vmem:[%s1300_s1 + $0x8] sm:$0xff] (!%p138_p2)   ;;  %v1017_v20 = vld [vmem:[%s1300_s1 + $0x10] sm:$0xff] (!%p138_p2)   ;;  %vm199_vm1 = vcmask (!%p138_p2), 1048064  }
   0x7   : > { %927 = vmatpush3.bf16.msra.mxu0 (!%p138_p2), %v1011_v1  ;;  %v1014_v4 = vld [vmem:[%s1300_s1 + $0xc0] sm:$0xff] (!%p138_p2)   ;;  %v1018_v21 = vld [vmem:[%s1300_s1 + $0xc8] sm:$0xff] (!%p138_p2)   ;;  %v1019_v22 = vld [vmem:[%s1300_s1 + $0x58] sm:$0xff] (!%p138_p2)  }
   0x8   : > { %928 = vmatprep.subr.bf16.mxu0 (!%p138_p2), %v1012_v2  ;;  %954 = vmatprep.subr.bf16.mxu1 (!%p138_p2), %v1014_v4  ;;  %v1016_v19 = vld [vmem:[%s1300_s1 + $0x80] sm:$0xff] (!%p138_p2)   ;;  %v1020_v23 = vld [vmem:[%s1300_s1 + $0x88] sm:$0xff] (!%p138_p2)   ;;  %v1021_v24 = vld [vmem:[%s1300_s1 + $0x18] sm:$0xff] (!%p138_p2)  }
   0x9   : > { %955 = vmatpush3.bf16.msra.mxu1 (!%p138_p2), %v1016_v19  ;;  %v1022_v25 = vld [vmem:[%s1300_s1 + $0xd0] sm:$0xff] (!%p138_p2)   ;;  %v1023_v26 = vld [vmem:[%s1300_s1 + $0x60] sm:$0xff] (!%p138_p2)   ;;  %v1026_v31 = vld [vmem:[%s1300_s1 + $0xd8] sm:$0xff] (!%p138_p2)  }
   0xa   : > { %956 = vmatprep.subr.bf16.mxu1 (!%p138_p2), %v1018_v21  ;;  %v1024_v27 = vld [vmem:[%s1300_s1 + $0x90] sm:$0xff] (!%p138_p2)   ;;  %v1025_v30 = vld [vmem:[%s1300_s1 + $0x20] sm:$0xff] (!%p138_p2)   ;;  %v1027_v32 = vld [vmem:[%s1300_s1 + $0x68] sm:$0xff] (!%p138_p2)  }
   0xb   : > { %929 = vmatpush3.bf16.msra.mxu0 (!%p138_p2), %v1013_v3  ;;  %v1028_v33 = vld [vmem:[%s1300_s1 + $0x98] sm:$0xff] (!%p138_p2)   ;;  %v1029_v35 = vld [vmem:[%s1300_s1 + $0x28] sm:$0xff] (!%p138_p2)   ;;  %v1030_v36 = vld [vmem:[%s1300_s1 + $0xe0] sm:$0xff] (!%p138_p2)  }
   0xc   : > { %930 = vmatprep.subr.bf16.mxu0 (!%p138_p2), %v1015_v5  ;;  %v1031_v37 = vld [vmem:[%s1300_s1 + $0x70] sm:$0xff] (!%p138_p2)   ;;  %v1032_v38 = vld [vmem:[%s1300_s1 + $0xa0] sm:$0xff] (!%p138_p2)   ;;  %v1034_v40 = vld [vmem:[%s1300_s1 + $0xe8] sm:$0xff] (!%p138_p2)  }
   0xd   : > { %s1304_s13 = smov (!%p160_p3, %s854_s13), 1  ;;  %957 = vmatpush3.bf16.msra.mxu1 %v1020_v23  ;;  %v1033_v39 = vld [vmem:[%s1300_s1 + $0x30] sm:$0xff]   ;;  %v1035_v41 = vld [vmem:[%s1300_s1 + $0x78] sm:$0xff]   ;;  %v1036_v42 = vld [vmem:[%s1300_s1 + $0xa8] sm:$0xff]  }
   0xe   : > { %s1000_s20 = smul.u32 96, %s1304_s13  ;;  %958 = vmatprep.subr.bf16.mxu1 %v1022_v25  ;;  %v1037_v43 = vld [vmem:[%s1300_s1 + $0x38] sm:$0xff]   ;;  %v1038_v44 = vld [vmem:[%s1300_s1 + $0xf0] sm:$0xff]   ;;  %v1042_v48 = vld [vmem:[%s1300_s1 + $0x100] sm:$0xff]  }
   0xf   : > { %931 = vmatpush3.bf16.msra.mxu0 %v1017_v20  ;;  %v1039_v45 = vld [vmem:[%s1300_s1 + $0xb0] sm:$0xff]   ;;  %v1040_v46 = vld [vmem:[%s1300_s1 + $0xf8] sm:$0xff]   ;;  %v1043_v1 = vld [vmem:[%s1300_s1 + $0x108] sm:$0xff]  }
  0x10   : > { %s1104_s27 = scalar_lea.vmem %s1299_s0, %s1000_s20  ;;  %932 = vmatprep.subr.bf16.mxu0 %v1019_v22  ;;  %v1041_v47 = vld [vmem:[%s1300_s1 + $0xb8] sm:$0xff]   ;;  %s860_s20 = sshll.u32 %s1304_s13, 3 }
  0x11   : > { %v861_v6 = vld [vmem:[%s1104_s27 + $0x10] sm:$0xff]  ;;  %v179_v7 = vld [vmem:[%s1104_s27 + $0x1] sm:$0xff]  ;;  %959 = vmatpush3.bf16.msra.mxu1 %v1024_v27  ;;  %s168_s23 = scalar_lea.vmem %s1302_s3, %s860_s20 }
  0x12   : > { %v862_v8 = vld [vmem:[%s1104_s27 + $0x20] sm:$0xff]  ;;  %221 = vrot.lane.b32.xlu0 %v861_v6, %s1054_s30  ;;  %187 = vrot.lane.b32.xlu1 %v179_v7, %s1054_s30  ;;  %v180_v9 = vld [vmem:[%s1104_s27 + $0x11] sm:$0xff]  ;;  %176 = vst.msk [vmem:[#allocation2 + $0x28] sm:$0xff] %vm174_vm0, %v861_v6 }
  0x13   : > { %v1116_v10 = vld [vmem:[%s1104_s27 + $0x21] sm:$0xff]  ;;  %274 = vst.msk [vmem:[#allocation2 + $0x18] sm:$0xff] %vm174_vm0, %v862_v8  ;;  %177 = vst.msk [vmem:[#allocation2 + $0x50] sm:$0xff] %vm174_vm0, %v862_v8  ;;  %v878_v11 = vld [vmem:[%s1104_s27 + $0x31] sm:$0xff]  ;;  %933 = vmatpush3.bf16.msra.mxu0 %v1021_v24  ;;  %960 = vmatprep.subr.bf16.mxu1 %v1026_v31 }
  0x14   : > { %v869_v12 = vld [vmem:[%s1104_s27 + $0x12] sm:$0xff]  ;;  %v870_v13 = vld [vmem:[%s1104_s27 + $0x22] sm:$0xff]  ;;  %241 = vst.msk [vmem:[#allocation2 + $0x10] sm:$0xff] %vm174_vm0, %v180_v9  ;;  %242 = vst.msk [vmem:[#allocation2 + $0x38] sm:$0xff] %vm174_vm0, %v1116_v10  ;;  %934 = vmatprep.subr.bf16.mxu0 %v1023_v26 }
  0x15   : > { %v863_v14 = vld [vmem:[%s1104_s27 + $0x30] sm:$0xff]  ;;  %v864_v15 = vld [vmem:[%s1104_s27 + $0x40] sm:$0xff]  ;;  %209 = vst.msk [vmem:[#allocation2 + $0x30] sm:$0xff] %vm174_vm0, %v869_v12  ;;  %210 = vst.msk [vmem:[#allocation2 + $0x58] sm:$0xff] %vm174_vm0, %v870_v13  ;;  %961 = vmatpush3.bf16.msra.mxu1 %v1028_v33 }
  0x16   : > { %v1130_v16 = vld [vmem:[%s1104_s27 + $0x41] sm:$0xff]  ;;  %243 = vst.msk [vmem:[#allocation2 + $0x60] sm:$0xff] %vm174_vm0, %v878_v11  ;;  %306 = vst.msk [vmem:[#allocation2 + $0x20] sm:$0xff] %vm174_vm0, %v870_v13  ;;  %v1137_v17 = vld [vmem:[%s1104_s27 + $0x32] sm:$0xff]  ;;  %223 = vrot.lane.b32.xlu0 %v862_v8, %s1054_s30  ;;  %189 = vrot.lane.b32.xlu1 %v180_v9, %s1054_s30 }
  0x17   : > { %v1140_v18 = vld [vmem:[%s1104_s27 + $0x42] sm:$0xff]  ;;  %275 = vst.msk [vmem:[#allocation2 + $0x40] sm:$0xff] %vm174_vm0, %v863_v14  ;;  %178 = vst.msk [vmem:[#allocation2 + $0x78] sm:$0xff] %vm174_vm0, %v863_v14  ;;  %935 = vmatpush3.bf16.msra.mxu0 %v1025_v30  ;;  %v880_v34 = vld [vmem:[%s1104_s27 + $0x51] sm:$0xff]  ;;  %962 = vmatprep.subr.bf16.mxu1 %v1030_v36 }
  0x18   : > { %276 = vst.msk [vmem:[#allocation2 + $0x68] sm:$0xff] %vm174_vm0, %v864_v15  ;;  %244 = vst.msk [vmem:[#allocation2 + $0x88] sm:$0xff] %vm174_vm0, %v1130_v16  ;;  %v204_v28 = vld [vmem:[%s1104_s27 + $0x2] sm:$0xff]  ;;  %936 = vmatprep.subr.bf16.mxu0 %v1027_v32  ;;  %v876_v49 = vld [vmem:[%s1104_s27 + $0x50] sm:$0xff] }
  0x19   : > { %211 = vst.msk [vmem:[#allocation2 + $0x80] sm:$0xff] %vm174_vm0, %v1137_v17  ;;  %307 = vst.msk [vmem:[#allocation2 + $0x48] sm:$0xff] %vm174_vm0, %v1137_v17  ;;  %v170_v29 = vld [vmem:[%s1104_s27] sm:$0xff]  ;;  %963 = vmatpush3.bf16.msra.mxu1 %v1032_v38  ;;  %v884_v50 = vld [vmem:[%s1104_s27 + $0x52] sm:$0xff] }
  0x1a   : > { %308 = vst.msk [vmem:[#allocation2 + $0x70] sm:$0xff] %vm174_vm0, %v1140_v18  ;;  %286 = vrot.lane.b32.xlu0 %v1116_v10, %s1054_s30  ;;  %288 = vrot.lane.b32.xlu1 %v878_v11, %s1054_s30  ;;  %208 = vst.msk [vmem:[#allocation2 + $0x8] sm:$0xff] %vm174_vm0, %v204_v28  ;;  %v1044_v7 = vld [vmem:[%s1300_s1 + $0x110] sm:$0xff]  }
  0x1b   : > { %175 = vst.msk [vmem:[#allocation2] sm:$0xff] %vm174_vm0, %v170_v29  ;;  %937 = vmatpush3.bf16.msra.mxu0 %v1029_v35  ;;  %964 = vmatprep.subr.bf16.mxu1 %v1034_v40  ;;  %277 = vst.msk [vmem:[#allocation2 + $0x90] sm:$0xff] %vm174_vm0, %v876_v49 }
  0x1c   : > { %938 = vmatprep.subr.bf16.mxu0 %v1031_v37  ;;  %309 = vst.msk [vmem:[#allocation2 + $0x98] sm:$0xff] %vm174_vm0, %v884_v50 }
  0x1d   : > { %965 = vmatpush3.bf16.msra.mxu1 %v1036_v42  ;;  %v314_v19 = vld [vmem:[#allocation2 + $0x20] sm:$0xff] }
  0x1e   : > { %253 = vrot.lane.b32.xlu0 %v869_v12, %s1054_s30  ;;  %255 = vrot.lane.b32.xlu1 %v870_v13, %s1054_s30  ;;  %v1045_v13 = vld [vmem:[%s1300_s1 + $0x118] sm:$0xff]   ;;  %v885_v42 = vld [vmem:[%s1301_s2] ss:$0 sm:$0xff] }
  0x1f   : > { %939 = vmatpush3.bf16.msra.mxu0 %v1033_v39  ;;  %966 = vmatprep.subr.bf16.mxu1 %v1038_v44 }
  0x20   : > { %940 = vmatprep.subr.bf16.mxu0 %v1035_v41  ;;  %v319_v20 = vld [vmem:[#allocation2 + $0x48] sm:$0xff] }
  0x21   : > { %967 = vmatpush3.bf16.msra.mxu1 %v1039_v45  ;;  %v334_v25 = vpack.c.bf16 %v319_v20, %v314_v19  ;;  %v324_v27 = vld [vmem:[#allocation2 + $0x70] sm:$0xff] }
  0x22   : > { %225 = vrot.lane.b32.xlu0 %v863_v14, %s1054_s30  ;;  %227 = vrot.lane.b32.xlu1 %v864_v15, %s1054_s30 }
  0x23   : > { %941 = vmatpush3.bf16.msra.mxu0 %v1037_v43  ;;  %968 = vmatprep.subr.bf16.mxu1 %v1040_v46  ;;  %v329_v30 = vld [vmem:[#allocation2 + $0x98] sm:$0xff] }
  0x24   : > { %988 = vmatprep.subr.bf16.mxu0 %v1042_v48  ;;  %v339_v32 = vpack.c.bf16 %v329_v30, %v324_v27 }
  0x25   : > { %969 = vmatpush3.bf16.msra.mxu1 %v1041_v47 }
  0x26   : > { %191 = vrot.lane.b32.xlu0 %v1116_v10, %s1054_s30  ;;  %193 = vrot.lane.b32.xlu1 %v878_v11, %s1054_s30 }
  0x2a   : > { %290 = vrot.lane.b32.xlu0 %v1130_v16, %s1054_s30  ;;  %292 = vrot.lane.b32.xlu1 %v880_v34, %s1054_s30 }
  0x2e   : > { %257 = vrot.lane.b32.xlu0 %v1137_v17, %s1054_s30  ;;  %259 = vrot.lane.b32.xlu1 %v1140_v18, %s1054_s30 }
  0x84   : > { %v222_v51 = vpop.permute.xlu0 %221  ;;  %v188_v52 = vpop.permute.xlu1 %187 }
  0x85   : > { %233 = vst.msk [vmem:[#allocation2 + $0x8] sm:$0xff] %vm199_vm1, %v222_v51  ;;  %200 = vst.msk [vmem:[#allocation2] sm:$0xff] %vm199_vm1, %v188_v52 }
  0x88   : > { %v224_v53 = vpop.permute.xlu0 %223  ;;  %v190_v54 = vpop.permute.xlu1 %189 }
  0x89   : > { %234 = vst.msk [vmem:[#allocation2 + $0x30] sm:$0xff] %vm199_vm1, %v224_v53  ;;  %201 = vst.msk [vmem:[#allocation2 + $0x28] sm:$0xff] %vm199_vm1, %v190_v54 }
  0x8c   : > { %v287_v55 = vpop.permute.xlu0 %286  ;;  %v289_v56 = vpop.permute.xlu1 %288  ;;  %v311_v57 = vld [vmem:[#allocation2 + $0x8] sm:$0xff]  ;;  %v310_v61 = vld [vmem:[#allocation2] sm:$0xff] }
  0x8d   : > { %298 = vst.msk [vmem:[#allocation2 + $0x18] sm:$0xff] %vm199_vm1, %v287_v55  ;;  %299 = vst.msk [vmem:[#allocation2 + $0x40] sm:$0xff] %vm199_vm1, %v289_v56 }
  0x90   : > { %v254_v58 = vpop.permute.xlu0 %253  ;;  %v256_v59 = vpop.permute.xlu1 %255  ;;  %v316_v60 = vld [vmem:[#allocation2 + $0x30] sm:$0xff]  ;;  %v315_v62 = vld [vmem:[#allocation2 + $0x28] sm:$0xff] }
  0x91   : > { %265 = vst.msk [vmem:[#allocation2 + $0x10] sm:$0xff] %vm199_vm1, %v254_v58  ;;  %266 = vst.msk [vmem:[#allocation2 + $0x38] sm:$0xff] %vm199_vm1, %v256_v59  ;;  %v331_v63 = vpack.c.bf16 %v316_v60, %v311_v57  ;;  %v330_v0 = vpack.c.bf16 %v315_v62, %v310_v61 }
  0x93   : > { %673 = vmatprep.mubr.bf16.mxu0 %v331_v63 }
  0x94   : > { %v226_v2 = vpop.permute.xlu0 %225  ;;  %v228_v3 = vpop.permute.xlu1 %227  ;;  %674 = vmatmul.mubr.bf16.vlgmr.msra.gmra.mrb[0].mxu0 %v330_v0  ;;  %v313_v4 = vld [vmem:[#allocation2 + $0x18] sm:$0xff]  ;;  %v318_v5 = vld [vmem:[#allocation2 + $0x40] sm:$0xff] }
  0x95   : > { %235 = vst.msk [vmem:[#allocation2 + $0x58] sm:$0xff] %vm199_vm1, %v226_v2  ;;  %236 = vst.msk [vmem:[#allocation2 + $0x80] sm:$0xff] %vm199_vm1, %v228_v3  ;;  %v333_v6 = vpack.c.bf16 %v318_v5, %v313_v4  ;;  %989 = vmatpush3.bf16.msra.mxu0 %v1042_v48 }
  0x96   : > { %990 = vmatprep.subr.bf16.mxu0 %v1043_v1 }
  0x97   : > { %722 = vmatprep.mubr.bf16.mxu1 %v333_v6 }
  0x98   : > { %v192_v8 = vpop.permute.xlu0 %191  ;;  %v194_v9 = vpop.permute.xlu1 %193  ;;  %v312_v10 = vld [vmem:[#allocation2 + $0x10] sm:$0xff]  ;;  %v317_v11 = vld [vmem:[#allocation2 + $0x38] sm:$0xff] }
  0x99   : > { %202 = vst.msk [vmem:[#allocation2 + $0x50] sm:$0xff] %vm199_vm1, %v192_v8  ;;  %203 = vst.msk [vmem:[#allocation2 + $0x78] sm:$0xff] %vm199_vm1, %v194_v9  ;;  %v332_v12 = vpack.c.bf16 %v317_v11, %v312_v10  ;;  %991 = vmatpush3.bf16.msra.mxu0 %v1043_v1 }
  0x9a   : > { %992 = vmatprep.subr.bf16.mxu0 %v1044_v7 }
  0x9b   : > { %723 = vmatmul.mubr.bf16.vlgmr.msra.gmra.mrb[0].mxu1 %v332_v12 }
  0x9c   : > { %v291_v14 = vpop.permute.xlu0 %290  ;;  %v293_v15 = vpop.permute.xlu1 %292  ;;  %v321_v16 = vld [vmem:[#allocation2 + $0x58] sm:$0xff]  ;;  %v326_v17 = vld [vmem:[#allocation2 + $0x80] sm:$0xff] }
  0x9d   : > { %300 = vst.msk [vmem:[#allocation2 + $0x68] sm:$0xff] %vm199_vm1, %v291_v14  ;;  %301 = vst.msk [vmem:[#allocation2 + $0x90] sm:$0xff] %vm199_vm1, %v293_v15  ;;  %v336_v18 = vpack.c.bf16 %v326_v17, %v321_v16  ;;  %993 = vmatpush3.bf16.msra.mxu0 %v1044_v7 }
  0x9e   : > { %994 = vmatprep.subr.bf16.mxu0 %v1045_v13 }
  0x9f   : > { %681 = vmatprep.mubr.bf16.mxu0 %v336_v18 }
  0xa0   : > { %v258_v21 = vpop.permute.xlu0 %257  ;;  %v260_v22 = vpop.permute.xlu1 %259  ;;  %v320_v23 = vld [vmem:[#allocation2 + $0x50] sm:$0xff]  ;;  %v325_v24 = vld [vmem:[#allocation2 + $0x78] sm:$0xff] }
  0xa1   : > { %267 = vst.msk [vmem:[#allocation2 + $0x60] sm:$0xff] %vm199_vm1, %v258_v21  ;;  %268 = vst.msk [vmem:[#allocation2 + $0x88] sm:$0xff] %vm199_vm1, %v260_v22  ;;  %v335_v26 = vpack.c.bf16 %v325_v24, %v320_v23  ;;  %995 = vmatpush3.bf16.msra.mxu0 %v1045_v13 }
  0xa3   : > { %682 = vmatmul.mubr.bf16.gmra.mrb[4].mxu0 %v335_v26 }
  0xa4   : > { %v323_v28 = vld [vmem:[#allocation2 + $0x68] sm:$0xff]  ;;  %v328_v29 = vld [vmem:[#allocation2 + $0x90] sm:$0xff]  ;;  %996 = vmatprep.mubr.msk.bf16.mxu0 %vm174_vm0, %v334_v25 }
  0xa5   : > { %v338_v31 = vpack.c.bf16 %v328_v29, %v323_v28 }
  0xa7   : > { %730 = vmatprep.mubr.bf16.mxu1 %v338_v31 }
  0xa8   : > { %v322_v33 = vld [vmem:[#allocation2 + $0x60] sm:$0xff]  ;;  %v327_v34 = vld [vmem:[#allocation2 + $0x88] sm:$0xff] }
  0xa9   : > { %v337_v35 = vpack.c.bf16 %v327_v34, %v322_v33 }
  0xab   : > { %731 = vmatmul.mubr.bf16.gmra.mrb[4].mxu1 %v337_v35  ;;  %997 = vmatmul.mubr.msk.bf16.vlgmr.msra.gmra.mrb[8].mxu0 %vm174_vm0, %v339_v32 }
 0x167   : > { %v942_v36 = vpop.f32.mrb[0].mxu0 }
 0x168   : > { %v943_v37 = vpop.f32.mrb[1].mxu0 }
 0x169   : > { %v944_v38 = vadd.f32 %v943_v37, %v942_v36  ;;  %v945_v39 = vpop.f32.mrb[2].mxu0 }
 0x16a   : > { %v946_v40 = vpop.f32.mrb[3].mxu0 }
 0x16b   : > { %v947_v41 = vadd.f32 %v946_v40, %v945_v39  ;;  %v676_v45 = vadd.f32 %v944_v38, %v885_v42 }
 0x16d   : > { %v679_v49 = vadd.f32 %v947_v41, %v885_v42 }
 0x16e   : > { %v970_v43 = vpop.f32.mrb[0].mxu1 }
 0x16f   : > { %v971_v44 = vpop.f32.mrb[1].mxu1 }
 0x170   : > { %v972_v46 = vadd.f32 %v971_v44, %v970_v43  ;;  %v973_v47 = vpop.f32.mrb[2].mxu1 }
 0x171   : > { %v974_v48 = vpop.f32.mrb[3].mxu1 }
 0x172   : > { %v975_v50 = vadd.f32 %v974_v48, %v973_v47  ;;  %v725_v51 = vadd.f32 %v972_v46, %v676_v45 }
 0x174   : > { %v728_v52 = vadd.f32 %v975_v50, %v679_v49 }
 0x176   : > { %v948_v53 = vpop.f32.mrb[4].mxu0 }
 0x177   : > { %v949_v54 = vpop.f32.mrb[5].mxu0 }
 0x178   : > { %v950_v55 = vadd.f32 %v949_v54, %v948_v53  ;;  %v951_v56 = vpop.f32.mrb[6].mxu0 }
 0x179   : > { %v952_v57 = vpop.f32.mrb[7].mxu0 }
 0x17a   : > { %v953_v58 = vadd.f32 %v952_v57, %v951_v56  ;;  %v684_v63 = vadd.f32 %v950_v55, %v885_v42 }
 0x17c   : > { %v687_v6 = vadd.f32 %v953_v58, %v885_v42 }
 0x17e   : > { %v976_v59 = vpop.f32.mrb[4].mxu1  ;;  %v998_v60 = vpop.f32.mrb[8].mxu0 }
 0x17f   : > { %v977_v61 = vpop.f32.mrb[5].mxu1  ;;  %v773_v62 = vpop.f32.mrb[9].mxu0 }
 0x180   : > { %v978_v0 = vadd.f32 %v977_v61, %v976_v59  ;;  %v774_v1 = vadd.f32 %v773_v62, %v725_v51  ;;  %v979_v2 = vpop.f32.mrb[6].mxu1  ;;  %v999_v3 = vpop.f32.mrb[10].mxu0 }
 0x181   : > { %v980_v4 = vpop.f32.mrb[7].mxu1  ;;  %v776_v5 = vpop.f32.mrb[11].mxu0 }
 0x182   : > { %v733_v7 = vadd.f32 %v978_v0, %v684_v63  ;;  %v981_v8 = vadd.f32 %v980_v4, %v979_v2  ;;  %v777_v9 = vadd.f32 %v776_v5, %v728_v52  ;;  %v788_v11 = vmax.f32 %v774_v1, 0.0 }
 0x184   : > { %v782_v10 = vadd.f32 %v998_v60, %v733_v7  ;;  %v736_v12 = vadd.f32 %v981_v8, %v687_v6  ;;  %v789_v13 = vmax.f32 %v777_v9, 0.0 }
 0x186   : > { %v785_v14 = vadd.f32 %v999_v3, %v736_v12  ;;  %v792_v15 = vmax.f32 %v788_v11, %v789_v13  ;;  %v790_v16 = vmax.f32 %v782_v10, 0.0 }
 0x188   : > { %v791_v17 = vmax.f32 %v785_v14, 0.0  ;;  %794 = vst [vmem:[#allocation3] sm:$0xff] %v792_v15 }
 0x18a   : > { %v793_v18 = vmax.f32 %v790_v16, %v791_v17 }
 0x18c   : > { %795 = vst [vmem:[#allocation3 + $0x8] sm:$0xff] %v793_v18 }
 0x193   : > { %v796_v19 = vld [vmem:[#allocation3] ss:$2 sm:$0xff]  ;;  %v798_v20 = vld [vmem:[#allocation3 + $0x1] ss:$2 sm:$0xff] }
 0x194   : > { %v799_v21 = vmax.f32 %v796_v19, %v798_v20 }
 0x196   : > { %800 = vst [vmem:[%s168_s23] sm:$0xff] %v799_v21 }
 0x197 PF: > { %s13_s12 = sadd.s32 1, %s1052_s12  }
 0x198   : > { %p10_p4 = scmp.ge.s32.totalorder %s13_s12, 4  }
 0x19a   :  { %12 = sbr.rel (!%p10_p4) target bundleno = 1 (0x1), region = 65 }

// kernel: convformer_forward.7
= control target key start
LH: loop header
LB: loop body
LE: loop exit
PB: predicated region body
PF: predicated region fallthrough
CT: control target
= control target key end

     0   :  { %s1143_s12 = smov 0   ;;  %s1493_s0 = inlined_call_operand.vmem [shape: f32[2,10,10,32], index: 0, kind: input, shape index: {}]   ;;  %s1494_s1 = inlined_call_operand.vmem [shape: bf16[288,64], index: 1, kind: input, shape index: {}]   ;;  %s1495_s2 = inlined_call_operand.vmem [shape: f32[1,64], index: 2, kind: input, shape index: {}]   ;;  %s1496_s3 = inlined_call_operand.vmem [shape: f32[2,16,64], index: 3, kind: output, shape index: {}]  }
   0x1 LB: > { %s926_s13 = sadd.s32 4294967295, %s1118_s12   ;;  %p930_p0 = scmp.ge.s32.totalorder %s1118_s12, 1  ;;  %s1118_s12 = sphi %s1143_s12, %s13_s12  }
   0x2   : > { %p137_p1 = scmp.lt.s32.totalorder %s1118_s12, 3 }
   0x4   : > { %p138_p2 = pnand %p930_p0, %p137_p1 }
   0x5   : > { %p161_p3 = scmp.lt.s32.totalorder (!%p138_p2), %s926_s13, 1  ;;  %v1094_v0 = vld [vmem:[%s1494_s1 + $0x40] sm:$0xff] (!%p138_p2)   ;;  %v1096_v2 = vld [vmem:[%s1494_s1 + $0x48] sm:$0xff] (!%p138_p2)   ;;  %vm180_vm0 = vcmask (!%p138_p2), 261120   ;;  %v1098_v4 = vld [vmem:[%s1494_s1 + $0x50] sm:$0xff] (!%p138_p2)   ;;  %s1120_s28 = smov (!%p138_p2), 32  }
   0x6   : > { %141 = sbr.rel (%p138_p2) target bundleno = 471 (0x1d7), region = 32  ;;  %v1095_v1 = vld [vmem:[%s1494_s1] sm:$0xff] (!%p138_p2)   ;;  %1008 = vmatprep.subr.bf16.mxu0 (!%p138_p2), %v1094_v0  ;;  %1066 = vmatprep.subr.bf16.mxu1 (!%p138_p2), %v1094_v0  ;;  %v1097_v3 = vld [vmem:[%s1494_s1 + $0x8] sm:$0xff] (!%p138_p2)   ;;  %v1099_v12 = vld [vmem:[%s1494_s1 + $0x10] sm:$0xff] (!%p138_p2)   ;;  %s1121_s4 = smov (!%p138_p2), 64   ;;  %vm229_vm1 = vcmask (!%p138_p2), 523520  }
   0x7   : > { %1009 = vmatpush3.bf16.msra.mxu0 (!%p138_p2), %v1095_v1  ;;  %1074 = vmatpush3.bf16.msra.mxu1 (!%p138_p2), %v1095_v1  ;;  %v1100_v32 = vld [vmem:[%s1494_s1 + $0x58] sm:$0xff] (!%p138_p2)   ;;  %v1102_v34 = vld [vmem:[%s1494_s1 + $0x60] sm:$0xff] (!%p138_p2)   ;;  %v1104_v36 = vld [vmem:[%s1494_s1 + $0x68] sm:$0xff] (!%p138_p2)   ;;  %s1122_s17 = smov (!%p138_p2), 96   ;;  %vm278_vm2 = vcmask (!%p138_p2), 785920   ;;  %vm328_vm3 = vcmask (!%p138_p2), 1048320  }
   0x8   : > { %1010 = vmatprep.subr.bf16.mxu0 (!%p138_p2), %v1096_v2  ;;  %1067 = vmatprep.subr.bf16.mxu1 (!%p138_p2), %v1096_v2  ;;  %v1101_v33 = vld [vmem:[%s1494_s1 + $0x18] sm:$0xff] (!%p138_p2)   ;;  %v1103_v35 = vld [vmem:[%s1494_s1 + $0x20] sm:$0xff] (!%p138_p2)   ;;  %v1105_v37 = vld [vmem:[%s1494_s1 + $0x28] sm:$0xff] (!%p138_p2)   ;;  %vm855_vm4 = vcmask (!%p138_p2), 523264  }
   0x9   : > { %v1106_v38 = vld [vmem:[%s1494_s1 + $0x70] sm:$0xff] (!%p138_p2)   ;;  %v1108_v40 = vld [vmem:[%s1494_s1 + $0x78] sm:$0xff] (!%p138_p2)   ;;  %v1362_v45 = vld [vmem:[%s1494_s1 + $0x80] sm:$0xff] (!%p138_p2)  }
   0xa   : > { %v1107_v39 = vld [vmem:[%s1494_s1 + $0x30] sm:$0xff] (!%p138_p2)   ;;  %v1109_v41 = vld [vmem:[%s1494_s1 + $0x38] sm:$0xff] (!%p138_p2)  }
   0xb   : > { %1011 = vmatpush3.bf16.msra.mxu0 (!%p138_p2), %v1097_v3  ;;  %1075 = vmatpush3.bf16.msra.mxu1 (!%p138_p2), %v1097_v3 }
   0xc   : > { %1012 = vmatprep.subr.bf16.mxu0 (!%p138_p2), %v1098_v4  ;;  %1068 = vmatprep.subr.bf16.mxu1 (!%p138_p2), %v1098_v4 }
   0xd   : > { %s1498_s13 = smov (!%p161_p3, %s926_s13), 1 }
   0xe   : > { %s1082_s20 = smul.u32 160, %s1498_s13  ;;  %s1007_s7 = sshll.u32 %s1498_s13, 4 }
   0xf   : > { %1013 = vmatpush3.bf16.msra.mxu0 %v1099_v12  ;;  %1076 = vmatpush3.bf16.msra.mxu1 %v1099_v12  ;;  %s170_s10 = scalar_lea.vmem %s1496_s3, %s1007_s7 }
  0x10   : > { %s1169_s25 = scalar_lea.vmem %s1493_s0, %s1082_s20  ;;  %1014 = vmatprep.subr.bf16.mxu0 %v1100_v32  ;;  %1069 = vmatprep.subr.bf16.mxu1 %v1100_v32 }
  0x11   : > { %v1175_v5 = vld [vmem:[%s1169_s25 + $0x12] sm:$0xff]  ;;  %v189_v6 = vld [vmem:[%s1169_s25 + $0x1] sm:$0xff] }
  0x12   : > { %v1179_v7 = vld [vmem:[%s1169_s25 + $0x22] sm:$0xff]  ;;  %369 = vrot.lane.b32.xlu0 %v1175_v5, %s1120_s28  ;;  %205 = vrot.lane.b32.xlu1 %v189_v6, %s1120_s28  ;;  %v190_v8 = vld [vmem:[%s1169_s25 + $0x11] sm:$0xff] }
  0x13   : > { %v1186_v9 = vld [vmem:[%s1169_s25 + $0x20] sm:$0xff]  ;;  %506 = vst.msk [vmem:[#allocation2 + $0x10] sm:$0xff] %vm180_vm0, %v1179_v7  ;;  %v1191_v10 = vld [vmem:[%s1169_s25 + $0x30] sm:$0xff]  ;;  %345 = vst.msk [vmem:[#allocation2 + $0x8] sm:$0xff] %vm180_vm0, %v190_v8  ;;  %1015 = vmatpush3.bf16.msra.mxu0 %v1101_v33  ;;  %1077 = vmatpush3.bf16.msra.mxu1 %v1101_v33 }
  0x14   : > { %v1194_v11 = vld [vmem:[%s1169_s25 + $0x21] sm:$0xff]  ;;  %183 = vst.msk [vmem:[#allocation2 + $0x30] sm:$0xff] %vm180_vm0, %v1186_v9  ;;  %v1203_v13 = vld [vmem:[%s1169_s25 + $0x31] sm:$0xff]  ;;  %184 = vst.msk [vmem:[#allocation2 + $0x48] sm:$0xff] %vm180_vm0, %v1191_v10  ;;  %1016 = vmatprep.subr.bf16.mxu0 %v1102_v34  ;;  %1070 = vmatprep.subr.bf16.mxu1 %v1102_v34 }
  0x15   : > { %v1206_v14 = vld [vmem:[%s1169_s25 + $0x10] sm:$0xff]  ;;  %346 = vst.msk [vmem:[#allocation2 + $0x20] sm:$0xff] %vm180_vm0, %v1194_v11  ;;  %v1216_v16 = vld [vmem:[%s1169_s25 + $0x82] sm:$0xff]  ;;  %347 = vst.msk [vmem:[#allocation2 + $0x38] sm:$0xff] %vm180_vm0, %v1203_v13 }
  0x16   : > { %v1209_v15 = vld [vmem:[%s1169_s25 + $0x72] sm:$0xff]  ;;  %v1219_v17 = vld [vmem:[%s1169_s25 + $0x61] sm:$0xff]  ;;  %182 = vst.msk [vmem:[#allocation2 + $0x18] sm:$0xff] %vm180_vm0, %v1206_v14  ;;  %371 = vrot.lane.b32.xlu0 %v1179_v7, %s1120_s28  ;;  %207 = vrot.lane.b32.xlu1 %v190_v8, %s1120_s28  ;;  %512 = vst.msk [vmem:[#allocation2 + $0xa0] sm:$0xff] %vm180_vm0, %v1216_v16 }
  0x17   : > { %v1222_v18 = vld [vmem:[%s1169_s25 + $0x71] sm:$0xff]  ;;  %511 = vst.msk [vmem:[#allocation2 + $0x88] sm:$0xff] %vm180_vm0, %v1209_v15  ;;  %350 = vst.msk [vmem:[#allocation2 + $0x80] sm:$0xff] %vm180_vm0, %v1219_v17  ;;  %v1240_v19 = vld [vmem:[%s1169_s25 + $0x62] sm:$0xff]  ;;  %1017 = vmatpush3.bf16.msra.mxu0 %v1103_v35  ;;  %1078 = vmatpush3.bf16.msra.mxu1 %v1103_v35 }
  0x18   : > { %351 = vst.msk [vmem:[#allocation2 + $0x98] sm:$0xff] %vm180_vm0, %v1222_v18  ;;  %v1243_v20 = vld [vmem:[%s1169_s25 + $0x81] sm:$0xff]  ;;  %v1246_v21 = vld [vmem:[%s1169_s25 + $0x70] sm:$0xff]  ;;  %510 = vst.msk [vmem:[#allocation2 + $0x70] sm:$0xff] %vm180_vm0, %v1240_v19  ;;  %1018 = vmatprep.subr.bf16.mxu0 %v1104_v36  ;;  %1071 = vmatprep.subr.bf16.mxu1 %v1104_v36 }
  0x19   : > { %v1249_v22 = vld [vmem:[%s1169_s25 + $0x32] sm:$0xff]  ;;  %v1252_v23 = vld [vmem:[%s1169_s25 + $0x42] sm:$0xff]  ;;  %352 = vst.msk [vmem:[#allocation2 + $0xb0] sm:$0xff] %vm180_vm0, %v1243_v20  ;;  %188 = vst.msk [vmem:[#allocation2 + $0xa8] sm:$0xff] %vm180_vm0, %v1246_v21 }
  0x1a   : > { %v238_v24 = vld [vmem:[%s1169_s25 + $0x2] sm:$0xff]  ;;  %v1263_v26 = vld [vmem:[%s1169_s25 + $0x50] sm:$0xff]  ;;  %507 = vst.msk [vmem:[#allocation2 + $0x28] sm:$0xff] %vm180_vm0, %v1249_v22  ;;  %508 = vst.msk [vmem:[#allocation2 + $0x40] sm:$0xff] %vm180_vm0, %v1252_v23  ;;  %418 = vrot.lane.b32.xlu0 %v1186_v9, %s1121_s4  ;;  %420 = vrot.lane.b32.xlu1 %v1191_v10, %s1121_s4 }
  0x1b   : > { %v1260_v25 = vld [vmem:[%s1169_s25 + $0x40] sm:$0xff]  ;;  %v1279_v28 = vld [vmem:[%s1169_s25 + $0x51] sm:$0xff]  ;;  %186 = vst.msk [vmem:[#allocation2 + $0x78] sm:$0xff] %vm180_vm0, %v1263_v26  ;;  %1019 = vmatpush3.bf16.msra.mxu0 %v1105_v37  ;;  %1079 = vmatpush3.bf16.msra.mxu1 %v1105_v37 }
  0x1c   : > { %v1266_v27 = vld [vmem:[%s1169_s25 + $0x41] sm:$0xff]  ;;  %v1282_v29 = vld [vmem:[%s1169_s25 + $0x52] sm:$0xff]  ;;  %185 = vst.msk [vmem:[#allocation2 + $0x60] sm:$0xff] %vm180_vm0, %v1260_v25  ;;  %349 = vst.msk [vmem:[#allocation2 + $0x68] sm:$0xff] %vm180_vm0, %v1279_v28  ;;  %1020 = vmatprep.subr.bf16.mxu0 %v1106_v38  ;;  %1072 = vmatprep.subr.bf16.mxu1 %v1106_v38 }
  0x1d   : > { %348 = vst.msk [vmem:[#allocation2 + $0x50] sm:$0xff] %vm180_vm0, %v1266_v27  ;;  %v1291_v30 = vld [vmem:[%s1169_s25 + $0x60] sm:$0xff]  ;;  %509 = vst.msk [vmem:[#allocation2 + $0x58] sm:$0xff] %vm180_vm0, %v1282_v29  ;;  %v965_v43 = vld [vmem:[%s1169_s25 + $0x90] sm:$0xff] }
  0x1e   : > { %v172_v31 = vld [vmem:[%s1169_s25] sm:$0xff]  ;;  %187 = vst.msk [vmem:[#allocation2 + $0x90] sm:$0xff] %vm180_vm0, %v1291_v30  ;;  %254 = vrot.lane.b32.xlu0 %v238_v24, %s1121_s4  ;;  %256 = vrot.lane.b32.xlu1 %v1175_v5, %s1121_s4  ;;  %v973_v44 = vld [vmem:[%s1169_s25 + $0x91] sm:$0xff]  ;;  %v531_v32 = vld [vmem:[#allocation2 + $0x88] sm:$0xff] }
  0x1f   : > { %181 = vst.msk [vmem:[#allocation2] sm:$0xff] %vm180_vm0, %v172_v31  ;;  %1021 = vmatpush3.bf16.msra.mxu0 %v1107_v39  ;;  %1080 = vmatpush3.bf16.msra.mxu1 %v1107_v39  ;;  %v964_v42 = vld [vmem:[%s1169_s25 + $0x80] sm:$0xff]  ;;  %v981_v46 = vld [vmem:[%s1169_s25 + $0x92] sm:$0xff] }
  0x20   : > { %1022 = vmatprep.subr.bf16.mxu0 %v1108_v40  ;;  %1073 = vmatprep.subr.bf16.mxu1 %v1108_v40  ;;  %513 = vst.msk [vmem:[#allocation2 + $0xb8] sm:$0xff] %vm180_vm0, %v981_v46  ;;  %v528_v31 = vld [vmem:[#allocation2 + $0x70] sm:$0xff]  ;;  %v534_v39 = vld [vmem:[#allocation2 + $0xa0] sm:$0xff] }
  0x21   : > { %v546_v36 = vpack.c.bf16 %v531_v32, %v528_v31 }
  0x22   : > { %466 = vrot.lane.b32.xlu0 %v1194_v11, %s1122_s17  ;;  %468 = vrot.lane.b32.xlu1 %v1203_v13, %s1122_s17 }
  0x23   : > { %1023 = vmatpush3.bf16.msra.mxu0 %v1109_v41  ;;  %1081 = vmatpush3.bf16.msra.mxu1 %v1109_v41 }
  0x24   : > { %1054 = vmatprep.subr.bf16.mxu1 %v1362_v45 }
  0x26   : > { %304 = vrot.lane.b32.xlu0 %v1206_v14, %s1122_s17  ;;  %306 = vrot.lane.b32.xlu1 %v1186_v9, %s1122_s17 }
  0x27   : > { %v537_v40 = vld [vmem:[#allocation2 + $0xb8] sm:$0xff] }
  0x28   : > { %v549_v41 = vpack.c.bf16 %v537_v40, %v534_v39 }
  0x2a   : > { %381 = vrot.lane.b32.xlu0 %v1209_v15, %s1120_s28  ;;  %383 = vrot.lane.b32.xlu1 %v1216_v16, %s1120_s28 }
  0x2e   : > { %217 = vrot.lane.b32.xlu0 %v1219_v17, %s1120_s28  ;;  %219 = vrot.lane.b32.xlu1 %v1222_v18, %s1120_s28 }
  0x32   : > { %430 = vrot.lane.b32.xlu0 %v964_v42, %s1121_s4  ;;  %432 = vrot.lane.b32.xlu1 %v965_v43, %s1121_s4 }
  0x36   : > { %266 = vrot.lane.b32.xlu0 %v1240_v19, %s1121_s4  ;;  %268 = vrot.lane.b32.xlu1 %v1209_v15, %s1121_s4 }
  0x3a   : > { %478 = vrot.lane.b32.xlu0 %v1243_v20, %s1122_s17  ;;  %480 = vrot.lane.b32.xlu1 %v973_v44, %s1122_s17 }
  0x3e   : > { %316 = vrot.lane.b32.xlu0 %v1246_v21, %s1122_s17  ;;  %318 = vrot.lane.b32.xlu1 %v964_v42, %s1122_s17 }
  0x42   : > { %373 = vrot.lane.b32.xlu0 %v1249_v22, %s1120_s28  ;;  %375 = vrot.lane.b32.xlu1 %v1252_v23, %s1120_s28 }
  0x46   : > { %209 = vrot.lane.b32.xlu0 %v1194_v11, %s1120_s28  ;;  %211 = vrot.lane.b32.xlu1 %v1203_v13, %s1120_s28 }
  0x4a   : > { %422 = vrot.lane.b32.xlu0 %v1260_v25, %s1121_s4  ;;  %424 = vrot.lane.b32.xlu1 %v1263_v26, %s1121_s4 }
  0x4e   : > { %258 = vrot.lane.b32.xlu0 %v1179_v7, %s1121_s4  ;;  %260 = vrot.lane.b32.xlu1 %v1249_v22, %s1121_s4 }
  0x52   : > { %470 = vrot.lane.b32.xlu0 %v1266_v27, %s1122_s17  ;;  %472 = vrot.lane.b32.xlu1 %v1279_v28, %s1122_s17 }
  0x56   : > { %308 = vrot.lane.b32.xlu0 %v1191_v10, %s1122_s17  ;;  %310 = vrot.lane.b32.xlu1 %v1260_v25, %s1122_s17 }
  0x5a   : > { %377 = vrot.lane.b32.xlu0 %v1282_v29, %s1120_s28  ;;  %379 = vrot.lane.b32.xlu1 %v1240_v19, %s1120_s28  ;;  %v519_v19 = vld [vmem:[#allocation2 + $0x28] sm:$0xff] }
  0x5e   : > { %213 = vrot.lane.b32.xlu0 %v1266_v27, %s1120_s28  ;;  %215 = vrot.lane.b32.xlu1 %v1279_v28, %s1120_s28 }
  0x62   : > { %426 = vrot.lane.b32.xlu0 %v1291_v30, %s1121_s4  ;;  %428 = vrot.lane.b32.xlu1 %v1246_v21, %s1121_s4 }
  0x66   : > { %262 = vrot.lane.b32.xlu0 %v1252_v23, %s1121_s4  ;;  %264 = vrot.lane.b32.xlu1 %v1282_v29, %s1121_s4  ;;  %v522_v29 = vld [vmem:[#allocation2 + $0x40] sm:$0xff] }
  0x6a   : > { %474 = vrot.lane.b32.xlu0 %v1219_v17, %s1122_s17  ;;  %476 = vrot.lane.b32.xlu1 %v1222_v18, %s1122_s17  ;;  %v516_v18 = vld [vmem:[#allocation2 + $0x10] sm:$0xff] }
  0x6b   : > { %v540_v24 = vpack.c.bf16 %v519_v19, %v516_v18 }
  0x6e   : > { %312 = vrot.lane.b32.xlu0 %v1263_v26, %s1122_s17  ;;  %314 = vrot.lane.b32.xlu1 %v1291_v30, %s1122_s17  ;;  %v1111_v26 = vld [vmem:[%s1494_s1 + $0x88] sm:$0xff]   ;;  %v525_v30 = vld [vmem:[#allocation2 + $0x58] sm:$0xff] }
  0x6f   : > { %v543_v33 = vpack.c.bf16 %v525_v30, %v522_v29 }
  0x84   : > { %v370_v47 = vpop.permute.xlu0 %369  ;;  %v206_v48 = vpop.permute.xlu1 %205 }
  0x85   : > { %393 = vst.msk [vmem:[#allocation2 + $0x8] sm:$0xff] %vm229_vm1, %v370_v47  ;;  %230 = vst.msk [vmem:[#allocation2] sm:$0xff] %vm229_vm1, %v206_v48 }
  0x88   : > { %v372_v49 = vpop.permute.xlu0 %371  ;;  %v208_v50 = vpop.permute.xlu1 %207 }
  0x89   : > { %394 = vst.msk [vmem:[#allocation2 + $0x20] sm:$0xff] %vm229_vm1, %v372_v49  ;;  %231 = vst.msk [vmem:[#allocation2 + $0x18] sm:$0xff] %vm229_vm1, %v208_v50 }
  0x8c   : > { %v419_v51 = vpop.permute.xlu0 %418  ;;  %v421_v52 = vpop.permute.xlu1 %420 }
  0x8d   : > { %442 = vst.msk [vmem:[#allocation2 + $0x8] sm:$0xff] %vm278_vm2, %v419_v51  ;;  %443 = vst.msk [vmem:[#allocation2 + $0x20] sm:$0xff] %vm278_vm2, %v421_v52 }
  0x90   : > { %v255_v53 = vpop.permute.xlu0 %254  ;;  %v257_v54 = vpop.permute.xlu1 %256 }
  0x91   : > { %279 = vst.msk [vmem:[#allocation2] sm:$0xff] %vm278_vm2, %v255_v53  ;;  %280 = vst.msk [vmem:[#allocation2 + $0x18] sm:$0xff] %vm278_vm2, %v257_v54 }
  0x94   : > { %v467_v55 = vpop.permute.xlu0 %466  ;;  %v469_v56 = vpop.permute.xlu1 %468 }
  0x95   : > { %490 = vst.msk [vmem:[#allocation2 + $0x8] sm:$0xff] %vm328_vm3, %v467_v55  ;;  %491 = vst.msk [vmem:[#allocation2 + $0x20] sm:$0xff] %vm328_vm3, %v469_v56 }
  0x98   : > { %v305_v57 = vpop.permute.xlu0 %304  ;;  %v307_v58 = vpop.permute.xlu1 %306 }
  0x99   : > { %329 = vst.msk [vmem:[#allocation2] sm:$0xff] %vm328_vm3, %v305_v57  ;;  %330 = vst.msk [vmem:[#allocation2 + $0x18] sm:$0xff] %vm328_vm3, %v307_v58 }
  0x9c   : > { %v382_v59 = vpop.permute.xlu0 %381  ;;  %v384_v60 = vpop.permute.xlu1 %383  ;;  %v515_v61 = vld [vmem:[#allocation2 + $0x8] sm:$0xff]  ;;  %v518_v62 = vld [vmem:[#allocation2 + $0x20] sm:$0xff] }
  0x9d   : > { %399 = vst.msk [vmem:[#allocation2 + $0x98] sm:$0xff] %vm229_vm1, %v382_v59  ;;  %400 = vst.msk [vmem:[#allocation2 + $0xb0] sm:$0xff] %vm229_vm1, %v384_v60  ;;  %v539_v63 = vpack.c.bf16 %v518_v62, %v515_v61 }
  0x9f   : > { %745 = vmatprep.mubr.bf16.mxu0 %v539_v63 }
  0xa0   : > { %v218_v0 = vpop.permute.xlu0 %217  ;;  %v220_v1 = vpop.permute.xlu1 %219  ;;  %v514_v2 = vld [vmem:[#allocation2] sm:$0xff]  ;;  %v517_v3 = vld [vmem:[#allocation2 + $0x18] sm:$0xff] }
  0xa1   : > { %236 = vst.msk [vmem:[#allocation2 + $0x90] sm:$0xff] %vm229_vm1, %v218_v0  ;;  %237 = vst.msk [vmem:[#allocation2 + $0xa8] sm:$0xff] %vm229_vm1, %v220_v1  ;;  %v538_v4 = vpack.c.bf16 %v517_v3, %v514_v2 }
  0xa3   : > { %746 = vmatmul.mubr.bf16.vlgmr.msra.gmra.mrb[0].mxu0 %v538_v4 }
  0xa4   : > { %v431_v5 = vpop.permute.xlu0 %430  ;;  %v433_v6 = vpop.permute.xlu1 %432 }
  0xa5   : > { %448 = vst.msk [vmem:[#allocation2 + $0x98] sm:$0xff] %vm278_vm2, %v431_v5  ;;  %449 = vst.msk [vmem:[#allocation2 + $0xb0] sm:$0xff] %vm278_vm2, %v433_v6 }
  0xa8   : > { %v267_v7 = vpop.permute.xlu0 %266  ;;  %v269_v8 = vpop.permute.xlu1 %268 }
  0xa9   : > { %285 = vst.msk [vmem:[#allocation2 + $0x90] sm:$0xff] %vm278_vm2, %v267_v7  ;;  %286 = vst.msk [vmem:[#allocation2 + $0xa8] sm:$0xff] %vm278_vm2, %v269_v8 }
  0xac   : > { %v479_v9 = vpop.permute.xlu0 %478  ;;  %v481_v10 = vpop.permute.xlu1 %480 }
  0xad   : > { %496 = vst.msk [vmem:[#allocation2 + $0x98] sm:$0xff] %vm328_vm3, %v479_v9  ;;  %497 = vst.msk [vmem:[#allocation2 + $0xb0] sm:$0xff] %vm328_vm3, %v481_v10 }
  0xb0   : > { %v317_v11 = vpop.permute.xlu0 %316  ;;  %v319_v12 = vpop.permute.xlu1 %318 }
  0xb1   : > { %335 = vst.msk [vmem:[#allocation2 + $0x90] sm:$0xff] %vm328_vm3, %v317_v11  ;;  %336 = vst.msk [vmem:[#allocation2 + $0xa8] sm:$0xff] %vm328_vm3, %v319_v12 }
  0xb4   : > { %v374_v13 = vpop.permute.xlu0 %373  ;;  %v376_v14 = vpop.permute.xlu1 %375  ;;  %v533_v15 = vld [vmem:[#allocation2 + $0x98] sm:$0xff]  ;;  %v536_v16 = vld [vmem:[#allocation2 + $0xb0] sm:$0xff] }
  0xb5   : > { %395 = vst.msk [vmem:[#allocation2 + $0x38] sm:$0xff] %vm229_vm1, %v374_v13  ;;  %396 = vst.msk [vmem:[#allocation2 + $0x50] sm:$0xff] %vm229_vm1, %v376_v14  ;;  %v548_v17 = vpack.c.bf16 %v536_v16, %v533_v15  ;;  %v982_v16 = vld [vmem:[%s1495_s2] ss:$0 sm:$0xff] }
  0xb7   : > { %769 = vmatprep.mubr.bf16.mxu1 %v548_v17 }
  0xb8   : > { %v210_v20 = vpop.permute.xlu0 %209  ;;  %v212_v21 = vpop.permute.xlu1 %211  ;;  %v532_v22 = vld [vmem:[#allocation2 + $0x90] sm:$0xff]  ;;  %v535_v23 = vld [vmem:[#allocation2 + $0xa8] sm:$0xff] }
  0xb9   : > { %232 = vst.msk [vmem:[#allocation2 + $0x30] sm:$0xff] %vm229_vm1, %v210_v20  ;;  %233 = vst.msk [vmem:[#allocation2 + $0x48] sm:$0xff] %vm229_vm1, %v212_v21  ;;  %v547_v25 = vpack.c.bf16 %v535_v23, %v532_v22 }
  0xbb   : > { %770 = vmatmul.mubr.bf16.vlgmr.msra.gmra.mrb[0].mxu1 %v547_v25 }
  0xbc   : > { %v423_v27 = vpop.permute.xlu0 %422  ;;  %v425_v28 = vpop.permute.xlu1 %424  ;;  %1055 = vmatpush3.bf16.msra.mxu1 %v1362_v45  ;;  %1058 = vmatprep.mubr.msk.bf16.mxu1 %vm180_vm0, %v540_v24 }
  0xbd   : > { %444 = vst.msk [vmem:[#allocation2 + $0x38] sm:$0xff] %vm278_vm2, %v423_v27  ;;  %445 = vst.msk [vmem:[#allocation2 + $0x50] sm:$0xff] %vm278_vm2, %v425_v28  ;;  %1056 = vmatprep.subr.bf16.mxu1 %v1111_v26 }
  0xc0   : > { %v259_v34 = vpop.permute.xlu0 %258  ;;  %v261_v35 = vpop.permute.xlu1 %260  ;;  %1057 = vmatpush3.bf16.msra.mxu1 %v1111_v26 }
  0xc1   : > { %281 = vst.msk [vmem:[#allocation2 + $0x30] sm:$0xff] %vm278_vm2, %v259_v34  ;;  %282 = vst.msk [vmem:[#allocation2 + $0x48] sm:$0xff] %vm278_vm2, %v261_v35 }
  0xc3   : > { %1059 = vmatmul.mubr.msk.bf16.vlgmr.msra.gmra.mrb[4].mxu1 %vm180_vm0, %v543_v33 }
  0xc4   : > { %v471_v37 = vpop.permute.xlu0 %470  ;;  %v473_v38 = vpop.permute.xlu1 %472  ;;  %1062 = vmatprep.mubr.msk.bf16.mxu1 %vm180_vm0, %v546_v36 }
  0xc5   : > { %492 = vst.msk [vmem:[#allocation2 + $0x38] sm:$0xff] %vm328_vm3, %v471_v37  ;;  %493 = vst.msk [vmem:[#allocation2 + $0x50] sm:$0xff] %vm328_vm3, %v473_v38 }
  0xc8   : > { %v309_v42 = vpop.permute.xlu0 %308  ;;  %v311_v43 = vpop.permute.xlu1 %310 }
  0xc9   : > { %331 = vst.msk [vmem:[#allocation2 + $0x30] sm:$0xff] %vm328_vm3, %v309_v42  ;;  %332 = vst.msk [vmem:[#allocation2 + $0x48] sm:$0xff] %vm328_vm3, %v311_v43 }
  0xcb   : > { %1063 = vmatmul.mubr.msk.bf16.gmra.mrb[8].mxu1 %vm180_vm0, %v549_v41 }
  0xcc   : > { %v378_v44 = vpop.permute.xlu0 %377  ;;  %v380_v45 = vpop.permute.xlu1 %379  ;;  %v521_v46 = vld [vmem:[#allocation2 + $0x38] sm:$0xff]  ;;  %v524_v47 = vld [vmem:[#allocation2 + $0x50] sm:$0xff] }
  0xcd   : > { %397 = vst.msk [vmem:[#allocation2 + $0x68] sm:$0xff] %vm229_vm1, %v378_v44  ;;  %398 = vst.msk [vmem:[#allocation2 + $0x80] sm:$0xff] %vm229_vm1, %v380_v45  ;;  %v542_v48 = vpack.c.bf16 %v524_v47, %v521_v46 }
  0xcf   : > { %753 = vmatprep.mubr.bf16.mxu0 %v542_v48 }
  0xd0   : > { %v214_v49 = vpop.permute.xlu0 %213  ;;  %v216_v50 = vpop.permute.xlu1 %215  ;;  %v520_v51 = vld [vmem:[#allocation2 + $0x30] sm:$0xff]  ;;  %v523_v52 = vld [vmem:[#allocation2 + $0x48] sm:$0xff] }
  0xd1   : > { %234 = vst.msk [vmem:[#allocation2 + $0x60] sm:$0xff] %vm229_vm1, %v214_v49  ;;  %235 = vst.msk [vmem:[#allocation2 + $0x78] sm:$0xff] %vm229_vm1, %v216_v50  ;;  %v541_v53 = vpack.c.bf16 %v523_v52, %v520_v51 }
  0xd3   : > { %754 = vmatmul.mubr.bf16.gmra.mrb[4].mxu0 %v541_v53 }
  0xd4   : > { %v427_v54 = vpop.permute.xlu0 %426  ;;  %v429_v55 = vpop.permute.xlu1 %428 }
  0xd5   : > { %446 = vst.msk [vmem:[#allocation2 + $0x68] sm:$0xff] %vm278_vm2, %v427_v54  ;;  %447 = vst.msk [vmem:[#allocation2 + $0x80] sm:$0xff] %vm278_vm2, %v429_v55 }
  0xd8   : > { %v263_v56 = vpop.permute.xlu0 %262  ;;  %v265_v57 = vpop.permute.xlu1 %264 }
  0xd9   : > { %283 = vst.msk [vmem:[#allocation2 + $0x60] sm:$0xff] %vm278_vm2, %v263_v56  ;;  %284 = vst.msk [vmem:[#allocation2 + $0x78] sm:$0xff] %vm278_vm2, %v265_v57 }
  0xdc   : > { %v475_v58 = vpop.permute.xlu0 %474  ;;  %v477_v59 = vpop.permute.xlu1 %476 }
  0xdd   : > { %494 = vst.msk [vmem:[#allocation2 + $0x68] sm:$0xff] %vm328_vm3, %v475_v58  ;;  %495 = vst.msk [vmem:[#allocation2 + $0x80] sm:$0xff] %vm328_vm3, %v477_v59 }
  0xe0   : > { %v313_v60 = vpop.permute.xlu0 %312  ;;  %v315_v61 = vpop.permute.xlu1 %314 }
  0xe1   : > { %333 = vst.msk [vmem:[#allocation2 + $0x60] sm:$0xff] %vm328_vm3, %v313_v60  ;;  %334 = vst.msk [vmem:[#allocation2 + $0x78] sm:$0xff] %vm328_vm3, %v315_v61 }
  0xe4   : > { %v527_v62 = vld [vmem:[#allocation2 + $0x68] sm:$0xff]  ;;  %v530_v63 = vld [vmem:[#allocation2 + $0x80] sm:$0xff] }
  0xe5   : > { %v545_v0 = vpack.c.bf16 %v530_v63, %v527_v62 }
  0xe7   : > { %761 = vmatprep.mubr.bf16.mxu0 %v545_v0 }
  0xe8   : > { %v526_v1 = vld [vmem:[#allocation2 + $0x60] sm:$0xff]  ;;  %v529_v2 = vld [vmem:[#allocation2 + $0x78] sm:$0xff] }
  0xe9   : > { %v544_v3 = vpack.c.bf16 %v529_v2, %v526_v1 }
  0xeb   : > { %762 = vmatmul.mubr.bf16.gmra.mrb[8].mxu0 %v544_v3 }
 0x176   : > { %v1024_v4 = vpop.f32.mrb[0].mxu0 }
 0x177   : > { %v1025_v5 = vpop.f32.mrb[1].mxu0 }
 0x178   : > { %v1026_v6 = vadd.f32 %v1025_v5, %v1024_v4  ;;  %v1027_v7 = vpop.f32.mrb[2].mxu0 }
 0x179   : > { %v1028_v8 = vpop.f32.mrb[3].mxu0 }
 0x17a   : > { %v1029_v9 = vadd.f32 %v1028_v8, %v1027_v7  ;;  %v748_v18 = vadd.f32 %v1026_v6, %v982_v16 }
 0x17c   : > { %v751_v22 = vadd.f32 %v1029_v9, %v982_v16 }
 0x18e   : > { %v1042_v10 = vpop.f32.mrb[0].mxu1 }
 0x18f   : > { %v1043_v11 = vpop.f32.mrb[1].mxu1 }
 0x190   : > { %v1044_v12 = vadd.f32 %v1043_v11, %v1042_v10  ;;  %v1045_v13 = vpop.f32.mrb[2].mxu1 }
 0x191   : > { %v1046_v14 = vpop.f32.mrb[3].mxu1 }
 0x192   : > { %v1047_v15 = vadd.f32 %v1046_v14, %v1045_v13  ;;  %v772_v27 = vadd.f32 %v1044_v12, %v982_v16 }
 0x194   : > { %v775_v32 = vadd.f32 %v1047_v15, %v982_v16 }
 0x196   : > { %v1060_v17 = vpop.f32.mrb[4].mxu1 }
 0x197   : > { %v812_v19 = vpop.f32.mrb[5].mxu1 }
 0x198   : > { %v813_v20 = vadd.f32 %v812_v19, %v748_v18  ;;  %v1061_v21 = vpop.f32.mrb[6].mxu1 }
 0x199   : > { %v815_v23 = vpop.f32.mrb[7].mxu1 }
 0x19a   : > { %v816_v24 = vadd.f32 %v815_v23, %v751_v22  ;;  %v843_v25 = vmax.f32 %v813_v20, 0.0 }
 0x19c   : > { %v844_v26 = vmax.f32 %v816_v24, 0.0 }
 0x19e   : > { %v851_v28 = vmax.f32 %v843_v25, %v844_v26  ;;  %v1064_v29 = vpop.f32.mrb[8].mxu1 }
 0x19f   : > { %v837_v30 = vadd.f32 %v1064_v29, %v772_v27  ;;  %v828_v31 = vpop.f32.mrb[9].mxu1 }
 0x1a0   : > { %856 = vst.msk [vmem:[#allocation3] sm:$0xff] %vm855_vm4, %v851_v28  ;;  %v1065_v33 = vpop.f32.mrb[10].mxu1 }
 0x1a1   : > { %v840_v34 = vadd.f32 %v1065_v33, %v775_v32  ;;  %v831_v35 = vpop.f32.mrb[11].mxu1  ;;  %v849_v36 = vmax.f32 %v837_v30, 0.0 }
 0x1a3   : > { %v850_v37 = vmax.f32 %v840_v34, 0.0 }
 0x1a5   : > { %v854_v38 = vmax.f32 %v849_v36, %v850_v37 }
 0x1a6   : > { %v1030_v39 = vpop.f32.mrb[4].mxu0 }
 0x1a7   : > { %859 = vst.msk [vmem:[#allocation3 + $0x18] sm:$0xff] %vm855_vm4, %v854_v38  ;;  %v1031_v40 = vpop.f32.mrb[5].mxu0 }
 0x1a8   : > { %v1032_v41 = vadd.f32 %v1031_v40, %v1030_v39  ;;  %v1033_v42 = vpop.f32.mrb[6].mxu0 }
 0x1a9   : > { %v1034_v43 = vpop.f32.mrb[7].mxu0 }
 0x1aa   : > { %v756_v44 = vadd.f32 %v1032_v41, %v982_v16  ;;  %v1035_v45 = vadd.f32 %v1034_v43, %v1033_v42 }
 0x1ac   : > { %v821_v46 = vadd.f32 %v1060_v17, %v756_v44  ;;  %v759_v47 = vadd.f32 %v1035_v45, %v982_v16 }
 0x1ae   : > { %v824_v48 = vadd.f32 %v1061_v21, %v759_v47  ;;  %v845_v49 = vmax.f32 %v821_v46, 0.0 }
 0x1b0   : > { %v846_v50 = vmax.f32 %v824_v48, 0.0 }
 0x1b2   : > { %v852_v51 = vmax.f32 %v845_v49, %v846_v50 }
 0x1b4   : > { %857 = vst.msk [vmem:[#allocation3 + $0x8] sm:$0xff] %vm855_vm4, %v852_v51 }
 0x1bb   : > { %v860_v52 = vld [vmem:[#allocation3] ss:$2 sm:$0xff]  ;;  %v864_v53 = vld [vmem:[#allocation3 + $0x1] ss:$2 sm:$0xff] }
 0x1bc   : > { %v867_v54 = vmax.f32 %v860_v52, %v864_v53 }
 0x1be   : > { %v1036_v55 = vpop.f32.mrb[8].mxu0  ;;  %869 = vst.msk [vmem:[%s170_s10] sm:$0xff] %vm855_vm4, %v867_v54 }
 0x1bf   : > { %v1037_v56 = vpop.f32.mrb[9].mxu0 }
 0x1c0   : > { %v1038_v57 = vadd.f32 %v1037_v56, %v1036_v55  ;;  %v1039_v58 = vpop.f32.mrb[10].mxu0 }
 0x1c1   : > { %v1040_v59 = vpop.f32.mrb[11].mxu0 }
 0x1c2   : > { %v764_v60 = vadd.f32 %v1038_v57, %v982_v16  ;;  %v1041_v61 = vadd.f32 %v1040_v59, %v1039_v58 }
 0x1c4   : > { %v829_v62 = vadd.f32 %v828_v31, %v764_v60  ;;  %v767_v63 = vadd.f32 %v1041_v61, %v982_v16 }
 0x1c6   : > { %v832_v0 = vadd.f32 %v831_v35, %v767_v63  ;;  %v847_v1 = vmax.f32 %v829_v62, 0.0 }
 0x1c8   : > { %v848_v2 = vmax.f32 %v832_v0, 0.0 }
 0x1ca   : > { %v853_v3 = vmax.f32 %v847_v1, %v848_v2 }
 0x1cc   : > { %858 = vst.msk [vmem:[#allocation3 + $0x10] sm:$0xff] %vm855_vm4, %v853_v3 }
 0x1d3   : > { %v862_v4 = vld [vmem:[#allocation3 + $0x10] ss:$2 sm:$0xff]  ;;  %v866_v5 = vld [vmem:[#allocation3 + $0x11] ss:$2 sm:$0xff] }
 0x1d4   : > { %v868_v6 = vmax.f32 %v862_v4, %v866_v5 }
 0x1d6   : > { %870 = vst.msk [vmem:[%s170_s10 + $0x8] sm:$0xff] %vm855_vm4, %v868_v6 }
 0x1d7 PF: > { %s13_s12 = sadd.s32 1, %s1118_s12  }
 0x1d8   : > { %p10_p4 = scmp.ge.s32.totalorder %s13_s12, 4  }
 0x1da   :  { %12 = sbr.rel (!%p10_p4) target bundleno = 1 (0x1), region = 67 }

// kernel: convformer_forward.6
= control target key start
LH: loop header
LB: loop body
LE: loop exit
PB: predicated region body
PF: predicated region fallthrough
CT: control target
= control target key end

     0   :  { %s2583_s12 = smov 0   ;;  %s3782_s0 = inlined_call_operand.vmem [shape: f32[2,18,18,4], index: 0, kind: input, shape index: {}]   ;;  %s3783_s1 = inlined_call_operand.vmem [shape: bf16[36,32], index: 1, kind: input, shape index: {}]   ;;  %s3784_s2 = inlined_call_operand.vmem [shape: f32[1,32], index: 2, kind: input, shape index: {}]   ;;  %s3785_s3 = inlined_call_operand.vmem [shape: f32[2,64,32], index: 3, kind: output, shape index: {}]  }
   0x1 LB: > { %s2239_s13 = sadd.s32 4294967295, %s2553_s12   ;;  %p2243_p0 = scmp.ge.s32.totalorder %s2553_s12, 1  ;;  %s2553_s12 = sphi %s2583_s12, %s13_s12  }
   0x2   : > { %p137_p1 = scmp.lt.s32.totalorder %s2553_s12, 3 }
   0x4   : > { %p138_p2 = pnand %p2243_p0, %p137_p1 }
   0x6   : > { %141 = sbr.rel (%p138_p2) target bundleno = 885 (0x375), region = 32 }
   0xd   : > { %p161_p3 = scmp.lt.s32.totalorder %s2239_s13, 1  ;;  %s2555_s18 = smov 4   ;;  %vm204_vm0 = vcmask 31744   ;;  %vm397_vm1 = vcmask 64544   ;;  %vm590_vm2 = vcmask 97344   ;;  %vm784_vm3 = vcmask 130144  }
   0xe   : > { %s2556_s19 = smov 8   ;;  %s2557_s20 = smov 12   ;;  %vm1907_vm4 = vcmask 1041408   ;;  %vm977_vm5 = vcmask 162944   ;;  %vm1170_vm6 = vcmask 195744   ;;  %vm1364_vm7 = vcmask 228544  }
   0xf   : > { %s3811_s13 = smov (!%p161_p3, %s2239_s13), 1  ;;  %s2558_s21 = smov 16   ;;  %vm1557_vm8 = vcmask 261344   ;;  %vm1750_vm9 = vcmask 294144   ;;  %vm1858_vm10 = vcmask 293888   ;;  %vm2120_vm11 = vcmask 261120  }
  0x10   : > { %s2527_s14 = smul.u32 432, %s3811_s13  ;;  %s2559_s22 = smov 20  }
  0x11   : > { %s2560_s23 = smov 24   ;;  %s2561_s24 = smov 28  }
  0x12   : > { %s2597_s17 = scalar_lea.vmem %s3782_s0, %s2527_s14  ;;  %s2562_s4 = smov 32  }
  0x13   : > { %v2600_v0 = vld [vmem:[%s2597_s17 + $0x19] sm:$0xff]  ;;  %v237_v1 = vld [vmem:[%s2597_s17 + $0x1] sm:$0xff]  ;;  %v238_v3 = vld [vmem:[%s2597_s17 + $0x9] sm:$0xff]  ;;  %s2461_s7 = sshll.u32 %s3811_s13, 6 }
  0x14   : > { %305 = vrot.lane.b32.xlu1 %v2600_v0, %s2555_s18  ;;  %301 = vrot.lane.b32.xlu0 %v237_v1, %s2555_s18  ;;  %v2607_v2 = vld [vmem:[%s2597_s17 + $0x21] sm:$0xff]  ;;  %v2614_v4 = vld [vmem:[%s2597_s17 + $0x39] sm:$0xff]  ;;  %s3713_s10 = scalar_lea.vmem %s3785_s3, %s2461_s7 }
  0x15   : > { %v2617_v5 = vld [vmem:[%s2597_s17 + $0x31] sm:$0xff]  ;;  %v2627_v7 = vld [vmem:[%s2597_s17 + $0x49] sm:$0xff]  ;;  %v2637_v9 = vld [vmem:[%s2597_s17 + $0x61] sm:$0xff] }
  0x16   : > { %v2624_v6 = vld [vmem:[%s2597_s17 + $0x51] sm:$0xff]  ;;  %v2634_v8 = vld [vmem:[%s2597_s17 + $0x69] sm:$0xff]  ;;  %v248_v10 = vld [vmem:[%s2597_s17 + $0x81] sm:$0xff] }
  0x17   : > { %v247_v11 = vld [vmem:[%s2597_s17 + $0x79] sm:$0xff]  ;;  %v249_v15 = vld [vmem:[%s2597_s17 + $0x91] sm:$0xff]  ;;  %v173_v17 = vld [vmem:[%s2597_s17 + $0x8] sm:$0xff] }
  0x18   : > { %307 = vrot.lane.b32.xlu1 %v2607_v2, %s2555_s18  ;;  %303 = vrot.lane.b32.xlu0 %v238_v3, %s2555_s18  ;;  %v2648_v12 = vld [vmem:[%s2597_s17 + $0x18] sm:$0xff]  ;;  %v172_v13 = vld [vmem:[%s2597_s17] sm:$0xff]  ;;  %206 = vst.msk [vmem:[#allocation2 + $0x8] sm:$0xff] %vm204_vm0, %v173_v17 }
  0x19   : > { %v250_v14 = vld [vmem:[%s2597_s17 + $0x99] sm:$0xff]  ;;  %207 = vst.msk [vmem:[#allocation2 + $0x10] sm:$0xff] %vm204_vm0, %v2648_v12  ;;  %205 = vst.msk [vmem:[#allocation2] sm:$0xff] %vm204_vm0, %v172_v13  ;;  %v252_v18 = vld [vmem:[%s2597_s17 + $0xb1] sm:$0xff] }
  0x1a   : > { %v2657_v16 = vld [vmem:[%s2597_s17 + $0x20] sm:$0xff]  ;;  %v2665_v19 = vld [vmem:[%s2597_s17 + $0x38] sm:$0xff]  ;;  %v2668_v20 = vld [vmem:[%s2597_s17 + $0x30] sm:$0xff] }
  0x1b   : > { %208 = vst.msk [vmem:[#allocation2 + $0x18] sm:$0xff] %vm204_vm0, %v2657_v16  ;;  %v251_v21 = vld [vmem:[%s2597_s17 + $0xa9] sm:$0xff]  ;;  %210 = vst.msk [vmem:[#allocation2 + $0x28] sm:$0xff] %vm204_vm0, %v2665_v19  ;;  %v2689_v25 = vld [vmem:[%s2597_s17 + $0x60] sm:$0xff] }
  0x1c   : > { %311 = vrot.lane.b32.xlu1 %v2614_v4, %s2555_s18  ;;  %309 = vrot.lane.b32.xlu0 %v2617_v5, %s2555_s18  ;;  %209 = vst.msk [vmem:[#allocation2 + $0x20] sm:$0xff] %vm204_vm0, %v2668_v20  ;;  %v2678_v22 = vld [vmem:[%s2597_s17 + $0x50] sm:$0xff]  ;;  %v2683_v23 = vld [vmem:[%s2597_s17 + $0x48] sm:$0xff]  ;;  %213 = vst.msk [vmem:[#allocation2 + $0x40] sm:$0xff] %vm204_vm0, %v2689_v25 }
  0x1d   : > { %212 = vst.msk [vmem:[#allocation2 + $0x38] sm:$0xff] %vm204_vm0, %v2678_v22  ;;  %v2686_v24 = vld [vmem:[%s2597_s17 + $0x68] sm:$0xff]  ;;  %211 = vst.msk [vmem:[#allocation2 + $0x30] sm:$0xff] %vm204_vm0, %v2683_v23  ;;  %v2698_v26 = vld [vmem:[%s2597_s17 + $0x80] sm:$0xff] }
  0x1e   : > { %214 = vst.msk [vmem:[#allocation2 + $0x48] sm:$0xff] %vm204_vm0, %v2686_v24  ;;  %v2701_v27 = vld [vmem:[%s2597_s17 + $0x78] sm:$0xff]  ;;  %v254_v29 = vld [vmem:[%s2597_s17 + $0xc9] sm:$0xff]  ;;  %v253_v30 = vld [vmem:[%s2597_s17 + $0xc1] sm:$0xff] }
  0x1f   : > { %v2704_v28 = vld [vmem:[%s2597_s17 + $0x98] sm:$0xff]  ;;  %216 = vst.msk [vmem:[#allocation2 + $0x58] sm:$0xff] %vm204_vm0, %v2698_v26  ;;  %215 = vst.msk [vmem:[#allocation2 + $0x50] sm:$0xff] %vm204_vm0, %v2701_v27  ;;  %v2715_v31 = vld [vmem:[%s2597_s17 + $0x90] sm:$0xff] }
  0x20   : > { %315 = vrot.lane.b32.xlu1 %v2624_v6, %s2555_s18  ;;  %313 = vrot.lane.b32.xlu0 %v2627_v7, %s2555_s18  ;;  %218 = vst.msk [vmem:[#allocation2 + $0x68] sm:$0xff] %vm204_vm0, %v2704_v28  ;;  %v2718_v32 = vld [vmem:[%s2597_s17 + $0xb0] sm:$0xff]  ;;  %v2721_v33 = vld [vmem:[%s2597_s17 + $0xa8] sm:$0xff]  ;;  %217 = vst.msk [vmem:[#allocation2 + $0x60] sm:$0xff] %vm204_vm0, %v2715_v31 }
  0x21   : > { %220 = vst.msk [vmem:[#allocation2 + $0x78] sm:$0xff] %vm204_vm0, %v2718_v32  ;;  %219 = vst.msk [vmem:[#allocation2 + $0x70] sm:$0xff] %vm204_vm0, %v2721_v33  ;;  %v2732_v34 = vld [vmem:[%s2597_s17 + $0xc8] sm:$0xff]  ;;  %v2735_v35 = vld [vmem:[%s2597_s17 + $0xc0] sm:$0xff] }
  0x22   : > { %222 = vst.msk [vmem:[#allocation2 + $0x88] sm:$0xff] %vm204_vm0, %v2732_v34  ;;  %221 = vst.msk [vmem:[#allocation2 + $0x80] sm:$0xff] %vm204_vm0, %v2735_v35  ;;  %v2742_v36 = vld [vmem:[%s2597_s17 + $0xe0] sm:$0xff]  ;;  %v2745_v37 = vld [vmem:[%s2597_s17 + $0xd8] sm:$0xff] }
  0x23   : > { %v2748_v38 = vld [vmem:[%s2597_s17 + $0xf8] sm:$0xff]  ;;  %224 = vst.msk [vmem:[#allocation2 + $0x98] sm:$0xff] %vm204_vm0, %v2742_v36  ;;  %223 = vst.msk [vmem:[#allocation2 + $0x90] sm:$0xff] %vm204_vm0, %v2745_v37  ;;  %v2757_v39 = vld [vmem:[%s2597_s17 + $0xf0] sm:$0xff] }
  0x24   : > { %319 = vrot.lane.b32.xlu1 %v2634_v8, %s2555_s18  ;;  %317 = vrot.lane.b32.xlu0 %v2637_v9, %s2555_s18  ;;  %226 = vst.msk [vmem:[#allocation2 + $0xa8] sm:$0xff] %vm204_vm0, %v2748_v38  ;;  %v2760_v40 = vld [vmem:[%s2597_s17 + $0x110] sm:$0xff]  ;;  %v2763_v41 = vld [vmem:[%s2597_s17 + $0x108] sm:$0xff]  ;;  %225 = vst.msk [vmem:[#allocation2 + $0xa0] sm:$0xff] %vm204_vm0, %v2757_v39 }
  0x25   : > { %228 = vst.msk [vmem:[#allocation2 + $0xb8] sm:$0xff] %vm204_vm0, %v2760_v40  ;;  %227 = vst.msk [vmem:[#allocation2 + $0xb0] sm:$0xff] %vm204_vm0, %v2763_v41  ;;  %v2774_v42 = vld [vmem:[%s2597_s17 + $0xe1] sm:$0xff]  ;;  %v2777_v43 = vld [vmem:[%s2597_s17 + $0xd9] sm:$0xff] }
  0x26   : > { %v2780_v44 = vld [vmem:[%s2597_s17 + $0x128] sm:$0xff]  ;;  %v2783_v45 = vld [vmem:[%s2597_s17 + $0x120] sm:$0xff]  ;;  %v2797_v47 = vld [vmem:[%s2597_s17 + $0xf1] sm:$0xff] }
  0x27   : > { %230 = vst.msk [vmem:[#allocation2 + $0xc8] sm:$0xff] %vm204_vm0, %v2780_v44  ;;  %229 = vst.msk [vmem:[#allocation2 + $0xc0] sm:$0xff] %vm204_vm0, %v2783_v45  ;;  %v2794_v46 = vld [vmem:[%s2597_s17 + $0xf9] sm:$0xff]  ;;  %v2814_v50 = vld [vmem:[%s2597_s17 + $0x111] sm:$0xff] }
  0x28   : > { %323 = vrot.lane.b32.xlu1 %v248_v10, %s2555_s18  ;;  %321 = vrot.lane.b32.xlu0 %v247_v11, %s2555_s18  ;;  %v2800_v48 = vld [vmem:[%s2597_s17 + $0x140] sm:$0xff]  ;;  %v2803_v49 = vld [vmem:[%s2597_s17 + $0x138] sm:$0xff] }
  0x29   : > { %232 = vst.msk [vmem:[#allocation2 + $0xd8] sm:$0xff] %vm204_vm0, %v2800_v48  ;;  %231 = vst.msk [vmem:[#allocation2 + $0xd0] sm:$0xff] %vm204_vm0, %v2803_v49  ;;  %v2817_v51 = vld [vmem:[%s2597_s17 + $0x109] sm:$0xff]  ;;  %v2820_v52 = vld [vmem:[%s2597_s17 + $0x158] sm:$0xff] }
  0x2a   : > { %v2823_v53 = vld [vmem:[%s2597_s17 + $0x150] sm:$0xff]  ;;  %234 = vst.msk [vmem:[#allocation2 + $0xe8] sm:$0xff] %vm204_vm0, %v2820_v52  ;;  %v2837_v55 = vld [vmem:[%s2597_s17 + $0x121] sm:$0xff]  ;;  %v263_v59 = vld [vmem:[%s2597_s17 + $0x139] sm:$0xff] }
  0x2b   : > { %233 = vst.msk [vmem:[#allocation2 + $0xe0] sm:$0xff] %vm204_vm0, %v2823_v53  ;;  %v2834_v54 = vld [vmem:[%s2597_s17 + $0x129] sm:$0xff]  ;;  %3795 = vst [vmem:[#allocation5_spill] sm:$0xff] %v2837_v55  ;;  %v264_v58 = vld [vmem:[%s2597_s17 + $0x141] sm:$0xff] }
  0x2c   : > { %327 = vrot.lane.b32.xlu1 %v250_v14, %s2555_s18  ;;  %325 = vrot.lane.b32.xlu0 %v249_v15, %s2555_s18  ;;  %3794 = vst [vmem:[#allocation4_spill] sm:$0xff] %v2834_v54  ;;  %v2840_v56 = vld [vmem:[%s2597_s17 + $0x170] sm:$0xff]  ;;  %v2843_v57 = vld [vmem:[%s2597_s17 + $0x168] sm:$0xff] }
  0x2d   : > { %3796 = vst [vmem:[#allocation6_spill] sm:$0xff] %v2840_v56  ;;  %3797 = vst [vmem:[#allocation7_spill] sm:$0xff] %v2843_v57  ;;  %v266_v60 = vld [vmem:[%s2597_s17 + $0x159] sm:$0xff]  ;;  %v265_v61 = vld [vmem:[%s2597_s17 + $0x151] sm:$0xff] }
  0x2e   : > { %236 = vst.msk [vmem:[#allocation2 + $0xf8] sm:$0xff] %vm204_vm0, %v2840_v56  ;;  %235 = vst.msk [vmem:[#allocation2 + $0xf0] sm:$0xff] %vm204_vm0, %v2843_v57  ;;  %v268_v62 = vld [vmem:[%s2597_s17 + $0x171] sm:$0xff]  ;;  %v267_v63 = vld [vmem:[%s2597_s17 + $0x169] sm:$0xff] }
  0x2f   : > { %v431_v1 = vld [vmem:[%s2597_s17 + $0xa] sm:$0xff]  ;;  %v430_v3 = vld [vmem:[%s2597_s17 + $0x2] sm:$0xff]  ;;  %v2873_v11 = vld [vmem:[%s2597_s17 + $0x1a] sm:$0xff] }
  0x30   : > { %331 = vrot.lane.b32.xlu1 %v252_v18, %s2555_s18  ;;  %329 = vrot.lane.b32.xlu0 %v251_v21, %s2555_s18  ;;  %v2870_v10 = vld [vmem:[%s2597_s17 + $0x22] sm:$0xff]  ;;  %v2880_v13 = vld [vmem:[%s2597_s17 + $0x3a] sm:$0xff] }
  0x31   : > { %v2883_v14 = vld [vmem:[%s2597_s17 + $0x32] sm:$0xff]  ;;  %v2893_v17 = vld [vmem:[%s2597_s17 + $0x4a] sm:$0xff]  ;;  %v2903_v21 = vld [vmem:[%s2597_s17 + $0x62] sm:$0xff] }
  0x32   : > { %v2890_v15 = vld [vmem:[%s2597_s17 + $0x52] sm:$0xff]  ;;  %v2900_v18 = vld [vmem:[%s2597_s17 + $0x6a] sm:$0xff]  ;;  %3799 = vst [vmem:[#allocation9_spill] sm:$0xff] %v2903_v21 }
  0x33   : > { %3798 = vst [vmem:[#allocation8_spill] sm:$0xff] %v2900_v18 }
  0x34   : > { %335 = vrot.lane.b32.xlu1 %v254_v29, %s2555_s18  ;;  %333 = vrot.lane.b32.xlu0 %v253_v30, %s2555_s18  ;;  %v441_v29 = vld [vmem:[%s2597_s17 + $0x82] sm:$0xff]  ;;  %v440_v30 = vld [vmem:[%s2597_s17 + $0x7a] sm:$0xff] }
  0x38   : > { %339 = vrot.lane.b32.xlu1 %v2774_v42, %s2555_s18  ;;  %337 = vrot.lane.b32.xlu0 %v2777_v43, %s2555_s18 }
  0x3c   : > { %343 = vrot.lane.b32.xlu1 %v2794_v46, %s2555_s18  ;;  %341 = vrot.lane.b32.xlu0 %v2797_v47, %s2555_s18 }
  0x40   : > { %347 = vrot.lane.b32.xlu1 %v2814_v50, %s2555_s18  ;;  %345 = vrot.lane.b32.xlu0 %v2817_v51, %s2555_s18 }
  0x44   : > { %351 = vrot.lane.b32.xlu1 %v2834_v54, %s2555_s18  ;;  %349 = vrot.lane.b32.xlu0 %v2837_v55, %s2555_s18 }
  0x48   : > { %355 = vrot.lane.b32.xlu1 %v264_v58, %s2555_s18  ;;  %353 = vrot.lane.b32.xlu0 %v263_v59, %s2555_s18  ;;  %v443_v58 = vld [vmem:[%s2597_s17 + $0x9a] sm:$0xff]  ;;  %v442_v59 = vld [vmem:[%s2597_s17 + $0x92] sm:$0xff] }
  0x4c   : > { %359 = vrot.lane.b32.xlu1 %v266_v60, %s2555_s18  ;;  %357 = vrot.lane.b32.xlu0 %v265_v61, %s2555_s18  ;;  %v445_v60 = vld [vmem:[%s2597_s17 + $0xb2] sm:$0xff]  ;;  %v444_v61 = vld [vmem:[%s2597_s17 + $0xaa] sm:$0xff] }
  0x50   : > { %363 = vrot.lane.b32.xlu1 %v268_v62, %s2555_s18  ;;  %361 = vrot.lane.b32.xlu0 %v267_v63, %s2555_s18  ;;  %v447_v62 = vld [vmem:[%s2597_s17 + $0xca] sm:$0xff]  ;;  %v446_v63 = vld [vmem:[%s2597_s17 + $0xc2] sm:$0xff] }
  0x54   : > { %496 = vrot.lane.b32.xlu1 %v431_v1, %s2556_s19  ;;  %494 = vrot.lane.b32.xlu0 %v430_v3, %s2556_s19  ;;  %v2926_v1 = vld [vmem:[%s2597_s17 + $0xe2] sm:$0xff]  ;;  %v2929_v3 = vld [vmem:[%s2597_s17 + $0xda] sm:$0xff] }
  0x58   : > { %500 = vrot.lane.b32.xlu1 %v2870_v10, %s2556_s19  ;;  %498 = vrot.lane.b32.xlu0 %v2873_v11, %s2556_s19 }
  0x5c   : > { %504 = vrot.lane.b32.xlu1 %v2880_v13, %s2556_s19  ;;  %502 = vrot.lane.b32.xlu0 %v2883_v14, %s2556_s19 }
  0x60   : > { %508 = vrot.lane.b32.xlu1 %v2890_v15, %s2556_s19  ;;  %506 = vrot.lane.b32.xlu0 %v2893_v17, %s2556_s19 }
  0x64   : > { %512 = vrot.lane.b32.xlu1 %v2900_v18, %s2556_s19  ;;  %510 = vrot.lane.b32.xlu0 %v2903_v21, %s2556_s19  ;;  %v459_v21 = vld [vmem:[%s2597_s17 + $0x15a] sm:$0xff] }
  0x68   : > { %516 = vrot.lane.b32.xlu1 %v441_v29, %s2556_s19  ;;  %514 = vrot.lane.b32.xlu0 %v440_v30, %s2556_s19  ;;  %v2936_v29 = vld [vmem:[%s2597_s17 + $0xfa] sm:$0xff]  ;;  %v2939_v30 = vld [vmem:[%s2597_s17 + $0xf2] sm:$0xff] }
  0x6c   : > { %520 = vrot.lane.b32.xlu1 %v443_v58, %s2556_s19  ;;  %518 = vrot.lane.b32.xlu0 %v442_v59, %s2556_s19  ;;  %v2946_v58 = vld [vmem:[%s2597_s17 + $0x112] sm:$0xff]  ;;  %v2949_v59 = vld [vmem:[%s2597_s17 + $0x10a] sm:$0xff] }
  0x70   : > { %524 = vrot.lane.b32.xlu1 %v445_v60, %s2556_s19  ;;  %522 = vrot.lane.b32.xlu0 %v444_v61, %s2556_s19  ;;  %v2956_v60 = vld [vmem:[%s2597_s17 + $0x12a] sm:$0xff]  ;;  %v2959_v61 = vld [vmem:[%s2597_s17 + $0x122] sm:$0xff] }
  0x71   : > { %3800 = vst [vmem:[#allocation10_spill] sm:$0xff] %v2956_v60  ;;  %3801 = vst [vmem:[#allocation11_spill] sm:$0xff] %v2959_v61 }
  0x74   : > { %528 = vrot.lane.b32.xlu1 %v447_v62, %s2556_s19  ;;  %526 = vrot.lane.b32.xlu0 %v446_v63, %s2556_s19  ;;  %v457_v62 = vld [vmem:[%s2597_s17 + $0x142] sm:$0xff]  ;;  %v456_v63 = vld [vmem:[%s2597_s17 + $0x13a] sm:$0xff] }
  0x78   : > { %532 = vrot.lane.b32.xlu1 %v2926_v1, %s2556_s19  ;;  %530 = vrot.lane.b32.xlu0 %v2929_v3, %s2556_s19 }
  0x7c   : > { %536 = vrot.lane.b32.xlu1 %v2936_v29, %s2556_s19  ;;  %534 = vrot.lane.b32.xlu0 %v2939_v30, %s2556_s19 }
  0x80   : > { %540 = vrot.lane.b32.xlu1 %v2946_v58, %s2556_s19  ;;  %538 = vrot.lane.b32.xlu0 %v2949_v59, %s2556_s19 }
  0x84   : > { %544 = vrot.lane.b32.xlu1 %v2956_v60, %s2556_s19  ;;  %542 = vrot.lane.b32.xlu0 %v2959_v61, %s2556_s19  ;;  %v458_v60 = vld [vmem:[%s2597_s17 + $0x152] sm:$0xff] }
  0x85   : > { %v461_v61 = vld [vmem:[%s2597_s17 + $0x172] sm:$0xff] }
  0x86   : > { %v306_v57 = vpop.permute.xlu1 %305  ;;  %v302_v56 = vpop.permute.xlu0 %301 }
  0x87   : > { %400 = vst.msk [vmem:[#allocation2 + $0x10] sm:$0xff] %vm397_vm1, %v306_v57  ;;  %398 = vst.msk [vmem:[#allocation2] sm:$0xff] %vm397_vm1, %v302_v56  ;;  %v460_v57 = vld [vmem:[%s2597_s17 + $0x16a] sm:$0xff] }
  0x88   : > { %548 = vrot.lane.b32.xlu1 %v457_v62, %s2556_s19  ;;  %546 = vrot.lane.b32.xlu0 %v456_v63, %s2556_s19 }
  0x8a   : > { %v308_v18 = vpop.permute.xlu1 %307  ;;  %v304_v55 = vpop.permute.xlu0 %303 }
  0x8b   : > { %401 = vst.msk [vmem:[#allocation2 + $0x18] sm:$0xff] %vm397_vm1, %v308_v18  ;;  %399 = vst.msk [vmem:[#allocation2 + $0x8] sm:$0xff] %vm397_vm1, %v304_v55 }
  0x8c   : > { %552 = vrot.lane.b32.xlu1 %v459_v21, %s2556_s19  ;;  %550 = vrot.lane.b32.xlu0 %v458_v60, %s2556_s19 }
  0x8e   : > { %v312_v54 = vpop.permute.xlu1 %311  ;;  %v310_v56 = vpop.permute.xlu0 %309 }
  0x8f   : > { %403 = vst.msk [vmem:[#allocation2 + $0x28] sm:$0xff] %vm397_vm1, %v312_v54  ;;  %402 = vst.msk [vmem:[#allocation2 + $0x20] sm:$0xff] %vm397_vm1, %v310_v56 }
  0x90   : > { %556 = vrot.lane.b32.xlu1 %v461_v61, %s2556_s19  ;;  %554 = vrot.lane.b32.xlu0 %v460_v57, %s2556_s19 }
  0x92   : > { %v316_v62 = vpop.permute.xlu1 %315  ;;  %v314_v18 = vpop.permute.xlu0 %313 }
  0x93   : > { %405 = vst.msk [vmem:[#allocation2 + $0x38] sm:$0xff] %vm397_vm1, %v316_v62  ;;  %404 = vst.msk [vmem:[#allocation2 + $0x30] sm:$0xff] %vm397_vm1, %v314_v18 }
  0x94   : > { %690 = vrot.lane.b32.xlu1 %v2657_v16, %s2557_s20  ;;  %688 = vrot.lane.b32.xlu0 %v2648_v12, %s2557_s20 }
  0x96   : > { %v320_v54 = vpop.permute.xlu1 %319  ;;  %v318_v55 = vpop.permute.xlu0 %317 }
  0x97   : > { %407 = vst.msk [vmem:[#allocation2 + $0x48] sm:$0xff] %vm397_vm1, %v320_v54  ;;  %406 = vst.msk [vmem:[#allocation2 + $0x40] sm:$0xff] %vm397_vm1, %v318_v55 }
  0x98   : > { %694 = vrot.lane.b32.xlu1 %v2665_v19, %s2557_s20  ;;  %692 = vrot.lane.b32.xlu0 %v2668_v20, %s2557_s20 }
  0x9a   : > { %v324_v21 = vpop.permute.xlu1 %323  ;;  %v322_v60 = vpop.permute.xlu0 %321 }
  0x9b   : > { %409 = vst.msk [vmem:[#allocation2 + $0x58] sm:$0xff] %vm397_vm1, %v324_v21  ;;  %408 = vst.msk [vmem:[#allocation2 + $0x50] sm:$0xff] %vm397_vm1, %v322_v60 }
  0x9c   : > { %698 = vrot.lane.b32.xlu1 %v2678_v22, %s2557_s20  ;;  %696 = vrot.lane.b32.xlu0 %v2683_v23, %s2557_s20 }
  0x9e   : > { %v328_v12 = vpop.permute.xlu1 %327  ;;  %v326_v16 = vpop.permute.xlu0 %325 }
  0x9f   : > { %411 = vst.msk [vmem:[#allocation2 + $0x68] sm:$0xff] %vm397_vm1, %v328_v12  ;;  %410 = vst.msk [vmem:[#allocation2 + $0x60] sm:$0xff] %vm397_vm1, %v326_v16 }
  0xa0   : > { %702 = vrot.lane.b32.xlu1 %v2686_v24, %s2557_s20  ;;  %700 = vrot.lane.b32.xlu0 %v2689_v25, %s2557_s20 }
  0xa2   : > { %v332_v61 = vpop.permute.xlu1 %331  ;;  %v330_v63 = vpop.permute.xlu0 %329 }
  0xa3   : > { %413 = vst.msk [vmem:[#allocation2 + $0x78] sm:$0xff] %vm397_vm1, %v332_v61  ;;  %412 = vst.msk [vmem:[#allocation2 + $0x70] sm:$0xff] %vm397_vm1, %v330_v63 }
  0xa4   : > { %706 = vrot.lane.b32.xlu1 %v2698_v26, %s2557_s20  ;;  %704 = vrot.lane.b32.xlu0 %v2701_v27, %s2557_s20 }
  0xa6   : > { %v336_v57 = vpop.permute.xlu1 %335  ;;  %v334_v56 = vpop.permute.xlu0 %333 }
  0xa7   : > { %415 = vst.msk [vmem:[#allocation2 + $0x88] sm:$0xff] %vm397_vm1, %v336_v57  ;;  %414 = vst.msk [vmem:[#allocation2 + $0x80] sm:$0xff] %vm397_vm1, %v334_v56 }
  0xa8   : > { %710 = vrot.lane.b32.xlu1 %v2704_v28, %s2557_s20  ;;  %708 = vrot.lane.b32.xlu0 %v2715_v31, %s2557_s20 }
  0xaa   : > { %v340_v62 = vpop.permute.xlu1 %339  ;;  %v338_v18 = vpop.permute.xlu0 %337 }
  0xab   : > { %417 = vst.msk [vmem:[#allocation2 + $0x98] sm:$0xff] %vm397_vm1, %v340_v62  ;;  %416 = vst.msk [vmem:[#allocation2 + $0x90] sm:$0xff] %vm397_vm1, %v338_v18 }
  0xac   : > { %714 = vrot.lane.b32.xlu1 %v2718_v32, %s2557_s20  ;;  %712 = vrot.lane.b32.xlu0 %v2721_v33, %s2557_s20 }
  0xae   : > { %v344_v54 = vpop.permute.xlu1 %343  ;;  %v342_v55 = vpop.permute.xlu0 %341 }
  0xaf   : > { %419 = vst.msk [vmem:[#allocation2 + $0xa8] sm:$0xff] %vm397_vm1, %v344_v54  ;;  %418 = vst.msk [vmem:[#allocation2 + $0xa0] sm:$0xff] %vm397_vm1, %v342_v55 }
  0xb0   : > { %718 = vrot.lane.b32.xlu1 %v2732_v34, %s2557_s20  ;;  %716 = vrot.lane.b32.xlu0 %v2735_v35, %s2557_s20 }
  0xb2   : > { %v348_v28 = vpop.permute.xlu1 %347  ;;  %v346_v31 = vpop.permute.xlu0 %345 }
  0xb3   : > { %421 = vst.msk [vmem:[#allocation2 + $0xb8] sm:$0xff] %vm397_vm1, %v348_v28  ;;  %420 = vst.msk [vmem:[#allocation2 + $0xb0] sm:$0xff] %vm397_vm1, %v346_v31 }
  0xb4   : > { %722 = vrot.lane.b32.xlu1 %v2742_v36, %s2557_s20  ;;  %720 = vrot.lane.b32.xlu0 %v2745_v37, %s2557_s20 }
  0xb6   : > { %v352_v32 = vpop.permute.xlu1 %351  ;;  %v350_v33 = vpop.permute.xlu0 %349 }
  0xb7   : > { %423 = vst.msk [vmem:[#allocation2 + $0xc8] sm:$0xff] %vm397_vm1, %v352_v32  ;;  %422 = vst.msk [vmem:[#allocation2 + $0xc0] sm:$0xff] %vm397_vm1, %v350_v33 }
  0xb8   : > { %726 = vrot.lane.b32.xlu1 %v2748_v38, %s2557_s20  ;;  %724 = vrot.lane.b32.xlu0 %v2757_v39, %s2557_s20 }
  0xba   : > { %v356_v34 = vpop.permute.xlu1 %355  ;;  %v354_v35 = vpop.permute.xlu0 %353 }
  0xbb   : > { %425 = vst.msk [vmem:[#allocation2 + $0xd8] sm:$0xff] %vm397_vm1, %v356_v34  ;;  %424 = vst.msk [vmem:[#allocation2 + $0xd0] sm:$0xff] %vm397_vm1, %v354_v35 }
  0xbc   : > { %730 = vrot.lane.b32.xlu1 %v2760_v40, %s2557_s20  ;;  %728 = vrot.lane.b32.xlu0 %v2763_v41, %s2557_s20 }
  0xbe   : > { %v360_v36 = vpop.permute.xlu1 %359  ;;  %v358_v37 = vpop.permute.xlu0 %357 }
  0xbf   : > { %427 = vst.msk [vmem:[#allocation2 + $0xe8] sm:$0xff] %vm397_vm1, %v360_v36  ;;  %426 = vst.msk [vmem:[#allocation2 + $0xe0] sm:$0xff] %vm397_vm1, %v358_v37 }
  0xc0   : > { %734 = vrot.lane.b32.xlu1 %v2780_v44, %s2557_s20  ;;  %732 = vrot.lane.b32.xlu0 %v2783_v45, %s2557_s20 }
  0xc2   : > { %v364_v21 = vpop.permute.xlu1 %363  ;;  %v362_v60 = vpop.permute.xlu0 %361 }
  0xc3   : > { %429 = vst.msk [vmem:[#allocation2 + $0xf8] sm:$0xff] %vm397_vm1, %v364_v21  ;;  %428 = vst.msk [vmem:[#allocation2 + $0xf0] sm:$0xff] %vm397_vm1, %v362_v60  ;;  %v2546_v21 = vld [vmem:[%s3783_s1 + $0x10] ss:$0 sps:$4 sm:$0x33]  }
  0xc4   : > { %738 = vrot.lane.b32.xlu1 %v2800_v48, %s2557_s20  ;;  %736 = vrot.lane.b32.xlu0 %v2803_v49, %s2557_s20  ;;  %v1909_v60 = vsel %vm1907_vm4, %v2546_v21, 0 }
  0xc6   : > { %v497_v12 = vpop.permute.xlu1 %496  ;;  %v495_v16 = vpop.permute.xlu0 %494 }
  0xc7   : > { %592 = vst.msk [vmem:[#allocation2 + $0x8] sm:$0xff] %vm590_vm2, %v497_v12  ;;  %591 = vst.msk [vmem:[#allocation2] sm:$0xff] %vm590_vm2, %v495_v16 }
  0xc8   : > { %742 = vrot.lane.b32.xlu1 %v2820_v52, %s2557_s20  ;;  %740 = vrot.lane.b32.xlu0 %v2823_v53, %s2557_s20 }
  0xca   : > { %v501_v61 = vpop.permute.xlu1 %500  ;;  %v499_v63 = vpop.permute.xlu0 %498 }
  0xcb   : > { %594 = vst.msk [vmem:[#allocation2 + $0x18] sm:$0xff] %vm590_vm2, %v501_v61  ;;  %593 = vst.msk [vmem:[#allocation2 + $0x10] sm:$0xff] %vm590_vm2, %v499_v63 }
  0xcc   : > { %883 = vrot.lane.b32.xlu1 %v2607_v2, %s2558_s21  ;;  %881 = vrot.lane.b32.xlu0 %v2600_v0, %s2558_s21 }
  0xce   : > { %v505_v57 = vpop.permute.xlu1 %504  ;;  %v503_v56 = vpop.permute.xlu0 %502 }
  0xcf   : > { %596 = vst.msk [vmem:[#allocation2 + $0x28] sm:$0xff] %vm590_vm2, %v505_v57  ;;  %595 = vst.msk [vmem:[#allocation2 + $0x20] sm:$0xff] %vm590_vm2, %v503_v56 }
  0xd0   : > { %915 = vrot.lane.b32.xlu1 %v2774_v42, %s2558_s21  ;;  %913 = vrot.lane.b32.xlu0 %v2777_v43, %s2558_s21 }
  0xd2   : > { %v509_v62 = vpop.permute.xlu1 %508  ;;  %v507_v18 = vpop.permute.xlu0 %506 }
  0xd3   : > { %598 = vst.msk [vmem:[#allocation2 + $0x38] sm:$0xff] %vm590_vm2, %v509_v62  ;;  %597 = vst.msk [vmem:[#allocation2 + $0x30] sm:$0xff] %vm590_vm2, %v507_v18 }
  0xd4   : > { %887 = vrot.lane.b32.xlu1 %v2614_v4, %s2558_s21  ;;  %885 = vrot.lane.b32.xlu0 %v2617_v5, %s2558_s21 }
  0xd6   : > { %v513_v0 = vpop.permute.xlu1 %512  ;;  %v511_v2 = vpop.permute.xlu0 %510 }
  0xd7   : > { %600 = vst.msk [vmem:[#allocation2 + $0x48] sm:$0xff] %vm590_vm2, %v513_v0  ;;  %599 = vst.msk [vmem:[#allocation2 + $0x40] sm:$0xff] %vm590_vm2, %v511_v2 }
  0xd8   : > { %919 = vrot.lane.b32.xlu1 %v2794_v46, %s2558_s21  ;;  %917 = vrot.lane.b32.xlu0 %v2797_v47, %s2558_s21 }
  0xda   : > { %v517_v42 = vpop.permute.xlu1 %516  ;;  %v515_v43 = vpop.permute.xlu0 %514 }
  0xdb   : > { %602 = vst.msk [vmem:[#allocation2 + $0x58] sm:$0xff] %vm590_vm2, %v517_v42  ;;  %601 = vst.msk [vmem:[#allocation2 + $0x50] sm:$0xff] %vm590_vm2, %v515_v43 }
  0xdc   : > { %1076 = vrot.lane.b32.xlu1 %v2870_v10, %s2559_s22  ;;  %1074 = vrot.lane.b32.xlu0 %v2873_v11, %s2559_s22 }
  0xde   : > { %v521_v54 = vpop.permute.xlu1 %520  ;;  %v519_v55 = vpop.permute.xlu0 %518 }
  0xdf   : > { %604 = vst.msk [vmem:[#allocation2 + $0x68] sm:$0xff] %vm590_vm2, %v521_v54  ;;  %603 = vst.msk [vmem:[#allocation2 + $0x60] sm:$0xff] %vm590_vm2, %v519_v55 }
  0xe0   : > { %1108 = vrot.lane.b32.xlu1 %v2926_v1, %s2559_s22  ;;  %1106 = vrot.lane.b32.xlu0 %v2929_v3, %s2559_s22 }
  0xe2   : > { %v525_v28 = vpop.permute.xlu1 %524  ;;  %v523_v31 = vpop.permute.xlu0 %522 }
  0xe3   : > { %606 = vst.msk [vmem:[#allocation2 + $0x78] sm:$0xff] %vm590_vm2, %v525_v28  ;;  %605 = vst.msk [vmem:[#allocation2 + $0x70] sm:$0xff] %vm590_vm2, %v523_v31 }
  0xe4   : > { %1080 = vrot.lane.b32.xlu1 %v2880_v13, %s2559_s22  ;;  %1078 = vrot.lane.b32.xlu0 %v2883_v14, %s2559_s22 }
  0xe6   : > { %v529_v10 = vpop.permute.xlu1 %528  ;;  %v527_v11 = vpop.permute.xlu0 %526 }
  0xe7   : > { %608 = vst.msk [vmem:[#allocation2 + $0x88] sm:$0xff] %vm590_vm2, %v529_v10  ;;  %607 = vst.msk [vmem:[#allocation2 + $0x80] sm:$0xff] %vm590_vm2, %v527_v11 }
  0xe8   : > { %1112 = vrot.lane.b32.xlu1 %v2936_v29, %s2559_s22  ;;  %1110 = vrot.lane.b32.xlu0 %v2939_v30, %s2559_s22 }
  0xea   : > { %v533_v1 = vpop.permute.xlu1 %532  ;;  %v531_v3 = vpop.permute.xlu0 %530 }
  0xeb   : > { %610 = vst.msk [vmem:[#allocation2 + $0x98] sm:$0xff] %vm590_vm2, %v533_v1  ;;  %609 = vst.msk [vmem:[#allocation2 + $0x90] sm:$0xff] %vm590_vm2, %v531_v3 }
  0xec   : > { %1270 = vrot.lane.b32.xlu1 %v2665_v19, %s2560_s23  ;;  %1268 = vrot.lane.b32.xlu0 %v2668_v20, %s2560_s23 }
  0xee   : > { %v537_v32 = vpop.permute.xlu1 %536  ;;  %v535_v33 = vpop.permute.xlu0 %534 }
  0xef   : > { %612 = vst.msk [vmem:[#allocation2 + $0xa8] sm:$0xff] %vm590_vm2, %v537_v32  ;;  %611 = vst.msk [vmem:[#allocation2 + $0xa0] sm:$0xff] %vm590_vm2, %v535_v33  ;;  %v2396_v32 = vld [vmem:[%s2597_s17 + $0x129] sm:$0xff] }
  0xf0   : > { %1302 = vrot.lane.b32.xlu1 %v2748_v38, %s2560_s23  ;;  %1300 = vrot.lane.b32.xlu0 %v2757_v39, %s2560_s23 }
  0xf2   : > { %v541_v34 = vpop.permute.xlu1 %540  ;;  %v539_v35 = vpop.permute.xlu0 %538 }
  0xf3   : > { %614 = vst.msk [vmem:[#allocation2 + $0xb8] sm:$0xff] %vm590_vm2, %v541_v34  ;;  %613 = vst.msk [vmem:[#allocation2 + $0xb0] sm:$0xff] %vm590_vm2, %v539_v35  ;;  %v2382_v34 = vld [vmem:[%s2597_s17 + $0x81] sm:$0xff]  ;;  %v2381_v35 = vld [vmem:[%s2597_s17 + $0x79] sm:$0xff] }
  0xf4   : > { %1274 = vrot.lane.b32.xlu1 %v2678_v22, %s2560_s23  ;;  %1272 = vrot.lane.b32.xlu0 %v2683_v23, %s2560_s23 }
  0xf6   : > { %v545_v19 = vpop.permute.xlu1 %544  ;;  %v543_v20 = vpop.permute.xlu0 %542 }
  0xf7   : > { %616 = vst.msk [vmem:[#allocation2 + $0xc8] sm:$0xff] %vm590_vm2, %v545_v19  ;;  %615 = vst.msk [vmem:[#allocation2 + $0xc0] sm:$0xff] %vm590_vm2, %v543_v20 }
  0xf8   : > { %1306 = vrot.lane.b32.xlu1 %v2760_v40, %s2560_s23  ;;  %1304 = vrot.lane.b32.xlu0 %v2763_v41, %s2560_s23 }
  0xfa   : > { %v549_v38 = vpop.permute.xlu1 %548  ;;  %v547_v39 = vpop.permute.xlu0 %546 }
  0xfb   : > { %618 = vst.msk [vmem:[#allocation2 + $0xd8] sm:$0xff] %vm590_vm2, %v549_v38  ;;  %617 = vst.msk [vmem:[#allocation2 + $0xd0] sm:$0xff] %vm590_vm2, %v547_v39  ;;  %v2398_v38 = vld [vmem:[%s2597_s17 + $0x141] sm:$0xff]  ;;  %v2397_v39 = vld [vmem:[%s2597_s17 + $0x139] sm:$0xff] }
  0xfc   : > { %1463 = vrot.lane.b32.xlu1 %v2614_v4, %s2561_s24  ;;  %1461 = vrot.lane.b32.xlu0 %v2617_v5, %s2561_s24  ;;  %v2544_v4 = vld [vmem:[%s3783_s1] sm:$0xff]  }
  0xfd   : > { %2481 = vmatprep.subr.bf16.mxu0 %v2544_v4  ;;  %2519 = vmatprep.subr.bf16.mxu1 %v2544_v4 }
  0xfe   : > { %v553_v22 = vpop.permute.xlu1 %552  ;;  %v551_v23 = vpop.permute.xlu0 %550  ;;  %2482 = vmatpush3.bf16.msra.mxu0 %v2544_v4  ;;  %2522 = vmatpush3.bf16.msra.mxu1 %v2544_v4 }
  0xff   : > { %620 = vst.msk [vmem:[#allocation2 + $0xe8] sm:$0xff] %vm590_vm2, %v553_v22  ;;  %619 = vst.msk [vmem:[#allocation2 + $0xe0] sm:$0xff] %vm590_vm2, %v551_v23 }
 0x100   : > { %1495 = vrot.lane.b32.xlu1 %v2794_v46, %s2561_s24  ;;  %1493 = vrot.lane.b32.xlu0 %v2797_v47, %s2561_s24  ;;  %v2545_v47 = vld [vmem:[%s3783_s1 + $0x8] sm:$0xff]  }
 0x101   : > { %2483 = vmatprep.subr.bf16.mxu0 %v2545_v47  ;;  %2520 = vmatprep.subr.bf16.mxu1 %v2545_v47 }
 0x102   : > { %v557_v40 = vpop.permute.xlu1 %556  ;;  %v555_v41 = vpop.permute.xlu0 %554  ;;  %2484 = vmatpush3.bf16.msra.mxu0 %v2545_v47  ;;  %2523 = vmatpush3.bf16.msra.mxu1 %v2545_v47  ;;  %v2427_v47 = vld [vmem:[%s2597_s17 + $0x122] sm:$0xff] }
 0x103   : > { %622 = vst.msk [vmem:[#allocation2 + $0xf8] sm:$0xff] %vm590_vm2, %v557_v40  ;;  %621 = vst.msk [vmem:[#allocation2 + $0xf0] sm:$0xff] %vm590_vm2, %v555_v41  ;;  %2525 = vmatprep.subr.msk.bf16.mxu0 %vm1907_vm4, %v2546_v21  ;;  %2526 = vmatprep.subr.msk.bf16.mxu1 %vm1907_vm4, %v2546_v21  ;;  %v2412_v40 = vld [vmem:[%s2597_s17 + $0x6a] sm:$0xff]  ;;  %v2411_v41 = vld [vmem:[%s2597_s17 + $0x62] sm:$0xff] }
 0x104   : > { %1467 = vrot.lane.b32.xlu1 %v2624_v6, %s2561_s24  ;;  %1465 = vrot.lane.b32.xlu0 %v2627_v7, %s2561_s24  ;;  %v2414_v21 = vld [vmem:[%s2597_s17 + $0x82] sm:$0xff] }
 0x106   : > { %v691_v5 = vpop.permute.xlu1 %690  ;;  %v689_v46 = vpop.permute.xlu0 %688  ;;  %2486 = vmatpush3.bf16.msra.mxu0 %v1909_v60  ;;  %2524 = vmatpush3.bf16.msra.mxu1 %v1909_v60  ;;  %v2413_v60 = vld [vmem:[%s2597_s17 + $0x7a] sm:$0xff] }
 0x107   : > { %786 = vst.msk [vmem:[#allocation2 + $0x8] sm:$0xff] %vm784_vm3, %v691_v5  ;;  %785 = vst.msk [vmem:[#allocation2] sm:$0xff] %vm784_vm3, %v689_v46  ;;  %v2428_v46 = vld [vmem:[%s2597_s17 + $0x12a] sm:$0xff] }
 0x108   : > { %1499 = vrot.lane.b32.xlu1 %v2814_v50, %s2561_s24  ;;  %1497 = vrot.lane.b32.xlu0 %v2817_v51, %s2561_s24 }
 0x10a   : > { %v695_v36 = vpop.permute.xlu1 %694  ;;  %v693_v37 = vpop.permute.xlu0 %692 }
 0x10b   : > { %788 = vst.msk [vmem:[#allocation2 + $0x18] sm:$0xff] %vm784_vm3, %v695_v36  ;;  %787 = vst.msk [vmem:[#allocation2 + $0x10] sm:$0xff] %vm784_vm3, %v693_v37 }
 0x10c   : > { %1656 = vrot.lane.b32.xlu1 %v2880_v13, %s2562_s4  ;;  %1654 = vrot.lane.b32.xlu0 %v2883_v14, %s2562_s4 }
 0x10e   : > { %v699_v12 = vpop.permute.xlu1 %698  ;;  %v697_v16 = vpop.permute.xlu0 %696 }
 0x10f   : > { %790 = vst.msk [vmem:[#allocation2 + $0x28] sm:$0xff] %vm784_vm3, %v699_v12  ;;  %789 = vst.msk [vmem:[#allocation2 + $0x20] sm:$0xff] %vm784_vm3, %v697_v16 }
 0x110   : > { %1688 = vrot.lane.b32.xlu1 %v2936_v29, %s2562_s4  ;;  %1686 = vrot.lane.b32.xlu0 %v2939_v30, %s2562_s4 }
 0x112   : > { %v703_v13 = vpop.permute.xlu1 %702  ;;  %v701_v14 = vpop.permute.xlu0 %700 }
 0x113   : > { %792 = vst.msk [vmem:[#allocation2 + $0x38] sm:$0xff] %vm784_vm3, %v703_v13  ;;  %791 = vst.msk [vmem:[#allocation2 + $0x30] sm:$0xff] %vm784_vm3, %v701_v14  ;;  %v2430_v13 = vld [vmem:[%s2597_s17 + $0x142] sm:$0xff]  ;;  %v2429_v14 = vld [vmem:[%s2597_s17 + $0x13a] sm:$0xff] }
 0x114   : > { %1660 = vrot.lane.b32.xlu1 %v2890_v15, %s2562_s4  ;;  %1658 = vrot.lane.b32.xlu0 %v2893_v17, %s2562_s4 }
 0x116   : > { %v707_v61 = vpop.permute.xlu1 %706  ;;  %v705_v63 = vpop.permute.xlu0 %704 }
 0x117   : > { %794 = vst.msk [vmem:[#allocation2 + $0x48] sm:$0xff] %vm784_vm3, %v707_v61  ;;  %793 = vst.msk [vmem:[#allocation2 + $0x40] sm:$0xff] %vm784_vm3, %v705_v63 }
 0x118   : > { %1692 = vrot.lane.b32.xlu1 %v2946_v58, %s2562_s4  ;;  %1690 = vrot.lane.b32.xlu0 %v2949_v59, %s2562_s4 }
 0x11a   : > { %v711_v29 = vpop.permute.xlu1 %710  ;;  %v709_v30 = vpop.permute.xlu0 %708 }
 0x11b   : > { %796 = vst.msk [vmem:[#allocation2 + $0x58] sm:$0xff] %vm784_vm3, %v711_v29  ;;  %795 = vst.msk [vmem:[#allocation2 + $0x50] sm:$0xff] %vm784_vm3, %v709_v30 }
 0x11c   : > { %891 = vrot.lane.b32.xlu1 %v2624_v6, %s2558_s21  ;;  %889 = vrot.lane.b32.xlu0 %v2627_v7, %s2558_s21 }
 0x11e   : > { %v715_v57 = vpop.permute.xlu1 %714  ;;  %v713_v56 = vpop.permute.xlu0 %712 }
 0x11f   : > { %798 = vst.msk [vmem:[#allocation2 + $0x68] sm:$0xff] %vm784_vm3, %v715_v57  ;;  %797 = vst.msk [vmem:[#allocation2 + $0x60] sm:$0xff] %vm784_vm3, %v713_v56 }
 0x120   : > { %923 = vrot.lane.b32.xlu1 %v2814_v50, %s2558_s21  ;;  %921 = vrot.lane.b32.xlu0 %v2817_v51, %s2558_s21  ;;  %v3802_v50 = vld [vmem:[#allocation4_spill] sm:$0xff]  ;;  %v3803_v51 = vld [vmem:[#allocation5_spill] sm:$0xff] }
 0x122   : > { %v719_v62 = vpop.permute.xlu1 %718  ;;  %v717_v18 = vpop.permute.xlu0 %716 }
 0x123   : > { %800 = vst.msk [vmem:[#allocation2 + $0x78] sm:$0xff] %vm784_vm3, %v719_v62  ;;  %799 = vst.msk [vmem:[#allocation2 + $0x70] sm:$0xff] %vm784_vm3, %v717_v18  ;;  %v3325_v62 = vld [vmem:[%s2597_s17 + $0x99] sm:$0xff]  ;;  %v3328_v18 = vld [vmem:[%s2597_s17 + $0x91] sm:$0xff] }
 0x124   : > { %895 = vrot.lane.b32.xlu1 %v2634_v8, %s2558_s21  ;;  %893 = vrot.lane.b32.xlu0 %v2637_v9, %s2558_s21 }
 0x126   : > { %v723_v6 = vpop.permute.xlu1 %722  ;;  %v721_v7 = vpop.permute.xlu0 %720 }
 0x127   : > { %802 = vst.msk [vmem:[#allocation2 + $0x88] sm:$0xff] %vm784_vm3, %v723_v6  ;;  %801 = vst.msk [vmem:[#allocation2 + $0x80] sm:$0xff] %vm784_vm3, %v721_v7 }
 0x128   : > { %927 = vrot.lane.b32.xlu1 %v3802_v50, %s2558_s21  ;;  %925 = vrot.lane.b32.xlu0 %v3803_v51, %s2558_s21  ;;  %v3337_v50 = vld [vmem:[%s2597_s17 + $0x159] sm:$0xff]  ;;  %v3340_v51 = vld [vmem:[%s2597_s17 + $0x151] sm:$0xff] }
 0x12a   : > { %v727_v0 = vpop.permute.xlu1 %726  ;;  %v725_v2 = vpop.permute.xlu0 %724 }
 0x12b   : > { %804 = vst.msk [vmem:[#allocation2 + $0x98] sm:$0xff] %vm784_vm3, %v727_v0  ;;  %803 = vst.msk [vmem:[#allocation2 + $0x90] sm:$0xff] %vm784_vm3, %v725_v2 }
 0x12c   : > { %1084 = vrot.lane.b32.xlu1 %v2890_v15, %s2559_s22  ;;  %1082 = vrot.lane.b32.xlu0 %v2893_v17, %s2559_s22  ;;  %v3804_v15 = vld [vmem:[#allocation8_spill] sm:$0xff]  ;;  %v3805_v17 = vld [vmem:[#allocation9_spill] sm:$0xff] }
 0x12e   : > { %v731_v8 = vpop.permute.xlu1 %730  ;;  %v729_v9 = vpop.permute.xlu0 %728 }
 0x12f   : > { %806 = vst.msk [vmem:[#allocation2 + $0xa8] sm:$0xff] %vm784_vm3, %v731_v8  ;;  %805 = vst.msk [vmem:[#allocation2 + $0xa0] sm:$0xff] %vm784_vm3, %v729_v9 }
 0x130   : > { %1116 = vrot.lane.b32.xlu1 %v2946_v58, %s2559_s22  ;;  %1114 = vrot.lane.b32.xlu0 %v2949_v59, %s2559_s22  ;;  %v3806_v58 = vld [vmem:[#allocation10_spill] sm:$0xff]  ;;  %v3807_v59 = vld [vmem:[#allocation11_spill] sm:$0xff] }
 0x132   : > { %v735_v42 = vpop.permute.xlu1 %734  ;;  %v733_v43 = vpop.permute.xlu0 %732 }
 0x133   : > { %808 = vst.msk [vmem:[#allocation2 + $0xb8] sm:$0xff] %vm784_vm3, %v735_v42  ;;  %807 = vst.msk [vmem:[#allocation2 + $0xb0] sm:$0xff] %vm784_vm3, %v733_v43 }
 0x134   : > { %1088 = vrot.lane.b32.xlu1 %v3804_v15, %s2559_s22  ;;  %1086 = vrot.lane.b32.xlu0 %v3805_v17, %s2559_s22  ;;  %v3357_v15 = vld [vmem:[%s2597_s17 + $0x9a] sm:$0xff]  ;;  %v3360_v17 = vld [vmem:[%s2597_s17 + $0x92] sm:$0xff] }
 0x136   : > { %v739_v54 = vpop.permute.xlu1 %738  ;;  %v737_v55 = vpop.permute.xlu0 %736 }
 0x137   : > { %810 = vst.msk [vmem:[#allocation2 + $0xc8] sm:$0xff] %vm784_vm3, %v739_v54  ;;  %809 = vst.msk [vmem:[#allocation2 + $0xc0] sm:$0xff] %vm784_vm3, %v737_v55 }
 0x138   : > { %1120 = vrot.lane.b32.xlu1 %v3806_v58, %s2559_s22  ;;  %1118 = vrot.lane.b32.xlu0 %v3807_v59, %s2559_s22  ;;  %v3369_v58 = vld [vmem:[%s2597_s17 + $0x15a] sm:$0xff]  ;;  %v3372_v59 = vld [vmem:[%s2597_s17 + $0x152] sm:$0xff] }
 0x13a   : > { %v743_v28 = vpop.permute.xlu1 %742  ;;  %v741_v31 = vpop.permute.xlu0 %740 }
 0x13b   : > { %812 = vst.msk [vmem:[#allocation2 + $0xd8] sm:$0xff] %vm784_vm3, %v743_v28  ;;  %811 = vst.msk [vmem:[#allocation2 + $0xd0] sm:$0xff] %vm784_vm3, %v741_v31 }
 0x13c   : > { %1278 = vrot.lane.b32.xlu1 %v2686_v24, %s2560_s23  ;;  %1276 = vrot.lane.b32.xlu0 %v2689_v25, %s2560_s23 }
 0x13e   : > { %v884_v10 = vpop.permute.xlu1 %883  ;;  %v882_v11 = vpop.permute.xlu0 %881 }
 0x13f   : > { %979 = vst.msk [vmem:[#allocation2 + $0x8] sm:$0xff] %vm977_vm5, %v884_v10  ;;  %978 = vst.msk [vmem:[#allocation2] sm:$0xff] %vm977_vm5, %v882_v11 }
 0x140   : > { %1310 = vrot.lane.b32.xlu1 %v2780_v44, %s2560_s23  ;;  %1308 = vrot.lane.b32.xlu0 %v2783_v45, %s2560_s23  ;;  %v2380_v44 = vld [vmem:[%s2597_s17 + $0x69] sm:$0xff]  ;;  %v2379_v45 = vld [vmem:[%s2597_s17 + $0x61] sm:$0xff] }
 0x142   : > { %v916_v1 = vpop.permute.xlu1 %915  ;;  %v914_v24 = vpop.permute.xlu0 %913 }
 0x143   : > { %995 = vst.msk [vmem:[#allocation2 + $0x88] sm:$0xff] %vm977_vm5, %v916_v1  ;;  %994 = vst.msk [vmem:[#allocation2 + $0x80] sm:$0xff] %vm977_vm5, %v914_v24  ;;  %v2352_v24 = vld [vmem:[%s2597_s17 + $0x98] sm:$0xff] }
 0x144   : > { %1282 = vrot.lane.b32.xlu1 %v2698_v26, %s2560_s23  ;;  %1280 = vrot.lane.b32.xlu0 %v2701_v27, %s2560_s23 }
 0x146   : > { %v888_v25 = vpop.permute.xlu1 %887  ;;  %v886_v3 = vpop.permute.xlu0 %885 }
 0x147   : > { %981 = vst.msk [vmem:[#allocation2 + $0x18] sm:$0xff] %vm977_vm5, %v888_v25  ;;  %980 = vst.msk [vmem:[#allocation2 + $0x10] sm:$0xff] %vm977_vm5, %v886_v3  ;;  %v2351_v25 = vld [vmem:[%s2597_s17 + $0x90] sm:$0xff] }
 0x148   : > { %1314 = vrot.lane.b32.xlu1 %v2800_v48, %s2560_s23  ;;  %1312 = vrot.lane.b32.xlu0 %v2803_v49, %s2560_s23  ;;  %v2395_v48 = vld [vmem:[%s2597_s17 + $0x121] sm:$0xff] }
 0x14a   : > { %v920_v26 = vpop.permute.xlu1 %919  ;;  %v918_v27 = vpop.permute.xlu0 %917 }
 0x14b   : > { %997 = vst.msk [vmem:[#allocation2 + $0x98] sm:$0xff] %vm977_vm5, %v920_v26  ;;  %996 = vst.msk [vmem:[#allocation2 + $0x90] sm:$0xff] %vm977_vm5, %v918_v27 }
 0x14c   : > { %1471 = vrot.lane.b32.xlu1 %v2380_v44, %s2561_s24  ;;  %1469 = vrot.lane.b32.xlu0 %v2379_v45, %s2561_s24 }
 0x14e   : > { %v1077_v49 = vpop.permute.xlu1 %1076  ;;  %v1075_v33 = vpop.permute.xlu0 %1074 }
 0x14f   : > { %1172 = vst.msk [vmem:[#allocation2 + $0x8] sm:$0xff] %vm1170_vm6, %v1077_v49  ;;  %1171 = vst.msk [vmem:[#allocation2] sm:$0xff] %vm1170_vm6, %v1075_v33 }
 0x150   : > { %1503 = vrot.lane.b32.xlu1 %v2396_v32, %s2561_s24  ;;  %1501 = vrot.lane.b32.xlu0 %v2395_v48, %s2561_s24 }
 0x152   : > { %v1109_v19 = vpop.permute.xlu1 %1108  ;;  %v1107_v20 = vpop.permute.xlu0 %1106 }
 0x153   : > { %1188 = vst.msk [vmem:[#allocation2 + $0x88] sm:$0xff] %vm1170_vm6, %v1109_v19  ;;  %1187 = vst.msk [vmem:[#allocation2 + $0x80] sm:$0xff] %vm1170_vm6, %v1107_v20  ;;  %v2353_v19 = vld [vmem:[%s2597_s17 + $0xa8] sm:$0xff] }
 0x154   : > { %1475 = vrot.lane.b32.xlu1 %v2382_v34, %s2561_s24  ;;  %1473 = vrot.lane.b32.xlu0 %v2381_v35, %s2561_s24 }
 0x156   : > { %v1081_v22 = vpop.permute.xlu1 %1080  ;;  %v1079_v23 = vpop.permute.xlu0 %1078 }
 0x157   : > { %1174 = vst.msk [vmem:[#allocation2 + $0x18] sm:$0xff] %vm1170_vm6, %v1081_v22  ;;  %1173 = vst.msk [vmem:[#allocation2 + $0x10] sm:$0xff] %vm1170_vm6, %v1079_v23 }
 0x158   : > { %1507 = vrot.lane.b32.xlu1 %v2398_v38, %s2561_s24  ;;  %1505 = vrot.lane.b32.xlu0 %v2397_v39, %s2561_s24 }
 0x15a   : > { %v1113_v4 = vpop.permute.xlu1 %1112  ;;  %v1111_v5 = vpop.permute.xlu0 %1110 }
 0x15b   : > { %1190 = vst.msk [vmem:[#allocation2 + $0x98] sm:$0xff] %vm1170_vm6, %v1113_v4  ;;  %1189 = vst.msk [vmem:[#allocation2 + $0x90] sm:$0xff] %vm1170_vm6, %v1111_v5 }
 0x15c   : > { %1664 = vrot.lane.b32.xlu1 %v2412_v40, %s2562_s4  ;;  %1662 = vrot.lane.b32.xlu0 %v2411_v41, %s2562_s4  ;;  %v3808_v40 = vld [vmem:[#allocation6_spill] sm:$0xff]  ;;  %v3809_v41 = vld [vmem:[#allocation7_spill] sm:$0xff] }
 0x15e   : > { %v1271_v36 = vpop.permute.xlu1 %1270  ;;  %v1269_v37 = vpop.permute.xlu0 %1268 }
 0x15f   : > { %1366 = vst.msk [vmem:[#allocation2 + $0x8] sm:$0xff] %vm1364_vm7, %v1271_v36  ;;  %1365 = vst.msk [vmem:[#allocation2] sm:$0xff] %vm1364_vm7, %v1269_v37  ;;  %v3421_v36 = vld [vmem:[%s2597_s17 + $0xb1] sm:$0xff]  ;;  %v3424_v37 = vld [vmem:[%s2597_s17 + $0xa9] sm:$0xff] }
 0x160   : > { %1696 = vrot.lane.b32.xlu1 %v2428_v46, %s2562_s4  ;;  %1694 = vrot.lane.b32.xlu0 %v2427_v47, %s2562_s4 }
 0x162   : > { %v1303_v12 = vpop.permute.xlu1 %1302  ;;  %v1301_v16 = vpop.permute.xlu0 %1300 }
 0x163   : > { %1382 = vst.msk [vmem:[#allocation2 + $0x88] sm:$0xff] %vm1364_vm7, %v1303_v12  ;;  %1381 = vst.msk [vmem:[#allocation2 + $0x80] sm:$0xff] %vm1364_vm7, %v1301_v16  ;;  %v2402_v12 = vld [vmem:[%s2597_s17 + $0x171] sm:$0xff]  ;;  %v2401_v16 = vld [vmem:[%s2597_s17 + $0x169] sm:$0xff] }
 0x164   : > { %1668 = vrot.lane.b32.xlu1 %v2414_v21, %s2562_s4  ;;  %1666 = vrot.lane.b32.xlu0 %v2413_v60, %s2562_s4 }
 0x166   : > { %v1275_v61 = vpop.permute.xlu1 %1274  ;;  %v1273_v63 = vpop.permute.xlu0 %1272 }
 0x167   : > { %1368 = vst.msk [vmem:[#allocation2 + $0x18] sm:$0xff] %vm1364_vm7, %v1275_v61  ;;  %1367 = vst.msk [vmem:[#allocation2 + $0x10] sm:$0xff] %vm1364_vm7, %v1273_v63 }
 0x168   : > { %1700 = vrot.lane.b32.xlu1 %v2430_v13, %s2562_s4  ;;  %1698 = vrot.lane.b32.xlu0 %v2429_v14, %s2562_s4 }
 0x16a   : > { %v1307_v29 = vpop.permute.xlu1 %1306  ;;  %v1305_v30 = vpop.permute.xlu0 %1304 }
 0x16b   : > { %1384 = vst.msk [vmem:[#allocation2 + $0x98] sm:$0xff] %vm1364_vm7, %v1307_v29  ;;  %1383 = vst.msk [vmem:[#allocation2 + $0x90] sm:$0xff] %vm1364_vm7, %v1305_v30 }
 0x16c   : > { %899 = vrot.lane.b32.xlu1 %v2382_v34, %s2558_s21  ;;  %897 = vrot.lane.b32.xlu0 %v2381_v35, %s2558_s21  ;;  %v2354_v35 = vld [vmem:[%s2597_s17 + $0xb0] sm:$0xff] }
 0x16e   : > { %v1464_v57 = vpop.permute.xlu1 %1463  ;;  %v1462_v56 = vpop.permute.xlu0 %1461 }
 0x16f   : > { %1559 = vst.msk [vmem:[#allocation2 + $0x8] sm:$0xff] %vm1557_vm8, %v1464_v57  ;;  %1558 = vst.msk [vmem:[#allocation2] sm:$0xff] %vm1557_vm8, %v1462_v56  ;;  %v3451_v57 = vld [vmem:[%s2597_s17 + $0xb2] sm:$0xff]  ;;  %v3454_v56 = vld [vmem:[%s2597_s17 + $0xaa] sm:$0xff] }
 0x170   : > { %931 = vrot.lane.b32.xlu1 %v2398_v38, %s2558_s21  ;;  %929 = vrot.lane.b32.xlu0 %v2397_v39, %s2558_s21 }
 0x172   : > { %v1496_v6 = vpop.permute.xlu1 %1495  ;;  %v1494_v7 = vpop.permute.xlu0 %1493 }
 0x173   : > { %1575 = vst.msk [vmem:[#allocation2 + $0x88] sm:$0xff] %vm1557_vm8, %v1496_v6  ;;  %1574 = vst.msk [vmem:[#allocation2 + $0x80] sm:$0xff] %vm1557_vm8, %v1494_v7  ;;  %v3463_v6 = vld [vmem:[%s2597_s17 + $0x172] sm:$0xff]  ;;  %v3466_v7 = vld [vmem:[%s2597_s17 + $0x16a] sm:$0xff] }
 0x174   : > { %903 = vrot.lane.b32.xlu1 %v3325_v62, %s2558_s21  ;;  %901 = vrot.lane.b32.xlu0 %v3328_v18, %s2558_s21 }
 0x176   : > { %v1468_v0 = vpop.permute.xlu1 %1467  ;;  %v1466_v2 = vpop.permute.xlu0 %1465 }
 0x177   : > { %1561 = vst.msk [vmem:[#allocation2 + $0x18] sm:$0xff] %vm1557_vm8, %v1468_v0  ;;  %1560 = vst.msk [vmem:[#allocation2 + $0x10] sm:$0xff] %vm1557_vm8, %v1466_v2  ;;  %v2276_v0 = vld [vmem:[%s2597_s17 + $0x170] sm:$0xff]  ;;  %v2275_v2 = vld [vmem:[%s2597_s17 + $0x168] sm:$0xff] }
 0x178   : > { %935 = vrot.lane.b32.xlu1 %v3337_v50, %s2558_s21  ;;  %933 = vrot.lane.b32.xlu0 %v3340_v51, %s2558_s21 }
 0x17a   : > { %v1500_v8 = vpop.permute.xlu1 %1499  ;;  %v1498_v9 = vpop.permute.xlu0 %1497 }
 0x17b   : > { %1577 = vst.msk [vmem:[#allocation2 + $0x98] sm:$0xff] %vm1557_vm8, %v1500_v8  ;;  %1576 = vst.msk [vmem:[#allocation2 + $0x90] sm:$0xff] %vm1557_vm8, %v1498_v9 }
 0x17c   : > { %1092 = vrot.lane.b32.xlu1 %v2414_v21, %s2559_s22  ;;  %1090 = vrot.lane.b32.xlu0 %v2413_v60, %s2559_s22 }
 0x17e   : > { %v1657_v42 = vpop.permute.xlu1 %1656  ;;  %v1655_v43 = vpop.permute.xlu0 %1654 }
 0x17f   : > { %1752 = vst.msk [vmem:[#allocation2 + $0x8] sm:$0xff] %vm1750_vm9, %v1657_v42  ;;  %1751 = vst.msk [vmem:[#allocation2] sm:$0xff] %vm1750_vm9, %v1655_v43  ;;  %v3481_v42 = vld [vmem:[%s2597_s17 + $0x188] sm:$0xff]  ;;  %v3484_v43 = vld [vmem:[%s2597_s17 + $0x180] sm:$0xff] }
 0x180   : > { %1124 = vrot.lane.b32.xlu1 %v2430_v13, %s2559_s22  ;;  %1122 = vrot.lane.b32.xlu0 %v2429_v14, %s2559_s22 }
 0x182   : > { %v1689_v54 = vpop.permute.xlu1 %1688  ;;  %v1687_v55 = vpop.permute.xlu0 %1686 }
 0x183   : > { %1768 = vst.msk [vmem:[#allocation2 + $0x88] sm:$0xff] %vm1750_vm9, %v1689_v54  ;;  %1767 = vst.msk [vmem:[#allocation2 + $0x80] sm:$0xff] %vm1750_vm9, %v1687_v55 }
 0x184   : > { %1096 = vrot.lane.b32.xlu1 %v3357_v15, %s2559_s22  ;;  %1094 = vrot.lane.b32.xlu0 %v3360_v17, %s2559_s22 }
 0x186   : > { %v1661_v28 = vpop.permute.xlu1 %1660  ;;  %v1659_v31 = vpop.permute.xlu0 %1658  ;;  %v1783_v10 = vld [vmem:[#allocation2] sm:$0xff]  ;;  %v1784_v11 = vld [vmem:[#allocation2 + $0x8] sm:$0xff] }
 0x187   : > { %1754 = vst.msk [vmem:[#allocation2 + $0x18] sm:$0xff] %vm1750_vm9, %v1661_v28  ;;  %1753 = vst.msk [vmem:[#allocation2 + $0x10] sm:$0xff] %vm1750_vm9, %v1659_v31  ;;  %v1815_v1 = vpack.c.bf16 %v1784_v11, %v1783_v10  ;;  %v3503_v28 = vld [vmem:[%s2597_s17 + $0xc9] sm:$0xff]  ;;  %v3506_v31 = vld [vmem:[%s2597_s17 + $0xc1] sm:$0xff] }
 0x188   : > { %1128 = vrot.lane.b32.xlu1 %v3369_v58, %s2559_s22  ;;  %1126 = vrot.lane.b32.xlu0 %v3372_v59, %s2559_s22 }
 0x189   : > { %2487 = vmatprep.mubr.msk.bf16.mxu0 %vm1858_vm10, %v1815_v1  ;;  %v3515_v1 = vld [vmem:[%s2597_s17 + $0x189] sm:$0xff] }
 0x18a   : > { %v1693_v3 = vpop.permute.xlu1 %1692  ;;  %v1691_v44 = vpop.permute.xlu0 %1690  ;;  %v1799_v45 = vld [vmem:[#allocation2 + $0x80] sm:$0xff]  ;;  %v1800_v26 = vld [vmem:[#allocation2 + $0x88] sm:$0xff] }
 0x18b   : > { %1770 = vst.msk [vmem:[#allocation2 + $0x98] sm:$0xff] %vm1750_vm9, %v1693_v3  ;;  %1769 = vst.msk [vmem:[#allocation2 + $0x90] sm:$0xff] %vm1750_vm9, %v1691_v44  ;;  %v1823_v27 = vpack.c.bf16 %v1800_v26, %v1799_v45 }
 0x18c   : > { %1286 = vrot.lane.b32.xlu1 %v2352_v24, %s2560_s23  ;;  %1284 = vrot.lane.b32.xlu0 %v2351_v25, %s2560_s23  ;;  %v3518_v24 = vld [vmem:[%s2597_s17 + $0x181] sm:$0xff] }
 0x18d   : > { %2503 = vmatprep.mubr.msk.bf16.mxu1 %vm1858_vm10, %v1823_v27 }
 0x18e   : > { %v892_v32 = vpop.permute.xlu1 %891  ;;  %v890_v48 = vpop.permute.xlu0 %889  ;;  %v1785_v49 = vld [vmem:[#allocation2 + $0x10] sm:$0xff]  ;;  %v1786_v33 = vld [vmem:[#allocation2 + $0x18] sm:$0xff] }
 0x18f   : > { %983 = vst.msk [vmem:[#allocation2 + $0x28] sm:$0xff] %vm977_vm5, %v892_v32  ;;  %982 = vst.msk [vmem:[#allocation2 + $0x20] sm:$0xff] %vm977_vm5, %v890_v48  ;;  %v1816_v34 = vpack.c.bf16 %v1786_v33, %v1785_v49  ;;  %v3540_v33 = vld [vmem:[%s2597_s17 + $0xca] sm:$0xff] }
 0x190   : > { %1318 = vrot.lane.b32.xlu1 %v2820_v52, %s2560_s23  ;;  %1316 = vrot.lane.b32.xlu0 %v2823_v53, %s2560_s23 }
 0x191   : > { %2488 = vmatmul.mubr.msk.bf16.vlgmr.msra.gmra.mrb[0].mxu0 %vm1858_vm10, %v1816_v34  ;;  %v3543_v34 = vld [vmem:[%s2597_s17 + $0xc2] sm:$0xff] }
 0x192   : > { %v924_v20 = vpop.permute.xlu1 %923  ;;  %v922_v38 = vpop.permute.xlu0 %921  ;;  %v1801_v39 = vld [vmem:[#allocation2 + $0x90] sm:$0xff]  ;;  %v1802_v22 = vld [vmem:[#allocation2 + $0x98] sm:$0xff] }
 0x193   : > { %999 = vst.msk [vmem:[#allocation2 + $0xa8] sm:$0xff] %vm977_vm5, %v924_v20  ;;  %998 = vst.msk [vmem:[#allocation2 + $0xa0] sm:$0xff] %vm977_vm5, %v922_v38  ;;  %v1824_v23 = vpack.c.bf16 %v1802_v22, %v1801_v39  ;;  %v3553_v22 = vld [vmem:[%s2597_s17 + $0x18a] sm:$0xff] }
 0x194   : > { %1290 = vrot.lane.b32.xlu1 %v2354_v35, %s2560_s23  ;;  %1288 = vrot.lane.b32.xlu0 %v2353_v19, %s2560_s23 }
 0x195   : > { %2504 = vmatmul.mubr.msk.bf16.vlgmr.msra.gmra.mrb[0].mxu1 %vm1858_vm10, %v1824_v23  ;;  %v3556_v23 = vld [vmem:[%s2597_s17 + $0x182] sm:$0xff] }
 0x196   : > { %v896_v52 = vpop.permute.xlu1 %895  ;;  %v894_v53 = vpop.permute.xlu0 %893 }
 0x197   : > { %985 = vst.msk [vmem:[#allocation2 + $0x38] sm:$0xff] %vm977_vm5, %v896_v52  ;;  %984 = vst.msk [vmem:[#allocation2 + $0x30] sm:$0xff] %vm977_vm5, %v894_v53 }
 0x198   : > { %1322 = vrot.lane.b32.xlu1 %v3808_v40, %s2560_s23  ;;  %1320 = vrot.lane.b32.xlu0 %v3809_v41, %s2560_s23 }
 0x19a   : > { %v928_v4 = vpop.permute.xlu1 %927  ;;  %v926_v5 = vpop.permute.xlu0 %925 }
 0x19b   : > { %1001 = vst.msk [vmem:[#allocation2 + $0xb8] sm:$0xff] %vm977_vm5, %v928_v4  ;;  %1000 = vst.msk [vmem:[#allocation2 + $0xb0] sm:$0xff] %vm977_vm5, %v926_v5  ;;  %v2356_v5 = vld [vmem:[%s2597_s17 + $0xc8] sm:$0xff] }
 0x19c   : > { %1479 = vrot.lane.b32.xlu1 %v3325_v62, %s2561_s24  ;;  %1477 = vrot.lane.b32.xlu0 %v3328_v18, %s2561_s24 }
 0x19e   : > { %v1085_v46 = vpop.permute.xlu1 %1084  ;;  %v1083_v47 = vpop.permute.xlu0 %1082 }
 0x19f   : > { %1176 = vst.msk [vmem:[#allocation2 + $0x28] sm:$0xff] %vm1170_vm6, %v1085_v46  ;;  %1175 = vst.msk [vmem:[#allocation2 + $0x20] sm:$0xff] %vm1170_vm6, %v1083_v47  ;;  %v2355_v46 = vld [vmem:[%s2597_s17 + $0xc0] sm:$0xff] }
 0x1a0   : > { %1511 = vrot.lane.b32.xlu1 %v3337_v50, %s2561_s24  ;;  %1509 = vrot.lane.b32.xlu0 %v3340_v51, %s2561_s24 }
 0x1a2   : > { %v1117_v21 = vpop.permute.xlu1 %1116  ;;  %v1115_v60 = vpop.permute.xlu0 %1114 }
 0x1a3   : > { %1192 = vst.msk [vmem:[#allocation2 + $0xa8] sm:$0xff] %vm1170_vm6, %v1117_v21  ;;  %1191 = vst.msk [vmem:[#allocation2 + $0xa0] sm:$0xff] %vm1170_vm6, %v1115_v60 }
 0x1a4   : > { %1483 = vrot.lane.b32.xlu1 %v3421_v36, %s2561_s24  ;;  %1481 = vrot.lane.b32.xlu0 %v3424_v37, %s2561_s24 }
 0x1a6   : > { %v1089_v13 = vpop.permute.xlu1 %1088  ;;  %v1087_v14 = vpop.permute.xlu0 %1086 }
 0x1a7   : > { %1178 = vst.msk [vmem:[#allocation2 + $0x38] sm:$0xff] %vm1170_vm6, %v1089_v13  ;;  %1177 = vst.msk [vmem:[#allocation2 + $0x30] sm:$0xff] %vm1170_vm6, %v1087_v14  ;;  %v2358_v13 = vld [vmem:[%s2597_s17 + $0xe0] sm:$0xff]  ;;  %v2357_v14 = vld [vmem:[%s2597_s17 + $0xd8] sm:$0xff] }
 0x1a8   : > { %1515 = vrot.lane.b32.xlu1 %v2402_v12, %s2561_s24  ;;  %1513 = vrot.lane.b32.xlu0 %v2401_v16, %s2561_s24 }
 0x1aa   : > { %v1121_v61 = vpop.permute.xlu1 %1120  ;;  %v1119_v63 = vpop.permute.xlu0 %1118 }
 0x1ab   : > { %1194 = vst.msk [vmem:[#allocation2 + $0xb8] sm:$0xff] %vm1170_vm6, %v1121_v61  ;;  %1193 = vst.msk [vmem:[#allocation2 + $0xb0] sm:$0xff] %vm1170_vm6, %v1119_v63 }
 0x1ac   : > { %1672 = vrot.lane.b32.xlu1 %v3357_v15, %s2562_s4  ;;  %1670 = vrot.lane.b32.xlu0 %v3360_v17, %s2562_s4 }
 0x1ae   : > { %v1279_v29 = vpop.permute.xlu1 %1278  ;;  %v1277_v30 = vpop.permute.xlu0 %1276 }
 0x1af   : > { %1370 = vst.msk [vmem:[#allocation2 + $0x28] sm:$0xff] %vm1364_vm7, %v1279_v29  ;;  %1369 = vst.msk [vmem:[#allocation2 + $0x20] sm:$0xff] %vm1364_vm7, %v1277_v30  ;;  %v2374_v29 = vld [vmem:[%s2597_s17 + $0x1a0] sm:$0xff]  ;;  %v2373_v30 = vld [vmem:[%s2597_s17 + $0x198] sm:$0xff] }
 0x1b0   : > { %1704 = vrot.lane.b32.xlu1 %v3369_v58, %s2562_s4  ;;  %1702 = vrot.lane.b32.xlu0 %v3372_v59, %s2562_s4 }
 0x1b2   : > { %v1311_v62 = vpop.permute.xlu1 %1310  ;;  %v1309_v18 = vpop.permute.xlu0 %1308 }
 0x1b3   : > { %1386 = vst.msk [vmem:[#allocation2 + $0xa8] sm:$0xff] %vm1364_vm7, %v1311_v62  ;;  %1385 = vst.msk [vmem:[#allocation2 + $0xa0] sm:$0xff] %vm1364_vm7, %v1309_v18 }
 0x1b4   : > { %1676 = vrot.lane.b32.xlu1 %v3451_v57, %s2562_s4  ;;  %1674 = vrot.lane.b32.xlu0 %v3454_v56, %s2562_s4 }
 0x1b6   : > { %v1283_v50 = vpop.permute.xlu1 %1282  ;;  %v1281_v51 = vpop.permute.xlu0 %1280 }
 0x1b7   : > { %1372 = vst.msk [vmem:[#allocation2 + $0x38] sm:$0xff] %vm1364_vm7, %v1283_v50  ;;  %1371 = vst.msk [vmem:[#allocation2 + $0x30] sm:$0xff] %vm1364_vm7, %v1281_v51  ;;  %v2390_v50 = vld [vmem:[%s2597_s17 + $0xe1] sm:$0xff]  ;;  %v2389_v51 = vld [vmem:[%s2597_s17 + $0xd9] sm:$0xff] }
 0x1b8   : > { %1708 = vrot.lane.b32.xlu1 %v3463_v6, %s2562_s4  ;;  %1706 = vrot.lane.b32.xlu0 %v3466_v7, %s2562_s4 }
 0x1ba   : > { %v1315_v8 = vpop.permute.xlu1 %1314  ;;  %v1313_v9 = vpop.permute.xlu0 %1312 }
 0x1bb   : > { %1388 = vst.msk [vmem:[#allocation2 + $0xb8] sm:$0xff] %vm1364_vm7, %v1315_v8  ;;  %1387 = vst.msk [vmem:[#allocation2 + $0xb0] sm:$0xff] %vm1364_vm7, %v1313_v9  ;;  %v2406_v8 = vld [vmem:[%s2597_s17 + $0x1a1] sm:$0xff]  ;;  %v2405_v9 = vld [vmem:[%s2597_s17 + $0x199] sm:$0xff] }
 0x1bc   : > { %746 = vrot.lane.b32.xlu1 %v2276_v0, %s2557_s20  ;;  %744 = vrot.lane.b32.xlu0 %v2275_v2, %s2557_s20 }
 0x1be   : > { %v1472_v15 = vpop.permute.xlu1 %1471  ;;  %v1470_v17 = vpop.permute.xlu0 %1469 }
 0x1bf   : > { %1563 = vst.msk [vmem:[#allocation2 + $0x28] sm:$0xff] %vm1557_vm8, %v1472_v15  ;;  %1562 = vst.msk [vmem:[#allocation2 + $0x20] sm:$0xff] %vm1557_vm8, %v1470_v17 }
 0x1c0   : > { %750 = vrot.lane.b32.xlu1 %v3481_v42, %s2557_s20  ;;  %748 = vrot.lane.b32.xlu0 %v3484_v43, %s2557_s20 }
 0x1c2   : > { %v1504_v54 = vpop.permute.xlu1 %1503  ;;  %v1502_v55 = vpop.permute.xlu0 %1501 }
 0x1c3   : > { %1579 = vst.msk [vmem:[#allocation2 + $0xa8] sm:$0xff] %vm1557_vm8, %v1504_v54  ;;  %1578 = vst.msk [vmem:[#allocation2 + $0xa0] sm:$0xff] %vm1557_vm8, %v1502_v55 }
 0x1c4   : > { %907 = vrot.lane.b32.xlu1 %v3421_v36, %s2558_s21  ;;  %905 = vrot.lane.b32.xlu0 %v3424_v37, %s2558_s21 }
 0x1c6   : > { %v1476_v58 = vpop.permute.xlu1 %1475  ;;  %v1474_v59 = vpop.permute.xlu0 %1473 }
 0x1c7   : > { %1565 = vst.msk [vmem:[#allocation2 + $0x38] sm:$0xff] %vm1557_vm8, %v1476_v58  ;;  %1564 = vst.msk [vmem:[#allocation2 + $0x30] sm:$0xff] %vm1557_vm8, %v1474_v59  ;;  %v2422_v58 = vld [vmem:[%s2597_s17 + $0xe2] sm:$0xff]  ;;  %v2421_v59 = vld [vmem:[%s2597_s17 + $0xda] sm:$0xff] }
 0x1c8   : > { %939 = vrot.lane.b32.xlu1 %v2402_v12, %s2558_s21  ;;  %937 = vrot.lane.b32.xlu0 %v2401_v16, %s2558_s21 }
 0x1ca   : > { %v1508_v10 = vpop.permute.xlu1 %1507  ;;  %v1506_v11 = vpop.permute.xlu0 %1505 }
 0x1cb   : > { %1581 = vst.msk [vmem:[#allocation2 + $0xb8] sm:$0xff] %vm1557_vm8, %v1508_v10  ;;  %1580 = vst.msk [vmem:[#allocation2 + $0xb0] sm:$0xff] %vm1557_vm8, %v1506_v11  ;;  %v2438_v10 = vld [vmem:[%s2597_s17 + $0x1a2] sm:$0xff]  ;;  %v2437_v11 = vld [vmem:[%s2597_s17 + $0x19a] sm:$0xff] }
 0x1cc   : > { %911 = vrot.lane.b32.xlu1 %v3503_v28, %s2558_s21  ;;  %909 = vrot.lane.b32.xlu0 %v3506_v31, %s2558_s21 }
 0x1ce   : > { %v1665_v25 = vpop.permute.xlu1 %1664  ;;  %v1663_v3 = vpop.permute.xlu0 %1662 }
 0x1cf   : > { %1756 = vst.msk [vmem:[#allocation2 + $0x28] sm:$0xff] %vm1750_vm9, %v1665_v25  ;;  %1755 = vst.msk [vmem:[#allocation2 + $0x20] sm:$0xff] %vm1750_vm9, %v1663_v3 }
 0x1d0   : > { %943 = vrot.lane.b32.xlu1 %v3515_v1, %s2558_s21  ;;  %941 = vrot.lane.b32.xlu0 %v3518_v24, %s2558_s21 }
 0x1d2   : > { %v1697_v44 = vpop.permute.xlu1 %1696  ;;  %v1695_v45 = vpop.permute.xlu0 %1694 }
 0x1d3   : > { %1772 = vst.msk [vmem:[#allocation2 + $0xa8] sm:$0xff] %vm1750_vm9, %v1697_v44  ;;  %1771 = vst.msk [vmem:[#allocation2 + $0xa0] sm:$0xff] %vm1750_vm9, %v1695_v45 }
 0x1d4   : > { %1100 = vrot.lane.b32.xlu1 %v3451_v57, %s2559_s22  ;;  %1098 = vrot.lane.b32.xlu0 %v3454_v56, %s2559_s22 }
 0x1d6   : > { %v1669_v26 = vpop.permute.xlu1 %1668  ;;  %v1667_v27 = vpop.permute.xlu0 %1666  ;;  %v1787_v32 = vld [vmem:[#allocation2 + $0x20] sm:$0xff]  ;;  %v1788_v48 = vld [vmem:[#allocation2 + $0x28] sm:$0xff] }
 0x1d7   : > { %1758 = vst.msk [vmem:[#allocation2 + $0x38] sm:$0xff] %vm1750_vm9, %v1669_v26  ;;  %1757 = vst.msk [vmem:[#allocation2 + $0x30] sm:$0xff] %vm1750_vm9, %v1667_v27  ;;  %v1817_v49 = vpack.c.bf16 %v1788_v48, %v1787_v32 }
 0x1d8   : > { %1132 = vrot.lane.b32.xlu1 %v3463_v6, %s2559_s22  ;;  %1130 = vrot.lane.b32.xlu0 %v3466_v7, %s2559_s22 }
 0x1d9   : > { %2491 = vmatprep.mubr.msk.bf16.mxu0 %vm1858_vm10, %v1817_v49 }
 0x1da   : > { %v1701_v35 = vpop.permute.xlu1 %1700  ;;  %v1699_v19 = vpop.permute.xlu0 %1698  ;;  %v1803_v20 = vld [vmem:[#allocation2 + $0xa0] sm:$0xff]  ;;  %v1804_v38 = vld [vmem:[#allocation2 + $0xa8] sm:$0xff] }
 0x1db   : > { %1774 = vst.msk [vmem:[#allocation2 + $0xb8] sm:$0xff] %vm1750_vm9, %v1701_v35  ;;  %1773 = vst.msk [vmem:[#allocation2 + $0xb0] sm:$0xff] %vm1750_vm9, %v1699_v19  ;;  %v1825_v39 = vpack.c.bf16 %v1804_v38, %v1803_v20 }
 0x1dc   : > { %1104 = vrot.lane.b32.xlu1 %v3540_v33, %s2559_s22  ;;  %1102 = vrot.lane.b32.xlu0 %v3543_v34, %s2559_s22 }
 0x1dd   : > { %2507 = vmatprep.mubr.msk.bf16.mxu1 %vm1858_vm10, %v1825_v39 }
 0x1de   : > { %v900_v52 = vpop.permute.xlu1 %899  ;;  %v898_v53 = vpop.permute.xlu0 %897  ;;  %v1789_v40 = vld [vmem:[#allocation2 + $0x30] sm:$0xff]  ;;  %v1790_v41 = vld [vmem:[#allocation2 + $0x38] sm:$0xff] }
 0x1df   : > { %987 = vst.msk [vmem:[#allocation2 + $0x48] sm:$0xff] %vm977_vm5, %v900_v52  ;;  %986 = vst.msk [vmem:[#allocation2 + $0x40] sm:$0xff] %vm977_vm5, %v898_v53  ;;  %v1818_v4 = vpack.c.bf16 %v1790_v41, %v1789_v40 }
 0x1e0   : > { %1136 = vrot.lane.b32.xlu1 %v3553_v22, %s2559_s22  ;;  %1134 = vrot.lane.b32.xlu0 %v3556_v23, %s2559_s22 }
 0x1e1   : > { %2492 = vmatmul.mubr.msk.bf16.gmra.mrb[4].mxu0 %vm1858_vm10, %v1818_v4 }
 0x1e2   : > { %v932_v47 = vpop.permute.xlu1 %931  ;;  %v930_v36 = vpop.permute.xlu0 %929  ;;  %v1805_v37 = vld [vmem:[#allocation2 + $0xb0] sm:$0xff]  ;;  %v1806_v21 = vld [vmem:[#allocation2 + $0xb8] sm:$0xff] }
 0x1e3   : > { %1003 = vst.msk [vmem:[#allocation2 + $0xc8] sm:$0xff] %vm977_vm5, %v932_v47  ;;  %1002 = vst.msk [vmem:[#allocation2 + $0xc0] sm:$0xff] %vm977_vm5, %v930_v36  ;;  %v1826_v60 = vpack.c.bf16 %v1806_v21, %v1805_v37 }
 0x1e4   : > { %1294 = vrot.lane.b32.xlu1 %v2356_v5, %s2560_s23  ;;  %1292 = vrot.lane.b32.xlu0 %v2355_v46, %s2560_s23 }
 0x1e5   : > { %2508 = vmatmul.mubr.msk.bf16.gmra.mrb[4].mxu1 %vm1858_vm10, %v1826_v60 }
 0x1e6   : > { %v904_v12 = vpop.permute.xlu1 %903  ;;  %v902_v16 = vpop.permute.xlu0 %901 }
 0x1e7   : > { %989 = vst.msk [vmem:[#allocation2 + $0x58] sm:$0xff] %vm977_vm5, %v904_v12  ;;  %988 = vst.msk [vmem:[#allocation2 + $0x50] sm:$0xff] %vm977_vm5, %v902_v16 }
 0x1e8   : > { %1326 = vrot.lane.b32.xlu1 %v3481_v42, %s2560_s23  ;;  %1324 = vrot.lane.b32.xlu0 %v3484_v43, %s2560_s23 }
 0x1ea   : > { %v936_v61 = vpop.permute.xlu1 %935  ;;  %v934_v63 = vpop.permute.xlu0 %933 }
 0x1eb   : > { %1005 = vst.msk [vmem:[#allocation2 + $0xd8] sm:$0xff] %vm977_vm5, %v936_v61  ;;  %1004 = vst.msk [vmem:[#allocation2 + $0xd0] sm:$0xff] %vm977_vm5, %v934_v63 }
 0x1ec   : > { %1298 = vrot.lane.b32.xlu1 %v2358_v13, %s2560_s23  ;;  %1296 = vrot.lane.b32.xlu0 %v2357_v14, %s2560_s23 }
 0x1ee   : > { %v1093_v57 = vpop.permute.xlu1 %1092  ;;  %v1091_v56 = vpop.permute.xlu0 %1090 }
 0x1ef   : > { %1180 = vst.msk [vmem:[#allocation2 + $0x48] sm:$0xff] %vm1170_vm6, %v1093_v57  ;;  %1179 = vst.msk [vmem:[#allocation2 + $0x40] sm:$0xff] %vm1170_vm6, %v1091_v56 }
 0x1f0   : > { %1330 = vrot.lane.b32.xlu1 %v2374_v29, %s2560_s23  ;;  %1328 = vrot.lane.b32.xlu0 %v2373_v30, %s2560_s23 }
 0x1f2   : > { %v1125_v62 = vpop.permute.xlu1 %1124  ;;  %v1123_v18 = vpop.permute.xlu0 %1122 }
 0x1f3   : > { %1196 = vst.msk [vmem:[#allocation2 + $0xc8] sm:$0xff] %vm1170_vm6, %v1125_v62  ;;  %1195 = vst.msk [vmem:[#allocation2 + $0xc0] sm:$0xff] %vm1170_vm6, %v1123_v18 }
 0x1f4   : > { %1487 = vrot.lane.b32.xlu1 %v3503_v28, %s2561_s24  ;;  %1485 = vrot.lane.b32.xlu0 %v3506_v31, %s2561_s24 }
 0x1f6   : > { %v1097_v6 = vpop.permute.xlu1 %1096  ;;  %v1095_v7 = vpop.permute.xlu0 %1094 }
 0x1f7   : > { %1182 = vst.msk [vmem:[#allocation2 + $0x58] sm:$0xff] %vm1170_vm6, %v1097_v6  ;;  %1181 = vst.msk [vmem:[#allocation2 + $0x50] sm:$0xff] %vm1170_vm6, %v1095_v7 }
 0x1f8   : > { %1519 = vrot.lane.b32.xlu1 %v3515_v1, %s2561_s24  ;;  %1517 = vrot.lane.b32.xlu0 %v3518_v24, %s2561_s24 }
 0x1fa   : > { %v1129_v0 = vpop.permute.xlu1 %1128  ;;  %v1127_v2 = vpop.permute.xlu0 %1126 }
 0x1fb   : > { %1198 = vst.msk [vmem:[#allocation2 + $0xd8] sm:$0xff] %vm1170_vm6, %v1129_v0  ;;  %1197 = vst.msk [vmem:[#allocation2 + $0xd0] sm:$0xff] %vm1170_vm6, %v1127_v2 }
 0x1fc   : > { %1491 = vrot.lane.b32.xlu1 %v2390_v50, %s2561_s24  ;;  %1489 = vrot.lane.b32.xlu0 %v2389_v51, %s2561_s24 }
 0x1fe   : > { %v1287_v42 = vpop.permute.xlu1 %1286  ;;  %v1285_v43 = vpop.permute.xlu0 %1284 }
 0x1ff   : > { %1374 = vst.msk [vmem:[#allocation2 + $0x48] sm:$0xff] %vm1364_vm7, %v1287_v42  ;;  %1373 = vst.msk [vmem:[#allocation2 + $0x40] sm:$0xff] %vm1364_vm7, %v1285_v43 }
 0x200   : > { %1523 = vrot.lane.b32.xlu1 %v2406_v8, %s2561_s24  ;;  %1521 = vrot.lane.b32.xlu0 %v2405_v9, %s2561_s24 }
 0x202   : > { %v1319_v15 = vpop.permute.xlu1 %1318  ;;  %v1317_v17 = vpop.permute.xlu0 %1316 }
 0x203   : > { %1390 = vst.msk [vmem:[#allocation2 + $0xc8] sm:$0xff] %vm1364_vm7, %v1319_v15  ;;  %1389 = vst.msk [vmem:[#allocation2 + $0xc0] sm:$0xff] %vm1364_vm7, %v1317_v17 }
 0x204   : > { %1680 = vrot.lane.b32.xlu1 %v3540_v33, %s2562_s4  ;;  %1678 = vrot.lane.b32.xlu0 %v3543_v34, %s2562_s4 }
 0x206   : > { %v1291_v54 = vpop.permute.xlu1 %1290  ;;  %v1289_v55 = vpop.permute.xlu0 %1288 }
 0x207   : > { %1376 = vst.msk [vmem:[#allocation2 + $0x58] sm:$0xff] %vm1364_vm7, %v1291_v54  ;;  %1375 = vst.msk [vmem:[#allocation2 + $0x50] sm:$0xff] %vm1364_vm7, %v1289_v55  ;;  %v3685_v54 = vld [vmem:[%s3784_s2] ss:$0 sm:$0xff] }
 0x208   : > { %1712 = vrot.lane.b32.xlu1 %v3553_v22, %s2562_s4  ;;  %1710 = vrot.lane.b32.xlu0 %v3556_v23, %s2562_s4 }
 0x20a   : > { %v1323_v28 = vpop.permute.xlu1 %1322  ;;  %v1321_v31 = vpop.permute.xlu0 %1320 }
 0x20b   : > { %1392 = vst.msk [vmem:[#allocation2 + $0xd8] sm:$0xff] %vm1364_vm7, %v1323_v28  ;;  %1391 = vst.msk [vmem:[#allocation2 + $0xd0] sm:$0xff] %vm1364_vm7, %v1321_v31 }
 0x20c   : > { %1684 = vrot.lane.b32.xlu1 %v2422_v58, %s2562_s4  ;;  %1682 = vrot.lane.b32.xlu0 %v2421_v59, %s2562_s4 }
 0x20e   : > { %v1480_v1 = vpop.permute.xlu1 %1479  ;;  %v1478_v24 = vpop.permute.xlu0 %1477 }
 0x20f   : > { %1567 = vst.msk [vmem:[#allocation2 + $0x48] sm:$0xff] %vm1557_vm8, %v1480_v1  ;;  %1566 = vst.msk [vmem:[#allocation2 + $0x40] sm:$0xff] %vm1557_vm8, %v1478_v24 }
 0x210   : > { %1716 = vrot.lane.b32.xlu1 %v2438_v10, %s2562_s4  ;;  %1714 = vrot.lane.b32.xlu0 %v2437_v11, %s2562_s4 }
 0x212   : > { %v1512_v25 = vpop.permute.xlu1 %1511  ;;  %v1510_v3 = vpop.permute.xlu0 %1509 }
 0x213   : > { %1583 = vst.msk [vmem:[#allocation2 + $0xc8] sm:$0xff] %vm1557_vm8, %v1512_v25  ;;  %1582 = vst.msk [vmem:[#allocation2 + $0xc0] sm:$0xff] %vm1557_vm8, %v1510_v3 }
 0x216   : > { %v1484_v44 = vpop.permute.xlu1 %1483  ;;  %v1482_v45 = vpop.permute.xlu0 %1481 }
 0x217   : > { %1569 = vst.msk [vmem:[#allocation2 + $0x58] sm:$0xff] %vm1557_vm8, %v1484_v44  ;;  %1568 = vst.msk [vmem:[#allocation2 + $0x50] sm:$0xff] %vm1557_vm8, %v1482_v45 }
 0x21a   : > { %v1516_v26 = vpop.permute.xlu1 %1515  ;;  %v1514_v27 = vpop.permute.xlu0 %1513 }
 0x21b   : > { %1585 = vst.msk [vmem:[#allocation2 + $0xd8] sm:$0xff] %vm1557_vm8, %v1516_v26  ;;  %1584 = vst.msk [vmem:[#allocation2 + $0xd0] sm:$0xff] %vm1557_vm8, %v1514_v27 }
 0x21e   : > { %v1673_v32 = vpop.permute.xlu1 %1672  ;;  %v1671_v48 = vpop.permute.xlu0 %1670 }
 0x21f   : > { %1760 = vst.msk [vmem:[#allocation2 + $0x48] sm:$0xff] %vm1750_vm9, %v1673_v32  ;;  %1759 = vst.msk [vmem:[#allocation2 + $0x40] sm:$0xff] %vm1750_vm9, %v1671_v48 }
 0x222   : > { %v1705_v49 = vpop.permute.xlu1 %1704  ;;  %v1703_v33 = vpop.permute.xlu0 %1702 }
 0x223   : > { %1776 = vst.msk [vmem:[#allocation2 + $0xc8] sm:$0xff] %vm1750_vm9, %v1705_v49  ;;  %1775 = vst.msk [vmem:[#allocation2 + $0xc0] sm:$0xff] %vm1750_vm9, %v1703_v33 }
 0x226   : > { %v1677_v34 = vpop.permute.xlu1 %1676  ;;  %v1675_v35 = vpop.permute.xlu0 %1674  ;;  %v1791_v19 = vld [vmem:[#allocation2 + $0x40] sm:$0xff]  ;;  %v1792_v20 = vld [vmem:[#allocation2 + $0x48] sm:$0xff] }
 0x227   : > { %1762 = vst.msk [vmem:[#allocation2 + $0x58] sm:$0xff] %vm1750_vm9, %v1677_v34  ;;  %1761 = vst.msk [vmem:[#allocation2 + $0x50] sm:$0xff] %vm1750_vm9, %v1675_v35  ;;  %v1819_v38 = vpack.c.bf16 %v1792_v20, %v1791_v19 }
 0x229   : > { %2495 = vmatprep.mubr.msk.bf16.mxu0 %vm1858_vm10, %v1819_v38 }
 0x22a   : > { %v1709_v39 = vpop.permute.xlu1 %1708  ;;  %v1707_v22 = vpop.permute.xlu0 %1706  ;;  %v1807_v23 = vld [vmem:[#allocation2 + $0xc0] sm:$0xff]  ;;  %v1808_v52 = vld [vmem:[#allocation2 + $0xc8] sm:$0xff] }
 0x22b   : > { %1778 = vst.msk [vmem:[#allocation2 + $0xd8] sm:$0xff] %vm1750_vm9, %v1709_v39  ;;  %1777 = vst.msk [vmem:[#allocation2 + $0xd0] sm:$0xff] %vm1750_vm9, %v1707_v22  ;;  %v1827_v53 = vpack.c.bf16 %v1808_v52, %v1807_v23 }
 0x22d   : > { %2511 = vmatprep.mubr.msk.bf16.mxu1 %vm1858_vm10, %v1827_v53 }
 0x22e   : > { %v747_v40 = vpop.permute.xlu1 %746  ;;  %v745_v41 = vpop.permute.xlu0 %744  ;;  %v1793_v4 = vld [vmem:[#allocation2 + $0x50] sm:$0xff]  ;;  %v1794_v5 = vld [vmem:[#allocation2 + $0x58] sm:$0xff] }
 0x22f   : > { %814 = vst.msk [vmem:[#allocation2 + $0xe8] sm:$0xff] %vm784_vm3, %v747_v40  ;;  %813 = vst.msk [vmem:[#allocation2 + $0xe0] sm:$0xff] %vm784_vm3, %v745_v41  ;;  %v1820_v46 = vpack.c.bf16 %v1794_v5, %v1793_v4 }
 0x231   : > { %2496 = vmatmul.mubr.msk.bf16.gmra.mrb[8].mxu0 %vm1858_vm10, %v1820_v46 }
 0x232   : > { %v751_v47 = vpop.permute.xlu1 %750  ;;  %v749_v36 = vpop.permute.xlu0 %748  ;;  %v1809_v37 = vld [vmem:[#allocation2 + $0xd0] sm:$0xff]  ;;  %v1810_v21 = vld [vmem:[#allocation2 + $0xd8] sm:$0xff] }
 0x233   : > { %816 = vst.msk [vmem:[#allocation2 + $0xf8] sm:$0xff] %vm784_vm3, %v751_v47  ;;  %815 = vst.msk [vmem:[#allocation2 + $0xf0] sm:$0xff] %vm784_vm3, %v749_v36  ;;  %v1828_v60 = vpack.c.bf16 %v1810_v21, %v1809_v37 }
 0x235   : > { %2512 = vmatmul.mubr.msk.bf16.gmra.mrb[8].mxu1 %vm1858_vm10, %v1828_v60 }
 0x236   : > { %v908_v12 = vpop.permute.xlu1 %907  ;;  %v906_v16 = vpop.permute.xlu0 %905 }
 0x237   : > { %991 = vst.msk [vmem:[#allocation2 + $0x68] sm:$0xff] %vm977_vm5, %v908_v12  ;;  %990 = vst.msk [vmem:[#allocation2 + $0x60] sm:$0xff] %vm977_vm5, %v906_v16 }
 0x23a   : > { %v940_v13 = vpop.permute.xlu1 %939  ;;  %v938_v14 = vpop.permute.xlu0 %937 }
 0x23b   : > { %1007 = vst.msk [vmem:[#allocation2 + $0xe8] sm:$0xff] %vm977_vm5, %v940_v13  ;;  %1006 = vst.msk [vmem:[#allocation2 + $0xe0] sm:$0xff] %vm977_vm5, %v938_v14 }
 0x23e   : > { %v912_v61 = vpop.permute.xlu1 %911  ;;  %v910_v63 = vpop.permute.xlu0 %909 }
 0x23f   : > { %993 = vst.msk [vmem:[#allocation2 + $0x78] sm:$0xff] %vm977_vm5, %v912_v61  ;;  %992 = vst.msk [vmem:[#allocation2 + $0x70] sm:$0xff] %vm977_vm5, %v910_v63 }
 0x242   : > { %v944_v29 = vpop.permute.xlu1 %943  ;;  %v942_v30 = vpop.permute.xlu0 %941 }
 0x243   : > { %1009 = vst.msk [vmem:[#allocation2 + $0xf8] sm:$0xff] %vm977_vm5, %v944_v29  ;;  %1008 = vst.msk [vmem:[#allocation2 + $0xf0] sm:$0xff] %vm977_vm5, %v942_v30 }
 0x246   : > { %v1101_v57 = vpop.permute.xlu1 %1100  ;;  %v1099_v56 = vpop.permute.xlu0 %1098 }
 0x247   : > { %1184 = vst.msk [vmem:[#allocation2 + $0x68] sm:$0xff] %vm1170_vm6, %v1101_v57  ;;  %1183 = vst.msk [vmem:[#allocation2 + $0x60] sm:$0xff] %vm1170_vm6, %v1099_v56 }
 0x24a   : > { %v1133_v62 = vpop.permute.xlu1 %1132  ;;  %v1131_v18 = vpop.permute.xlu0 %1130 }
 0x24b   : > { %1200 = vst.msk [vmem:[#allocation2 + $0xe8] sm:$0xff] %vm1170_vm6, %v1133_v62  ;;  %1199 = vst.msk [vmem:[#allocation2 + $0xe0] sm:$0xff] %vm1170_vm6, %v1131_v18 }
 0x24e   : > { %v1105_v6 = vpop.permute.xlu1 %1104  ;;  %v1103_v7 = vpop.permute.xlu0 %1102 }
 0x24f   : > { %1186 = vst.msk [vmem:[#allocation2 + $0x78] sm:$0xff] %vm1170_vm6, %v1105_v6  ;;  %1185 = vst.msk [vmem:[#allocation2 + $0x70] sm:$0xff] %vm1170_vm6, %v1103_v7 }
 0x252   : > { %v1137_v50 = vpop.permute.xlu1 %1136  ;;  %v1135_v51 = vpop.permute.xlu0 %1134 }
 0x253   : > { %1202 = vst.msk [vmem:[#allocation2 + $0xf8] sm:$0xff] %vm1170_vm6, %v1137_v50  ;;  %1201 = vst.msk [vmem:[#allocation2 + $0xf0] sm:$0xff] %vm1170_vm6, %v1135_v51 }
 0x256   : > { %v1295_v0 = vpop.permute.xlu1 %1294  ;;  %v1293_v2 = vpop.permute.xlu0 %1292 }
 0x257   : > { %1378 = vst.msk [vmem:[#allocation2 + $0x68] sm:$0xff] %vm1364_vm7, %v1295_v0  ;;  %1377 = vst.msk [vmem:[#allocation2 + $0x60] sm:$0xff] %vm1364_vm7, %v1293_v2 }
 0x25a   : > { %v1327_v8 = vpop.permute.xlu1 %1326  ;;  %v1325_v9 = vpop.permute.xlu0 %1324 }
 0x25b   : > { %1394 = vst.msk [vmem:[#allocation2 + $0xe8] sm:$0xff] %vm1364_vm7, %v1327_v8  ;;  %1393 = vst.msk [vmem:[#allocation2 + $0xe0] sm:$0xff] %vm1364_vm7, %v1325_v9 }
 0x25e   : > { %v1299_v42 = vpop.permute.xlu1 %1298  ;;  %v1297_v43 = vpop.permute.xlu0 %1296 }
 0x25f   : > { %1380 = vst.msk [vmem:[#allocation2 + $0x78] sm:$0xff] %vm1364_vm7, %v1299_v42  ;;  %1379 = vst.msk [vmem:[#allocation2 + $0x70] sm:$0xff] %vm1364_vm7, %v1297_v43 }
 0x262   : > { %v1331_v15 = vpop.permute.xlu1 %1330  ;;  %v1329_v17 = vpop.permute.xlu0 %1328 }
 0x263   : > { %1396 = vst.msk [vmem:[#allocation2 + $0xf8] sm:$0xff] %vm1364_vm7, %v1331_v15  ;;  %1395 = vst.msk [vmem:[#allocation2 + $0xf0] sm:$0xff] %vm1364_vm7, %v1329_v17 }
 0x264   : > { %v2489_v55 = vpop.f32.mrb[0].mxu0 }
 0x265   : > { %v1954_v58 = vadd.f32 %v2489_v55, %v3685_v54  ;;  %v1945_v59 = vpop.f32.mrb[1].mxu0 }
 0x266   : > { %v1946_v28 = vadd.f32 %v3685_v54, %v1945_v59  ;;  %v1488_v31 = vpop.permute.xlu1 %1487  ;;  %v1486_v10 = vpop.permute.xlu0 %1485 }
 0x267   : > { %v2074_v11 = vmax.f32 %v1954_v58, 0.0  ;;  %1571 = vst.msk [vmem:[#allocation2 + $0x68] sm:$0xff] %vm1557_vm8, %v1488_v31  ;;  %1570 = vst.msk [vmem:[#allocation2 + $0x60] sm:$0xff] %vm1557_vm8, %v1486_v10  ;;  %v2490_v1 = vpop.f32.mrb[2].mxu0 }
 0x268   : > { %v2072_v24 = vmax.f32 %v1946_v28, 0.0  ;;  %v1957_v25 = vadd.f32 %v2490_v1, %v3685_v54  ;;  %v1948_v3 = vpop.f32.mrb[3].mxu0  ;;  %v2505_v44 = vpop.f32.mrb[0].mxu1 }
 0x269   : > { %v1949_v45 = vadd.f32 %v3685_v54, %v1948_v3  ;;  %v2018_v26 = vadd.f32 %v2505_v44, %v3685_v54  ;;  %v2009_v27 = vpop.f32.mrb[1].mxu1 }
 0x26a   : > { %v2104_v32 = vmax.f32 %v2072_v24, %v2074_v11  ;;  %v2075_v48 = vmax.f32 %v1957_v25, 0.0  ;;  %v2010_v49 = vadd.f32 %v3685_v54, %v2009_v27  ;;  %v1520_v33 = vpop.permute.xlu1 %1519  ;;  %v1518_v34 = vpop.permute.xlu0 %1517 }
 0x26b   : > { %v2073_v35 = vmax.f32 %v1949_v45, 0.0  ;;  %v2090_v19 = vmax.f32 %v2018_v26, 0.0  ;;  %1587 = vst.msk [vmem:[#allocation2 + $0xe8] sm:$0xff] %vm1557_vm8, %v1520_v33  ;;  %1586 = vst.msk [vmem:[#allocation2 + $0xe0] sm:$0xff] %vm1557_vm8, %v1518_v34  ;;  %v2506_v20 = vpop.f32.mrb[2].mxu1 }
 0x26c   : > { %2121 = vst.msk [vmem:[#allocation3] sm:$0xff] %vm2120_vm11, %v2104_v32  ;;  %v2088_v38 = vmax.f32 %v2010_v49, 0.0  ;;  %v2021_v39 = vadd.f32 %v2506_v20, %v3685_v54  ;;  %v2012_v22 = vpop.f32.mrb[3].mxu1 }
 0x26d   : > { %v2105_v23 = vmax.f32 %v2073_v35, %v2075_v48  ;;  %v2013_v52 = vadd.f32 %v3685_v54, %v2012_v22 }
 0x26e   : > { %v2112_v53 = vmax.f32 %v2088_v38, %v2090_v19  ;;  %v2091_v40 = vmax.f32 %v2021_v39, 0.0  ;;  %v1492_v41 = vpop.permute.xlu1 %1491  ;;  %v1490_v4 = vpop.permute.xlu0 %1489 }
 0x26f   : > { %2122 = vst.msk [vmem:[#allocation3 + $0x8] sm:$0xff] %vm2120_vm11, %v2105_v23  ;;  %v2089_v5 = vmax.f32 %v2013_v52, 0.0 }
 0x270   : > { %1573 = vst.msk [vmem:[#allocation2 + $0x78] sm:$0xff] %vm1557_vm8, %v1492_v41  ;;  %1572 = vst.msk [vmem:[#allocation2 + $0x70] sm:$0xff] %vm1557_vm8, %v1490_v4 }
 0x271   : > { %2129 = vst.msk [vmem:[#allocation3 + $0x40] sm:$0xff] %vm2120_vm11, %v2112_v53  ;;  %v2113_v46 = vmax.f32 %v2089_v5, %v2091_v40 }
 0x272   : > { %v1524_v47 = vpop.permute.xlu1 %1523  ;;  %v1522_v36 = vpop.permute.xlu0 %1521 }
 0x273   : > { %2130 = vst.msk [vmem:[#allocation3 + $0x48] sm:$0xff] %vm2120_vm11, %v2113_v46 }
 0x274   : > { %1589 = vst.msk [vmem:[#allocation2 + $0xf8] sm:$0xff] %vm1557_vm8, %v1524_v47  ;;  %1588 = vst.msk [vmem:[#allocation2 + $0xf0] sm:$0xff] %vm1557_vm8, %v1522_v36 }
 0x276   : > { %v2137_v37 = vld [vmem:[#allocation3] ss:$2 sm:$0xff]  ;;  %v2153_v21 = vld [vmem:[#allocation3 + $0x1] ss:$2 sm:$0xff]  ;;  %v1681_v60 = vpop.permute.xlu1 %1680  ;;  %v1679_v12 = vpop.permute.xlu0 %1678 }
 0x277   : > { %v2168_v16 = vmax.f32 %v2137_v37, %v2153_v21  ;;  %1764 = vst.msk [vmem:[#allocation2 + $0x68] sm:$0xff] %vm1750_vm9, %v1681_v60  ;;  %1763 = vst.msk [vmem:[#allocation2 + $0x60] sm:$0xff] %vm1750_vm9, %v1679_v12 }
 0x279   : > { %2176 = vst.msk [vmem:[%s3713_s10] sm:$0xff] %vm2120_vm11, %v2168_v16 }
 0x27a   : > { %v2145_v13 = vld [vmem:[#allocation3 + $0x40] ss:$2 sm:$0xff]  ;;  %v2161_v14 = vld [vmem:[#allocation3 + $0x41] ss:$2 sm:$0xff]  ;;  %v1713_v61 = vpop.permute.xlu1 %1712  ;;  %v1711_v63 = vpop.permute.xlu0 %1710 }
 0x27b   : > { %v2172_v29 = vmax.f32 %v2145_v13, %v2161_v14  ;;  %1780 = vst.msk [vmem:[#allocation2 + $0xe8] sm:$0xff] %vm1750_vm9, %v1713_v61  ;;  %1779 = vst.msk [vmem:[#allocation2 + $0xe0] sm:$0xff] %vm1750_vm9, %v1711_v63 }
 0x27d   : > { %2180 = vst.msk [vmem:[%s3713_s10 + $0x20] sm:$0xff] %vm2120_vm11, %v2172_v29 }
 0x27e   : > { %v1685_v30 = vpop.permute.xlu1 %1684  ;;  %v1683_v57 = vpop.permute.xlu0 %1682  ;;  %v1795_v56 = vld [vmem:[#allocation2 + $0x60] sm:$0xff]  ;;  %v1796_v62 = vld [vmem:[#allocation2 + $0x68] sm:$0xff] }
 0x27f   : > { %1766 = vst.msk [vmem:[#allocation2 + $0x78] sm:$0xff] %vm1750_vm9, %v1685_v30  ;;  %1765 = vst.msk [vmem:[#allocation2 + $0x70] sm:$0xff] %vm1750_vm9, %v1683_v57  ;;  %v1821_v18 = vpack.c.bf16 %v1796_v62, %v1795_v56 }
 0x281   : > { %2499 = vmatprep.mubr.msk.bf16.mxu0 %vm1858_vm10, %v1821_v18 }
 0x282   : > { %v1717_v6 = vpop.permute.xlu1 %1716  ;;  %v1715_v7 = vpop.permute.xlu0 %1714  ;;  %v1811_v50 = vld [vmem:[#allocation2 + $0xe0] sm:$0xff]  ;;  %v1812_v51 = vld [vmem:[#allocation2 + $0xe8] sm:$0xff] }
 0x283   : > { %1782 = vst.msk [vmem:[#allocation2 + $0xf8] sm:$0xff] %vm1750_vm9, %v1717_v6  ;;  %1781 = vst.msk [vmem:[#allocation2 + $0xf0] sm:$0xff] %vm1750_vm9, %v1715_v7  ;;  %v1829_v0 = vpack.c.bf16 %v1812_v51, %v1811_v50 }
 0x285   : > { %2515 = vmatprep.mubr.msk.bf16.mxu1 %vm1858_vm10, %v1829_v0 }
 0x286   : > { %v1797_v2 = vld [vmem:[#allocation2 + $0x70] sm:$0xff]  ;;  %v1798_v8 = vld [vmem:[#allocation2 + $0x78] sm:$0xff] }
 0x287   : > { %v1822_v9 = vpack.c.bf16 %v1798_v8, %v1797_v2 }
 0x289   : > { %2500 = vmatmul.mubr.msk.bf16.gmra.mrb[12].mxu0 %vm1858_vm10, %v1822_v9 }
 0x28a   : > { %v1813_v42 = vld [vmem:[#allocation2 + $0xf0] sm:$0xff]  ;;  %v1814_v43 = vld [vmem:[#allocation2 + $0xf8] sm:$0xff] }
 0x28b   : > { %v1830_v15 = vpack.c.bf16 %v1814_v43, %v1813_v42 }
 0x28d   : > { %2516 = vmatmul.mubr.msk.bf16.gmra.mrb[12].mxu1 %vm1858_vm10, %v1830_v15 }
 0x2b4   : > { %v2493_v17 = vpop.f32.mrb[4].mxu0 }
 0x2b5   : > { %v1970_v55 = vadd.f32 %v2493_v17, %v3685_v54  ;;  %v1961_v58 = vpop.f32.mrb[5].mxu0 }
 0x2b6   : > { %v1962_v59 = vadd.f32 %v3685_v54, %v1961_v58  ;;  %v2494_v28 = vpop.f32.mrb[6].mxu0 }
 0x2b7   : > { %v2078_v31 = vmax.f32 %v1970_v55, 0.0  ;;  %v1973_v10 = vadd.f32 %v2494_v28, %v3685_v54  ;;  %v1964_v11 = vpop.f32.mrb[7].mxu0 }
 0x2b8   : > { %v2076_v1 = vmax.f32 %v1962_v59, 0.0  ;;  %v1965_v24 = vadd.f32 %v3685_v54, %v1964_v11  ;;  %v2509_v25 = vpop.f32.mrb[4].mxu1 }
 0x2b9   : > { %v2079_v3 = vmax.f32 %v1973_v10, 0.0  ;;  %v2034_v44 = vadd.f32 %v2509_v25, %v3685_v54  ;;  %v2025_v45 = vpop.f32.mrb[5].mxu1 }
 0x2ba   : > { %v2106_v26 = vmax.f32 %v2076_v1, %v2078_v31  ;;  %v2077_v27 = vmax.f32 %v1965_v24, 0.0  ;;  %v2026_v32 = vadd.f32 %v3685_v54, %v2025_v45  ;;  %v2510_v48 = vpop.f32.mrb[6].mxu1 }
 0x2bb   : > { %v2094_v49 = vmax.f32 %v2034_v44, 0.0  ;;  %v2037_v33 = vadd.f32 %v2510_v48, %v3685_v54  ;;  %v2028_v34 = vpop.f32.mrb[7].mxu1 }
 0x2bc   : > { %2123 = vst.msk [vmem:[#allocation3 + $0x10] sm:$0xff] %vm2120_vm11, %v2106_v26  ;;  %v2107_v35 = vmax.f32 %v2077_v27, %v2079_v3  ;;  %v2092_v19 = vmax.f32 %v2026_v32, 0.0  ;;  %v2029_v20 = vadd.f32 %v3685_v54, %v2028_v34 }
 0x2bd   : > { %v2095_v38 = vmax.f32 %v2037_v33, 0.0 }
 0x2be   : > { %2124 = vst.msk [vmem:[#allocation3 + $0x18] sm:$0xff] %vm2120_vm11, %v2107_v35  ;;  %v2114_v39 = vmax.f32 %v2092_v19, %v2094_v49  ;;  %v2093_v22 = vmax.f32 %v2029_v20, 0.0 }
 0x2c0   : > { %2131 = vst.msk [vmem:[#allocation3 + $0x50] sm:$0xff] %vm2120_vm11, %v2114_v39  ;;  %v2115_v23 = vmax.f32 %v2093_v22, %v2095_v38 }
 0x2c2   : > { %2132 = vst.msk [vmem:[#allocation3 + $0x58] sm:$0xff] %vm2120_vm11, %v2115_v23 }
 0x2c5   : > { %v2139_v52 = vld [vmem:[#allocation3 + $0x10] ss:$2 sm:$0xff]  ;;  %v2155_v53 = vld [vmem:[#allocation3 + $0x11] ss:$2 sm:$0xff] }
 0x2c6   : > { %v2169_v40 = vmax.f32 %v2139_v52, %v2155_v53 }
 0x2c8   : > { %2177 = vst.msk [vmem:[%s3713_s10 + $0x8] sm:$0xff] %vm2120_vm11, %v2169_v40 }
 0x2c9   : > { %v2147_v41 = vld [vmem:[#allocation3 + $0x50] ss:$2 sm:$0xff]  ;;  %v2163_v4 = vld [vmem:[#allocation3 + $0x51] ss:$2 sm:$0xff] }
 0x2ca   : > { %v2173_v5 = vmax.f32 %v2147_v41, %v2163_v4 }
 0x2cc   : > { %2181 = vst.msk [vmem:[%s3713_s10 + $0x28] sm:$0xff] %vm2120_vm11, %v2173_v5 }
 0x304   : > { %v2497_v46 = vpop.f32.mrb[8].mxu0 }
 0x305   : > { %v1986_v47 = vadd.f32 %v2497_v46, %v3685_v54  ;;  %v1977_v36 = vpop.f32.mrb[9].mxu0 }
 0x306   : > { %v1978_v37 = vadd.f32 %v3685_v54, %v1977_v36  ;;  %v2498_v21 = vpop.f32.mrb[10].mxu0 }
 0x307   : > { %v2082_v60 = vmax.f32 %v1986_v47, 0.0  ;;  %v1989_v12 = vadd.f32 %v2498_v21, %v3685_v54  ;;  %v1980_v16 = vpop.f32.mrb[11].mxu0 }
 0x308   : > { %v2080_v13 = vmax.f32 %v1978_v37, 0.0  ;;  %v1981_v14 = vadd.f32 %v3685_v54, %v1980_v16  ;;  %v2513_v61 = vpop.f32.mrb[8].mxu1 }
 0x309   : > { %v2083_v63 = vmax.f32 %v1989_v12, 0.0  ;;  %v2050_v29 = vadd.f32 %v2513_v61, %v3685_v54  ;;  %v2041_v30 = vpop.f32.mrb[9].mxu1 }
 0x30a   : > { %v2108_v57 = vmax.f32 %v2080_v13, %v2082_v60  ;;  %v2081_v56 = vmax.f32 %v1981_v14, 0.0  ;;  %v2042_v62 = vadd.f32 %v3685_v54, %v2041_v30  ;;  %v2514_v18 = vpop.f32.mrb[10].mxu1 }
 0x30b   : > { %v2098_v6 = vmax.f32 %v2050_v29, 0.0  ;;  %v2053_v7 = vadd.f32 %v2514_v18, %v3685_v54  ;;  %v2044_v50 = vpop.f32.mrb[11].mxu1 }
 0x30c   : > { %2125 = vst.msk [vmem:[#allocation3 + $0x20] sm:$0xff] %vm2120_vm11, %v2108_v57  ;;  %v2109_v51 = vmax.f32 %v2081_v56, %v2083_v63  ;;  %v2096_v0 = vmax.f32 %v2042_v62, 0.0  ;;  %v2045_v2 = vadd.f32 %v3685_v54, %v2044_v50 }
 0x30d   : > { %v2099_v8 = vmax.f32 %v2053_v7, 0.0 }
 0x30e   : > { %2126 = vst.msk [vmem:[#allocation3 + $0x28] sm:$0xff] %vm2120_vm11, %v2109_v51  ;;  %v2116_v9 = vmax.f32 %v2096_v0, %v2098_v6  ;;  %v2097_v42 = vmax.f32 %v2045_v2, 0.0 }
 0x310   : > { %2133 = vst.msk [vmem:[#allocation3 + $0x60] sm:$0xff] %vm2120_vm11, %v2116_v9  ;;  %v2117_v43 = vmax.f32 %v2097_v42, %v2099_v8 }
 0x312   : > { %2134 = vst.msk [vmem:[#allocation3 + $0x68] sm:$0xff] %vm2120_vm11, %v2117_v43 }
 0x315   : > { %v2141_v15 = vld [vmem:[#allocation3 + $0x20] ss:$2 sm:$0xff]  ;;  %v2157_v17 = vld [vmem:[#allocation3 + $0x21] ss:$2 sm:$0xff] }
 0x316   : > { %v2170_v55 = vmax.f32 %v2141_v15, %v2157_v17 }
 0x318   : > { %2178 = vst.msk [vmem:[%s3713_s10 + $0x10] sm:$0xff] %vm2120_vm11, %v2170_v55 }
 0x319   : > { %v2149_v58 = vld [vmem:[#allocation3 + $0x60] ss:$2 sm:$0xff]  ;;  %v2165_v59 = vld [vmem:[#allocation3 + $0x61] ss:$2 sm:$0xff] }
 0x31a   : > { %v2174_v28 = vmax.f32 %v2149_v58, %v2165_v59 }
 0x31c   : > { %2182 = vst.msk [vmem:[%s3713_s10 + $0x30] sm:$0xff] %vm2120_vm11, %v2174_v28 }
 0x35c   : > { %v2501_v31 = vpop.f32.mrb[12].mxu0 }
 0x35d   : > { %v2002_v10 = vadd.f32 %v2501_v31, %v3685_v54  ;;  %v1993_v11 = vpop.f32.mrb[13].mxu0 }
 0x35e   : > { %v1994_v1 = vadd.f32 %v3685_v54, %v1993_v11  ;;  %v2502_v24 = vpop.f32.mrb[14].mxu0 }
 0x35f   : > { %v2086_v25 = vmax.f32 %v2002_v10, 0.0  ;;  %v2005_v3 = vadd.f32 %v2502_v24, %v3685_v54  ;;  %v1996_v44 = vpop.f32.mrb[15].mxu0 }
 0x360   : > { %v2084_v45 = vmax.f32 %v1994_v1, 0.0  ;;  %v1997_v26 = vadd.f32 %v3685_v54, %v1996_v44  ;;  %v2517_v27 = vpop.f32.mrb[12].mxu1 }
 0x361   : > { %v2087_v32 = vmax.f32 %v2005_v3, 0.0  ;;  %v2066_v48 = vadd.f32 %v2517_v27, %v3685_v54  ;;  %v2057_v49 = vpop.f32.mrb[13].mxu1 }
 0x362   : > { %v2110_v33 = vmax.f32 %v2084_v45, %v2086_v25  ;;  %v2085_v34 = vmax.f32 %v1997_v26, 0.0  ;;  %v2058_v35 = vadd.f32 %v3685_v54, %v2057_v49  ;;  %v2518_v19 = vpop.f32.mrb[14].mxu1 }
 0x363   : > { %v2102_v20 = vmax.f32 %v2066_v48, 0.0  ;;  %v2069_v38 = vadd.f32 %v2518_v19, %v3685_v54  ;;  %v2060_v39 = vpop.f32.mrb[15].mxu1 }
 0x364   : > { %2127 = vst.msk [vmem:[#allocation3 + $0x30] sm:$0xff] %vm2120_vm11, %v2110_v33  ;;  %v2111_v22 = vmax.f32 %v2085_v34, %v2087_v32  ;;  %v2100_v23 = vmax.f32 %v2058_v35, 0.0  ;;  %v2061_v52 = vadd.f32 %v3685_v54, %v2060_v39 }
 0x365   : > { %v2103_v53 = vmax.f32 %v2069_v38, 0.0 }
 0x366   : > { %2128 = vst.msk [vmem:[#allocation3 + $0x38] sm:$0xff] %vm2120_vm11, %v2111_v22  ;;  %v2118_v40 = vmax.f32 %v2100_v23, %v2102_v20  ;;  %v2101_v41 = vmax.f32 %v2061_v52, 0.0 }
 0x368   : > { %2135 = vst.msk [vmem:[#allocation3 + $0x70] sm:$0xff] %vm2120_vm11, %v2118_v40  ;;  %v2119_v4 = vmax.f32 %v2101_v41, %v2103_v53 }
 0x36a   : > { %2136 = vst.msk [vmem:[#allocation3 + $0x78] sm:$0xff] %vm2120_vm11, %v2119_v4 }
 0x36d   : > { %v2143_v5 = vld [vmem:[#allocation3 + $0x30] ss:$2 sm:$0xff]  ;;  %v2159_v46 = vld [vmem:[#allocation3 + $0x31] ss:$2 sm:$0xff] }
 0x36e   : > { %v2171_v47 = vmax.f32 %v2143_v5, %v2159_v46 }
 0x370   : > { %2179 = vst.msk [vmem:[%s3713_s10 + $0x18] sm:$0xff] %vm2120_vm11, %v2171_v47 }
 0x371   : > { %v2151_v36 = vld [vmem:[#allocation3 + $0x70] ss:$2 sm:$0xff]  ;;  %v2167_v37 = vld [vmem:[#allocation3 + $0x71] ss:$2 sm:$0xff] }
 0x372   : > { %v2175_v21 = vmax.f32 %v2151_v36, %v2167_v37 }
 0x374   : > { %2183 = vst.msk [vmem:[%s3713_s10 + $0x38] sm:$0xff] %vm2120_vm11, %v2175_v21 }
 0x375 PF: > { %s13_s12 = sadd.s32 1, %s2553_s12  }
 0x376   : > { %p10_p4 = scmp.ge.s32.totalorder %s13_s12, 4  }
 0x378   :  { %12 = sbr.rel (!%p10_p4) target bundleno = 1 (0x1), region = 79 }

// kernel: convformer_forward.11
= control target key start
LH: loop header
LB: loop body
LE: loop exit
PB: predicated region body
PF: predicated region fallthrough
CT: control target
= control target key end

     0   :  { %v245_v1 = vmov 0.0   ;;  %vm246_vm0 = vmmov 0   ;;  %vm18_vm1 = vcmask 1043456   ;;  %s313_s0 = inlined_call_operand.vmem [shape: f32[2,4,128], index: 0, kind: input, shape index: {}]   ;;  %s314_s1 = inlined_call_operand.vmem [shape: bf16[128,128], index: 1, kind: input, shape index: {}]   ;;  %s315_s2 = inlined_call_operand.vmem [shape: f32[1,128], index: 2, kind: input, shape index: {}]   ;;  %s316_s3 = inlined_call_operand.hbm [shape: f32[2,128], index: 3, kind: output, shape index: {}]  }
   0x1   :  { %v213_v0 = vld [vmem:[%s314_s1] sm:$0xff]   ;;  %190 = vmatprep.subr.bf16.mxu0 %v245_v1  ;;  %v214_v2 = vld [vmem:[%s314_s1 + $0x8] sm:$0xff]   ;;  %206 = vmatprep.mubr.msk.bf16.mxu0 %vm246_vm0, %v245_v1  ;;  %v215_v3 = vld [vmem:[%s314_s1 + $0x10] sm:$0xff]  }
   0x2   :  { %191 = vmatpush3.bf16.msra.mxu0 %v213_v0  ;;  %v16_v4 = vld [vmem:[%s313_s0] sm:$0xf]  ;;  %v17_v5 = vld [vmem:[%s313_s0 + $0x4] sm:$0xf] }
   0x3   :  { %192 = vmatprep.subr.bf16.mxu0 %v245_v1  ;;  %v19_v6 = vsel %vm18_vm1, %v16_v4, 0.0  ;;  %v26_v7 = vsel %vm18_vm1, %v17_v5, 0.0 }
   0x6   :  { %193 = vmatpush3.bf16.msra.mxu0 %v214_v2 }
   0x7   :  { %194 = vmatprep.subr.bf16.mxu0 %v245_v1 }
   0x8   :  { %8 = vsyncpa [#allocation3], 0  ;;  %v216_v8 = vld [vmem:[%s314_s1 + $0x18] sm:$0xff]   ;;  %v20_v9 = vrot.slane %v19_v6, 4  ;;  %v27_v10 = vrot.slane %v26_v7, 4  ;;  %v217_v13 = vld [vmem:[%s314_s1 + $0x20] sm:$0xff]  }
   0x9   :  { %v218_v18 = vld [vmem:[%s314_s1 + $0x28] sm:$0xff]   ;;  %v219_v23 = vld [vmem:[%s314_s1 + $0x30] sm:$0xff]   ;;  %vm65_vm2 = vcmask 1041409   ;;  %v220_v28 = vld [vmem:[%s314_s1 + $0x38] sm:$0xff]   ;;  %s247_s6 = smov [#allocation2]  }
   0xa   :  { %195 = vmatpush3.bf16.msra.mxu0 %v215_v3  ;;  %v21_v11 = vadd.f32 %v20_v9, %v19_v6  ;;  %v28_v12 = vadd.f32 %v27_v10, %v26_v7  ;;  %v172_v33 = vld [vmem:[%s315_s2] ss:$0 sm:$0xff]  ;;  %s164_s7 = sshll.u32 %s247_s6, 4  ;;  %s165_s7 = int_to_ptr.vmem [resolvable:$true] %s164_s7 }
   0xb   :  { %196 = vmatprep.subr.bf16.mxu0 %v245_v1  ;;  %s221_s1 = scalar_lea.vmem %s165_s7, 32  ;;  %p226_p1 = scmp.lt.s32.totalorder %s165_s7, %s165_s7 }
   0xc   :  { %v22_v14 = vrot.slane %v21_v11, 2  ;;  %v29_v15 = vrot.slane %v28_v12, 2  ;;  %p222_p0 = scmp.ne.s32.totalorder %s165_s7, %s221_s1  ;;  %p227_p2 = scmp.lt.s32.totalorder %s221_s1, %s221_s1 }
   0xe   :  { %197 = vmatpush3.bf16.msra.mxu0 %v216_v8  ;;  %v23_v16 = vadd.f32 %v22_v14, %v21_v11  ;;  %v30_v17 = vadd.f32 %v29_v15, %v28_v12  ;;  %p228_p3 = por %p227_p2, %p226_p1 }
   0xf   :  { %198 = vmatprep.subr.bf16.mxu0 %v245_v1 }
  0x10   :  { %v24_v19 = vrot.slane %v23_v16, 1  ;;  %v31_v20 = vrot.slane %v30_v17, 1  ;;  %p229_p4 = pnand %p228_p3, %p222_p0 }
  0x12   :  { %199 = vmatpush3.bf16.msra.mxu0 %v217_v13  ;;  %v25_v21 = vadd.f32 %v24_v19, %v23_v16  ;;  %v32_v22 = vadd.f32 %v31_v20, %v30_v17 }
  0x13   :  { %200 = vmatprep.subr.bf16.mxu0 %v245_v1 }
  0x14   :  { %v34_v24 = vmul.f32 0.25, %v25_v21  ;;  %v35_v25 = vmul.f32 0.25, %v32_v22 }
  0x16   :  { %201 = vmatpush3.bf16.msra.mxu0 %v218_v18  ;;  %v36_v26 = vpack.c.bf16 %v34_v24, %v34_v24  ;;  %v37_v27 = vpack.c.bf16 %v35_v25, %v35_v25 }
  0x17   :  { %202 = vmatprep.subr.bf16.mxu0 %v245_v1 }
  0x18   :  { %v63_v29 = vunpack.c.l.b16 %v36_v26  ;;  %v64_v30 = vunpack.c.l.b16 %v37_v27 }
  0x1a   :  { %203 = vmatpush3.bf16.msra.mxu0 %v219_v23  ;;  %v66_v31 = vsel %vm65_vm2, %v64_v30, %v63_v29 }
  0x1b   :  { %204 = vmatprep.subr.bf16.mxu0 %v245_v1  ;;  %v67_v32 = vpack.c.b16 %v66_v31, %v66_v31 }
  0x1e   :  { %205 = vmatpush3.bf16.msra.mxu0 %v220_v28 }
  0x21   :  { %207 = vmatmul.mubr.bf16.vlgmr.msra.gmra.mrb[0].mxu0 %v67_v32 }
  0xf4   :  { %v151_v34 = vpop.f32.mrb[0].mxu0 }
  0xf5   :  { %v152_v35 = vadd.f32 %v172_v33, %v151_v34  ;;  %v208_v36 = vpop.f32.mrb[1].mxu0 }
  0xf6   :  { %v154_v37 = vpop.f32.mrb[2].mxu0 }
  0xf7   :  { %157 = vst [vmem:[#allocation2] sm:$0x3] %v152_v35  ;;  %v209_v38 = vpop.f32.mrb[3].mxu0 }
  0xf8   :  { %232 = shalt.err (!%p229_p4)
}
  0xf9   :  { %s233_s2 = scalar_lea.hbm %s316_s3, 32 }
  0xfa   :  { %p234_p5 = scmp.ne.s32.totalorder %s316_s3, %s233_s2  ;;  %p237_p6 = scmp.lt.u32.totalorder %s233_s2, %s316_s3 }
  0xfc   :  { %p239_p7 = pnand %p237_p6, %p234_p5 }
  0xfe   :  { %242 = shalt.err (!%p239_p7)
}
  0xff   :  { %167 = dma.vmem_to_hbm [thread:$0]  %s165_s7, 32, %s316_s3, [#allocation3]  }
 0x100   :  { %243 = dma.done.wait [#allocation3], 32  }
 0x101   :  { %244 = vsyncadd [#allocation3], 4294967264 }
 0x102   :  { %171 = vsyncpa [#allocation3], 1 }

// kernel: convformer_forward.9
= control target key start
LH: loop header
LB: loop body
LE: loop exit
PB: predicated region body
PF: predicated region fallthrough
CT: control target
= control target key end

     0   :  { %s5411_s25 = smov 0   ;;  %s6606_s0 = inlined_call_operand.vmem [shape: f32[2,4,128], index: 0, kind: input, shape index: {}]   ;;  %s6607_s1 = inlined_call_operand.vmem [shape: bf16[128,384], index: 1, kind: input, shape index: {}]   ;;  %s6608_s2 = inlined_call_operand.vmem [shape: f32[1,384], index: 2, kind: input, shape index: {}]   ;;  %s6609_s3 = inlined_call_operand.vmem [shape: bf16[128,128], index: 3, kind: input, shape index: {}]   ;;  %s6610_s4 = inlined_call_operand.vmem [shape: f32[1,128], index: 4, kind: input, shape index: {}]   ;;  %s6611_s5 = inlined_call_operand.vmem [shape: f32[1,128], index: 5, kind: input, shape index: {}]   ;;  %s6612_s6 = inlined_call_operand.vmem [shape: f32[1,128], index: 6, kind: input, shape index: {}]   ;;  %s6613_s7 = inlined_call_operand.vmem [shape: bf16[128,2048], index: 7, kind: input, shape index: {}]   ;;  %s6614_s8 = inlined_call_operand.vmem [shape: f32[1,2048], index: 8, kind: input, shape index: {}]   ;;  %s6615_s9 = inlined_call_operand.vmem [shape: bf16[2048,128], index: 9, kind: input, shape index: {}]   ;;  %s6616_s10 = inlined_call_operand.vmem [shape: f32[1,128], index: 10, kind: input, shape index: {}]   ;;  %s6617_s11 = inlined_call_operand.vmem [shape: f32[1,128], index: 11, kind: input, shape index: {}]   ;;  %s6618_s12 = inlined_call_operand.vmem [shape: f32[1,128], index: 12, kind: input, shape index: {}]   ;;  %s6619_s13 = inlined_call_operand.vmem [shape: f32[2,4,128], index: 13, kind: output, shape index: {}]  }
   0x1 LB: > { %s4419_s26 = sadd.s32 4294967295, %s5329_s25   ;;  %p4423_p0 = scmp.ge.s32.totalorder %s5329_s25, 1  ;;  %s5329_s25 = sphi %s5411_s25, %s23_s25  }
   0x2   : > { %p386_p1 = scmp.lt.s32.totalorder %s5329_s25, 3 }
   0x4   : > { %p387_p2 = pnand %p4423_p0, %p386_p1 }
   0x5   : > { %v5118_v0 = vld [vmem:[%s6607_s1 + $0x4] ss:$12 sps:$4 sm:$0xff] (!%p387_p2)   ;;  %v5120_v1 = vld [vmem:[%s6607_s1] ss:$12 sps:$4 sm:$0xff] (!%p387_p2)   ;;  %v5331_v2 = vmov (!%p387_p2), 0   ;;  %v5332_v4 = vmov (!%p387_p2), 0.0   ;;  %v473_v28 = vlaneseq (!%p387_p2) }
   0x6   : > { %390 = sbr.rel (%p387_p2) target bundleno = 3125 (0xc35), region = 72  ;;  %648 = vmatprep.mubr.bf16.mxu0 (!%p387_p2), %v5331_v2  ;;  %616 = vmatprep.subr.bf16.mxu0 (!%p387_p2), %v5118_v0  ;;  %v5121_v3 = vld [vmem:[%s6607_s1 + $0x1c] ss:$12 sps:$4 sm:$0xff] (!%p387_p2)   ;;  %v5123_v5 = vld [vmem:[%s6607_s1 + $0x18] ss:$12 sps:$4 sm:$0xff] (!%p387_p2)   ;;  %p428_p3 = scmp.lt.s32.totalorder (!%p387_p2), %s4419_s26, 1 }
   0x7   : > { %4964 = vmatprep.subr.bf16.mxu1 (!%p387_p2), %v5332_v4  ;;  %617 = vmatpush1.bf16.msra.mxu0 (!%p387_p2), %v5120_v1  ;;  %v5124_v6 = vld [vmem:[%s6607_s1 + $0x34] ss:$12 sps:$4 sm:$0xff] (!%p387_p2)   ;;  %v5126_v7 = vld [vmem:[%s6607_s1 + $0x30] ss:$12 sps:$4 sm:$0xff] (!%p387_p2)   ;;  %v5127_v8 = vld [vmem:[%s6607_s1 + $0x4c] ss:$12 sps:$4 sm:$0xff] (!%p387_p2)  }
   0x8   : > { %618 = vmatprep.subr.bf16.mxu0 (!%p387_p2), %v5121_v3  ;;  %v5129_v9 = vld [vmem:[%s6607_s1 + $0x48] ss:$12 sps:$4 sm:$0xff] (!%p387_p2)   ;;  %v5130_v11 = vld [vmem:[%s6607_s1 + $0x64] ss:$12 sps:$4 sm:$0xff] (!%p387_p2)   ;;  %v5143_v12 = vld [vmem:[%s6607_s1 + $0x20] ss:$12 sps:$4 sm:$0xff] (!%p387_p2)  }
   0x9   : > { %v5142_v10 = vld [vmem:[%s6607_s1 + $0x8] ss:$12 sps:$4 sm:$0xff] (!%p387_p2)   ;;  %v5132_v13 = vld [vmem:[%s6607_s1 + $0x60] ss:$12 sps:$4 sm:$0xff] (!%p387_p2)   ;;  %v5135_v15 = vld [vmem:[%s6607_s1 + $0x78] ss:$12 sps:$4 sm:$0xff] (!%p387_p2)  }
   0xa   : > { %4965 = vmatpush3.bf16.msra.mxu1 (!%p387_p2), %v5142_v10  ;;  %v5133_v14 = vld [vmem:[%s6607_s1 + $0x7c] ss:$12 sps:$4 sm:$0xff] (!%p387_p2)   ;;  %v5144_v16 = vld [vmem:[%s6607_s1 + $0x38] ss:$12 sps:$4 sm:$0xff] (!%p387_p2)   ;;  %v5136_v17 = vld [vmem:[%s6607_s1 + $0x94] ss:$12 sps:$4 sm:$0xff] (!%p387_p2)  }
   0xb   : > { %619 = vmatpush1.bf16.msra.mxu0 (!%p387_p2), %v5123_v5  ;;  %4966 = vmatprep.subr.bf16.mxu1 (!%p387_p2), %v5332_v4  ;;  %v5145_v18 = vld [vmem:[%s6607_s1 + $0x50] ss:$12 sps:$4 sm:$0xff] (!%p387_p2)   ;;  %v5139_v20 = vld [vmem:[%s6607_s1 + $0xac] ss:$12 sps:$4 sm:$0xff] (!%p387_p2)   ;;  %v5146_v21 = vld [vmem:[%s6607_s1 + $0x68] ss:$12 sps:$4 sm:$0xff] (!%p387_p2)  }
   0xc   : > { %620 = vmatprep.subr.bf16.mxu0 (!%p387_p2), %v5124_v6  ;;  %v5138_v19 = vld [vmem:[%s6607_s1 + $0x90] ss:$12 sps:$4 sm:$0xff] (!%p387_p2)   ;;  %v5141_v22 = vld [vmem:[%s6607_s1 + $0xa8] ss:$12 sps:$4 sm:$0xff] (!%p387_p2)   ;;  %v5147_v24 = vld [vmem:[%s6607_s1 + $0x80] ss:$12 sps:$4 sm:$0xff] (!%p387_p2)  }
   0xd   : > { %s6621_s26 = smov (!%p428_p3, %s4419_s26), 1  ;;  %v5148_v26 = vld [vmem:[%s6607_s1 + $0x98] ss:$12 sps:$4 sm:$0xff]   ;;  %v5149_v27 = vld [vmem:[%s6607_s1 + $0xb0] ss:$12 sps:$4 sm:$0xff]   ;;  %vm5333_vm0 = vmmov 0  }
   0xe   : > { %s4424_s17 = sshll.u32 %s6621_s26, 2  ;;  %4967 = vmatpush3.bf16.msra.mxu1 %v5143_v12  ;;  %4980 = vmatprep.mubr.msk.bf16.mxu1 %vm5333_vm0, %v5332_v4  ;;  %v5519_v29 = vshrl.u32 %v473_v28, 7  ;;  %v471_v31 = vld [vmem:[%s6608_s2] sm:$0x7]  ;;  %vm700_vm1 = vcmask 130048   ;;  %s5334_s21 = smov 112  }
   0xf   : > { %621 = vmatpush1.bf16.msra.mxu0 %v5126_v7  ;;  %4968 = vmatprep.subr.bf16.mxu1 %v5332_v4  ;;  %s5488_s22 = scalar_lea.vmem %s6606_s0, %s4424_s17  ;;  %s5335_s23 = smov 96   ;;  %vm765_vm2 = vcmask 1041408   ;;  %vm747_vm3 = vcmask 27648   ;;  %vm761_vm4 = vcmask 31744   ;;  %vm809_vm5 = vcmask 125952  }
  0x10   : > { %622 = vmatprep.subr.bf16.mxu0 %v5127_v8  ;;  %v437_v23 = vld [vmem:[%s5488_s22] sm:$0xf]  ;;  %v5522_v30 = vsub.s32 0, %v5519_v29  ;;  %v5528_v32 = vsub.s32 1, %v5519_v29  ;;  %s5336_s24 = smov 80   ;;  %s5337_s27 = smov 64  }
  0x11   : > { %v438_v25 = vpack.c.bf16 %v437_v23, %v437_v23  ;;  %s5338_s28 = smov 48   ;;  %s5339_s29 = smov 32   ;;  %v5548_v45 = vsub.s32 2, %v5519_v29  ;;  %vm928_vm6 = vcmask 257152   ;;  %vm1044_vm7 = vcmask 388352  }
  0x12   : > { %4969 = vmatpush3.bf16.msra.mxu1 %v5144_v16  ;;  %v476_v33 = vrot.slane %v471_v31, %v5522_v30  ;;  %v480_v34 = vrot.slane %v471_v31, %v5528_v32  ;;  %s5340_s30 = smov 16   ;;  %vm1160_vm8 = vcmask 519552   ;;  %vm1276_vm9 = vcmask 650752   ;;  %s435_s19 = scalar_lea.vmem %s6619_s13, %s4424_s17 }
  0x13   : > { %623 = vmatpush1.bf16.msra.mxu0 %v5129_v9  ;;  %4970 = vmatprep.subr.bf16.mxu1 %v5332_v4  ;;  %v484_v46 = vrot.slane %v471_v31, %v5548_v45  ;;  %vm1392_vm10 = vcmask 781952   ;;  %vm1508_vm11 = vcmask 913152   ;;  %vm1624_vm12 = vcmask 1044352  }
  0x14   : > { %624 = vmatprep.subr.bf16.mxu0 %v5130_v11  ;;  %vm1742_vm13 = vcmask 1043456  }
  0x16   : > { %4971 = vmatpush3.bf16.msra.mxu1 %v5145_v18 }
  0x17   : > { %625 = vmatpush1.bf16.msra.mxu0 %v5132_v13  ;;  %4972 = vmatprep.subr.bf16.mxu1 %v5332_v4 }
  0x18   : > { %626 = vmatprep.subr.bf16.mxu0 %v5133_v14 }
  0x1a   : > { %4973 = vmatpush3.bf16.msra.mxu1 %v5146_v21 }
  0x1b   : > { %627 = vmatpush1.bf16.msra.mxu0 %v5135_v15  ;;  %4974 = vmatprep.subr.bf16.mxu1 %v5332_v4 }
  0x1c   : > { %628 = vmatprep.subr.bf16.mxu0 %v5136_v17 }
  0x1e   : > { %4975 = vmatpush3.bf16.msra.mxu1 %v5147_v24 }
  0x1f   : > { %629 = vmatpush1.bf16.msra.mxu0 %v5138_v19  ;;  %4976 = vmatprep.subr.bf16.mxu1 %v5332_v4 }
  0x20   : > { %630 = vmatprep.subr.bf16.mxu0 %v5139_v20 }
  0x22   : > { %4977 = vmatpush3.bf16.msra.mxu1 %v5148_v26 }
  0x23   : > { %631 = vmatpush1.bf16.msra.mxu0 %v5141_v22  ;;  %4978 = vmatprep.subr.bf16.mxu1 %v5332_v4 }
  0x24   : > { %5008 = vmatprep.subr.bf16.mxu0 %v5332_v4 }
  0x26   : > { %649 = vmatmul.mubr.bf16.vlgmr.msra.gmra.mrb[0].mxu0 %v438_v25  ;;  %4979 = vmatpush3.bf16.msra.mxu1 %v5149_v27 }
  0x27   : > { %4984 = vmatprep.subr.bf16.mxu1 %v5332_v4  ;;  %5010 = vmatprep.mubr.msk.bf16.mxu0 %vm5333_vm0, %v5332_v4 }
  0x29   : > { %4981 = vmatmul.mubr.bf16.vlgmr.msra.gmra.mrb[0].mxu1 %v438_v25 }
  0x2a   : > { %4986 = vmatprep.mubr.msk.bf16.mxu1 %vm5333_vm0, %v5332_v4 }
  0xf9   : > { %v650_v35 = vpop.f32.mrb[0].mxu0 }
  0xfa   : > { %v651_v36 = vadd.f32 %v650_v35, %v476_v33  ;;  %v652_v37 = vpop.f32.mrb[1].mxu0 }
  0xfb   : > { %v653_v38 = vadd.f32 %v652_v37, %v480_v34  ;;  %v654_v39 = vpop.f32.mrb[2].mxu0 }
  0xfc   : > { %v655_v40 = vpop.f32.mrb[3].mxu0  ;;  %v697_v41 = vmul.f32 0.25, %v651_v36  ;;  %v691_v47 = vpop.f32.mrb[0].mxu1 }
  0xfd   : > { %v699_v42 = vpack.c.bf16 %v653_v38, %v653_v38  ;;  %v692_v48 = vadd.f32 %v691_v47, %v484_v46  ;;  %v4982_v49 = vpop.f32.mrb[1].mxu1 }
  0xfe   : > { %v698_v44 = vpack.c.bf16 %v697_v41, %v697_v41  ;;  %v694_v50 = vpop.f32.mrb[2].mxu1 }
  0xff   : > { %815 = vrot.lane.b32.xlu1 %v699_v42, %s5334_s21  ;;  %v705_v43 = vsel %vm700_vm1, %v699_v42, 0  ;;  %v5551_v51 = vpack.c.bf16 %v692_v48, %v692_v48  ;;  %v4983_v52 = vpop.f32.mrb[3].mxu1 }
 0x100   : > { %4985 = vmatpush3.bf16.xpose.msra.mxu1 %v705_v43 }
 0x101   : > { %4990 = vmatprep.subr.bf16.mxu1 %v5332_v4  ;;  %v767_v53 = vsel %vm765_vm2, %v5551_v51, 0 }
 0x103   : > { %812 = vrot.lane.b32.xlu1 %v698_v44, %s5334_s21 }
 0x107   : > { %930 = vrot.lane.b32.xlu1 %v698_v44, %s5335_s23  ;;  %4987 = vmatmul.mubr.msk.bf16.vlgmr.msra.gmra.mrb[4].mxu1 %vm700_vm1, %v698_v44 }
 0x108   : > { %4992 = vmatprep.mubr.msk.bf16.mxu1 %vm5333_vm0, %v5332_v4  ;;  %4991 = vmatpush3.bf16.msra.mxu1 %v767_v53 }
 0x109   : > { %4996 = vmatprep.subr.bf16.mxu1 %v5332_v4 }
 0x10b   : > { %1048 = vrot.lane.b32.xlu1 %v699_v42, %s5336_s24 }
 0x10f   : > { %1046 = vrot.lane.b32.xlu1 %v698_v44, %s5336_s24 }
 0x113   : > { %1164 = vrot.lane.b32.xlu1 %v699_v42, %s5337_s27 }
 0x117   : > { %1162 = vrot.lane.b32.xlu1 %v698_v44, %s5337_s27 }
 0x11b   : > { %1280 = vrot.lane.b32.xlu1 %v699_v42, %s5338_s28 }
 0x11f   : > { %1396 = vrot.lane.b32.xlu1 %v699_v42, %s5339_s29 }
 0x123   : > { %1512 = vrot.lane.b32.xlu1 %v699_v42, %s5340_s30 }
 0x171   : > { %v816_v0 = vpop.permute.xlu1 %815 }
 0x172   : > { %v821_v15 = vsel %vm700_vm1, %v816_v0, 0 }
 0x175   : > { %v813_v1 = vpop.permute.xlu1 %812 }
 0x179   : > { %v931_v3 = vpop.permute.xlu1 %930 }
 0x17d   : > { %v1049_v6 = vpop.permute.xlu1 %1048 }
 0x17e   : > { %v1054_v12 = vsel %vm700_vm1, %v1049_v6, 0 }
 0x181   : > { %v1047_v9 = vpop.permute.xlu1 %1046 }
 0x185   : > { %v1165_v13 = vpop.permute.xlu1 %1164 }
 0x186   : > { %v1170_v17 = vsel %vm700_vm1, %v1165_v13, 0 }
 0x189   : > { %v1163_v16 = vpop.permute.xlu1 %1162 }
 0x18d   : > { %v1281_v18 = vpop.permute.xlu1 %1280 }
 0x18e   : > { %v1286_v19 = vsel %vm700_vm1, %v1281_v18, 0 }
 0x191   : > { %v1397_v20 = vpop.permute.xlu1 %1396 }
 0x192   : > { %v1402_v22 = vsel %vm700_vm1, %v1397_v20, 0 }
 0x195   : > { %v1513_v23 = vpop.permute.xlu1 %1512 }
 0x196   : > { %v1518_v25 = vsel %vm700_vm1, %v1513_v23, 0 }
 0x1da   : > { %v741_v54 = vpop.f32.mrb[4].mxu1 }
 0x1db   : > { %v4988_v55 = vpop.f32.mrb[5].mxu1  ;;  %v748_v56 = vsel %vm747_vm3, %v741_v54, -inf }
 0x1dc   : > { %749 = vmax.xlane.f32.xlu0 %v748_v56  ;;  %v744_v57 = vpop.f32.mrb[6].mxu1 }
 0x1dd   : > { %v4989_v58 = vpop.f32.mrb[7].mxu1 }
 0x269   : > { %v750_v59 = vpop.xlane.xlu0 %749 }
 0x26a   : > { %v751_v60 = vsub.f32 %v741_v54, %v750_v59 }
 0x26c   : > { %v752_v61 = vmul.f32 1.442695, %v751_v60 }
 0x26e   : > { %5286 = vpow2.f32 %v752_v61 }
 0x278   : > { %v5287_v62 = vpop.eup %5286 }
 0x279   : > { %v754_v63 = vsel %vm747_vm3, %v5287_v62, 0.0 }
 0x27a   : > { %755 = vadd.xlane.f32.xlu0 %v754_v63 }
 0x290   : > { %932 = vrot.lane.b32.xlu0 %v699_v42, %s5335_s23 }
 0x294   : > { %1278 = vrot.lane.b32.xlu0 %v698_v44, %s5338_s28 }
 0x298   : > { %1394 = vrot.lane.b32.xlu0 %v698_v44, %s5339_s29 }
 0x29c   : > { %1510 = vrot.lane.b32.xlu0 %v698_v44, %s5340_s30 }
 0x307   : > { %v756_v5 = vpop.xlane.xlu0 %755 }
 0x308   : > { %5288 = vrcp.f32 %v756_v5 }
 0x30b   : > { %v933_v7 = vpop.permute.xlu0 %932 }
 0x30c   : > { %v938_v8 = vsel %vm700_vm1, %v933_v7, 0 }
 0x30d   : > { %5009 = vmatpush3.bf16.xpose.msra.mxu0 %v938_v8 }
 0x30e   : > { %5020 = vmatprep.subr.bf16.mxu0 %v5332_v4 }
 0x30f   : > { %v1279_v21 = vpop.permute.xlu0 %1278 }
 0x312   : > { %v5289_v10 = vpop.eup %5288 }
 0x313   : > { %v758_v11 = vmul.f32 %v5289_v10, %v5287_v62  ;;  %v1395_v24 = vpop.permute.xlu0 %1394 }
 0x314   : > { %5011 = vmatmul.mubr.msk.bf16.vlgmr.msra.gmra.mrb[4].mxu0 %vm700_vm1, %v931_v3 }
 0x315   : > { %5021 = vmatpush3.bf16.xpose.msra.mxu0 %v1054_v12  ;;  %v759_v14 = vpack.c.bf16 %v758_v11, %v758_v11  ;;  %5022 = vmatprep.mubr.msk.bf16.mxu0 %vm5333_vm0, %v5332_v4 }
 0x316   : > { %5032 = vmatprep.subr.bf16.mxu0 %v5332_v4 }
 0x317   : > { %4993 = vmatmul.mubr.msk.bf16.vlgmr.msra.gmra.mrb[8].mxu1 %vm761_vm4, %v759_v14  ;;  %v1511_v26 = vpop.permute.xlu0 %1510 }
 0x318   : > { %4997 = vmatpush3.bf16.xpose.msra.mxu1 %v821_v15  ;;  %4998 = vmatprep.mubr.msk.bf16.mxu1 %vm5333_vm0, %v5332_v4 }
 0x319   : > { %5002 = vmatprep.subr.bf16.mxu1 %v5332_v4 }
 0x31c   : > { %5023 = vmatmul.mubr.msk.bf16.vlgmr.msra.gmra.mrb[8].mxu0 %vm700_vm1, %v1047_v9 }
 0x31d   : > { %5033 = vmatpush3.bf16.xpose.msra.mxu0 %v1170_v17  ;;  %5034 = vmatprep.mubr.msk.bf16.mxu0 %vm5333_vm0, %v5332_v4 }
 0x31e   : > { %5044 = vmatprep.subr.bf16.mxu0 %v5332_v4 }
 0x31f   : > { %4999 = vmatmul.mubr.msk.bf16.vlgmr.msra.gmra.mrb[12].mxu1 %vm700_vm1, %v813_v1 }
 0x320   : > { %5004 = vmatprep.mubr.msk.bf16.mxu1 %vm5333_vm0, %v5332_v4 }
 0x324   : > { %5035 = vmatmul.mubr.msk.bf16.vlgmr.msra.gmra.mrb[12].mxu0 %vm700_vm1, %v1163_v16 }
 0x325   : > { %5045 = vmatpush3.bf16.xpose.msra.mxu0 %v1286_v19  ;;  %5046 = vmatprep.mubr.msk.bf16.mxu0 %vm5333_vm0, %v5332_v4 }
 0x326   : > { %5056 = vmatprep.subr.bf16.mxu0 %v5332_v4 }
 0x32c   : > { %5047 = vmatmul.mubr.msk.bf16.vlgmr.msra.gmra.mrb[16].mxu0 %vm700_vm1, %v1279_v21 }
 0x32d   : > { %5057 = vmatpush3.bf16.xpose.msra.mxu0 %v1402_v22  ;;  %5058 = vmatprep.mubr.msk.bf16.mxu0 %vm5333_vm0, %v5332_v4 }
 0x32e   : > { %5068 = vmatprep.subr.bf16.mxu0 %v5332_v4 }
 0x334   : > { %5059 = vmatmul.mubr.msk.bf16.vlgmr.msra.gmra.mrb[20].mxu0 %vm700_vm1, %v1395_v24 }
 0x335   : > { %5069 = vmatpush3.bf16.xpose.msra.mxu0 %v1518_v25  ;;  %5070 = vmatprep.mubr.msk.bf16.mxu0 %vm5333_vm0, %v5332_v4 }
 0x336   : > { %5080 = vmatprep.subr.bf16.mxu0 %v5332_v4 }
 0x33c   : > { %5071 = vmatmul.mubr.msk.bf16.vlgmr.msra.gmra.mrb[24].mxu0 %vm700_vm1, %v1511_v26 }
 0x33d   : > { %5096 = vmatprep.mubr.msk.bf16.mxu0 %vm5333_vm0, %v5332_v4 }
 0x3e7   : > { %v974_v27 = vpop.f32.mrb[4].mxu0 }
 0x3e8   : > { %v5012_v28 = vpop.f32.mrb[5].mxu0  ;;  %v980_v31 = vsel %vm747_vm3, %v974_v27, -inf }
 0x3e9   : > { %981 = vmax.xlane.f32.xlu0 %v980_v31  ;;  %v977_v33 = vpop.f32.mrb[6].mxu0 }
 0x3ea   : > { %v803_v34 = vpop.f32.mrb[8].mxu1  ;;  %v5013_v35 = vpop.f32.mrb[7].mxu0 }
 0x3eb   : > { %810 = vst.msk [vmem:[#allocation2] sm:$0xf] %vm809_vm5, %v803_v34  ;;  %v4994_v36 = vpop.f32.mrb[9].mxu1 }
 0x3ec   : > { %v806_v37 = vpop.f32.mrb[10].mxu1 }
 0x3ed   : > { %v4995_v38 = vpop.f32.mrb[11].mxu1 }
 0x3ef   : > { %v1090_v39 = vpop.f32.mrb[8].mxu0 }
 0x3f0   : > { %v5024_v40 = vpop.f32.mrb[9].mxu0  ;;  %v1096_v41 = vsel %vm747_vm3, %v1090_v39, -inf }
 0x3f1   : > { %1097 = vmax.xlane.f32.xlu0 %v1096_v41  ;;  %v1093_v42 = vpop.f32.mrb[10].mxu0 }
 0x3f2   : > { %v857_v43 = vpop.f32.mrb[12].mxu1  ;;  %v5025_v44 = vpop.f32.mrb[11].mxu0 }
 0x3f3   : > { %v5000_v46 = vpop.f32.mrb[13].mxu1  ;;  %v863_v47 = vsel %vm747_vm3, %v857_v43, -inf }
 0x3f4   : > { %864 = vmax.xlane.f32.xlu1 %v863_v47  ;;  %v860_v48 = vpop.f32.mrb[14].mxu1 }
 0x3f5   : > { %v5001_v49 = vpop.f32.mrb[15].mxu1 }
 0x3f7   : > { %v1206_v50 = vpop.f32.mrb[12].mxu0 }
 0x3f8   : > { %v5036_v52 = vpop.f32.mrb[13].mxu0  ;;  %v1212_v53 = vsel %vm747_vm3, %v1206_v50, -inf }
 0x3f9   : > { %v1209_v54 = vpop.f32.mrb[14].mxu0  ;;  %1213 = vmax.xlane.f32.xlu1 %v1212_v53 }
 0x3fa   : > { %v5037_v55 = vpop.f32.mrb[15].mxu0 }
 0x3ff   : > { %v1322_v56 = vpop.f32.mrb[16].mxu0 }
 0x400   : > { %v5048_v57 = vpop.f32.mrb[17].mxu0  ;;  %v1328_v58 = vsel %vm747_vm3, %v1322_v56, -inf }
 0x401   : > { %1329 = vmax.xlane.f32.xlu0 %v1328_v58  ;;  %v1325_v59 = vpop.f32.mrb[18].mxu0 }
 0x402   : > { %v5049_v60 = vpop.f32.mrb[19].mxu0 }
 0x407   : > { %v1438_v61 = vpop.f32.mrb[20].mxu0 }
 0x408   : > { %v5060_v62 = vpop.f32.mrb[21].mxu0  ;;  %v1444_v63 = vsel %vm747_vm3, %v1438_v61, -inf }
 0x409   : > { %v1441_v0 = vpop.f32.mrb[22].mxu0  ;;  %1445 = vmax.xlane.f32.xlu1 %v1444_v63 }
 0x40a   : > { %v5061_v1 = vpop.f32.mrb[23].mxu0 }
 0x40f   : > { %v1554_v3 = vpop.f32.mrb[24].mxu0 }
 0x410   : > { %v5072_v5 = vpop.f32.mrb[25].mxu0  ;;  %v1560_v6 = vsel %vm747_vm3, %v1554_v3, -inf }
 0x411   : > { %1561 = vmax.xlane.f32.xlu0 %v1560_v6  ;;  %v1557_v7 = vpop.f32.mrb[26].mxu0 }
 0x412   : > { %v5073_v8 = vpop.f32.mrb[27].mxu0 }
 0x476   : > { %v982_v9 = vpop.xlane.xlu0 %981 }
 0x477   : > { %v983_v10 = vsub.f32 %v974_v27, %v982_v9 }
 0x479   : > { %v984_v11 = vmul.f32 1.442695, %v983_v10 }
 0x47b   : > { %5290 = vpow2.f32 %v984_v11 }
 0x47e   : > { %v1098_v12 = vpop.xlane.xlu0 %1097 }
 0x47f   : > { %v1099_v13 = vsub.f32 %v1090_v39, %v1098_v12 }
 0x481   : > { %v1100_v14 = vmul.f32 1.442695, %v1099_v13  ;;  %v865_v15 = vpop.xlane.xlu1 %864 }
 0x482   : > { %v866_v16 = vsub.f32 %v857_v43, %v865_v15 }
 0x483   : > { %5292 = vpow2.f32 %v1100_v14 }
 0x484   : > { %v867_v17 = vmul.f32 1.442695, %v866_v16 }
 0x485   : > { %v5607_v18 = vpop.eup %5290 }
 0x486   : > { %5294 = vpow2.f32 %v867_v17  ;;  %v1214_v19 = vpop.xlane.xlu1 %1213  ;;  %v986_v20 = vsel %vm747_vm3, %v5607_v18, 0.0 }
 0x487   : > { %v1215_v21 = vsub.f32 %v1206_v50, %v1214_v19  ;;  %987 = vadd.xlane.f32.xlu0 %v986_v20 }
 0x489   : > { %v1216_v22 = vmul.f32 1.442695, %v1215_v21 }
 0x48b   : > { %5296 = vpow2.f32 %v1216_v22 }
 0x48d   : > { %v5611_v23 = vpop.eup %5292 }
 0x48e   : > { %v1330_v24 = vpop.xlane.xlu0 %1329  ;;  %v1102_v25 = vsel %vm747_vm3, %v5611_v23, 0.0 }
 0x48f   : > { %v1331_v26 = vsub.f32 %v1322_v56, %v1330_v24  ;;  %1103 = vadd.xlane.f32.xlu1 %v1102_v25 }
 0x490   : > { %v5295_v27 = vpop.eup %5294 }
 0x491   : > { %v1332_v28 = vmul.f32 1.442695, %v1331_v26  ;;  %v869_v31 = vsel %vm747_vm3, %v5295_v27, 0.0 }
 0x493   : > { %5298 = vpow2.f32 %v1332_v28  ;;  %870 = vadd.xlane.f32.xlu1 %v869_v31 }
 0x495   : > { %v5616_v33 = vpop.eup %5296 }
 0x496   : > { %v1218_v34 = vsel %vm747_vm3, %v5616_v33, 0.0  ;;  %v1446_v37 = vpop.xlane.xlu1 %1445 }
 0x497   : > { %1219 = vadd.xlane.f32.xlu0 %v1218_v34  ;;  %v1447_v38 = vsub.f32 %v1438_v61, %v1446_v37 }
 0x499   : > { %v1448_v39 = vmul.f32 1.442695, %v1447_v38 }
 0x49b   : > { %5300 = vpow2.f32 %v1448_v39 }
 0x49d   : > { %v5620_v35 = vpop.eup %5298 }
 0x49e   : > { %v1334_v36 = vsel %vm747_vm3, %v5620_v35, 0.0  ;;  %v1562_v40 = vpop.xlane.xlu0 %1561 }
 0x49f   : > { %1335 = vadd.xlane.f32.xlu0 %v1334_v36  ;;  %v1563_v41 = vsub.f32 %v1554_v3, %v1562_v40 }
 0x4a1   : > { %v1564_v43 = vmul.f32 1.442695, %v1563_v41 }
 0x4a3   : > { %5302 = vpow2.f32 %v1564_v43  ;;  %v5150_v43 = vld [vmem:[%s6609_s3] sm:$0xff]  }
 0x4a4   : > { %876 = vrot.lane.b32.xlu1 %v5551_v51, %s5334_s21  ;;  %5081 = vmatpush3.bf16.msra.mxu0 %v5150_v43  ;;  %v1813_v43 = vld [vmem:[%s6613_s7 + $0x148] sm:$0xff] }
 0x4a5   : > { %v5630_v42 = vpop.eup %5300  ;;  %5082 = vmatprep.subr.bf16.mxu0 %v5332_v4 }
 0x4a6   : > { %v1450_v44 = vsel %vm747_vm3, %v5630_v42, 0.0 }
 0x4ad   : > { %v5634_v46 = vpop.eup %5302 }
 0x4ae   : > { %v1566_v47 = vsel %vm747_vm3, %v5634_v46, 0.0 }
 0x4b5   : > { %992 = vrot.lane.b32.xlu0 %v5551_v51, %s5335_s23 }
 0x4b9   : > { %1108 = vrot.lane.b32.xlu0 %v5551_v51, %s5336_s24 }
 0x4c8   : > { %1451 = vadd.xlane.f32.xlu1 %v1450_v44  ;;  %v5151_v44 = vld [vmem:[%s6609_s3 + $0x8] sm:$0xff]  }
 0x4c9   : > { %5083 = vmatpush3.bf16.msra.mxu0 %v5151_v44 }
 0x4ca   : > { %5084 = vmatprep.subr.bf16.mxu0 %v5332_v4 }
 0x4d8   : > { %1567 = vadd.xlane.f32.xlu0 %v1566_v47 }
 0x4d9   : > { %1224 = vrot.lane.b32.xlu1 %v5551_v51, %s5337_s27 }
 0x4dd   : > { %1456 = vrot.lane.b32.xlu1 %v5551_v51, %s5339_s29 }
 0x4e1   : > { %1572 = vrot.lane.b32.xlu1 %v5551_v51, %s5340_s30 }
 0x4ee   : > { %1340 = vrot.lane.b32.xlu0 %v5551_v51, %s5338_s28 }
 0x514   : > { %v988_v50 = vpop.xlane.xlu0 %987 }
 0x51c   : > { %v1104_v48 = vpop.xlane.xlu1 %1103 }
 0x520   : > { %v871_v49 = vpop.xlane.xlu1 %870 }
 0x521   : > { %5304 = vrcp.f32 %v871_v49 }
 0x522   : > { %5306 = vrcp.f32 %v988_v50  ;;  %v5152_v50 = vld [vmem:[%s6609_s3 + $0x10] sm:$0xff]  }
 0x523   : > { %5308 = vrcp.f32 %v1104_v48  ;;  %5085 = vmatpush3.bf16.msra.mxu0 %v5152_v50 }
 0x524   : > { %v877_v52 = vpop.permute.xlu1 %876  ;;  %v1220_v54 = vpop.xlane.xlu0 %1219  ;;  %5086 = vmatprep.subr.bf16.mxu0 %v5332_v4 }
 0x525   : > { %v882_v53 = vsel %vm765_vm2, %v877_v52, 0  ;;  %5310 = vrcp.f32 %v1220_v54  ;;  %v5153_v52 = vld [vmem:[%s6609_s3 + $0x18] sm:$0xff]   ;;  %v5155_v54 = vld [vmem:[%s6609_s3 + $0x28] sm:$0xff]  }
 0x526   : > { %5003 = vmatpush3.bf16.msra.mxu1 %v882_v53  ;;  %v5154_v53 = vld [vmem:[%s6609_s3 + $0x20] sm:$0xff]  }
 0x527   : > { %5014 = vmatprep.subr.bf16.mxu1 %v5332_v4  ;;  %5087 = vmatpush3.bf16.msra.mxu0 %v5153_v52 }
 0x528   : > { %5088 = vmatprep.subr.bf16.mxu0 %v5332_v4 }
 0x52b   : > { %v5305_v55 = vpop.eup %5304  ;;  %5089 = vmatpush3.bf16.msra.mxu0 %v5154_v53 }
 0x52c   : > { %v873_v56 = vmul.f32 %v5305_v55, %v5295_v27  ;;  %v1336_v57 = vpop.xlane.xlu0 %1335  ;;  %v5307_v59 = vpop.eup %5306  ;;  %5090 = vmatprep.subr.bf16.mxu0 %v5332_v4 }
 0x52d   : > { %v990_v61 = vmul.f32 %v5307_v59, %v5607_v18  ;;  %v5309_v0 = vpop.eup %5308  ;;  %5312 = vrcp.f32 %v1336_v57  ;;  %v5156_v59 = vld [vmem:[%s6609_s3 + $0x30] sm:$0xff]  }
 0x52e   : > { %v874_v58 = vpack.c.bf16 %v873_v56, %v873_v56  ;;  %v1106_v3 = vmul.f32 %v5309_v0, %v5611_v23 }
 0x52f   : > { %v991_v63 = vpack.c.bf16 %v990_v61, %v990_v61  ;;  %v5311_v6 = vpop.eup %5310  ;;  %5091 = vmatpush3.bf16.msra.mxu0 %v5155_v54 }
 0x530   : > { %v993_v60 = vpop.permute.xlu0 %992  ;;  %5005 = vmatmul.mubr.msk.bf16.vlgmr.msra.gmra.mrb[16].mxu1 %vm761_vm4, %v874_v58  ;;  %v1107_v5 = vpack.c.bf16 %v1106_v3, %v1106_v3  ;;  %v1222_v8 = vmul.f32 %v5311_v6, %v5616_v33  ;;  %5092 = vmatprep.subr.bf16.mxu0 %v5332_v4 }
 0x531   : > { %v998_v51 = vsel %vm765_vm2, %v993_v60, 0  ;;  %5016 = vmatprep.mubr.msk.bf16.mxu1 %vm5333_vm0, %v5332_v4  ;;  %v5157_v60 = vld [vmem:[%s6609_s3 + $0x38] sm:$0xff]  }
 0x532   : > { %5015 = vmatpush3.bf16.msra.mxu1 %v998_v51  ;;  %v1223_v11 = vpack.c.bf16 %v1222_v8, %v1222_v8 }
 0x533   : > { %5026 = vmatprep.subr.bf16.mxu1 %v5332_v4  ;;  %5093 = vmatpush3.bf16.msra.mxu0 %v5156_v59  ;;  %v1821_v59 = vld [vmem:[%s6613_s7 + $0x188] sm:$0xff] }
 0x534   : > { %v1109_v62 = vpop.permute.xlu0 %1108  ;;  %5094 = vmatprep.subr.bf16.mxu0 %v5332_v4 }
 0x535   : > { %v1114_v1 = vsel %vm765_vm2, %v1109_v62, 0 }
 0x537   : > { %v5313_v12 = vpop.eup %5312  ;;  %5095 = vmatpush3.bf16.msra.mxu0 %v5157_v60 }
 0x538   : > { %5017 = vmatmul.mubr.msk.bf16.vlgmr.msra.gmra.mrb[20].mxu1 %vm761_vm4, %v991_v63  ;;  %v1338_v14 = vmul.f32 %v5313_v12, %v5620_v35 }
 0x539   : > { %5027 = vmatpush3.bf16.msra.mxu1 %v1114_v1  ;;  %5028 = vmatprep.mubr.msk.bf16.mxu1 %vm5333_vm0, %v5332_v4 }
 0x53a   : > { %5038 = vmatprep.subr.bf16.mxu1 %v5332_v4  ;;  %v1339_v18 = vpack.c.bf16 %v1338_v14, %v1338_v14  ;;  %v4466_v14 = vld [vmem:[%s6610_s4] ss:$0 sm:$0xff] }
 0x540   : > { %5029 = vmatmul.mubr.msk.bf16.vlgmr.msra.gmra.mrb[24].mxu1 %vm761_vm4, %v1107_v5 }
 0x541   : > { %5040 = vmatprep.mubr.msk.bf16.mxu1 %vm5333_vm0, %v5332_v4 }
 0x555   : > { %v1452_v7 = vpop.xlane.xlu1 %1451 }
 0x556   : > { %5314 = vrcp.f32 %v1452_v7 }
 0x559   : > { %v1225_v9 = vpop.permute.xlu1 %1224 }
 0x55a   : > { %v1230_v10 = vsel %vm765_vm2, %v1225_v9, 0 }
 0x55b   : > { %5039 = vmatpush3.bf16.msra.mxu1 %v1230_v10 }
 0x55c   : > { %5050 = vmatprep.subr.bf16.mxu1 %v5332_v4 }
 0x55d   : > { %v1457_v17 = vpop.permute.xlu1 %1456 }
 0x55e   : > { %5041 = vmatmul.mubr.msk.bf16.vlgmr.msra.gmra.mrb[28].mxu1 %vm761_vm4, %v1223_v11  ;;  %v1462_v20 = vsel %vm765_vm2, %v1457_v17, 0 }
 0x55f   : > { %5052 = vmatprep.mubr.msk.bf16.mxu1 %vm5333_vm0, %v5332_v4 }
 0x560   : > { %v5315_v19 = vpop.eup %5314 }
 0x561   : > { %v1454_v21 = vmul.f32 %v5315_v19, %v5630_v42  ;;  %v1573_v22 = vpop.permute.xlu1 %1572 }
 0x562   : > { %v1578_v25 = vsel %vm765_vm2, %v1573_v22, 0 }
 0x563   : > { %v1455_v23 = vpack.c.bf16 %v1454_v21, %v1454_v21 }
 0x565   : > { %v1568_v13 = vpop.xlane.xlu0 %1567 }
 0x566   : > { %5316 = vrcp.f32 %v1568_v13 }
 0x569   : > { %v1341_v15 = vpop.permute.xlu0 %1340 }
 0x56a   : > { %v1346_v16 = vsel %vm765_vm2, %v1341_v15, 0 }
 0x56b   : > { %5051 = vmatpush3.bf16.msra.mxu1 %v1346_v16 }
 0x56c   : > { %5062 = vmatprep.subr.bf16.mxu1 %v5332_v4 }
 0x56e   : > { %5053 = vmatmul.mubr.msk.bf16.vlgmr.msra.gmra.mrb[32].mxu1 %vm761_vm4, %v1339_v18 }
 0x56f   : > { %5063 = vmatpush3.bf16.msra.mxu1 %v1462_v20  ;;  %5064 = vmatprep.mubr.msk.bf16.mxu1 %vm5333_vm0, %v5332_v4  ;;  %v5322_v20 = vld [vmem:[%s5488_s22] sm:$0xf] }
 0x570   : > { %5074 = vmatprep.subr.bf16.mxu1 %v5332_v4  ;;  %v5317_v24 = vpop.eup %5316 }
 0x571   : > { %v1570_v26 = vmul.f32 %v5317_v24, %v5634_v46  ;;  %v1780_v24 = vld [vmem:[%s6613_s7 + $0x40] sm:$0xff] }
 0x573   : > { %v1571_v27 = vpack.c.bf16 %v1570_v26, %v1570_v26 }
 0x576   : > { %5065 = vmatmul.mubr.msk.bf16.vlgmr.msra.gmra.mrb[36].mxu1 %vm761_vm4, %v1455_v23  ;;  %v1772_v23 = vld [vmem:[%s6613_s7] sm:$0xff] }
 0x577   : > { %5075 = vmatpush3.bf16.msra.mxu1 %v1578_v25  ;;  %5076 = vmatprep.mubr.msk.bf16.mxu1 %vm5333_vm0, %v5332_v4  ;;  %v1773_v25 = vld [vmem:[%s6613_s7 + $0x8] sm:$0xff]  ;;  %v4477_v26 = vcombine.low %v1772_v23, %v1780_v24 }
 0x57e   : > { %5077 = vmatmul.mubr.msk.bf16.vlgmr.msra.gmra.mrb[40].mxu1 %vm761_vm4, %v1571_v27  ;;  %v4478_v27 = vcombine.high %v1772_v23, %v1780_v24 }
 0x57f   : > { %2656 = vmatprep.mubr.bf16.mxu1 %v5331_v2 }
 0x580   : > { %2624 = vmatprep.subr.bf16.mxu1 %v4478_v27  ;;  %v1885_v27 = vld [vmem:[%s6613_s7 + $0x388] sm:$0xff] }
 0x581   : > { %2625 = vmatpush1.bf16.msra.mxu1 %v4477_v26  ;;  %v1892_v26 = vld [vmem:[%s6613_s7 + $0x3c0] sm:$0xff] }
 0x603   : > { %v918_v28 = vpop.f32.mrb[16].mxu1 }
 0x604   : > { %925 = vrot.lane.b32.xlu1 %v918_v28, %s5340_s30  ;;  %v5006_v31 = vpop.f32.mrb[17].mxu1  ;;  %v1781_v28 = vld [vmem:[%s6613_s7 + $0x48] sm:$0xff] }
 0x605   : > { %v921_v33 = vpop.f32.mrb[18].mxu1  ;;  %v1788_v31 = vld [vmem:[%s6613_s7 + $0x80] sm:$0xff] }
 0x606   : > { %v5007_v34 = vpop.f32.mrb[19].mxu1  ;;  %v1796_v33 = vld [vmem:[%s6613_s7 + $0xc0] sm:$0xff] }
 0x607   : > { %v4479_v34 = vcombine.low %v1773_v25, %v1781_v28  ;;  %v4493_v44 = vcombine.low %v1788_v31, %v1796_v33 }
 0x60b   : > { %v1034_v35 = vpop.f32.mrb[20].mxu1 }
 0x60c   : > { %1041 = vrot.lane.b32.xlu1 %v1034_v35, %s5339_s29  ;;  %v5018_v36 = vpop.f32.mrb[21].mxu1  ;;  %v4480_v35 = vcombine.high %v1773_v25, %v1781_v28  ;;  %v1884_v25 = vld [vmem:[%s6613_s7 + $0x380] sm:$0xff] }
 0x60d   : > { %v1037_v37 = vpop.f32.mrb[22].mxu1  ;;  %v4494_v36 = vcombine.high %v1788_v31, %v1796_v33  ;;  %v4590_v28 = vcombine.high %v1884_v25, %v1892_v26  ;;  %v1893_v31 = vld [vmem:[%s6613_s7 + $0x3c8] sm:$0xff]  ;;  %v4589_v33 = vcombine.low %v1884_v25, %v1892_v26  ;;  %v1863_v25 = vld [vmem:[%s6613_s7 + $0x2d8] sm:$0xff] }
 0x60e   : > { %v5019_v38 = vpop.f32.mrb[23].mxu1  ;;  %v1789_v37 = vld [vmem:[%s6613_s7 + $0x88] sm:$0xff]  ;;  %2665 = vmatprep.subr.bf16.mxu0 %v4480_v35  ;;  %v4592_v35 = vcombine.high %v1885_v27, %v1893_v31 }
 0x60f   : > { %v1797_v38 = vld [vmem:[%s6613_s7 + $0xc8] sm:$0xff]  ;;  %2626 = vmatprep.subr.bf16.mxu1 %v4494_v36  ;;  %v1774_v36 = vld [vmem:[%s6613_s7 + $0x10] sm:$0xff] }
 0x610   : > { %2627 = vmatpush1.bf16.msra.mxu1 %v4493_v44 }
 0x613   : > { %v1150_v39 = vpop.f32.mrb[24].mxu1 }
 0x614   : > { %1157 = vrot.lane.b32.xlu0 %v1150_v39, %s5338_s28  ;;  %v5030_v40 = vpop.f32.mrb[25].mxu1  ;;  %v1804_v39 = vld [vmem:[%s6613_s7 + $0x100] sm:$0xff] }
 0x615   : > { %v1153_v41 = vpop.f32.mrb[26].mxu1  ;;  %v4496_v40 = vcombine.high %v1789_v37, %v1797_v38 }
 0x616   : > { %v5031_v42 = vpop.f32.mrb[27].mxu1  ;;  %v1812_v41 = vld [vmem:[%s6613_s7 + $0x140] sm:$0xff] }
 0x617   : > { %v1805_v42 = vld [vmem:[%s6613_s7 + $0x108] sm:$0xff] }
 0x618   : > { %v4511_v50 = vcombine.low %v1805_v42, %v1813_v43 }
 0x631   : > { %v1266_v46 = vpop.f32.mrb[28].mxu1 }
 0x632   : > { %1273 = vrot.lane.b32.xlu1 %v1266_v46, %s5337_s27  ;;  %v5042_v47 = vpop.f32.mrb[29].mxu1  ;;  %v4495_v46 = vcombine.low %v1789_v37, %v1797_v38  ;;  %v1782_v37 = vld [vmem:[%s6613_s7 + $0x50] sm:$0xff]  ;;  %v1775_v38 = vld [vmem:[%s6613_s7 + $0x18] sm:$0xff] }
 0x633   : > { %v1269_v48 = vpop.f32.mrb[30].mxu1  ;;  %v4510_v47 = vcombine.high %v1804_v39, %v1812_v41 }
 0x634   : > { %v5043_v49 = vpop.f32.mrb[31].mxu1  ;;  %v4512_v48 = vcombine.high %v1805_v42, %v1813_v43 }
 0x635   : > { %v4509_v49 = vcombine.low %v1804_v39, %v1812_v41  ;;  %2628 = vmatprep.subr.bf16.mxu1 %v4510_v47  ;;  %v4481_v39 = vcombine.low %v1774_v36, %v1782_v37  ;;  %v1783_v41 = vld [vmem:[%s6613_s7 + $0x58] sm:$0xff] }
 0x636   : > { %v4483_v42 = vcombine.low %v1775_v38, %v1783_v41  ;;  %v4484_v43 = vcombine.high %v1775_v38, %v1783_v41  ;;  %v1886_v41 = vld [vmem:[%s6613_s7 + $0x390] sm:$0xff] }
 0x637   : > { %2629 = vmatpush1.bf16.msra.mxu1 %v4509_v49  ;;  %v4475_v49 = vld [vmem:[%s6611_s5] ss:$0 sm:$0xff] }
 0x641   : > { %v1382_v55 = vpop.f32.mrb[32].mxu1 }
 0x642   : > { %1389 = vrot.lane.b32.xlu0 %v1382_v55, %s5336_s24  ;;  %v5054_v56 = vpop.f32.mrb[33].mxu1 }
 0x643   : > { %v1385_v57 = vpop.f32.mrb[34].mxu1 }
 0x644   : > { %v5055_v58 = vpop.f32.mrb[35].mxu1  ;;  %v1820_v57 = vld [vmem:[%s6613_s7 + $0x180] sm:$0xff] }
 0x645   : > { %v1828_v58 = vld [vmem:[%s6613_s7 + $0x1c0] sm:$0xff] }
 0x646   : > { %v4526_v60 = vcombine.high %v1820_v57, %v1828_v58 }
 0x648   : > { %2630 = vmatprep.subr.bf16.mxu1 %v4526_v60 }
 0x649   : > { %v1498_v51 = vpop.f32.mrb[36].mxu1 }
 0x64a   : > { %1505 = vrot.lane.b32.xlu1 %v1498_v51, %s5335_s23  ;;  %v5066_v61 = vpop.f32.mrb[37].mxu1  ;;  %v1829_v51 = vld [vmem:[%s6613_s7 + $0x1c8] sm:$0xff] }
 0x64b   : > { %v1501_v62 = vpop.f32.mrb[38].mxu1  ;;  %v4525_v61 = vcombine.low %v1820_v57, %v1828_v58  ;;  %v1791_v57 = vld [vmem:[%s6613_s7 + $0x98] sm:$0xff] }
 0x64c   : > { %v5067_v63 = vpop.f32.mrb[39].mxu1  ;;  %v4527_v62 = vcombine.low %v1821_v59, %v1829_v51 }
 0x64d   : > { %v4528_v63 = vcombine.high %v1821_v59, %v1829_v51  ;;  %2631 = vmatpush1.bf16.msra.mxu1 %v4525_v61  ;;  %v1806_v61 = vld [vmem:[%s6613_s7 + $0x110] sm:$0xff] }
 0x651   : > { %v1614_v0 = vpop.f32.mrb[40].mxu1 }
 0x652   : > { %1621 = vrot.lane.b32.xlu0 %v1614_v0, %s5334_s21  ;;  %v5078_v1 = vpop.f32.mrb[41].mxu1  ;;  %v1836_v0 = vld [vmem:[%s6613_s7 + $0x200] sm:$0xff] }
 0x653   : > { %v1617_v3 = vpop.f32.mrb[42].mxu1  ;;  %v1844_v1 = vld [vmem:[%s6613_s7 + $0x240] sm:$0xff] }
 0x654   : > { %v5079_v5 = vpop.f32.mrb[43].mxu1  ;;  %v1837_v3 = vld [vmem:[%s6613_s7 + $0x208] sm:$0xff] }
 0x655   : > { %v4542_v5 = vcombine.high %v1836_v0, %v1844_v1 }
 0x657   : > { %2632 = vmatprep.subr.bf16.mxu1 %v4542_v5 }
 0x676   : > { %v926_v6 = vpop.permute.xlu1 %925 }
 0x677   : > { %929 = vst.msk [vmem:[#allocation2] sm:$0xf] %vm928_vm6, %v926_v6  ;;  %v1845_v6 = vld [vmem:[%s6613_s7 + $0x248] sm:$0xff] }
 0x67e   : > { %v1042_v7 = vpop.permute.xlu1 %1041 }
 0x67f   : > { %1045 = vst.msk [vmem:[#allocation2] sm:$0xf] %vm1044_vm7, %v1042_v7  ;;  %v4541_v7 = vcombine.low %v1836_v0, %v1844_v1  ;;  %v1815_v0 = vld [vmem:[%s6613_s7 + $0x158] sm:$0xff] }
 0x681   : > { %2633 = vmatpush1.bf16.msra.mxu1 %v4541_v7  ;;  %v1822_v7 = vld [vmem:[%s6613_s7 + $0x190] sm:$0xff] }
 0x686   : > { %v1158_v4 = vpop.permute.xlu0 %1157 }
 0x687   : > { %1161 = vst.msk [vmem:[#allocation2] sm:$0xf] %vm1160_vm8, %v1158_v4  ;;  %v4543_v4 = vcombine.low %v1837_v3, %v1845_v6 }
 0x6a4   : > { %v1274_v8 = vpop.permute.xlu1 %1273 }
 0x6a5   : > { %1277 = vst.msk [vmem:[#allocation2] sm:$0xf] %vm1276_vm9, %v1274_v8  ;;  %v4544_v8 = vcombine.high %v1837_v3, %v1845_v6 }
 0x6b4   : > { %v1390_v9 = vpop.permute.xlu0 %1389 }
 0x6b5   : > { %1393 = vst.msk [vmem:[#allocation2] sm:$0xf] %vm1392_vm10, %v1390_v9  ;;  %v1852_v9 = vld [vmem:[%s6613_s7 + $0x280] sm:$0xff] }
 0x6bc   : > { %v1506_v10 = vpop.permute.xlu1 %1505 }
 0x6bd   : > { %1509 = vst.msk [vmem:[#allocation2] sm:$0xf] %vm1508_vm11, %v1506_v10  ;;  %v1860_v10 = vld [vmem:[%s6613_s7 + $0x2c0] sm:$0xff] }
 0x6c4   : > { %v1622_v11 = vpop.permute.xlu0 %1621 }
 0x6c5   : > { %1625 = vst.msk [vmem:[#allocation2] sm:$0xf] %vm1624_vm12, %v1622_v11  ;;  %v1853_v11 = vld [vmem:[%s6613_s7 + $0x288] sm:$0xff] }
 0x6cc   : > { %v1626_v12 = vld [vmem:[#allocation2] sm:$0xf] }
 0x6cd   : > { %v1627_v13 = vpack.c.bf16 %v1626_v12, %v1626_v12  ;;  %v4558_v12 = vcombine.high %v1852_v9, %v1860_v10 }
 0x6cf   : > { %5097 = vmatmul.mubr.bf16.vlgmr.msra.gmra.mrb[28].mxu0 %v1627_v13  ;;  %v1861_v13 = vld [vmem:[%s6613_s7 + $0x2c8] sm:$0xff]  ;;  %2634 = vmatprep.subr.bf16.mxu1 %v4558_v12 }
 0x6d0   : > { %2697 = vmatprep.mubr.bf16.mxu0 %v5331_v2  ;;  %2666 = vmatpush1.bf16.msra.mxu0 %v4479_v34  ;;  %v4591_v34 = vcombine.low %v1885_v27, %v1893_v31 }
 0x6d1   : > { %2667 = vmatprep.subr.bf16.mxu0 %v4496_v40  ;;  %v4482_v40 = vcombine.high %v1774_v36, %v1782_v37  ;;  %v1879_v36 = vld [vmem:[%s6613_s7 + $0x358] sm:$0xff] }
 0x6d4   : > { %2668 = vmatpush1.bf16.msra.mxu0 %v4495_v46 }
 0x6d5   : > { %2669 = vmatprep.subr.bf16.mxu0 %v4512_v48 }
 0x6d8   : > { %2670 = vmatpush1.bf16.msra.mxu0 %v4511_v50 }
 0x6d9   : > { %2671 = vmatprep.subr.bf16.mxu0 %v4528_v63  ;;  %v1807_v63 = vld [vmem:[%s6613_s7 + $0x118] sm:$0xff] }
 0x6da   : > { %v4516_v6 = vcombine.high %v1807_v63, %v1815_v0 }
 0x6dc   : > { %2672 = vmatpush1.bf16.msra.mxu0 %v4527_v62  ;;  %v1814_v62 = vld [vmem:[%s6613_s7 + $0x150] sm:$0xff] }
 0x6dd   : > { %2673 = vmatprep.subr.bf16.mxu0 %v4544_v8  ;;  %v4514_v5 = vcombine.high %v1806_v61, %v1814_v62  ;;  %v1823_v8 = vld [vmem:[%s6613_s7 + $0x198] sm:$0xff] }
 0x6e0   : > { %2674 = vmatpush1.bf16.msra.mxu0 %v4543_v4  ;;  %v1830_v4 = vld [vmem:[%s6613_s7 + $0x1d0] sm:$0xff] }
 0x6e1   : > { %v4530_v12 = vcombine.high %v1822_v7, %v1830_v4 }
 0x7a2   : > { %v1733_v15 = vpop.f32.mrb[28].mxu0 }
 0x7a3   : > { %v1734_v16 = vadd.f32 %v4466_v14, %v1733_v15  ;;  %v5098_v17 = vpop.f32.mrb[29].mxu0  ;;  %v4557_v14 = vcombine.low %v1852_v9, %v1860_v10  ;;  %v4559_v15 = vcombine.low %v1853_v11, %v1861_v13  ;;  %v1831_v9 = vld [vmem:[%s6613_s7 + $0x1d8] sm:$0xff]  ;;  %v4513_v10 = vcombine.low %v1806_v61, %v1814_v62  ;;  %v1800_v61 = vld [vmem:[%s6613_s7 + $0xe0] sm:$0xff]  ;;  %v1793_v62 = vld [vmem:[%s6613_s7 + $0xa8] sm:$0xff] }
 0x7a4   : > { %v1736_v18 = vpop.f32.mrb[30].mxu0  ;;  %v1868_v17 = vld [vmem:[%s6613_s7 + $0x300] sm:$0xff] }
 0x7a5   : > { %v5099_v19 = vpop.f32.mrb[31].mxu0  ;;  %v1739_v21 = vadd.f32 %v5322_v20, %v1734_v16  ;;  %v4560_v16 = vcombine.high %v1853_v11, %v1861_v13  ;;  %2635 = vmatpush1.bf16.msra.mxu1 %v4557_v14  ;;  %v1876_v18 = vld [vmem:[%s6613_s7 + $0x340] sm:$0xff]  ;;  %v4515_v11 = vcombine.low %v1807_v63, %v1815_v0  ;;  %v4532_v13 = vcombine.high %v1823_v8, %v1831_v9  ;;  %v1838_v14 = vld [vmem:[%s6613_s7 + $0x210] sm:$0xff]  ;;  %v1801_v63 = vld [vmem:[%s6613_s7 + $0xe8] sm:$0xff] }
 0x7a6   : > { %v1869_v19 = vld [vmem:[%s6613_s7 + $0x308] sm:$0xff]  ;;  %v4574_v20 = vcombine.high %v1868_v17, %v1876_v18 }
 0x7a7   : > { %v1743_v22 = vsel %vm1742_vm13, %v1739_v21, 0.0  ;;  %2675 = vmatprep.subr.bf16.mxu0 %v4560_v16  ;;  %v1839_v16 = vld [vmem:[%s6613_s7 + $0x218] sm:$0xff] }
 0x7a8   : > { %1744 = vadd.xlane.f32.xlu1 %v1743_v22  ;;  %2676 = vmatpush1.bf16.msra.mxu0 %v4559_v15  ;;  %v4573_v22 = vcombine.low %v1868_v17, %v1876_v18  ;;  %v1846_v15 = vld [vmem:[%s6613_s7 + $0x250] sm:$0xff]  ;;  %v1847_v17 = vld [vmem:[%s6613_s7 + $0x258] sm:$0xff]  ;;  %v4529_v18 = vcombine.low %v1822_v7, %v1830_v4  ;;  %v1816_v7 = vld [vmem:[%s6613_s7 + $0x160] sm:$0xff] }
 0x7a9   : > { %2636 = vmatprep.subr.bf16.mxu1 %v4574_v20  ;;  %v4546_v20 = vcombine.high %v1838_v14, %v1846_v15  ;;  %v4545_v26 = vcombine.low %v1838_v14, %v1846_v15  ;;  %v4547_v27 = vcombine.low %v1839_v16, %v1847_v17  ;;  %v1809_v4 = vld [vmem:[%s6613_s7 + $0x128] sm:$0xff]  ;;  %v1832_v14 = vld [vmem:[%s6613_s7 + $0x1e0] sm:$0xff] }
 0x7aa   : > { %2637 = vmatpush1.bf16.msra.mxu1 %v4573_v22  ;;  %v1854_v22 = vld [vmem:[%s6613_s7 + $0x290] sm:$0xff]  ;;  %v1825_v15 = vld [vmem:[%s6613_s7 + $0x1a8] sm:$0xff] }
 0x7ab   : > { %2638 = vmatprep.subr.bf16.mxu1 %v4590_v28 }
 0x7ae   : > { %2639 = vmatpush1.bf16.msra.mxu1 %v4589_v33  ;;  %v1870_v33 = vld [vmem:[%s6613_s7 + $0x310] sm:$0xff] }
 0x7af   : > { %2706 = vmatprep.subr.bf16.mxu1 %v4482_v40 }
 0x835   : > { %v1745_v52 = vpop.xlane.xlu1 %1744 }
 0x836   : > { %v1747_v53 = vmul.f32 0.0078125, %v1745_v52  ;;  %v4476_v52 = vld [vmem:[%s6612_s6] ss:$0 sm:$0xff] }
 0x838   : > { %v5765_v54 = vsub.f32 %v1739_v21, %v1747_v53  ;;  %v1877_v21 = vld [vmem:[%s6613_s7 + $0x348] sm:$0xff] }
 0x839   : > { %v4575_v23 = vcombine.low %v1869_v19, %v1877_v21  ;;  %v4576_v24 = vcombine.high %v1869_v19, %v1877_v21  ;;  %v4531_v19 = vcombine.low %v1823_v8, %v1831_v9  ;;  %v4548_v21 = vcombine.high %v1839_v16, %v1847_v17  ;;  %v1817_v8 = vld [vmem:[%s6613_s7 + $0x168] sm:$0xff] }
 0x83a   : > { %v1749_v55 = vmul.f32 %v5765_v54, %v5765_v54  ;;  %v1833_v16 = vld [vmem:[%s6613_s7 + $0x1e8] sm:$0xff] }
 0x83b   : > { %2677 = vmatprep.subr.bf16.mxu0 %v4576_v24  ;;  %v1855_v24 = vld [vmem:[%s6613_s7 + $0x298] sm:$0xff] }
 0x83c   : > { %v1750_v56 = vsel %vm1742_vm13, %v1749_v55, 0.0  ;;  %2678 = vmatpush1.bf16.msra.mxu0 %v4575_v23  ;;  %v1790_v55 = vld [vmem:[%s6613_s7 + $0x90] sm:$0xff]  ;;  %v4564_v31 = vcombine.high %v1855_v24, %v1863_v25  ;;  %v4563_v38 = vcombine.low %v1855_v24, %v1863_v25  ;;  %v1849_v24 = vld [vmem:[%s6613_s7 + $0x268] sm:$0xff] }
 0x83d   : > { %1751 = vadd.xlane.f32.xlu0 %v1750_v56  ;;  %2679 = vmatprep.subr.bf16.mxu0 %v4592_v35  ;;  %v1798_v56 = vld [vmem:[%s6613_s7 + $0xd0] sm:$0xff]  ;;  %v1871_v35 = vld [vmem:[%s6613_s7 + $0x318] sm:$0xff] }
 0x83e   : > { %v4498_v60 = vcombine.high %v1790_v55, %v1798_v56  ;;  %v4497_v1 = vcombine.low %v1790_v55, %v1798_v56  ;;  %v1862_v23 = vld [vmem:[%s6613_s7 + $0x2d0] sm:$0xff]  ;;  %v4580_v40 = vcombine.high %v1871_v35, %v1879_v36  ;;  %v1785_v55 = vld [vmem:[%s6613_s7 + $0x68] sm:$0xff] }
 0x83f   : > { %v4562_v28 = vcombine.high %v1854_v22, %v1862_v23  ;;  %v4561_v37 = vcombine.low %v1854_v22, %v1862_v23  ;;  %v1848_v22 = vld [vmem:[%s6613_s7 + $0x260] sm:$0xff]  ;;  %v1841_v23 = vld [vmem:[%s6613_s7 + $0x228] sm:$0xff] }
 0x840   : > { %2680 = vmatpush1.bf16.msra.mxu0 %v4591_v34  ;;  %v1878_v34 = vld [vmem:[%s6613_s7 + $0x350] sm:$0xff] }
 0x841   : > { %2747 = vmatprep.subr.bf16.mxu0 %v4484_v43  ;;  %v1887_v43 = vld [vmem:[%s6613_s7 + $0x398] sm:$0xff] }
 0x8ca   : > { %v1752_v44 = vpop.xlane.xlu0 %1751 }
 0x8cb   : > { %v1753_v46 = vmul.f32 0.0078125, %v1752_v44  ;;  %v1895_v44 = vld [vmem:[%s6613_s7 + $0x3d8] sm:$0xff] }
 0x8cd   : > { %v1754_v47 = vadd.f32 1e-05, %v1753_v46  ;;  %v4577_v46 = vcombine.low %v1870_v33, %v1878_v34 }
 0x8cf   : > { %5318 = vrsqrt.f32 %v1754_v47  ;;  %v4579_v47 = vcombine.low %v1871_v35, %v1879_v36  ;;  %v1865_v35 = vld [vmem:[%s6613_s7 + $0x2e8] sm:$0xff] }
 0x8d9   : > { %v5319_v48 = vpop.eup %5318 }
 0x8da   : > { %v1756_v50 = vmul.f32 %v5319_v48, %v5765_v54  ;;  %v1799_v54 = vld [vmem:[%s6613_s7 + $0xd8] sm:$0xff] }
 0x8db   : > { %v4500_v51 = vcombine.high %v1791_v57, %v1799_v54  ;;  %v4499_v3 = vcombine.low %v1791_v57, %v1799_v54  ;;  %v4595_v57 = vcombine.low %v1887_v43, %v1895_v44 }
 0x8dc   : > { %v1763_v53 = vmul.f32 %v4475_v49, %v1756_v50  ;;  %v4596_v49 = vcombine.high %v1887_v43, %v1895_v44  ;;  %v1776_v50 = vld [vmem:[%s6613_s7 + $0x20] sm:$0xff]  ;;  %v1881_v43 = vld [vmem:[%s6613_s7 + $0x368] sm:$0xff] }
 0x8de   : > { %v5861_v58 = vadd.f32 %v4476_v52, %v1763_v53  ;;  %v1784_v52 = vld [vmem:[%s6613_s7 + $0x60] sm:$0xff]  ;;  %v1777_v53 = vld [vmem:[%s6613_s7 + $0x28] sm:$0xff] }
 0x8df   : > { %v4486_v54 = vcombine.high %v1776_v50, %v1784_v52  ;;  %v4485_v0 = vcombine.low %v1776_v50, %v1784_v52  ;;  %v1896_v50 = vld [vmem:[%s6613_s7 + $0x3e0] sm:$0xff]  ;;  %v1889_v52 = vld [vmem:[%s6613_s7 + $0x3a8] sm:$0xff] }
 0x8e0   : > { %v5865_v59 = vpack.c.bf16 %v5861_v58, %v5861_v58 }
 0x8e2   : > { %2657 = vmatmul.mubr.bf16.vlgmr.msra.gmra.mrb[44].mxu1 %v5865_v59  ;;  %2698 = vmatmul.mubr.bf16.vlgmr.msra.gmra.mrb[32].mxu0 %v5865_v59 }
 0x8e3   : > { %2707 = vmatpush1.bf16.msra.mxu1 %v4481_v39  ;;  %2748 = vmatpush1.bf16.msra.mxu0 %v4483_v42  ;;  %v4578_v39 = vcombine.high %v1870_v33, %v1878_v34  ;;  %v1894_v42 = vld [vmem:[%s6613_s7 + $0x3d0] sm:$0xff]  ;;  %v1864_v33 = vld [vmem:[%s6613_s7 + $0x2e0] sm:$0xff]  ;;  %v1857_v34 = vld [vmem:[%s6613_s7 + $0x2a8] sm:$0xff] }
 0x8e4   : > { %2708 = vmatprep.subr.bf16.mxu1 %v4498_v60  ;;  %2749 = vmatprep.subr.bf16.mxu0 %v4500_v51  ;;  %v4594_v48 = vcombine.high %v1886_v41, %v1894_v42  ;;  %v4593_v56 = vcombine.low %v1886_v41, %v1894_v42  ;;  %v4488_v60 = vcombine.high %v1777_v53, %v1785_v55  ;;  %v1792_v51 = vld [vmem:[%s6613_s7 + $0xa0] sm:$0xff]  ;;  %v1873_v42 = vld [vmem:[%s6613_s7 + $0x328] sm:$0xff] }
 0x8e5   : > { %2738 = vmatprep.mubr.bf16.mxu1 %v5331_v2  ;;  %2779 = vmatprep.mubr.bf16.mxu0 %v5331_v2  ;;  %v4501_v9 = vcombine.low %v1792_v51, %v1800_v61  ;;  %v1880_v41 = vld [vmem:[%s6613_s7 + $0x360] sm:$0xff] }
 0x8e7   : > { %2709 = vmatpush1.bf16.msra.mxu1 %v4497_v1  ;;  %2750 = vmatpush1.bf16.msra.mxu0 %v4499_v3  ;;  %v4487_v1 = vcombine.low %v1777_v53, %v1785_v55  ;;  %v4502_v3 = vcombine.high %v1792_v51, %v1800_v61  ;;  %v1897_v53 = vld [vmem:[%s6613_s7 + $0x3e8] sm:$0xff]  ;;  %v1786_v51 = vld [vmem:[%s6613_s7 + $0x70] sm:$0xff]  ;;  %v1779_v61 = vld [vmem:[%s6613_s7 + $0x38] sm:$0xff] }
 0x8e8   : > { %2710 = vmatprep.subr.bf16.mxu1 %v4514_v5  ;;  %2751 = vmatprep.subr.bf16.mxu0 %v4516_v6  ;;  %v4504_v5 = vcombine.high %v1793_v62, %v1801_v63  ;;  %v1808_v6 = vld [vmem:[%s6613_s7 + $0x120] sm:$0xff] }
 0x8e9   : > { %v4517_v17 = vcombine.low %v1808_v6, %v1816_v7 }
 0x8eb   : > { %2711 = vmatpush1.bf16.msra.mxu1 %v4513_v10  ;;  %2752 = vmatpush1.bf16.msra.mxu0 %v4515_v11  ;;  %v4503_v10 = vcombine.low %v1793_v62, %v1801_v63  ;;  %v4518_v11 = vcombine.high %v1808_v6, %v1816_v7  ;;  %v1787_v62 = vld [vmem:[%s6613_s7 + $0x78] sm:$0xff]  ;;  %v1802_v6 = vld [vmem:[%s6613_s7 + $0xf0] sm:$0xff] }
 0x8ec   : > { %2712 = vmatprep.subr.bf16.mxu1 %v4530_v12  ;;  %2753 = vmatprep.subr.bf16.mxu0 %v4532_v13  ;;  %v4520_v12 = vcombine.high %v1809_v4, %v1817_v8  ;;  %v1824_v13 = vld [vmem:[%s6613_s7 + $0x1a0] sm:$0xff]  ;;  %v1795_v7 = vld [vmem:[%s6613_s7 + $0xb8] sm:$0xff] }
 0x8ed   : > { %v4533_v25 = vcombine.low %v1824_v13, %v1832_v14 }
 0x8ef   : > { %2713 = vmatpush1.bf16.msra.mxu1 %v4529_v18  ;;  %2754 = vmatpush1.bf16.msra.mxu0 %v4531_v19  ;;  %v4519_v18 = vcombine.low %v1809_v4, %v1817_v8  ;;  %v4534_v19 = vcombine.high %v1824_v13, %v1832_v14  ;;  %v1803_v4 = vld [vmem:[%s6613_s7 + $0xf8] sm:$0xff]  ;;  %v1818_v13 = vld [vmem:[%s6613_s7 + $0x170] sm:$0xff] }
 0x8f0   : > { %2714 = vmatprep.subr.bf16.mxu1 %v4546_v20  ;;  %2755 = vmatprep.subr.bf16.mxu0 %v4548_v21  ;;  %v4536_v20 = vcombine.high %v1825_v15, %v1833_v16  ;;  %v1840_v21 = vld [vmem:[%s6613_s7 + $0x220] sm:$0xff]  ;;  %v1811_v14 = vld [vmem:[%s6613_s7 + $0x138] sm:$0xff] }
 0x8f1   : > { %v4549_v36 = vcombine.low %v1840_v21, %v1848_v22 }
 0x8f3   : > { %2715 = vmatpush1.bf16.msra.mxu1 %v4545_v26  ;;  %2756 = vmatpush1.bf16.msra.mxu0 %v4547_v27  ;;  %v4535_v26 = vcombine.low %v1825_v15, %v1833_v16  ;;  %v4550_v27 = vcombine.high %v1840_v21, %v1848_v22  ;;  %v1819_v15 = vld [vmem:[%s6613_s7 + $0x178] sm:$0xff]  ;;  %v1834_v21 = vld [vmem:[%s6613_s7 + $0x1f0] sm:$0xff] }
 0x8f4   : > { %2716 = vmatprep.subr.bf16.mxu1 %v4562_v28  ;;  %2757 = vmatprep.subr.bf16.mxu0 %v4564_v31  ;;  %v4552_v28 = vcombine.high %v1841_v23, %v1849_v24  ;;  %v1856_v31 = vld [vmem:[%s6613_s7 + $0x2a0] sm:$0xff]  ;;  %v1827_v22 = vld [vmem:[%s6613_s7 + $0x1b8] sm:$0xff] }
 0x8f5   : > { %v4565_v44 = vcombine.low %v1856_v31, %v1864_v33 }
 0x8f7   : > { %2717 = vmatpush1.bf16.msra.mxu1 %v4561_v37  ;;  %2758 = vmatpush1.bf16.msra.mxu0 %v4563_v38  ;;  %v4551_v37 = vcombine.low %v1841_v23, %v1849_v24  ;;  %v4566_v38 = vcombine.high %v1856_v31, %v1864_v33  ;;  %v1835_v23 = vld [vmem:[%s6613_s7 + $0x1f8] sm:$0xff]  ;;  %v1850_v31 = vld [vmem:[%s6613_s7 + $0x270] sm:$0xff] }
 0x8f8   : > { %2718 = vmatprep.subr.bf16.mxu1 %v4578_v39  ;;  %2759 = vmatprep.subr.bf16.mxu0 %v4580_v40  ;;  %v4568_v39 = vcombine.high %v1857_v34, %v1865_v35  ;;  %v1872_v40 = vld [vmem:[%s6613_s7 + $0x320] sm:$0xff]  ;;  %v1851_v33 = vld [vmem:[%s6613_s7 + $0x278] sm:$0xff] }
 0x8f9   : > { %v4581_v55 = vcombine.low %v1872_v40, %v1880_v41 }
 0x8fb   : > { %2719 = vmatpush1.bf16.msra.mxu1 %v4577_v46  ;;  %2760 = vmatpush1.bf16.msra.mxu0 %v4579_v47  ;;  %v4567_v46 = vcombine.low %v1857_v34, %v1865_v35  ;;  %v4582_v47 = vcombine.high %v1872_v40, %v1880_v41  ;;  %v4539_v35 = vcombine.low %v1827_v22, %v1835_v23  ;;  %v1859_v40 = vld [vmem:[%s6613_s7 + $0x2b8] sm:$0xff] }
 0x8fc   : > { %2720 = vmatprep.subr.bf16.mxu1 %v4594_v48  ;;  %2761 = vmatprep.subr.bf16.mxu0 %v4596_v49  ;;  %v4584_v48 = vcombine.high %v1873_v42, %v1881_v43  ;;  %v1888_v49 = vld [vmem:[%s6613_s7 + $0x3a0] sm:$0xff]  ;;  %v1867_v41 = vld [vmem:[%s6613_s7 + $0x2f8] sm:$0xff] }
 0x8fd   : > { %v4597_v63 = vcombine.low %v1888_v49, %v1896_v50 }
 0x8ff   : > { %2721 = vmatpush1.bf16.msra.mxu1 %v4593_v56  ;;  %2762 = vmatpush1.bf16.msra.mxu0 %v4595_v57  ;;  %v4583_v56 = vcombine.low %v1873_v42, %v1881_v43  ;;  %v4598_v57 = vcombine.high %v1888_v49, %v1896_v50  ;;  %v1875_v49 = vld [vmem:[%s6613_s7 + $0x338] sm:$0xff] }
 0x900   : > { %2788 = vmatprep.subr.bf16.mxu1 %v4486_v54  ;;  %2829 = vmatprep.subr.bf16.mxu0 %v4488_v60  ;;  %v4600_v54 = vcombine.high %v1889_v52, %v1897_v53  ;;  %v1778_v60 = vld [vmem:[%s6613_s7 + $0x30] sm:$0xff]  ;;  %v1883_v50 = vld [vmem:[%s6613_s7 + $0x378] sm:$0xff] }
 0x901   : > { %v4489_v8 = vcombine.low %v1778_v60, %v1786_v51 }
 0x902   : > { %2739 = vmatmul.mubr.bf16.vlgmr.msra.gmra.mrb[48].mxu1 %v5865_v59  ;;  %2780 = vmatmul.mubr.bf16.vlgmr.msra.gmra.mrb[36].mxu0 %v5865_v59 }
 0x903   : > { %2789 = vmatpush1.bf16.msra.mxu1 %v4485_v0  ;;  %2830 = vmatpush1.bf16.msra.mxu0 %v4487_v1  ;;  %v4599_v0 = vcombine.low %v1889_v52, %v1897_v53  ;;  %v4490_v1 = vcombine.high %v1778_v60, %v1786_v51  ;;  %v4571_v53 = vcombine.low %v1859_v40, %v1867_v41  ;;  %v1891_v60 = vld [vmem:[%s6613_s7 + $0x3b8] sm:$0xff] }
 0x904   : > { %2790 = vmatprep.subr.bf16.mxu1 %v4502_v3  ;;  %2831 = vmatprep.subr.bf16.mxu0 %v4504_v5  ;;  %v4492_v3 = vcombine.high %v1779_v61, %v1787_v62  ;;  %v1794_v5 = vld [vmem:[%s6613_s7 + $0xb0] sm:$0xff]  ;;  %v1899_v51 = vld [vmem:[%s6613_s7 + $0x3f8] sm:$0xff] }
 0x905   : > { %2820 = vmatprep.mubr.bf16.mxu1 %v5331_v2  ;;  %2861 = vmatprep.mubr.bf16.mxu0 %v5331_v2  ;;  %v4505_v16 = vcombine.low %v1794_v5, %v1802_v6 }
 0x907   : > { %2791 = vmatpush1.bf16.msra.mxu1 %v4501_v9  ;;  %2832 = vmatpush1.bf16.msra.mxu0 %v4503_v10  ;;  %v4491_v9 = vcombine.low %v1779_v61, %v1787_v62  ;;  %v4506_v10 = vcombine.high %v1794_v5, %v1802_v6  ;;  %v4587_v62 = vcombine.low %v1875_v49, %v1883_v50  ;;  %v5158_v5 = vld [vmem:[%s6615_s9 + $0x40] sm:$0xff]  }
 0x908   : > { %2792 = vmatprep.subr.bf16.mxu1 %v4518_v11  ;;  %2833 = vmatprep.subr.bf16.mxu0 %v4520_v12  ;;  %v4508_v11 = vcombine.high %v1795_v7, %v1803_v4  ;;  %v1810_v12 = vld [vmem:[%s6613_s7 + $0x130] sm:$0xff]  ;;  %v5159_v6 = vld [vmem:[%s6615_s9 + $0xc0] sm:$0xff]  }
 0x909   : > { %v4521_v24 = vcombine.low %v1810_v12, %v1818_v13 }
 0x90b   : > { %2793 = vmatpush1.bf16.msra.mxu1 %v4517_v17  ;;  %2834 = vmatpush1.bf16.msra.mxu0 %v4519_v18  ;;  %v4507_v17 = vcombine.low %v1795_v7, %v1803_v4  ;;  %v4522_v18 = vcombine.high %v1810_v12, %v1818_v13  ;;  %v5160_v7 = vld [vmem:[%s6615_s9] sm:$0xff]   ;;  %v5166_v12 = vld [vmem:[%s6615_s9 + $0x50] sm:$0xff]  }
 0x90c   : > { %2794 = vmatprep.subr.bf16.mxu1 %v4534_v19  ;;  %2835 = vmatprep.subr.bf16.mxu0 %v4536_v20  ;;  %v4524_v19 = vcombine.high %v1811_v14, %v1819_v15  ;;  %v1826_v20 = vld [vmem:[%s6613_s7 + $0x1b0] sm:$0xff]  ;;  %v5161_v4 = vld [vmem:[%s6615_s9 + $0x80] sm:$0xff]  }
 0x90d   : > { %v4537_v34 = vcombine.low %v1826_v20, %v1834_v21  ;;  %v5168_v13 = vld [vmem:[%s6615_s9 + $0x10] sm:$0xff]  }
 0x90f   : > { %2795 = vmatpush1.bf16.msra.mxu1 %v4533_v25  ;;  %2836 = vmatpush1.bf16.msra.mxu0 %v4535_v26  ;;  %v4523_v25 = vcombine.low %v1811_v14, %v1819_v15  ;;  %v4538_v26 = vcombine.high %v1826_v20, %v1834_v21  ;;  %v5169_v14 = vld [vmem:[%s6615_s9 + $0x90] sm:$0xff]   ;;  %v5170_v15 = vld [vmem:[%s6615_s9 + $0x58] sm:$0xff]   ;;  %v5175_v20 = vld [vmem:[%s6615_s9 + $0xe0] sm:$0xff]  }
 0x910   : > { %2796 = vmatprep.subr.bf16.mxu1 %v4550_v27  ;;  %2837 = vmatprep.subr.bf16.mxu0 %v4552_v28  ;;  %v4540_v27 = vcombine.high %v1827_v22, %v1835_v23  ;;  %v1842_v28 = vld [vmem:[%s6613_s7 + $0x230] sm:$0xff]  ;;  %v5176_v21 = vld [vmem:[%s6615_s9 + $0x20] sm:$0xff]   ;;  %v5178_v23 = vld [vmem:[%s6615_s9 + $0x68] sm:$0xff]  }
 0x911   : > { %v4553_v42 = vcombine.low %v1842_v28, %v1850_v31  ;;  %v5177_v22 = vld [vmem:[%s6615_s9 + $0xa0] sm:$0xff]  }
 0x913   : > { %2797 = vmatpush1.bf16.msra.mxu1 %v4549_v36  ;;  %2838 = vmatpush1.bf16.msra.mxu0 %v4551_v37  ;;  %v4554_v36 = vcombine.high %v1842_v28, %v1850_v31  ;;  %v5183_v28 = vld [vmem:[%s6615_s9 + $0xf0] sm:$0xff]  }
 0x914   : > { %2798 = vmatprep.subr.bf16.mxu1 %v4566_v38  ;;  %2839 = vmatprep.subr.bf16.mxu0 %v4568_v39  ;;  %v1858_v38 = vld [vmem:[%s6613_s7 + $0x2b0] sm:$0xff] }
 0x915   : > { %v1866_v39 = vld [vmem:[%s6613_s7 + $0x2f0] sm:$0xff] }
 0x916   : > { %v4569_v52 = vcombine.low %v1858_v38, %v1866_v39  ;;  %v5184_v31 = vld [vmem:[%s6615_s9 + $0x30] sm:$0xff]  }
 0x917   : > { %2799 = vmatpush1.bf16.msra.mxu1 %v4565_v44  ;;  %2840 = vmatpush1.bf16.msra.mxu0 %v4567_v46  ;;  %v4570_v44 = vcombine.high %v1858_v38, %v1866_v39  ;;  %v4572_v46 = vcombine.high %v1859_v40, %v1867_v41  ;;  %v5191_v38 = vld [vmem:[%s6615_s9 + $0x1c0] sm:$0xff]   ;;  %v1918_v40 = vsub.s32 3, %v5519_v29 }
 0x918   : > { %2800 = vmatprep.subr.bf16.mxu1 %v4582_v47  ;;  %2841 = vmatprep.subr.bf16.mxu0 %v4584_v48  ;;  %v1874_v47 = vld [vmem:[%s6613_s7 + $0x330] sm:$0xff]  ;;  %v6250_v39 = vld [vmem:[%s6614_s8] sm:$0xff] }
 0x919   : > { %v1882_v48 = vld [vmem:[%s6613_s7 + $0x370] sm:$0xff]  ;;  %v1907_v41 = vrot.slane %v6250_v39, %v5522_v30 }
 0x91a   : > { %v4585_v61 = vcombine.low %v1874_v47, %v1882_v48 }
 0x91b   : > { %2801 = vmatpush1.bf16.msra.mxu1 %v4581_v55  ;;  %2842 = vmatpush1.bf16.msra.mxu0 %v4583_v56  ;;  %v4586_v55 = vcombine.high %v1874_v47, %v1882_v48  ;;  %v4588_v56 = vcombine.high %v1875_v49, %v1883_v50 }
 0x91c   : > { %2802 = vmatprep.subr.bf16.mxu1 %v4598_v57  ;;  %2843 = vmatprep.subr.bf16.mxu0 %v4600_v54  ;;  %v1890_v57 = vld [vmem:[%s6613_s7 + $0x3b0] sm:$0xff] }
 0x91d   : > { %v1898_v54 = vld [vmem:[%s6613_s7 + $0x3f0] sm:$0xff] }
 0x91f   : > { %2803 = vmatpush1.bf16.msra.mxu1 %v4597_v63  ;;  %2844 = vmatpush1.bf16.msra.mxu0 %v4599_v0  ;;  %v4602_v63 = vcombine.high %v1890_v57, %v1898_v54  ;;  %v4604_v0 = vcombine.high %v1891_v60, %v1899_v51 }
 0x920   : > { %2870 = vmatprep.subr.bf16.mxu1 %v4490_v1  ;;  %2911 = vmatprep.subr.bf16.mxu0 %v4492_v3  ;;  %v4601_v1 = vcombine.low %v1890_v57, %v1898_v54  ;;  %v4603_v3 = vcombine.low %v1891_v60, %v1899_v51 }
 0x922   : > { %2821 = vmatmul.mubr.bf16.vlgmr.msra.gmra.mrb[52].mxu1 %v5865_v59  ;;  %2862 = vmatmul.mubr.bf16.vlgmr.msra.gmra.mrb[40].mxu0 %v5865_v59 }
 0x923   : > { %2871 = vmatpush1.bf16.msra.mxu1 %v4489_v8  ;;  %2912 = vmatpush1.bf16.msra.mxu0 %v4491_v9  ;;  %v5162_v8 = vld [vmem:[%s6615_s9 + $0x48] sm:$0xff]  }
 0x924   : > { %2872 = vmatprep.subr.bf16.mxu1 %v4506_v10  ;;  %2913 = vmatprep.subr.bf16.mxu0 %v4508_v11  ;;  %v5163_v9 = vld [vmem:[%s6615_s9 + $0xc8] sm:$0xff]  }
 0x925   : > { %2902 = vmatprep.mubr.bf16.mxu1 %v5331_v2  ;;  %2943 = vmatprep.mubr.bf16.mxu0 %v5331_v2  ;;  %v1843_v2 = vld [vmem:[%s6613_s7 + $0x238] sm:$0xff]  ;;  %v5164_v10 = vld [vmem:[%s6615_s9 + $0x8] sm:$0xff]  }
 0x926   : > { %v4556_v37 = vcombine.high %v1843_v2, %v1851_v33  ;;  %v4555_v43 = vcombine.low %v1843_v2, %v1851_v33  ;;  %v5165_v11 = vld [vmem:[%s6615_s9 + $0x88] sm:$0xff]   ;;  %v5185_v2 = vld [vmem:[%s6615_s9 + $0xb0] sm:$0xff]   ;;  %v5186_v33 = vld [vmem:[%s6615_s9 + $0x78] sm:$0xff]  }
 0x927   : > { %2873 = vmatpush1.bf16.msra.mxu1 %v4505_v16  ;;  %2914 = vmatpush1.bf16.msra.mxu0 %v4507_v17  ;;  %v5171_v16 = vld [vmem:[%s6615_s9 + $0xd8] sm:$0xff]  }
 0x928   : > { %2874 = vmatprep.subr.bf16.mxu1 %v4522_v18  ;;  %2915 = vmatprep.subr.bf16.mxu0 %v4524_v19  ;;  %v5172_v17 = vld [vmem:[%s6615_s9 + $0x18] sm:$0xff]   ;;  %v5174_v19 = vld [vmem:[%s6615_s9 + $0x60] sm:$0xff]  }
 0x929   : > { %v5173_v18 = vld [vmem:[%s6615_s9 + $0x98] sm:$0xff]  }
 0x92b   : > { %2875 = vmatpush1.bf16.msra.mxu1 %v4521_v24  ;;  %2916 = vmatpush1.bf16.msra.mxu0 %v4523_v25  ;;  %v5179_v24 = vld [vmem:[%s6615_s9 + $0xe8] sm:$0xff]  }
 0x92c   : > { %2876 = vmatprep.subr.bf16.mxu1 %v4538_v26  ;;  %2917 = vmatprep.subr.bf16.mxu0 %v4540_v27  ;;  %v5180_v25 = vld [vmem:[%s6615_s9 + $0x28] sm:$0xff]   ;;  %v5182_v27 = vld [vmem:[%s6615_s9 + $0x70] sm:$0xff]  }
 0x92d   : > { %v5181_v26 = vld [vmem:[%s6615_s9 + $0xa8] sm:$0xff]  }
 0x92f   : > { %2877 = vmatpush1.bf16.msra.mxu1 %v4537_v34  ;;  %2918 = vmatpush1.bf16.msra.mxu0 %v4539_v35  ;;  %v5187_v34 = vld [vmem:[%s6615_s9 + $0xf8] sm:$0xff]  }
 0x930   : > { %2878 = vmatprep.subr.bf16.mxu1 %v4554_v36  ;;  %2919 = vmatprep.subr.bf16.mxu0 %v4556_v37  ;;  %v5188_v35 = vld [vmem:[%s6615_s9 + $0x38] sm:$0xff]   ;;  %v5190_v37 = vld [vmem:[%s6615_s9 + $0x140] sm:$0xff]  }
 0x931   : > { %v5189_v36 = vld [vmem:[%s6615_s9 + $0xb8] sm:$0xff]  }
 0x933   : > { %2879 = vmatpush1.bf16.msra.mxu1 %v4553_v42  ;;  %2920 = vmatpush1.bf16.msra.mxu0 %v4555_v43  ;;  %v1915_v42 = vrot.slane %v6250_v39, %v5548_v45  ;;  %v1911_v43 = vrot.slane %v6250_v39, %v5528_v32 }
 0x934   : > { %2880 = vmatprep.subr.bf16.mxu1 %v4570_v44  ;;  %2921 = vmatprep.subr.bf16.mxu0 %v4572_v46  ;;  %v1919_v44 = vrot.slane %v6250_v39, %v1918_v40 }
 0x937   : > { %2881 = vmatpush1.bf16.msra.mxu1 %v4569_v52  ;;  %2922 = vmatpush1.bf16.msra.mxu0 %v4571_v53 }
 0x938   : > { %2882 = vmatprep.subr.bf16.mxu1 %v4586_v55  ;;  %2923 = vmatprep.subr.bf16.mxu0 %v4588_v56 }
 0x93b   : > { %2883 = vmatpush1.bf16.msra.mxu1 %v4585_v61  ;;  %2924 = vmatpush1.bf16.msra.mxu0 %v4587_v62 }
 0x93c   : > { %2884 = vmatprep.subr.bf16.mxu1 %v4602_v63  ;;  %2925 = vmatprep.subr.bf16.mxu0 %v4604_v0 }
 0x93f   : > { %2885 = vmatpush1.bf16.msra.mxu1 %v4601_v1  ;;  %2926 = vmatpush1.bf16.msra.mxu0 %v4603_v3  ;;  %v5192_v3 = vld [vmem:[%s6615_s9 + $0x100] sm:$0xff]  }
 0x940   : > { %4788 = vmatprep.subr.bf16.mxu1 %v5158_v5  ;;  %4810 = vmatprep.subr.bf16.mxu0 %v5159_v6  ;;  %v5193_v5 = vld [vmem:[%s6615_s9 + $0x180] sm:$0xff]  }
 0x942   : > { %2903 = vmatmul.mubr.bf16.vlgmr.msra.gmra.mrb[56].mxu1 %v5865_v59  ;;  %2944 = vmatmul.mubr.bf16.vlgmr.msra.gmra.mrb[44].mxu0 %v5865_v59  ;;  %v5167_v59 = vld [vmem:[%s6615_s9 + $0xd0] sm:$0xff]  }
 0x943   : > { %4789 = vmatpush3.bf16.msra.mxu1 %v5160_v7  ;;  %4811 = vmatpush3.bf16.msra.mxu0 %v5161_v4  ;;  %v5194_v4 = vld [vmem:[%s6615_s9 + $0x148] sm:$0xff]  }
 0x944   : > { %4790 = vmatprep.subr.bf16.mxu1 %v5162_v8  ;;  %4812 = vmatprep.subr.bf16.mxu0 %v5163_v9  ;;  %v5195_v8 = vld [vmem:[%s6615_s9 + $0x1c8] sm:$0xff]  }
 0x945   : > { %v5196_v9 = vld [vmem:[%s6615_s9 + $0x108] sm:$0xff]  }
 0x947   : > { %4791 = vmatpush3.bf16.msra.mxu1 %v5164_v10  ;;  %4813 = vmatpush3.bf16.msra.mxu0 %v5165_v11  ;;  %v5197_v10 = vld [vmem:[%s6615_s9 + $0x188] sm:$0xff]   ;;  %v5198_v11 = vld [vmem:[%s6615_s9 + $0x150] sm:$0xff]  }
 0x948   : > { %4792 = vmatprep.subr.bf16.mxu1 %v5166_v12  ;;  %4814 = vmatprep.subr.bf16.mxu0 %v5167_v59  ;;  %v5199_v12 = vld [vmem:[%s6615_s9 + $0x1d0] sm:$0xff]  }
 0x949   : > { %v5200_v59 = vld [vmem:[%s6615_s9 + $0x110] sm:$0xff]  }
 0x94b   : > { %4793 = vmatpush3.bf16.msra.mxu1 %v5168_v13  ;;  %4815 = vmatpush3.bf16.msra.mxu0 %v5169_v14  ;;  %v5201_v13 = vld [vmem:[%s6615_s9 + $0x190] sm:$0xff]   ;;  %v5202_v14 = vld [vmem:[%s6615_s9 + $0x158] sm:$0xff]  }
 0x94c   : > { %4794 = vmatprep.subr.bf16.mxu1 %v5170_v15  ;;  %4816 = vmatprep.subr.bf16.mxu0 %v5171_v16  ;;  %v5203_v15 = vld [vmem:[%s6615_s9 + $0x1d8] sm:$0xff]  }
 0x94d   : > { %v5204_v16 = vld [vmem:[%s6615_s9 + $0x118] sm:$0xff]  }
 0x94f   : > { %4795 = vmatpush3.bf16.msra.mxu1 %v5172_v17  ;;  %4817 = vmatpush3.bf16.msra.mxu0 %v5173_v18  ;;  %v5205_v17 = vld [vmem:[%s6615_s9 + $0x198] sm:$0xff]   ;;  %v5206_v18 = vld [vmem:[%s6615_s9 + $0x160] sm:$0xff]  }
 0x950   : > { %4796 = vmatprep.subr.bf16.mxu1 %v5174_v19  ;;  %4818 = vmatprep.subr.bf16.mxu0 %v5175_v20  ;;  %v5207_v19 = vld [vmem:[%s6615_s9 + $0x1e0] sm:$0xff]  }
 0x951   : > { %v5208_v20 = vld [vmem:[%s6615_s9 + $0x120] sm:$0xff]  }
 0x953   : > { %4797 = vmatpush3.bf16.msra.mxu1 %v5176_v21  ;;  %4819 = vmatpush3.bf16.msra.mxu0 %v5177_v22  ;;  %v5209_v21 = vld [vmem:[%s6615_s9 + $0x1a0] sm:$0xff]   ;;  %v5210_v22 = vld [vmem:[%s6615_s9 + $0x168] sm:$0xff]  }
 0x954   : > { %4798 = vmatprep.subr.bf16.mxu1 %v5178_v23  ;;  %4820 = vmatprep.subr.bf16.mxu0 %v5179_v24  ;;  %v5211_v23 = vld [vmem:[%s6615_s9 + $0x1e8] sm:$0xff]   ;;  %v1922_v24 = vsub.s32 4, %v5519_v29 }
 0x957   : > { %4799 = vmatpush3.bf16.msra.mxu1 %v5180_v25  ;;  %4821 = vmatpush3.bf16.msra.mxu0 %v5181_v26  ;;  %v1930_v25 = vsub.s32 6, %v5519_v29  ;;  %v5212_v26 = vld [vmem:[%s6615_s9 + $0x128] sm:$0xff]  }
 0x958   : > { %4800 = vmatprep.subr.bf16.mxu1 %v5182_v27  ;;  %4822 = vmatprep.subr.bf16.mxu0 %v5183_v28  ;;  %v5213_v27 = vld [vmem:[%s6615_s9 + $0x1a8] sm:$0xff]   ;;  %v1926_v28 = vsub.s32 5, %v5519_v29 }
 0x95b   : > { %4801 = vmatpush3.bf16.msra.mxu1 %v5184_v31  ;;  %4823 = vmatpush3.bf16.msra.mxu0 %v5185_v2  ;;  %v1934_v31 = vsub.s32 7, %v5519_v29  ;;  %v5214_v2 = vld [vmem:[%s6615_s9 + $0x170] sm:$0xff]   ;;  %v5283_v29 = vld [vmem:[%s6615_s9 + $0x3f8] sm:$0xff]  }
 0x95c   : > { %4802 = vmatprep.subr.bf16.mxu1 %v5186_v33  ;;  %4824 = vmatprep.subr.bf16.mxu0 %v5187_v34  ;;  %v5215_v33 = vld [vmem:[%s6615_s9 + $0x1f0] sm:$0xff]   ;;  %v1923_v34 = vrot.slane %v6250_v39, %v1922_v24 }
 0x95f   : > { %4803 = vmatpush3.bf16.msra.mxu1 %v5188_v35  ;;  %4825 = vmatpush3.bf16.msra.mxu0 %v5189_v36  ;;  %v1931_v35 = vrot.slane %v6250_v39, %v1930_v25  ;;  %v1927_v36 = vrot.slane %v6250_v39, %v1926_v28 }
 0x960   : > { %4832 = vmatprep.subr.bf16.mxu1 %v5190_v37  ;;  %4854 = vmatprep.subr.bf16.mxu0 %v5191_v38  ;;  %v1935_v37 = vrot.slane %v6250_v39, %v1934_v31  ;;  %v5216_v38 = vld [vmem:[%s6615_s9 + $0x130] sm:$0xff]  }
 0x9b5   : > { %v2658_v46 = vpop.f32.mrb[44].mxu1  ;;  %v2699_v47 = vpop.f32.mrb[32].mxu0 }
 0x9b6   : > { %v2659_v48 = vadd.f32 %v2658_v46, %v1907_v41  ;;  %v2700_v49 = vadd.f32 %v2699_v47, %v1915_v42  ;;  %v2660_v50 = vpop.f32.mrb[45].mxu1  ;;  %v2701_v52 = vpop.f32.mrb[33].mxu0  ;;  %v5217_v41 = vld [vmem:[%s6615_s9 + $0x1b0] sm:$0xff]   ;;  %v5218_v42 = vld [vmem:[%s6615_s9 + $0x178] sm:$0xff]  }
 0x9b7   : > { %v2661_v53 = vadd.f32 %v2660_v50, %v1911_v43  ;;  %v2702_v55 = vadd.f32 %v2701_v52, %v1919_v44  ;;  %v2662_v56 = vpop.f32.mrb[46].mxu1  ;;  %v2703_v57 = vpop.f32.mrb[34].mxu0  ;;  %v5219_v43 = vld [vmem:[%s6615_s9 + $0x1f8] sm:$0xff]  }
 0x9b8   : > { %v2952_v54 = vmax.f32 %v2659_v48, 0.0  ;;  %v2954_v60 = vmax.f32 %v2700_v49, 0.0  ;;  %v2663_v51 = vpop.f32.mrb[47].mxu1  ;;  %v2704_v61 = vpop.f32.mrb[35].mxu0  ;;  %v5220_v56 = vld [vmem:[%s6615_s9 + $0x138] sm:$0xff]  }
 0x9b9   : > { %v2953_v62 = vmax.f32 %v2661_v53, 0.0  ;;  %v2955_v63 = vmax.f32 %v2702_v55, 0.0  ;;  %v5221_v57 = vld [vmem:[%s6615_s9 + $0x1b8] sm:$0xff]  }
 0x9ba   : > { %v2968_v6 = vpack.c.bf16 %v2952_v54, %v2952_v54  ;;  %v2970_v7 = vpack.c.bf16 %v2954_v60, %v2954_v60 }
 0x9bb   : > { %v2969_v0 = vpack.c.bf16 %v2953_v62, %v2953_v62  ;;  %v2971_v1 = vpack.c.bf16 %v2955_v63, %v2955_v63  ;;  %v5222_v62 = vld [vmem:[%s6615_s9 + $0x240] sm:$0xff]  }
 0x9bc   : > { %v5223_v63 = vld [vmem:[%s6615_s9 + $0x2c0] sm:$0xff]  }
 0x9bd   : > { %4047 = vmatprep.mubr.bf16.mxu1 %v2969_v0  ;;  %4087 = vmatprep.mubr.bf16.mxu0 %v2971_v1 }
 0x9be   : > { %4048 = vmatmul.mubr.bf16.vlgmr.msra.gmra.mrb[60].mxu1 %v2968_v6  ;;  %4088 = vmatmul.mubr.bf16.vlgmr.msra.gmra.mrb[48].mxu0 %v2970_v7  ;;  %v5224_v6 = vld [vmem:[%s6615_s9 + $0x200] sm:$0xff]  }
 0x9bf   : > { %4833 = vmatpush3.bf16.msra.mxu1 %v5192_v3  ;;  %4855 = vmatpush3.bf16.msra.mxu0 %v5193_v5  ;;  %v5225_v7 = vld [vmem:[%s6615_s9 + $0x280] sm:$0xff]  }
 0x9c0   : > { %4834 = vmatprep.subr.bf16.mxu1 %v5194_v4  ;;  %4856 = vmatprep.subr.bf16.mxu0 %v5195_v8 }
 0x9c3   : > { %4835 = vmatpush3.bf16.msra.mxu1 %v5196_v9  ;;  %4857 = vmatpush3.bf16.msra.mxu0 %v5197_v10  ;;  %v5226_v9 = vld [vmem:[%s6615_s9 + $0x248] sm:$0xff]  }
 0x9c4   : > { %4836 = vmatprep.subr.bf16.mxu1 %v5198_v11  ;;  %4858 = vmatprep.subr.bf16.mxu0 %v5199_v12  ;;  %v5227_v10 = vld [vmem:[%s6615_s9 + $0x2c8] sm:$0xff]  }
 0x9c5   : > { %v5228_v11 = vld [vmem:[%s6615_s9 + $0x208] sm:$0xff]  }
 0x9c6   : > { %v5229_v12 = vld [vmem:[%s6615_s9 + $0x288] sm:$0xff]  }
 0x9c7   : > { %4837 = vmatpush3.bf16.msra.mxu1 %v5200_v59  ;;  %4859 = vmatpush3.bf16.msra.mxu0 %v5201_v13  ;;  %v5230_v59 = vld [vmem:[%s6615_s9 + $0x250] sm:$0xff]  }
 0x9c8   : > { %4838 = vmatprep.subr.bf16.mxu1 %v5202_v14  ;;  %4860 = vmatprep.subr.bf16.mxu0 %v5203_v15  ;;  %v5231_v13 = vld [vmem:[%s6615_s9 + $0x2d0] sm:$0xff]  }
 0x9c9   : > { %v5232_v14 = vld [vmem:[%s6615_s9 + $0x210] sm:$0xff]  }
 0x9ca   : > { %v5233_v15 = vld [vmem:[%s6615_s9 + $0x290] sm:$0xff]  }
 0x9cb   : > { %4839 = vmatpush3.bf16.msra.mxu1 %v5204_v16  ;;  %4861 = vmatpush3.bf16.msra.mxu0 %v5205_v17  ;;  %v5234_v16 = vld [vmem:[%s6615_s9 + $0x258] sm:$0xff]  }
 0x9cc   : > { %4840 = vmatprep.subr.bf16.mxu1 %v5206_v18  ;;  %4862 = vmatprep.subr.bf16.mxu0 %v5207_v19  ;;  %v5235_v17 = vld [vmem:[%s6615_s9 + $0x2d8] sm:$0xff]  }
 0x9cd   : > { %v5236_v18 = vld [vmem:[%s6615_s9 + $0x218] sm:$0xff]  }
 0x9ce   : > { %v5237_v19 = vld [vmem:[%s6615_s9 + $0x298] sm:$0xff]  }
 0x9cf   : > { %4841 = vmatpush3.bf16.msra.mxu1 %v5208_v20  ;;  %4863 = vmatpush3.bf16.msra.mxu0 %v5209_v21  ;;  %v5238_v20 = vld [vmem:[%s6615_s9 + $0x260] sm:$0xff]  }
 0x9d0   : > { %4842 = vmatprep.subr.bf16.mxu1 %v5210_v22  ;;  %4864 = vmatprep.subr.bf16.mxu0 %v5211_v23  ;;  %v5239_v21 = vld [vmem:[%s6615_s9 + $0x2e0] sm:$0xff]  }
 0x9d1   : > { %v5240_v22 = vld [vmem:[%s6615_s9 + $0x220] sm:$0xff]  }
 0x9d2   : > { %v5241_v23 = vld [vmem:[%s6615_s9 + $0x2a0] sm:$0xff]  }
 0x9d3   : > { %4843 = vmatpush3.bf16.msra.mxu1 %v5212_v26  ;;  %4865 = vmatpush3.bf16.msra.mxu0 %v5213_v27  ;;  %v5242_v26 = vld [vmem:[%s6615_s9 + $0x268] sm:$0xff]  }
 0x9d4   : > { %4844 = vmatprep.subr.bf16.mxu1 %v5214_v2  ;;  %4866 = vmatprep.subr.bf16.mxu0 %v5215_v33  ;;  %v5243_v27 = vld [vmem:[%s6615_s9 + $0x2e8] sm:$0xff]  }
 0x9d5   : > { %v2740_v44 = vpop.f32.mrb[48].mxu1  ;;  %v2781_v39 = vpop.f32.mrb[36].mxu0  ;;  %v5244_v2 = vld [vmem:[%s6615_s9 + $0x228] sm:$0xff]  }
 0x9d6   : > { %v2741_v46 = vadd.f32 %v2740_v44, %v1923_v34  ;;  %v2782_v47 = vadd.f32 %v2781_v39, %v1931_v35  ;;  %v2742_v48 = vpop.f32.mrb[49].mxu1  ;;  %v2783_v49 = vpop.f32.mrb[37].mxu0  ;;  %v5245_v33 = vld [vmem:[%s6615_s9 + $0x2a8] sm:$0xff]   ;;  %v5246_v35 = vld [vmem:[%s6615_s9 + $0x270] sm:$0xff]  }
 0x9d7   : > { %v2743_v50 = vadd.f32 %v2742_v48, %v1927_v36  ;;  %v2784_v52 = vadd.f32 %v2783_v49, %v1935_v37  ;;  %v2744_v53 = vpop.f32.mrb[50].mxu1  ;;  %v2785_v55 = vpop.f32.mrb[38].mxu0  ;;  %4845 = vmatpush3.bf16.msra.mxu1 %v5216_v38  ;;  %4867 = vmatpush3.bf16.msra.mxu0 %v5217_v41  ;;  %v6443_v34 = vld [vmem:[%s6614_s8 + $0x8] sm:$0xff]  ;;  %v5247_v36 = vld [vmem:[%s6615_s9 + $0x2f0] sm:$0xff]  }
 0x9d8   : > { %v2956_v54 = vmax.f32 %v2741_v46, 0.0  ;;  %v2958_v60 = vmax.f32 %v2782_v47, 0.0  ;;  %v2745_v51 = vpop.f32.mrb[51].mxu1  ;;  %v2786_v61 = vpop.f32.mrb[39].mxu0  ;;  %4846 = vmatprep.subr.bf16.mxu1 %v5218_v42  ;;  %4868 = vmatprep.subr.bf16.mxu0 %v5219_v43  ;;  %v1939_v37 = vrot.slane %v6443_v34, %v5522_v30  ;;  %v1947_v38 = vrot.slane %v6443_v34, %v5548_v45  ;;  %v5248_v43 = vld [vmem:[%s6615_s9 + $0x230] sm:$0xff]   ;;  %v5250_v45 = vld [vmem:[%s6615_s9 + $0x278] sm:$0xff]  }
 0x9d9   : > { %v2957_v0 = vmax.f32 %v2743_v50, 0.0  ;;  %v2959_v1 = vmax.f32 %v2784_v52, 0.0  ;;  %v1943_v41 = vrot.slane %v6443_v34, %v5528_v32  ;;  %v1951_v42 = vrot.slane %v6443_v34, %v1918_v40  ;;  %v5249_v30 = vld [vmem:[%s6615_s9 + $0x2b0] sm:$0xff]   ;;  %v5251_v32 = vld [vmem:[%s6615_s9 + $0x2f8] sm:$0xff]   ;;  %v5254_v61 = vld [vmem:[%s6615_s9 + $0x340] sm:$0xff]  }
 0x9da   : > { %v2972_v4 = vpack.c.bf16 %v2956_v54, %v2956_v54  ;;  %v2974_v8 = vpack.c.bf16 %v2958_v60, %v2958_v60  ;;  %v5252_v55 = vld [vmem:[%s6615_s9 + $0x238] sm:$0xff]  }
 0x9db   : > { %v2973_v3 = vpack.c.bf16 %v2957_v0, %v2957_v0  ;;  %v2975_v5 = vpack.c.bf16 %v2959_v1, %v2959_v1  ;;  %4847 = vmatpush3.bf16.msra.mxu1 %v5220_v56  ;;  %4869 = vmatpush3.bf16.msra.mxu0 %v5221_v57  ;;  %v5253_v56 = vld [vmem:[%s6615_s9 + $0x2b8] sm:$0xff]  }
 0x9dc   : > { %4876 = vmatprep.subr.bf16.mxu1 %v5222_v62  ;;  %4898 = vmatprep.subr.bf16.mxu0 %v5223_v63  ;;  %v5255_v62 = vld [vmem:[%s6615_s9 + $0x3c0] sm:$0xff]  }
 0x9dd   : > { %4127 = vmatprep.mubr.bf16.mxu1 %v2973_v3  ;;  %4167 = vmatprep.mubr.bf16.mxu0 %v2975_v5  ;;  %v5256_v5 = vld [vmem:[%s6615_s9 + $0x300] sm:$0xff]  }
 0x9de   : > { %4128 = vmatmul.mubr.bf16.vlgmr.msra.gmra.mrb[64].mxu1 %v2972_v4  ;;  %4168 = vmatmul.mubr.bf16.vlgmr.msra.gmra.mrb[52].mxu0 %v2974_v8  ;;  %v5258_v8 = vld [vmem:[%s6615_s9 + $0x348] sm:$0xff]  }
 0x9df   : > { %4877 = vmatpush3.bf16.msra.mxu1 %v5224_v6  ;;  %4899 = vmatpush3.bf16.msra.mxu0 %v5225_v7  ;;  %v5257_v6 = vld [vmem:[%s6615_s9 + $0x380] sm:$0xff]  }
 0x9e0   : > { %4878 = vmatprep.subr.bf16.mxu1 %v5226_v9  ;;  %4900 = vmatprep.subr.bf16.mxu0 %v5227_v10  ;;  %v5259_v9 = vld [vmem:[%s6615_s9 + $0x3c8] sm:$0xff]  }
 0x9e1   : > { %v5260_v10 = vld [vmem:[%s6615_s9 + $0x308] sm:$0xff]  }
 0x9e3   : > { %4879 = vmatpush3.bf16.msra.mxu1 %v5228_v11  ;;  %4901 = vmatpush3.bf16.msra.mxu0 %v5229_v12  ;;  %v5261_v11 = vld [vmem:[%s6615_s9 + $0x388] sm:$0xff]   ;;  %v5262_v12 = vld [vmem:[%s6615_s9 + $0x350] sm:$0xff]  }
 0x9e4   : > { %4880 = vmatprep.subr.bf16.mxu1 %v5230_v59  ;;  %4902 = vmatprep.subr.bf16.mxu0 %v5231_v13  ;;  %v5263_v59 = vld [vmem:[%s6615_s9 + $0x3d0] sm:$0xff]  }
 0x9e5   : > { %v5264_v13 = vld [vmem:[%s6615_s9 + $0x310] sm:$0xff]  }
 0x9e7   : > { %4881 = vmatpush3.bf16.msra.mxu1 %v5232_v14  ;;  %4903 = vmatpush3.bf16.msra.mxu0 %v5233_v15  ;;  %v5265_v14 = vld [vmem:[%s6615_s9 + $0x390] sm:$0xff]   ;;  %v5266_v15 = vld [vmem:[%s6615_s9 + $0x358] sm:$0xff]  }
 0x9e8   : > { %4882 = vmatprep.subr.bf16.mxu1 %v5234_v16  ;;  %4904 = vmatprep.subr.bf16.mxu0 %v5235_v17  ;;  %v5267_v16 = vld [vmem:[%s6615_s9 + $0x3d8] sm:$0xff]  }
 0x9e9   : > { %v5268_v17 = vld [vmem:[%s6615_s9 + $0x318] sm:$0xff]  }
 0x9eb   : > { %4883 = vmatpush3.bf16.msra.mxu1 %v5236_v18  ;;  %4905 = vmatpush3.bf16.msra.mxu0 %v5237_v19  ;;  %v5269_v18 = vld [vmem:[%s6615_s9 + $0x398] sm:$0xff]   ;;  %v5270_v19 = vld [vmem:[%s6615_s9 + $0x360] sm:$0xff]  }
 0x9ec   : > { %4884 = vmatprep.subr.bf16.mxu1 %v5238_v20  ;;  %4906 = vmatprep.subr.bf16.mxu0 %v5239_v21  ;;  %v5271_v20 = vld [vmem:[%s6615_s9 + $0x3e0] sm:$0xff]  }
 0x9ed   : > { %v5272_v21 = vld [vmem:[%s6615_s9 + $0x320] sm:$0xff]  }
 0x9ef   : > { %4885 = vmatpush3.bf16.msra.mxu1 %v5240_v22  ;;  %4907 = vmatpush3.bf16.msra.mxu0 %v5241_v23  ;;  %v5273_v22 = vld [vmem:[%s6615_s9 + $0x3a0] sm:$0xff]   ;;  %v5274_v23 = vld [vmem:[%s6615_s9 + $0x368] sm:$0xff]  }
 0x9f0   : > { %4886 = vmatprep.subr.bf16.mxu1 %v5242_v26  ;;  %4908 = vmatprep.subr.bf16.mxu0 %v5243_v27  ;;  %v5275_v26 = vld [vmem:[%s6615_s9 + $0x3e8] sm:$0xff]  }
 0x9f1   : > { %v5276_v27 = vld [vmem:[%s6615_s9 + $0x328] sm:$0xff]  }
 0x9f3   : > { %4887 = vmatpush3.bf16.msra.mxu1 %v5244_v2  ;;  %4909 = vmatpush3.bf16.msra.mxu0 %v5245_v33  ;;  %v5277_v2 = vld [vmem:[%s6615_s9 + $0x3a8] sm:$0xff]   ;;  %v5278_v33 = vld [vmem:[%s6615_s9 + $0x370] sm:$0xff]  }
 0x9f4   : > { %4888 = vmatprep.subr.bf16.mxu1 %v5246_v35  ;;  %4910 = vmatprep.subr.bf16.mxu0 %v5247_v36  ;;  %v5279_v35 = vld [vmem:[%s6615_s9 + $0x3f0] sm:$0xff]   ;;  %v1955_v36 = vrot.slane %v6443_v34, %v1922_v24 }
 0x9f5   : > { %v2822_v44 = vpop.f32.mrb[52].mxu1  ;;  %v2863_v40 = vpop.f32.mrb[40].mxu0  ;;  %v5281_v24 = vld [vmem:[%s6615_s9 + $0x3b0] sm:$0xff]  }
 0x9f6   : > { %v2823_v39 = vadd.f32 %v2822_v44, %v1939_v37  ;;  %v2864_v46 = vadd.f32 %v2863_v40, %v1947_v38  ;;  %v2824_v47 = vpop.f32.mrb[53].mxu1  ;;  %v2865_v48 = vpop.f32.mrb[41].mxu0  ;;  %v1963_v37 = vrot.slane %v6443_v34, %v1930_v25  ;;  %v1959_v38 = vrot.slane %v6443_v34, %v1926_v28  ;;  %v5282_v25 = vld [vmem:[%s6615_s9 + $0x378] sm:$0xff]  }
 0x9f7   : > { %v2825_v49 = vadd.f32 %v2824_v47, %v1943_v41  ;;  %v2866_v50 = vadd.f32 %v2865_v48, %v1951_v42  ;;  %v2826_v52 = vpop.f32.mrb[54].mxu1  ;;  %v2867_v53 = vpop.f32.mrb[42].mxu0  ;;  %4889 = vmatpush3.bf16.msra.mxu1 %v5248_v43  ;;  %4911 = vmatpush3.bf16.msra.mxu0 %v5249_v30  ;;  %v1967_v41 = vrot.slane %v6443_v34, %v1934_v31  ;;  %v5280_v42 = vld [vmem:[%s6615_s9 + $0x330] sm:$0xff]   ;;  %v5285_v47 = vld [vmem:[%s6615_s9 + $0x3b8] sm:$0xff]  }
 0x9f8   : > { %v2960_v57 = vmax.f32 %v2823_v39, 0.0  ;;  %v2962_v54 = vmax.f32 %v2864_v46, 0.0  ;;  %v2827_v60 = vpop.f32.mrb[55].mxu1  ;;  %v2868_v51 = vpop.f32.mrb[43].mxu0  ;;  %4890 = vmatprep.subr.bf16.mxu1 %v5250_v45  ;;  %4912 = vmatprep.subr.bf16.mxu0 %v5251_v32  ;;  %v5284_v46 = vld [vmem:[%s6615_s9 + $0x338] sm:$0xff]  }
 0x9f9   : > { %v2961_v63 = vmax.f32 %v2825_v49, 0.0  ;;  %v2963_v0 = vmax.f32 %v2866_v50, 0.0 }
 0x9fa   : > { %v2976_v7 = vpack.c.bf16 %v2960_v57, %v2960_v57  ;;  %v2978_v4 = vpack.c.bf16 %v2962_v54, %v2962_v54 }
 0x9fb   : > { %v2977_v1 = vpack.c.bf16 %v2961_v63, %v2961_v63  ;;  %v2979_v3 = vpack.c.bf16 %v2963_v0, %v2963_v0  ;;  %4891 = vmatpush3.bf16.msra.mxu1 %v5252_v55  ;;  %4913 = vmatpush3.bf16.msra.mxu0 %v5253_v56 }
 0x9fc   : > { %4920 = vmatprep.subr.bf16.mxu1 %v5254_v61  ;;  %4942 = vmatprep.subr.bf16.mxu0 %v5255_v62  ;;  %v4605_v62 = vld [vmem:[%s6616_s10] ss:$0 sm:$0xff] }
 0x9fd   : > { %4207 = vmatprep.mubr.bf16.mxu1 %v2977_v1  ;;  %4247 = vmatprep.mubr.bf16.mxu0 %v2979_v3 }
 0x9fe   : > { %4208 = vmatmul.mubr.bf16.vlgmr.msra.gmra.mrb[68].mxu1 %v2976_v7  ;;  %4248 = vmatmul.mubr.bf16.vlgmr.msra.gmra.mrb[56].mxu0 %v2978_v4 }
 0x9ff   : > { %4921 = vmatpush3.bf16.msra.mxu1 %v5256_v5  ;;  %4943 = vmatpush3.bf16.msra.mxu0 %v5257_v6 }
 0xa00   : > { %4922 = vmatprep.subr.bf16.mxu1 %v5258_v8  ;;  %4944 = vmatprep.subr.bf16.mxu0 %v5259_v9 }
 0xa03   : > { %4923 = vmatpush3.bf16.msra.mxu1 %v5260_v10  ;;  %4945 = vmatpush3.bf16.msra.mxu0 %v5261_v11 }
 0xa04   : > { %4924 = vmatprep.subr.bf16.mxu1 %v5262_v12  ;;  %4946 = vmatprep.subr.bf16.mxu0 %v5263_v59 }
 0xa07   : > { %4925 = vmatpush3.bf16.msra.mxu1 %v5264_v13  ;;  %4947 = vmatpush3.bf16.msra.mxu0 %v5265_v14 }
 0xa08   : > { %4926 = vmatprep.subr.bf16.mxu1 %v5266_v15  ;;  %4948 = vmatprep.subr.bf16.mxu0 %v5267_v16 }
 0xa0b   : > { %4927 = vmatpush3.bf16.msra.mxu1 %v5268_v17  ;;  %4949 = vmatpush3.bf16.msra.mxu0 %v5269_v18 }
 0xa0c   : > { %4928 = vmatprep.subr.bf16.mxu1 %v5270_v19  ;;  %4950 = vmatprep.subr.bf16.mxu0 %v5271_v20 }
 0xa0f   : > { %4929 = vmatpush3.bf16.msra.mxu1 %v5272_v21  ;;  %4951 = vmatpush3.bf16.msra.mxu0 %v5273_v22 }
 0xa10   : > { %4930 = vmatprep.subr.bf16.mxu1 %v5274_v23  ;;  %4952 = vmatprep.subr.bf16.mxu0 %v5275_v26 }
 0xa13   : > { %4931 = vmatpush3.bf16.msra.mxu1 %v5276_v27  ;;  %4953 = vmatpush3.bf16.msra.mxu0 %v5277_v2 }
 0xa14   : > { %4932 = vmatprep.subr.bf16.mxu1 %v5278_v33  ;;  %4954 = vmatprep.subr.bf16.mxu0 %v5279_v35 }
 0xa15   : > { %v2904_v28 = vpop.f32.mrb[56].mxu1  ;;  %v2945_v31 = vpop.f32.mrb[44].mxu0 }
 0xa16   : > { %v2905_v34 = vadd.f32 %v2904_v28, %v1955_v36  ;;  %v2946_v43 = vadd.f32 %v2945_v31, %v1963_v37  ;;  %v2906_v30 = vpop.f32.mrb[57].mxu1  ;;  %v2947_v45 = vpop.f32.mrb[45].mxu0 }
 0xa17   : > { %v2907_v32 = vadd.f32 %v2906_v30, %v1959_v38  ;;  %v2948_v44 = vadd.f32 %v2947_v45, %v1967_v41  ;;  %v2908_v40 = vpop.f32.mrb[58].mxu1  ;;  %v2949_v39 = vpop.f32.mrb[46].mxu0  ;;  %4933 = vmatpush3.bf16.msra.mxu1 %v5280_v42  ;;  %4955 = vmatpush3.bf16.msra.mxu0 %v5281_v24 }
 0xa18   : > { %v2964_v48 = vmax.f32 %v2905_v34, 0.0  ;;  %v2966_v49 = vmax.f32 %v2946_v43, 0.0  ;;  %v2909_v50 = vpop.f32.mrb[59].mxu1  ;;  %v2950_v52 = vpop.f32.mrb[47].mxu0  ;;  %4934 = vmatprep.subr.bf16.mxu1 %v5282_v25  ;;  %4956 = vmatprep.subr.bf16.mxu0 %v5283_v29 }
 0xa19   : > { %v2965_v53 = vmax.f32 %v2907_v32, 0.0  ;;  %v2967_v55 = vmax.f32 %v2948_v44, 0.0 }
 0xa1a   : > { %v2980_v54 = vpack.c.bf16 %v2964_v48, %v2964_v48  ;;  %v2982_v60 = vpack.c.bf16 %v2966_v49, %v2966_v49 }
 0xa1b   : > { %v2981_v56 = vpack.c.bf16 %v2965_v53, %v2965_v53  ;;  %v2983_v57 = vpack.c.bf16 %v2967_v55, %v2967_v55  ;;  %4935 = vmatpush3.bf16.msra.mxu1 %v5284_v46  ;;  %4957 = vmatpush3.bf16.msra.mxu0 %v5285_v47 }
 0xa1d   : > { %4287 = vmatprep.mubr.bf16.mxu1 %v2981_v56  ;;  %4327 = vmatprep.mubr.bf16.mxu0 %v2983_v57 }
 0xa1e   : > { %4288 = vmatmul.mubr.bf16.vlgmr.msra.gmra.mrb[72].mxu1 %v2980_v54  ;;  %4328 = vmatmul.mubr.bf16.vlgmr.msra.gmra.mrb[60].mxu0 %v2982_v60  ;;  %v4735_v54 = vld [vmem:[%s6618_s12] ss:$0 sm:$0xff] }
 0xa91   : > { %v4804_v51 = vpop.f32.mrb[60].mxu1  ;;  %v4826_v61 = vpop.f32.mrb[48].mxu0 }
 0xa92   : > { %v4805_v63 = vpop.f32.mrb[61].mxu1  ;;  %v4827_v0 = vpop.f32.mrb[49].mxu0 }
 0xa93   : > { %v4806_v1 = vadd.f32 %v4805_v63, %v4804_v51  ;;  %v4828_v3 = vadd.f32 %v4827_v0, %v4826_v61  ;;  %v4807_v5 = vpop.f32.mrb[62].mxu1  ;;  %v4829_v6 = vpop.f32.mrb[50].mxu0 }
 0xa94   : > { %v4808_v7 = vpop.f32.mrb[63].mxu1  ;;  %v4830_v4 = vpop.f32.mrb[51].mxu0 }
 0xa95   : > { %v4050_v8 = vadd.f32 %v4806_v1, %v4605_v62 }
 0xa97   : > { %v4090_v9 = vadd.f32 %v4828_v3, %v4050_v8 }
 0xab1   : > { %v4848_v10 = vpop.f32.mrb[64].mxu1  ;;  %v4870_v11 = vpop.f32.mrb[52].mxu0 }
 0xab2   : > { %v4849_v12 = vpop.f32.mrb[65].mxu1  ;;  %v4871_v59 = vpop.f32.mrb[53].mxu0 }
 0xab3   : > { %v4850_v13 = vadd.f32 %v4849_v12, %v4848_v10  ;;  %v4872_v14 = vadd.f32 %v4871_v59, %v4870_v11  ;;  %v4851_v15 = vpop.f32.mrb[66].mxu1  ;;  %v4873_v16 = vpop.f32.mrb[54].mxu0 }
 0xab4   : > { %v4852_v17 = vpop.f32.mrb[67].mxu1  ;;  %v4874_v18 = vpop.f32.mrb[55].mxu0 }
 0xab5   : > { %v4130_v19 = vadd.f32 %v4850_v13, %v4090_v9 }
 0xab7   : > { %v4170_v20 = vadd.f32 %v4872_v14, %v4130_v19 }
 0xad1   : > { %v4892_v21 = vpop.f32.mrb[68].mxu1  ;;  %v4914_v22 = vpop.f32.mrb[56].mxu0 }
 0xad2   : > { %v4893_v23 = vpop.f32.mrb[69].mxu1  ;;  %v4915_v26 = vpop.f32.mrb[57].mxu0 }
 0xad3   : > { %v4894_v27 = vadd.f32 %v4893_v23, %v4892_v21  ;;  %v4916_v2 = vadd.f32 %v4915_v26, %v4914_v22  ;;  %v4895_v33 = vpop.f32.mrb[70].mxu1  ;;  %v4917_v35 = vpop.f32.mrb[58].mxu0 }
 0xad4   : > { %v4896_v36 = vpop.f32.mrb[71].mxu1  ;;  %v4918_v37 = vpop.f32.mrb[59].mxu0 }
 0xad5   : > { %v4210_v38 = vadd.f32 %v4894_v27, %v4170_v20 }
 0xad7   : > { %v4250_v41 = vadd.f32 %v4916_v2, %v4210_v38 }
 0xaf1   : > { %v4936_v42 = vpop.f32.mrb[72].mxu1  ;;  %v4958_v24 = vpop.f32.mrb[60].mxu0 }
 0xaf2   : > { %v4937_v25 = vpop.f32.mrb[73].mxu1  ;;  %v4959_v29 = vpop.f32.mrb[61].mxu0 }
 0xaf3   : > { %v4938_v28 = vadd.f32 %v4937_v25, %v4936_v42  ;;  %v4960_v31 = vadd.f32 %v4959_v29, %v4958_v24  ;;  %v4939_v34 = vpop.f32.mrb[74].mxu1  ;;  %v4961_v43 = vpop.f32.mrb[62].mxu0 }
 0xaf4   : > { %v4940_v30 = vpop.f32.mrb[75].mxu1  ;;  %v4962_v45 = vpop.f32.mrb[63].mxu0 }
 0xaf5   : > { %v4290_v32 = vadd.f32 %v4938_v28, %v4250_v41 }
 0xaf7   : > { %v4330_v44 = vadd.f32 %v4960_v31, %v4290_v32 }
 0xaf9   : > { %v4335_v40 = vadd.f32 %v4330_v44, %v5861_v58  ;;  %v4734_v58 = vld [vmem:[%s6617_s11] ss:$0 sm:$0xff] }
 0xafb   : > { %v4338_v39 = vsel %vm1742_vm13, %v4335_v40, 0.0 }
 0xafc   : > { %4339 = vadd.xlane.f32.xlu0 %v4338_v39 }
 0xb89   : > { %v4340_v46 = vpop.xlane.xlu0 %4339 }
 0xb8a   : > { %v4341_v47 = vmul.f32 0.0078125, %v4340_v46 }
 0xb8c   : > { %v4342_v48 = vsub.f32 %v4335_v40, %v4341_v47 }
 0xb8e   : > { %v4343_v49 = vmul.f32 %v4342_v48, %v4342_v48 }
 0xb90   : > { %v4344_v50 = vsel %vm1742_vm13, %v4343_v49, 0.0 }
 0xb91   : > { %4345 = vadd.xlane.f32.xlu1 %v4344_v50 }
 0xc1e   : > { %v4346_v52 = vpop.xlane.xlu1 %4345 }
 0xc1f   : > { %v4347_v53 = vmul.f32 0.0078125, %v4346_v52 }
 0xc21   : > { %v4348_v55 = vadd.f32 1e-05, %v4347_v53 }
 0xc23   : > { %5320 = vrsqrt.f32 %v4348_v55 }
 0xc2d   : > { %v5321_v56 = vpop.eup %5320 }
 0xc2e   : > { %v4350_v57 = vmul.f32 %v5321_v56, %v4342_v48 }
 0xc30   : > { %v4357_v60 = vmul.f32 %v4734_v58, %v4350_v57 }
 0xc32   : > { %v4364_v51 = vadd.f32 %v4735_v54, %v4357_v60 }
 0xc34   : > { %4365 = vst [vmem:[%s435_s19] sm:$0xf] %v4364_v51 }
 0xc35 PF: > { %s23_s25 = sadd.s32 1, %s5329_s25  }
 0xc36   : > { %p20_p4 = scmp.ge.s32.totalorder %s23_s25, 4  }
 0xc38   :  { %22 = sbr.rel (!%p20_p4) target bundleno = 1 (0x1), region = 102 }

</bundles_post_ra>
